<compile_context>
chip_gen: v7x
topology: tpu7x:2x2x1
jax: 0.10.0
libtpu: 0.0.40
codegen_flags: <defaults>
</compile_context>

<pallas_src>
import jax
import jax.numpy as jnp
from jax.experimental import pallas as pl
from jax.experimental.pallas import tpu as pltpu

H = 20                      # hidden width of the MLP
LANES = 128                 # TPU lane count; batch maps onto lanes
CHUNK = 16                  # sublane rows per inner-loop step (2 vregs f32)
MAX_BLOCK_ROWS = 512        # rows of 128 lanes per grid step (256 KiB/buffer)

# Packed-parameter slab layout (1-D f32 in SMEM).
W1_OFF = 0                  # w1[i]           : fc1 weight for hidden unit i
B1_OFF = W1_OFF + H         # b1[i]
W2_OFF = B1_OFF + H         # w2[i*H + j]     : weight from h1_i to h2_j
B2_OFF = W2_OFF + H * H     # b2[j]
W3_OFF = B2_OFF + H         # w3[j]           : fc3 weight from h2_j to output
B3_OFF = W3_OFF + H         # b3
N_PARAMS = B3_OFF + 1       # = 481
PARAM_PAD = 512             # pad to a power of two for the SMEM allocation


def mlp_kernel(p_ref, x_ref, o_ref):
    """p_ref: (PARAM_PAD,) f32 in SMEM.  x_ref/o_ref: (block_rows, 128) f32 in VMEM."""
    n_chunks = x_ref.shape[0] // CHUNK

    # ---- Prologue: hoist loop-invariant scalar reads (fc1 + fc3 coeffs). ----
    # These 61 SMEM loads would otherwise be re-issued every chunk iteration.
    w1 = [p_ref[W1_OFF + i] for i in range(H)]
    b1 = [p_ref[B1_OFF + i] for i in range(H)]
    w3 = [p_ref[W3_OFF + j] for j in range(H)]
    b3 = p_ref[B3_OFF]

    # Un-unrolled chunk loop: keeps Mosaic code size independent of block_rows.
    @pl.loop(0, n_chunks)
    def _(c):
        r0 = pl.multiple_of(c * CHUNK, CHUNK)
        x = x_ref[pl.ds(r0, CHUNK), :]                       # (CHUNK, 128) f32

        # ---- fc1 + ReLU: h1_i = relu(w1_i * x + b1_i)  (20 broadcast FMAs) ----
        h1 = [jnp.maximum(x * w1[i] + b1[i], 0.0) for i in range(H)]

        # ---- fc2 + ReLU fused with fc3 accumulation (pure VPU, no MXU) ----
        # TODO(synk): optional packed-bf16 fc2 path (v6e/v7x only) left out to
        # preserve the 1e-4 f32 tolerance.
        acc = None
        for j in range(H):
            s = h1[0] * p_ref[W2_OFF + j] + p_ref[B2_OFF + j]
            for i in range(1, H):
                s = s + h1[i] * p_ref[W2_OFF + i * H + j]
            h2_j = jnp.maximum(s, 0.0)                       # ReLU
            term = h2_j * w3[j]
            acc = term if acc is None else acc + term
        out = acc + b3

        o_ref[pl.ds(r0, CHUNK), :] = out


def pack_params(params):
    """Pack all weights/biases into one padded 1-D f32 slab (SMEM-resident)."""
    flat = jnp.concatenate([
        params["w1"].reshape(-1),   # (20,)   fc1 weight  (in=1 squeezed)
        params["b1"].reshape(-1),   # (20,)
        params["w2"].reshape(-1),   # (400,)  (in, out) row-major -> i*H + j
        params["b2"].reshape(-1),   # (20,)
        params["w3"].reshape(-1),   # (20,)   fc3 weight  (out=1 squeezed)
        params["b3"].reshape(-1),   # (1,)
    ]).astype(jnp.float32)
    return jnp.pad(flat, (0, PARAM_PAD - N_PARAMS))


def _choose_blocking(rows):
    """Pick (block_rows, rows_padded).

    block_rows is a multiple of CHUNK (=16, so also of 8).  Whenever the batch
    spans more than 2 chunks we force >= 2 grid steps so the "parallel" batch
    axis actually shards across v7x's two TensorCores; block size is capped at
    MAX_BLOCK_ROWS to amortize the ~0.35us per-step pipeline overhead without
    collapsing the grid to a single step for small/medium batches.
    """
    rows_aligned = pl.cdiv(rows, CHUNK) * CHUNK
    if rows_aligned <= 2 * CHUNK:
        return rows_aligned, rows_aligned            # tiny batch: one block
    half = pl.cdiv(pl.cdiv(rows_aligned, 2), CHUNK) * CHUNK
    block_rows = min(half, MAX_BLOCK_ROWS)
    rows_padded = pl.cdiv(rows_aligned, block_rows) * block_rows
    return block_rows, rows_padded


def net_forward(x, params):
    """x: (N, 1) float32 (PyTorch nn.Linear layout).  Returns (N, 1) float32."""
    n = x.shape[0]
    rows = pl.cdiv(n, LANES)
    block_rows, rows_padded = _choose_blocking(rows)
    total = rows_padded * LANES

    # Batch -> lane-dense (rows_padded, 128) slab; padded tail is sliced off below.
    xf = jnp.pad(x.reshape(-1).astype(jnp.float32), (0, total - n))
    x2d = xf.reshape(rows_padded, LANES)
    packed = pack_params(params)

    out2d = pl.pallas_call(
        mlp_kernel,
        out_shape=jax.ShapeDtypeStruct((rows_padded, LANES), jnp.float32),
        grid_spec=pl.GridSpec(
            grid=(rows_padded // block_rows,),
            in_specs=[
                # One tiny DMA for all parameters, kept resident in SMEM.
                pl.BlockSpec(memory_space=pltpu.MemorySpace.SMEM),
                # Lane-dense batch tiles, double-buffered by the auto-pipeline.
                pl.BlockSpec((block_rows, LANES), lambda r: (r, 0)),
            ],
            out_specs=pl.BlockSpec((block_rows, LANES), lambda r: (r, 0)),
        ),
        compiler_params=pltpu.CompilerParams(
            dimension_semantics=("parallel",),   # shard batch across v7x's 2 TCs
        ),
    )(packed, x2d)

    return out2d.reshape(-1)[:n].reshape(n, 1)


def init_params(key):
    """Deterministic init mimicking PyTorch Linear's U(-1/sqrt(fan_in), ...).
    Weights stored as (in_features, out_features)."""
    ks = jax.random.split(key, 6)

    def lin(kw, kb, fan_in, fan_out):
        bound = 1.0 / jnp.sqrt(jnp.float32(fan_in))
        w = jax.random.uniform(kw, (fan_in, fan_out), jnp.float32, -bound, bound)
        b = jax.random.uniform(kb, (1, fan_out), jnp.float32, -bound, bound)
        return w, b

    w1, b1 = lin(ks[0], ks[1], 1, H)
    w2, b2 = lin(ks[2], ks[3], H, H)
    w3, b3 = lin(ks[4], ks[5], H, 1)
    return {"w1": w1, "b1": b1, "w2": w2, "b2": b2, "w3": w3, "b3": b3}


def net_reference(x, p):
    h1 = jnp.maximum(x @ p["w1"] + p["b1"], 0.0)
    h2 = jnp.maximum(h1 @ p["w2"] + p["b2"], 0.0)
    return h2 @ p["w3"] + p["b3"]


if __name__ == "__main__":
    key = jax.random.PRNGKey(0)
    k_params, k_x = jax.random.split(key)

    params = init_params(k_params)
    # Non-multiple-of-128 batch to exercise padding, the multi-chunk inner
    # loop, and the >=2-step grid (rows = 33 -> block_rows = 32, grid = (2,)).
    n = 4097
    x = jax.random.uniform(k_x, (n, 1), jnp.float32, -2.0, 2.0)

    out = net_forward(x, params)
    out = jax.block_until_ready(out)

    ref = net_reference(x, params)
    assert out.shape == (n, 1)
    assert jnp.allclose(out, ref, atol=1e-4, rtol=1e-4)

    print("KERNEL_OK")
</pallas_src>

<mosaic_0001>
module attributes {stable_mosaic.version = 11 : i64} {
  func.func @mlp_kernel(%arg0: i32, %arg1: memref<512xf32, #tpu.memory_space<smem>>, %arg2: memref<32x128xf32, #tpu.memory_space<vmem>>, %arg3: memref<32x128xf32, #tpu.memory_space<vmem>>) attributes {dimension_semantics = [#tpu.dimension_semantics<parallel>], iteration_bounds = array<i64: 2>, scalar_prefetch = 0 : i64, scratch_operands = 0 : i64, tpu.core_type = #tpu.core_type<tc>, window_params = [{transform_indices = @transform_0, window_bounds = array<i64: 512>}, {transform_indices = @transform_1, window_bounds = array<i64: 32, 128>}, {transform_indices = @transform_2, window_bounds = array<i64: 32, 128>}]} {
    %c0 = arith.constant 0 : index
    %0 = memref.load %arg1[%c0] : memref<512xf32, #tpu.memory_space<smem>>
    %c1 = arith.constant 1 : index
    %1 = memref.load %arg1[%c1] : memref<512xf32, #tpu.memory_space<smem>>
    %c2 = arith.constant 2 : index
    %2 = memref.load %arg1[%c2] : memref<512xf32, #tpu.memory_space<smem>>
    %c3 = arith.constant 3 : index
    %3 = memref.load %arg1[%c3] : memref<512xf32, #tpu.memory_space<smem>>
    %c4 = arith.constant 4 : index
    %4 = memref.load %arg1[%c4] : memref<512xf32, #tpu.memory_space<smem>>
    %c5 = arith.constant 5 : index
    %5 = memref.load %arg1[%c5] : memref<512xf32, #tpu.memory_space<smem>>
    %c6 = arith.constant 6 : index
    %6 = memref.load %arg1[%c6] : memref<512xf32, #tpu.memory_space<smem>>
    %c7 = arith.constant 7 : index
    %7 = memref.load %arg1[%c7] : memref<512xf32, #tpu.memory_space<smem>>
    %c8 = arith.constant 8 : index
    %8 = memref.load %arg1[%c8] : memref<512xf32, #tpu.memory_space<smem>>
    %c9 = arith.constant 9 : index
    %9 = memref.load %arg1[%c9] : memref<512xf32, #tpu.memory_space<smem>>
    %c10 = arith.constant 10 : index
    %10 = memref.load %arg1[%c10] : memref<512xf32, #tpu.memory_space<smem>>
    %c11 = arith.constant 11 : index
    %11 = memref.load %arg1[%c11] : memref<512xf32, #tpu.memory_space<smem>>
    %c12 = arith.constant 12 : index
    %12 = memref.load %arg1[%c12] : memref<512xf32, #tpu.memory_space<smem>>
    %c13 = arith.constant 13 : index
    %13 = memref.load %arg1[%c13] : memref<512xf32, #tpu.memory_space<smem>>
    %c14 = arith.constant 14 : index
    %14 = memref.load %arg1[%c14] : memref<512xf32, #tpu.memory_space<smem>>
    %c15 = arith.constant 15 : index
    %15 = memref.load %arg1[%c15] : memref<512xf32, #tpu.memory_space<smem>>
    %c16 = arith.constant 16 : index
    %16 = memref.load %arg1[%c16] : memref<512xf32, #tpu.memory_space<smem>>
    %c17 = arith.constant 17 : index
    %17 = memref.load %arg1[%c17] : memref<512xf32, #tpu.memory_space<smem>>
    %c18 = arith.constant 18 : index
    %18 = memref.load %arg1[%c18] : memref<512xf32, #tpu.memory_space<smem>>
    %c19 = arith.constant 19 : index
    %19 = memref.load %arg1[%c19] : memref<512xf32, #tpu.memory_space<smem>>
    %c20 = arith.constant 20 : index
    %20 = memref.load %arg1[%c20] : memref<512xf32, #tpu.memory_space<smem>>
    %c21 = arith.constant 21 : index
    %21 = memref.load %arg1[%c21] : memref<512xf32, #tpu.memory_space<smem>>
    %c22 = arith.constant 22 : index
    %22 = memref.load %arg1[%c22] : memref<512xf32, #tpu.memory_space<smem>>
    %c23 = arith.constant 23 : index
    %23 = memref.load %arg1[%c23] : memref<512xf32, #tpu.memory_space<smem>>
    %c24 = arith.constant 24 : index
    %24 = memref.load %arg1[%c24] : memref<512xf32, #tpu.memory_space<smem>>
    %c25 = arith.constant 25 : index
    %25 = memref.load %arg1[%c25] : memref<512xf32, #tpu.memory_space<smem>>
    %c26 = arith.constant 26 : index
    %26 = memref.load %arg1[%c26] : memref<512xf32, #tpu.memory_space<smem>>
    %c27 = arith.constant 27 : index
    %27 = memref.load %arg1[%c27] : memref<512xf32, #tpu.memory_space<smem>>
    %c28 = arith.constant 28 : index
    %28 = memref.load %arg1[%c28] : memref<512xf32, #tpu.memory_space<smem>>
    %c29 = arith.constant 29 : index
    %29 = memref.load %arg1[%c29] : memref<512xf32, #tpu.memory_space<smem>>
    %c30 = arith.constant 30 : index
    %30 = memref.load %arg1[%c30] : memref<512xf32, #tpu.memory_space<smem>>
    %c31 = arith.constant 31 : index
    %31 = memref.load %arg1[%c31] : memref<512xf32, #tpu.memory_space<smem>>
    %c32 = arith.constant 32 : index
    %32 = memref.load %arg1[%c32] : memref<512xf32, #tpu.memory_space<smem>>
    %c33 = arith.constant 33 : index
    %33 = memref.load %arg1[%c33] : memref<512xf32, #tpu.memory_space<smem>>
    %c34 = arith.constant 34 : index
    %34 = memref.load %arg1[%c34] : memref<512xf32, #tpu.memory_space<smem>>
    %c35 = arith.constant 35 : index
    %35 = memref.load %arg1[%c35] : memref<512xf32, #tpu.memory_space<smem>>
    %c36 = arith.constant 36 : index
    %36 = memref.load %arg1[%c36] : memref<512xf32, #tpu.memory_space<smem>>
    %c37 = arith.constant 37 : index
    %37 = memref.load %arg1[%c37] : memref<512xf32, #tpu.memory_space<smem>>
    %c38 = arith.constant 38 : index
    %38 = memref.load %arg1[%c38] : memref<512xf32, #tpu.memory_space<smem>>
    %c39 = arith.constant 39 : index
    %39 = memref.load %arg1[%c39] : memref<512xf32, #tpu.memory_space<smem>>
    %c460 = arith.constant 460 : index
    %40 = memref.load %arg1[%c460] : memref<512xf32, #tpu.memory_space<smem>>
    %c461 = arith.constant 461 : index
    %41 = memref.load %arg1[%c461] : memref<512xf32, #tpu.memory_space<smem>>
    %c462 = arith.constant 462 : index
    %42 = memref.load %arg1[%c462] : memref<512xf32, #tpu.memory_space<smem>>
    %c463 = arith.constant 463 : index
    %43 = memref.load %arg1[%c463] : memref<512xf32, #tpu.memory_space<smem>>
    %c464 = arith.constant 464 : index
    %44 = memref.load %arg1[%c464] : memref<512xf32, #tpu.memory_space<smem>>
    %c465 = arith.constant 465 : index
    %45 = memref.load %arg1[%c465] : memref<512xf32, #tpu.memory_space<smem>>
    %c466 = arith.constant 466 : index
    %46 = memref.load %arg1[%c466] : memref<512xf32, #tpu.memory_space<smem>>
    %c467 = arith.constant 467 : index
    %47 = memref.load %arg1[%c467] : memref<512xf32, #tpu.memory_space<smem>>
    %c468 = arith.constant 468 : index
    %48 = memref.load %arg1[%c468] : memref<512xf32, #tpu.memory_space<smem>>
    %c469 = arith.constant 469 : index
    %49 = memref.load %arg1[%c469] : memref<512xf32, #tpu.memory_space<smem>>
    %c470 = arith.constant 470 : index
    %50 = memref.load %arg1[%c470] : memref<512xf32, #tpu.memory_space<smem>>
    %c471 = arith.constant 471 : index
    %51 = memref.load %arg1[%c471] : memref<512xf32, #tpu.memory_space<smem>>
    %c472 = arith.constant 472 : index
    %52 = memref.load %arg1[%c472] : memref<512xf32, #tpu.memory_space<smem>>
    %c473 = arith.constant 473 : index
    %53 = memref.load %arg1[%c473] : memref<512xf32, #tpu.memory_space<smem>>
    %c474 = arith.constant 474 : index
    %54 = memref.load %arg1[%c474] : memref<512xf32, #tpu.memory_space<smem>>
    %c475 = arith.constant 475 : index
    %55 = memref.load %arg1[%c475] : memref<512xf32, #tpu.memory_space<smem>>
    %c476 = arith.constant 476 : index
    %56 = memref.load %arg1[%c476] : memref<512xf32, #tpu.memory_space<smem>>
    %c477 = arith.constant 477 : index
    %57 = memref.load %arg1[%c477] : memref<512xf32, #tpu.memory_space<smem>>
    %c478 = arith.constant 478 : index
    %58 = memref.load %arg1[%c478] : memref<512xf32, #tpu.memory_space<smem>>
    %c479 = arith.constant 479 : index
    %59 = memref.load %arg1[%c479] : memref<512xf32, #tpu.memory_space<smem>>
    %c480 = arith.constant 480 : index
    %60 = memref.load %arg1[%c480] : memref<512xf32, #tpu.memory_space<smem>>
    %c0_i32 = arith.constant 0 : i32
    %c2_i32 = arith.constant 2 : i32
    %61 = arith.addi %c0_i32, %c2_i32 : i32
    %c1_i32 = arith.constant 1 : i32
    scf.for %arg4 = %c0_i32 to %61 step %c1_i32  : i32 {
      %c1_i32_1 = arith.constant 1 : i32
      %62 = arith.muli %arg4, %c1_i32_1 : i32
      %c0_i32_2 = arith.constant 0 : i32
      %63 = arith.addi %c0_i32_2, %62 : i32
      %c16_i32 = arith.constant 16 : i32
      %64 = arith.muli %63, %c16_i32 : i32
      %65 = tpu.assume_multiple %64, 16 : i32
      %66 = arith.index_cast %65 : i32 to index
      %c0_3 = arith.constant 0 : index
      %67 = vector.load %arg2[%66, %c0_3] : memref<32x128xf32, #tpu.memory_space<vmem>>, vector<16x128xf32>
      %68 = vector.broadcast %0 : f32 to vector<16x128xf32>
      %69 = arith.mulf %67, %68 : vector<16x128xf32>
      %70 = vector.broadcast %20 : f32 to vector<16x128xf32>
      %71 = arith.addf %69, %70 : vector<16x128xf32>
      %cst = arith.constant 0.000000e+00 : f32
      %72 = vector.broadcast %cst : f32 to vector<16x128xf32>
      %73 = arith.maximumf %71, %72 : vector<16x128xf32>
      %74 = vector.broadcast %1 : f32 to vector<16x128xf32>
      %75 = arith.mulf %67, %74 : vector<16x128xf32>
      %76 = vector.broadcast %21 : f32 to vector<16x128xf32>
      %77 = arith.addf %75, %76 : vector<16x128xf32>
      %cst_4 = arith.constant 0.000000e+00 : f32
      %78 = vector.broadcast %cst_4 : f32 to vector<16x128xf32>
      %79 = arith.maximumf %77, %78 : vector<16x128xf32>
      %80 = vector.broadcast %2 : f32 to vector<16x128xf32>
      %81 = arith.mulf %67, %80 : vector<16x128xf32>
      %82 = vector.broadcast %22 : f32 to vector<16x128xf32>
      %83 = arith.addf %81, %82 : vector<16x128xf32>
      %cst_5 = arith.constant 0.000000e+00 : f32
      %84 = vector.broadcast %cst_5 : f32 to vector<16x128xf32>
      %85 = arith.maximumf %83, %84 : vector<16x128xf32>
      %86 = vector.broadcast %3 : f32 to vector<16x128xf32>
      %87 = arith.mulf %67, %86 : vector<16x128xf32>
      %88 = vector.broadcast %23 : f32 to vector<16x128xf32>
      %89 = arith.addf %87, %88 : vector<16x128xf32>
      %cst_6 = arith.constant 0.000000e+00 : f32
      %90 = vector.broadcast %cst_6 : f32 to vector<16x128xf32>
      %91 = arith.maximumf %89, %90 : vector<16x128xf32>
      %92 = vector.broadcast %4 : f32 to vector<16x128xf32>
      %93 = arith.mulf %67, %92 : vector<16x128xf32>
      %94 = vector.broadcast %24 : f32 to vector<16x128xf32>
      %95 = arith.addf %93, %94 : vector<16x128xf32>
      %cst_7 = arith.constant 0.000000e+00 : f32
      %96 = vector.broadcast %cst_7 : f32 to vector<16x128xf32>
      %97 = arith.maximumf %95, %96 : vector<16x128xf32>
      %98 = vector.broadcast %5 : f32 to vector<16x128xf32>
      %99 = arith.mulf %67, %98 : vector<16x128xf32>
      %100 = vector.broadcast %25 : f32 to vector<16x128xf32>
      %101 = arith.addf %99, %100 : vector<16x128xf32>
      %cst_8 = arith.constant 0.000000e+00 : f32
      %102 = vector.broadcast %cst_8 : f32 to vector<16x128xf32>
      %103 = arith.maximumf %101, %102 : vector<16x128xf32>
      %104 = vector.broadcast %6 : f32 to vector<16x128xf32>
      %105 = arith.mulf %67, %104 : vector<16x128xf32>
      %106 = vector.broadcast %26 : f32 to vector<16x128xf32>
      %107 = arith.addf %105, %106 : vector<16x128xf32>
      %cst_9 = arith.constant 0.000000e+00 : f32
      %108 = vector.broadcast %cst_9 : f32 to vector<16x128xf32>
      %109 = arith.maximumf %107, %108 : vector<16x128xf32>
      %110 = vector.broadcast %7 : f32 to vector<16x128xf32>
      %111 = arith.mulf %67, %110 : vector<16x128xf32>
      %112 = vector.broadcast %27 : f32 to vector<16x128xf32>
      %113 = arith.addf %111, %112 : vector<16x128xf32>
      %cst_10 = arith.constant 0.000000e+00 : f32
      %114 = vector.broadcast %cst_10 : f32 to vector<16x128xf32>
      %115 = arith.maximumf %113, %114 : vector<16x128xf32>
      %116 = vector.broadcast %8 : f32 to vector<16x128xf32>
      %117 = arith.mulf %67, %116 : vector<16x128xf32>
      %118 = vector.broadcast %28 : f32 to vector<16x128xf32>
      %119 = arith.addf %117, %118 : vector<16x128xf32>
      %cst_11 = arith.constant 0.000000e+00 : f32
      %120 = vector.broadcast %cst_11 : f32 to vector<16x128xf32>
      %121 = arith.maximumf %119, %120 : vector<16x128xf32>
      %122 = vector.broadcast %9 : f32 to vector<16x128xf32>
      %123 = arith.mulf %67, %122 : vector<16x128xf32>
      %124 = vector.broadcast %29 : f32 to vector<16x128xf32>
      %125 = arith.addf %123, %124 : vector<16x128xf32>
      %cst_12 = arith.constant 0.000000e+00 : f32
      %126 = vector.broadcast %cst_12 : f32 to vector<16x128xf32>
      %127 = arith.maximumf %125, %126 : vector<16x128xf32>
      %128 = vector.broadcast %10 : f32 to vector<16x128xf32>
      %129 = arith.mulf %67, %128 : vector<16x128xf32>
      %130 = vector.broadcast %30 : f32 to vector<16x128xf32>
      %131 = arith.addf %129, %130 : vector<16x128xf32>
      %cst_13 = arith.constant 0.000000e+00 : f32
      %132 = vector.broadcast %cst_13 : f32 to vector<16x128xf32>
      %133 = arith.maximumf %131, %132 : vector<16x128xf32>
      %134 = vector.broadcast %11 : f32 to vector<16x128xf32>
      %135 = arith.mulf %67, %134 : vector<16x128xf32>
      %136 = vector.broadcast %31 : f32 to vector<16x128xf32>
      %137 = arith.addf %135, %136 : vector<16x128xf32>
      %cst_14 = arith.constant 0.000000e+00 : f32
      %138 = vector.broadcast %cst_14 : f32 to vector<16x128xf32>
      %139 = arith.maximumf %137, %138 : vector<16x128xf32>
      %140 = vector.broadcast %12 : f32 to vector<16x128xf32>
      %141 = arith.mulf %67, %140 : vector<16x128xf32>
      %142 = vector.broadcast %32 : f32 to vector<16x128xf32>
      %143 = arith.addf %141, %142 : vector<16x128xf32>
      %cst_15 = arith.constant 0.000000e+00 : f32
      %144 = vector.broadcast %cst_15 : f32 to vector<16x128xf32>
      %145 = arith.maximumf %143, %144 : vector<16x128xf32>
      %146 = vector.broadcast %13 : f32 to vector<16x128xf32>
      %147 = arith.mulf %67, %146 : vector<16x128xf32>
      %148 = vector.broadcast %33 : f32 to vector<16x128xf32>
      %149 = arith.addf %147, %148 : vector<16x128xf32>
      %cst_16 = arith.constant 0.000000e+00 : f32
      %150 = vector.broadcast %cst_16 : f32 to vector<16x128xf32>
      %151 = arith.maximumf %149, %150 : vector<16x128xf32>
      %152 = vector.broadcast %14 : f32 to vector<16x128xf32>
      %153 = arith.mulf %67, %152 : vector<16x128xf32>
      %154 = vector.broadcast %34 : f32 to vector<16x128xf32>
      %155 = arith.addf %153, %154 : vector<16x128xf32>
      %cst_17 = arith.constant 0.000000e+00 : f32
      %156 = vector.broadcast %cst_17 : f32 to vector<16x128xf32>
      %157 = arith.maximumf %155, %156 : vector<16x128xf32>
      %158 = vector.broadcast %15 : f32 to vector<16x128xf32>
      %159 = arith.mulf %67, %158 : vector<16x128xf32>
      %160 = vector.broadcast %35 : f32 to vector<16x128xf32>
      %161 = arith.addf %159, %160 : vector<16x128xf32>
      %cst_18 = arith.constant 0.000000e+00 : f32
      %162 = vector.broadcast %cst_18 : f32 to vector<16x128xf32>
      %163 = arith.maximumf %161, %162 : vector<16x128xf32>
      %164 = vector.broadcast %16 : f32 to vector<16x128xf32>
      %165 = arith.mulf %67, %164 : vector<16x128xf32>
      %166 = vector.broadcast %36 : f32 to vector<16x128xf32>
      %167 = arith.addf %165, %166 : vector<16x128xf32>
      %cst_19 = arith.constant 0.000000e+00 : f32
      %168 = vector.broadcast %cst_19 : f32 to vector<16x128xf32>
      %169 = arith.maximumf %167, %168 : vector<16x128xf32>
      %170 = vector.broadcast %17 : f32 to vector<16x128xf32>
      %171 = arith.mulf %67, %170 : vector<16x128xf32>
      %172 = vector.broadcast %37 : f32 to vector<16x128xf32>
      %173 = arith.addf %171, %172 : vector<16x128xf32>
      %cst_20 = arith.constant 0.000000e+00 : f32
      %174 = vector.broadcast %cst_20 : f32 to vector<16x128xf32>
      %175 = arith.maximumf %173, %174 : vector<16x128xf32>
      %176 = vector.broadcast %18 : f32 to vector<16x128xf32>
      %177 = arith.mulf %67, %176 : vector<16x128xf32>
      %178 = vector.broadcast %38 : f32 to vector<16x128xf32>
      %179 = arith.addf %177, %178 : vector<16x128xf32>
      %cst_21 = arith.constant 0.000000e+00 : f32
      %180 = vector.broadcast %cst_21 : f32 to vector<16x128xf32>
      %181 = arith.maximumf %179, %180 : vector<16x128xf32>
      %182 = vector.broadcast %19 : f32 to vector<16x128xf32>
      %183 = arith.mulf %67, %182 : vector<16x128xf32>
      %184 = vector.broadcast %39 : f32 to vector<16x128xf32>
      %185 = arith.addf %183, %184 : vector<16x128xf32>
      %cst_22 = arith.constant 0.000000e+00 : f32
      %186 = vector.broadcast %cst_22 : f32 to vector<16x128xf32>
      %187 = arith.maximumf %185, %186 : vector<16x128xf32>
      %c40 = arith.constant 40 : index
      %188 = memref.load %arg1[%c40] : memref<512xf32, #tpu.memory_space<smem>>
      %189 = vector.broadcast %188 : f32 to vector<16x128xf32>
      %190 = arith.mulf %73, %189 : vector<16x128xf32>
      %c440 = arith.constant 440 : index
      %191 = memref.load %arg1[%c440] : memref<512xf32, #tpu.memory_space<smem>>
      %192 = vector.broadcast %191 : f32 to vector<16x128xf32>
      %193 = arith.addf %190, %192 : vector<16x128xf32>
      %c60 = arith.constant 60 : index
      %194 = memref.load %arg1[%c60] : memref<512xf32, #tpu.memory_space<smem>>
      %195 = vector.broadcast %194 : f32 to vector<16x128xf32>
      %196 = arith.mulf %79, %195 : vector<16x128xf32>
      %197 = arith.addf %193, %196 : vector<16x128xf32>
      %c80 = arith.constant 80 : index
      %198 = memref.load %arg1[%c80] : memref<512xf32, #tpu.memory_space<smem>>
      %199 = vector.broadcast %198 : f32 to vector<16x128xf32>
      %200 = arith.mulf %85, %199 : vector<16x128xf32>
      %201 = arith.addf %197, %200 : vector<16x128xf32>
      %c100 = arith.constant 100 : index
      %202 = memref.load %arg1[%c100] : memref<512xf32, #tpu.memory_space<smem>>
      %203 = vector.broadcast %202 : f32 to vector<16x128xf32>
      %204 = arith.mulf %91, %203 : vector<16x128xf32>
      %205 = arith.addf %201, %204 : vector<16x128xf32>
      %c120 = arith.constant 120 : index
      %206 = memref.load %arg1[%c120] : memref<512xf32, #tpu.memory_space<smem>>
      %207 = vector.broadcast %206 : f32 to vector<16x128xf32>
      %208 = arith.mulf %97, %207 : vector<16x128xf32>
      %209 = arith.addf %205, %208 : vector<16x128xf32>
      %c140 = arith.constant 140 : index
      %210 = memref.load %arg1[%c140] : memref<512xf32, #tpu.memory_space<smem>>
      %211 = vector.broadcast %210 : f32 to vector<16x128xf32>
      %212 = arith.mulf %103, %211 : vector<16x128xf32>
      %213 = arith.addf %209, %212 : vector<16x128xf32>
      %c160 = arith.constant 160 : index
      %214 = memref.load %arg1[%c160] : memref<512xf32, #tpu.memory_space<smem>>
      %215 = vector.broadcast %214 : f32 to vector<16x128xf32>
      %216 = arith.mulf %109, %215 : vector<16x128xf32>
      %217 = arith.addf %213, %216 : vector<16x128xf32>
      %c180 = arith.constant 180 : index
      %218 = memref.load %arg1[%c180] : memref<512xf32, #tpu.memory_space<smem>>
      %219 = vector.broadcast %218 : f32 to vector<16x128xf32>
      %220 = arith.mulf %115, %219 : vector<16x128xf32>
      %221 = arith.addf %217, %220 : vector<16x128xf32>
      %c200 = arith.constant 200 : index
      %222 = memref.load %arg1[%c200] : memref<512xf32, #tpu.memory_space<smem>>
      %223 = vector.broadcast %222 : f32 to vector<16x128xf32>
      %224 = arith.mulf %121, %223 : vector<16x128xf32>
      %225 = arith.addf %221, %224 : vector<16x128xf32>
      %c220 = arith.constant 220 : index
      %226 = memref.load %arg1[%c220] : memref<512xf32, #tpu.memory_space<smem>>
      %227 = vector.broadcast %226 : f32 to vector<16x128xf32>
      %228 = arith.mulf %127, %227 : vector<16x128xf32>
      %229 = arith.addf %225, %228 : vector<16x128xf32>
      %c240 = arith.constant 240 : index
      %230 = memref.load %arg1[%c240] : memref<512xf32, #tpu.memory_space<smem>>
      %231 = vector.broadcast %230 : f32 to vector<16x128xf32>
      %232 = arith.mulf %133, %231 : vector<16x128xf32>
      %233 = arith.addf %229, %232 : vector<16x128xf32>
      %c260 = arith.constant 260 : index
      %234 = memref.load %arg1[%c260] : memref<512xf32, #tpu.memory_space<smem>>
      %235 = vector.broadcast %234 : f32 to vector<16x128xf32>
      %236 = arith.mulf %139, %235 : vector<16x128xf32>
      %237 = arith.addf %233, %236 : vector<16x128xf32>
      %c280 = arith.constant 280 : index
      %238 = memref.load %arg1[%c280] : memref<512xf32, #tpu.memory_space<smem>>
      %239 = vector.broadcast %238 : f32 to vector<16x128xf32>
      %240 = arith.mulf %145, %239 : vector<16x128xf32>
      %241 = arith.addf %237, %240 : vector<16x128xf32>
      %c300 = arith.constant 300 : index
      %242 = memref.load %arg1[%c300] : memref<512xf32, #tpu.memory_space<smem>>
      %243 = vector.broadcast %242 : f32 to vector<16x128xf32>
      %244 = arith.mulf %151, %243 : vector<16x128xf32>
      %245 = arith.addf %241, %244 : vector<16x128xf32>
      %c320 = arith.constant 320 : index
      %246 = memref.load %arg1[%c320] : memref<512xf32, #tpu.memory_space<smem>>
      %247 = vector.broadcast %246 : f32 to vector<16x128xf32>
      %248 = arith.mulf %157, %247 : vector<16x128xf32>
      %249 = arith.addf %245, %248 : vector<16x128xf32>
      %c340 = arith.constant 340 : index
      %250 = memref.load %arg1[%c340] : memref<512xf32, #tpu.memory_space<smem>>
      %251 = vector.broadcast %250 : f32 to vector<16x128xf32>
      %252 = arith.mulf %163, %251 : vector<16x128xf32>
      %253 = arith.addf %249, %252 : vector<16x128xf32>
      %c360 = arith.constant 360 : index
      %254 = memref.load %arg1[%c360] : memref<512xf32, #tpu.memory_space<smem>>
      %255 = vector.broadcast %254 : f32 to vector<16x128xf32>
      %256 = arith.mulf %169, %255 : vector<16x128xf32>
      %257 = arith.addf %253, %256 : vector<16x128xf32>
      %c380 = arith.constant 380 : index
      %258 = memref.load %arg1[%c380] : memref<512xf32, #tpu.memory_space<smem>>
      %259 = vector.broadcast %258 : f32 to vector<16x128xf32>
      %260 = arith.mulf %175, %259 : vector<16x128xf32>
      %261 = arith.addf %257, %260 : vector<16x128xf32>
      %c400 = arith.constant 400 : index
      %262 = memref.load %arg1[%c400] : memref<512xf32, #tpu.memory_space<smem>>
      %263 = vector.broadcast %262 : f32 to vector<16x128xf32>
      %264 = arith.mulf %181, %263 : vector<16x128xf32>
      %265 = arith.addf %261, %264 : vector<16x128xf32>
      %c420 = arith.constant 420 : index
      %266 = memref.load %arg1[%c420] : memref<512xf32, #tpu.memory_space<smem>>
      %267 = vector.broadcast %266 : f32 to vector<16x128xf32>
      %268 = arith.mulf %187, %267 : vector<16x128xf32>
      %269 = arith.addf %265, %268 : vector<16x128xf32>
      %cst_23 = arith.constant 0.000000e+00 : f32
      %270 = vector.broadcast %cst_23 : f32 to vector<16x128xf32>
      %271 = arith.maximumf %269, %270 : vector<16x128xf32>
      %272 = vector.broadcast %40 : f32 to vector<16x128xf32>
      %273 = arith.mulf %271, %272 : vector<16x128xf32>
      %c41 = arith.constant 41 : index
      %274 = memref.load %arg1[%c41] : memref<512xf32, #tpu.memory_space<smem>>
      %275 = vector.broadcast %274 : f32 to vector<16x128xf32>
      %276 = arith.mulf %73, %275 : vector<16x128xf32>
      %c441 = arith.constant 441 : index
      %277 = memref.load %arg1[%c441] : memref<512xf32, #tpu.memory_space<smem>>
      %278 = vector.broadcast %277 : f32 to vector<16x128xf32>
      %279 = arith.addf %276, %278 : vector<16x128xf32>
      %c61 = arith.constant 61 : index
      %280 = memref.load %arg1[%c61] : memref<512xf32, #tpu.memory_space<smem>>
      %281 = vector.broadcast %280 : f32 to vector<16x128xf32>
      %282 = arith.mulf %79, %281 : vector<16x128xf32>
      %283 = arith.addf %279, %282 : vector<16x128xf32>
      %c81 = arith.constant 81 : index
      %284 = memref.load %arg1[%c81] : memref<512xf32, #tpu.memory_space<smem>>
      %285 = vector.broadcast %284 : f32 to vector<16x128xf32>
      %286 = arith.mulf %85, %285 : vector<16x128xf32>
      %287 = arith.addf %283, %286 : vector<16x128xf32>
      %c101 = arith.constant 101 : index
      %288 = memref.load %arg1[%c101] : memref<512xf32, #tpu.memory_space<smem>>
      %289 = vector.broadcast %288 : f32 to vector<16x128xf32>
      %290 = arith.mulf %91, %289 : vector<16x128xf32>
      %291 = arith.addf %287, %290 : vector<16x128xf32>
      %c121 = arith.constant 121 : index
      %292 = memref.load %arg1[%c121] : memref<512xf32, #tpu.memory_space<smem>>
      %293 = vector.broadcast %292 : f32 to vector<16x128xf32>
      %294 = arith.mulf %97, %293 : vector<16x128xf32>
      %295 = arith.addf %291, %294 : vector<16x128xf32>
      %c141 = arith.constant 141 : index
      %296 = memref.load %arg1[%c141] : memref<512xf32, #tpu.memory_space<smem>>
      %297 = vector.broadcast %296 : f32 to vector<16x128xf32>
      %298 = arith.mulf %103, %297 : vector<16x128xf32>
      %299 = arith.addf %295, %298 : vector<16x128xf32>
      %c161 = arith.constant 161 : index
      %300 = memref.load %arg1[%c161] : memref<512xf32, #tpu.memory_space<smem>>
      %301 = vector.broadcast %300 : f32 to vector<16x128xf32>
      %302 = arith.mulf %109, %301 : vector<16x128xf32>
      %303 = arith.addf %299, %302 : vector<16x128xf32>
      %c181 = arith.constant 181 : index
      %304 = memref.load %arg1[%c181] : memref<512xf32, #tpu.memory_space<smem>>
      %305 = vector.broadcast %304 : f32 to vector<16x128xf32>
      %306 = arith.mulf %115, %305 : vector<16x128xf32>
      %307 = arith.addf %303, %306 : vector<16x128xf32>
      %c201 = arith.constant 201 : index
      %308 = memref.load %arg1[%c201] : memref<512xf32, #tpu.memory_space<smem>>
      %309 = vector.broadcast %308 : f32 to vector<16x128xf32>
      %310 = arith.mulf %121, %309 : vector<16x128xf32>
      %311 = arith.addf %307, %310 : vector<16x128xf32>
      %c221 = arith.constant 221 : index
      %312 = memref.load %arg1[%c221] : memref<512xf32, #tpu.memory_space<smem>>
      %313 = vector.broadcast %312 : f32 to vector<16x128xf32>
      %314 = arith.mulf %127, %313 : vector<16x128xf32>
      %315 = arith.addf %311, %314 : vector<16x128xf32>
      %c241 = arith.constant 241 : index
      %316 = memref.load %arg1[%c241] : memref<512xf32, #tpu.memory_space<smem>>
      %317 = vector.broadcast %316 : f32 to vector<16x128xf32>
      %318 = arith.mulf %133, %317 : vector<16x128xf32>
      %319 = arith.addf %315, %318 : vector<16x128xf32>
      %c261 = arith.constant 261 : index
      %320 = memref.load %arg1[%c261] : memref<512xf32, #tpu.memory_space<smem>>
      %321 = vector.broadcast %320 : f32 to vector<16x128xf32>
      %322 = arith.mulf %139, %321 : vector<16x128xf32>
      %323 = arith.addf %319, %322 : vector<16x128xf32>
      %c281 = arith.constant 281 : index
      %324 = memref.load %arg1[%c281] : memref<512xf32, #tpu.memory_space<smem>>
      %325 = vector.broadcast %324 : f32 to vector<16x128xf32>
      %326 = arith.mulf %145, %325 : vector<16x128xf32>
      %327 = arith.addf %323, %326 : vector<16x128xf32>
      %c301 = arith.constant 301 : index
      %328 = memref.load %arg1[%c301] : memref<512xf32, #tpu.memory_space<smem>>
      %329 = vector.broadcast %328 : f32 to vector<16x128xf32>
      %330 = arith.mulf %151, %329 : vector<16x128xf32>
      %331 = arith.addf %327, %330 : vector<16x128xf32>
      %c321 = arith.constant 321 : index
      %332 = memref.load %arg1[%c321] : memref<512xf32, #tpu.memory_space<smem>>
      %333 = vector.broadcast %332 : f32 to vector<16x128xf32>
      %334 = arith.mulf %157, %333 : vector<16x128xf32>
      %335 = arith.addf %331, %334 : vector<16x128xf32>
      %c341 = arith.constant 341 : index
      %336 = memref.load %arg1[%c341] : memref<512xf32, #tpu.memory_space<smem>>
      %337 = vector.broadcast %336 : f32 to vector<16x128xf32>
      %338 = arith.mulf %163, %337 : vector<16x128xf32>
      %339 = arith.addf %335, %338 : vector<16x128xf32>
      %c361 = arith.constant 361 : index
      %340 = memref.load %arg1[%c361] : memref<512xf32, #tpu.memory_space<smem>>
      %341 = vector.broadcast %340 : f32 to vector<16x128xf32>
      %342 = arith.mulf %169, %341 : vector<16x128xf32>
      %343 = arith.addf %339, %342 : vector<16x128xf32>
      %c381 = arith.constant 381 : index
      %344 = memref.load %arg1[%c381] : memref<512xf32, #tpu.memory_space<smem>>
      %345 = vector.broadcast %344 : f32 to vector<16x128xf32>
      %346 = arith.mulf %175, %345 : vector<16x128xf32>
      %347 = arith.addf %343, %346 : vector<16x128xf32>
      %c401 = arith.constant 401 : index
      %348 = memref.load %arg1[%c401] : memref<512xf32, #tpu.memory_space<smem>>
      %349 = vector.broadcast %348 : f32 to vector<16x128xf32>
      %350 = arith.mulf %181, %349 : vector<16x128xf32>
      %351 = arith.addf %347, %350 : vector<16x128xf32>
      %c421 = arith.constant 421 : index
      %352 = memref.load %arg1[%c421] : memref<512xf32, #tpu.memory_space<smem>>
      %353 = vector.broadcast %352 : f32 to vector<16x128xf32>
      %354 = arith.mulf %187, %353 : vector<16x128xf32>
      %355 = arith.addf %351, %354 : vector<16x128xf32>
      %cst_24 = arith.constant 0.000000e+00 : f32
      %356 = vector.broadcast %cst_24 : f32 to vector<16x128xf32>
      %357 = arith.maximumf %355, %356 : vector<16x128xf32>
      %358 = vector.broadcast %41 : f32 to vector<16x128xf32>
      %359 = arith.mulf %357, %358 : vector<16x128xf32>
      %360 = arith.addf %273, %359 : vector<16x128xf32>
      %c42 = arith.constant 42 : index
      %361 = memref.load %arg1[%c42] : memref<512xf32, #tpu.memory_space<smem>>
      %362 = vector.broadcast %361 : f32 to vector<16x128xf32>
      %363 = arith.mulf %73, %362 : vector<16x128xf32>
      %c442 = arith.constant 442 : index
      %364 = memref.load %arg1[%c442] : memref<512xf32, #tpu.memory_space<smem>>
      %365 = vector.broadcast %364 : f32 to vector<16x128xf32>
      %366 = arith.addf %363, %365 : vector<16x128xf32>
      %c62 = arith.constant 62 : index
      %367 = memref.load %arg1[%c62] : memref<512xf32, #tpu.memory_space<smem>>
      %368 = vector.broadcast %367 : f32 to vector<16x128xf32>
      %369 = arith.mulf %79, %368 : vector<16x128xf32>
      %370 = arith.addf %366, %369 : vector<16x128xf32>
      %c82 = arith.constant 82 : index
      %371 = memref.load %arg1[%c82] : memref<512xf32, #tpu.memory_space<smem>>
      %372 = vector.broadcast %371 : f32 to vector<16x128xf32>
      %373 = arith.mulf %85, %372 : vector<16x128xf32>
      %374 = arith.addf %370, %373 : vector<16x128xf32>
      %c102 = arith.constant 102 : index
      %375 = memref.load %arg1[%c102] : memref<512xf32, #tpu.memory_space<smem>>
      %376 = vector.broadcast %375 : f32 to vector<16x128xf32>
      %377 = arith.mulf %91, %376 : vector<16x128xf32>
      %378 = arith.addf %374, %377 : vector<16x128xf32>
      %c122 = arith.constant 122 : index
      %379 = memref.load %arg1[%c122] : memref<512xf32, #tpu.memory_space<smem>>
      %380 = vector.broadcast %379 : f32 to vector<16x128xf32>
      %381 = arith.mulf %97, %380 : vector<16x128xf32>
      %382 = arith.addf %378, %381 : vector<16x128xf32>
      %c142 = arith.constant 142 : index
      %383 = memref.load %arg1[%c142] : memref<512xf32, #tpu.memory_space<smem>>
      %384 = vector.broadcast %383 : f32 to vector<16x128xf32>
      %385 = arith.mulf %103, %384 : vector<16x128xf32>
      %386 = arith.addf %382, %385 : vector<16x128xf32>
      %c162 = arith.constant 162 : index
      %387 = memref.load %arg1[%c162] : memref<512xf32, #tpu.memory_space<smem>>
      %388 = vector.broadcast %387 : f32 to vector<16x128xf32>
      %389 = arith.mulf %109, %388 : vector<16x128xf32>
      %390 = arith.addf %386, %389 : vector<16x128xf32>
      %c182 = arith.constant 182 : index
      %391 = memref.load %arg1[%c182] : memref<512xf32, #tpu.memory_space<smem>>
      %392 = vector.broadcast %391 : f32 to vector<16x128xf32>
      %393 = arith.mulf %115, %392 : vector<16x128xf32>
      %394 = arith.addf %390, %393 : vector<16x128xf32>
      %c202 = arith.constant 202 : index
      %395 = memref.load %arg1[%c202] : memref<512xf32, #tpu.memory_space<smem>>
      %396 = vector.broadcast %395 : f32 to vector<16x128xf32>
      %397 = arith.mulf %121, %396 : vector<16x128xf32>
      %398 = arith.addf %394, %397 : vector<16x128xf32>
      %c222 = arith.constant 222 : index
      %399 = memref.load %arg1[%c222] : memref<512xf32, #tpu.memory_space<smem>>
      %400 = vector.broadcast %399 : f32 to vector<16x128xf32>
      %401 = arith.mulf %127, %400 : vector<16x128xf32>
      %402 = arith.addf %398, %401 : vector<16x128xf32>
      %c242 = arith.constant 242 : index
      %403 = memref.load %arg1[%c242] : memref<512xf32, #tpu.memory_space<smem>>
      %404 = vector.broadcast %403 : f32 to vector<16x128xf32>
      %405 = arith.mulf %133, %404 : vector<16x128xf32>
      %406 = arith.addf %402, %405 : vector<16x128xf32>
      %c262 = arith.constant 262 : index
      %407 = memref.load %arg1[%c262] : memref<512xf32, #tpu.memory_space<smem>>
      %408 = vector.broadcast %407 : f32 to vector<16x128xf32>
      %409 = arith.mulf %139, %408 : vector<16x128xf32>
      %410 = arith.addf %406, %409 : vector<16x128xf32>
      %c282 = arith.constant 282 : index
      %411 = memref.load %arg1[%c282] : memref<512xf32, #tpu.memory_space<smem>>
      %412 = vector.broadcast %411 : f32 to vector<16x128xf32>
      %413 = arith.mulf %145, %412 : vector<16x128xf32>
      %414 = arith.addf %410, %413 : vector<16x128xf32>
      %c302 = arith.constant 302 : index
      %415 = memref.load %arg1[%c302] : memref<512xf32, #tpu.memory_space<smem>>
      %416 = vector.broadcast %415 : f32 to vector<16x128xf32>
      %417 = arith.mulf %151, %416 : vector<16x128xf32>
      %418 = arith.addf %414, %417 : vector<16x128xf32>
      %c322 = arith.constant 322 : index
      %419 = memref.load %arg1[%c322] : memref<512xf32, #tpu.memory_space<smem>>
      %420 = vector.broadcast %419 : f32 to vector<16x128xf32>
      %421 = arith.mulf %157, %420 : vector<16x128xf32>
      %422 = arith.addf %418, %421 : vector<16x128xf32>
      %c342 = arith.constant 342 : index
      %423 = memref.load %arg1[%c342] : memref<512xf32, #tpu.memory_space<smem>>
      %424 = vector.broadcast %423 : f32 to vector<16x128xf32>
      %425 = arith.mulf %163, %424 : vector<16x128xf32>
      %426 = arith.addf %422, %425 : vector<16x128xf32>
      %c362 = arith.constant 362 : index
      %427 = memref.load %arg1[%c362] : memref<512xf32, #tpu.memory_space<smem>>
      %428 = vector.broadcast %427 : f32 to vector<16x128xf32>
      %429 = arith.mulf %169, %428 : vector<16x128xf32>
      %430 = arith.addf %426, %429 : vector<16x128xf32>
      %c382 = arith.constant 382 : index
      %431 = memref.load %arg1[%c382] : memref<512xf32, #tpu.memory_space<smem>>
      %432 = vector.broadcast %431 : f32 to vector<16x128xf32>
      %433 = arith.mulf %175, %432 : vector<16x128xf32>
      %434 = arith.addf %430, %433 : vector<16x128xf32>
      %c402 = arith.constant 402 : index
      %435 = memref.load %arg1[%c402] : memref<512xf32, #tpu.memory_space<smem>>
      %436 = vector.broadcast %435 : f32 to vector<16x128xf32>
      %437 = arith.mulf %181, %436 : vector<16x128xf32>
      %438 = arith.addf %434, %437 : vector<16x128xf32>
      %c422 = arith.constant 422 : index
      %439 = memref.load %arg1[%c422] : memref<512xf32, #tpu.memory_space<smem>>
      %440 = vector.broadcast %439 : f32 to vector<16x128xf32>
      %441 = arith.mulf %187, %440 : vector<16x128xf32>
      %442 = arith.addf %438, %441 : vector<16x128xf32>
      %cst_25 = arith.constant 0.000000e+00 : f32
      %443 = vector.broadcast %cst_25 : f32 to vector<16x128xf32>
      %444 = arith.maximumf %442, %443 : vector<16x128xf32>
      %445 = vector.broadcast %42 : f32 to vector<16x128xf32>
      %446 = arith.mulf %444, %445 : vector<16x128xf32>
      %447 = arith.addf %360, %446 : vector<16x128xf32>
      %c43 = arith.constant 43 : index
      %448 = memref.load %arg1[%c43] : memref<512xf32, #tpu.memory_space<smem>>
      %449 = vector.broadcast %448 : f32 to vector<16x128xf32>
      %450 = arith.mulf %73, %449 : vector<16x128xf32>
      %c443 = arith.constant 443 : index
      %451 = memref.load %arg1[%c443] : memref<512xf32, #tpu.memory_space<smem>>
      %452 = vector.broadcast %451 : f32 to vector<16x128xf32>
      %453 = arith.addf %450, %452 : vector<16x128xf32>
      %c63 = arith.constant 63 : index
      %454 = memref.load %arg1[%c63] : memref<512xf32, #tpu.memory_space<smem>>
      %455 = vector.broadcast %454 : f32 to vector<16x128xf32>
      %456 = arith.mulf %79, %455 : vector<16x128xf32>
      %457 = arith.addf %453, %456 : vector<16x128xf32>
      %c83 = arith.constant 83 : index
      %458 = memref.load %arg1[%c83] : memref<512xf32, #tpu.memory_space<smem>>
      %459 = vector.broadcast %458 : f32 to vector<16x128xf32>
      %460 = arith.mulf %85, %459 : vector<16x128xf32>
      %461 = arith.addf %457, %460 : vector<16x128xf32>
      %c103 = arith.constant 103 : index
      %462 = memref.load %arg1[%c103] : memref<512xf32, #tpu.memory_space<smem>>
      %463 = vector.broadcast %462 : f32 to vector<16x128xf32>
      %464 = arith.mulf %91, %463 : vector<16x128xf32>
      %465 = arith.addf %461, %464 : vector<16x128xf32>
      %c123 = arith.constant 123 : index
      %466 = memref.load %arg1[%c123] : memref<512xf32, #tpu.memory_space<smem>>
      %467 = vector.broadcast %466 : f32 to vector<16x128xf32>
      %468 = arith.mulf %97, %467 : vector<16x128xf32>
      %469 = arith.addf %465, %468 : vector<16x128xf32>
      %c143 = arith.constant 143 : index
      %470 = memref.load %arg1[%c143] : memref<512xf32, #tpu.memory_space<smem>>
      %471 = vector.broadcast %470 : f32 to vector<16x128xf32>
      %472 = arith.mulf %103, %471 : vector<16x128xf32>
      %473 = arith.addf %469, %472 : vector<16x128xf32>
      %c163 = arith.constant 163 : index
      %474 = memref.load %arg1[%c163] : memref<512xf32, #tpu.memory_space<smem>>
      %475 = vector.broadcast %474 : f32 to vector<16x128xf32>
      %476 = arith.mulf %109, %475 : vector<16x128xf32>
      %477 = arith.addf %473, %476 : vector<16x128xf32>
      %c183 = arith.constant 183 : index
      %478 = memref.load %arg1[%c183] : memref<512xf32, #tpu.memory_space<smem>>
      %479 = vector.broadcast %478 : f32 to vector<16x128xf32>
      %480 = arith.mulf %115, %479 : vector<16x128xf32>
      %481 = arith.addf %477, %480 : vector<16x128xf32>
      %c203 = arith.constant 203 : index
      %482 = memref.load %arg1[%c203] : memref<512xf32, #tpu.memory_space<smem>>
      %483 = vector.broadcast %482 : f32 to vector<16x128xf32>
      %484 = arith.mulf %121, %483 : vector<16x128xf32>
      %485 = arith.addf %481, %484 : vector<16x128xf32>
      %c223 = arith.constant 223 : index
      %486 = memref.load %arg1[%c223] : memref<512xf32, #tpu.memory_space<smem>>
      %487 = vector.broadcast %486 : f32 to vector<16x128xf32>
      %488 = arith.mulf %127, %487 : vector<16x128xf32>
      %489 = arith.addf %485, %488 : vector<16x128xf32>
      %c243 = arith.constant 243 : index
      %490 = memref.load %arg1[%c243] : memref<512xf32, #tpu.memory_space<smem>>
      %491 = vector.broadcast %490 : f32 to vector<16x128xf32>
      %492 = arith.mulf %133, %491 : vector<16x128xf32>
      %493 = arith.addf %489, %492 : vector<16x128xf32>
      %c263 = arith.constant 263 : index
      %494 = memref.load %arg1[%c263] : memref<512xf32, #tpu.memory_space<smem>>
      %495 = vector.broadcast %494 : f32 to vector<16x128xf32>
      %496 = arith.mulf %139, %495 : vector<16x128xf32>
      %497 = arith.addf %493, %496 : vector<16x128xf32>
      %c283 = arith.constant 283 : index
      %498 = memref.load %arg1[%c283] : memref<512xf32, #tpu.memory_space<smem>>
      %499 = vector.broadcast %498 : f32 to vector<16x128xf32>
      %500 = arith.mulf %145, %499 : vector<16x128xf32>
      %501 = arith.addf %497, %500 : vector<16x128xf32>
      %c303 = arith.constant 303 : index
      %502 = memref.load %arg1[%c303] : memref<512xf32, #tpu.memory_space<smem>>
      %503 = vector.broadcast %502 : f32 to vector<16x128xf32>
      %504 = arith.mulf %151, %503 : vector<16x128xf32>
      %505 = arith.addf %501, %504 : vector<16x128xf32>
      %c323 = arith.constant 323 : index
      %506 = memref.load %arg1[%c323] : memref<512xf32, #tpu.memory_space<smem>>
      %507 = vector.broadcast %506 : f32 to vector<16x128xf32>
      %508 = arith.mulf %157, %507 : vector<16x128xf32>
      %509 = arith.addf %505, %508 : vector<16x128xf32>
      %c343 = arith.constant 343 : index
      %510 = memref.load %arg1[%c343] : memref<512xf32, #tpu.memory_space<smem>>
      %511 = vector.broadcast %510 : f32 to vector<16x128xf32>
      %512 = arith.mulf %163, %511 : vector<16x128xf32>
      %513 = arith.addf %509, %512 : vector<16x128xf32>
      %c363 = arith.constant 363 : index
      %514 = memref.load %arg1[%c363] : memref<512xf32, #tpu.memory_space<smem>>
      %515 = vector.broadcast %514 : f32 to vector<16x128xf32>
      %516 = arith.mulf %169, %515 : vector<16x128xf32>
      %517 = arith.addf %513, %516 : vector<16x128xf32>
      %c383 = arith.constant 383 : index
      %518 = memref.load %arg1[%c383] : memref<512xf32, #tpu.memory_space<smem>>
      %519 = vector.broadcast %518 : f32 to vector<16x128xf32>
      %520 = arith.mulf %175, %519 : vector<16x128xf32>
      %521 = arith.addf %517, %520 : vector<16x128xf32>
      %c403 = arith.constant 403 : index
      %522 = memref.load %arg1[%c403] : memref<512xf32, #tpu.memory_space<smem>>
      %523 = vector.broadcast %522 : f32 to vector<16x128xf32>
      %524 = arith.mulf %181, %523 : vector<16x128xf32>
      %525 = arith.addf %521, %524 : vector<16x128xf32>
      %c423 = arith.constant 423 : index
      %526 = memref.load %arg1[%c423] : memref<512xf32, #tpu.memory_space<smem>>
      %527 = vector.broadcast %526 : f32 to vector<16x128xf32>
      %528 = arith.mulf %187, %527 : vector<16x128xf32>
      %529 = arith.addf %525, %528 : vector<16x128xf32>
      %cst_26 = arith.constant 0.000000e+00 : f32
      %530 = vector.broadcast %cst_26 : f32 to vector<16x128xf32>
      %531 = arith.maximumf %529, %530 : vector<16x128xf32>
      %532 = vector.broadcast %43 : f32 to vector<16x128xf32>
      %533 = arith.mulf %531, %532 : vector<16x128xf32>
      %534 = arith.addf %447, %533 : vector<16x128xf32>
      %c44 = arith.constant 44 : index
      %535 = memref.load %arg1[%c44] : memref<512xf32, #tpu.memory_space<smem>>
      %536 = vector.broadcast %535 : f32 to vector<16x128xf32>
      %537 = arith.mulf %73, %536 : vector<16x128xf32>
      %c444 = arith.constant 444 : index
      %538 = memref.load %arg1[%c444] : memref<512xf32, #tpu.memory_space<smem>>
      %539 = vector.broadcast %538 : f32 to vector<16x128xf32>
      %540 = arith.addf %537, %539 : vector<16x128xf32>
      %c64 = arith.constant 64 : index
      %541 = memref.load %arg1[%c64] : memref<512xf32, #tpu.memory_space<smem>>
      %542 = vector.broadcast %541 : f32 to vector<16x128xf32>
      %543 = arith.mulf %79, %542 : vector<16x128xf32>
      %544 = arith.addf %540, %543 : vector<16x128xf32>
      %c84 = arith.constant 84 : index
      %545 = memref.load %arg1[%c84] : memref<512xf32, #tpu.memory_space<smem>>
      %546 = vector.broadcast %545 : f32 to vector<16x128xf32>
      %547 = arith.mulf %85, %546 : vector<16x128xf32>
      %548 = arith.addf %544, %547 : vector<16x128xf32>
      %c104 = arith.constant 104 : index
      %549 = memref.load %arg1[%c104] : memref<512xf32, #tpu.memory_space<smem>>
      %550 = vector.broadcast %549 : f32 to vector<16x128xf32>
      %551 = arith.mulf %91, %550 : vector<16x128xf32>
      %552 = arith.addf %548, %551 : vector<16x128xf32>
      %c124 = arith.constant 124 : index
      %553 = memref.load %arg1[%c124] : memref<512xf32, #tpu.memory_space<smem>>
      %554 = vector.broadcast %553 : f32 to vector<16x128xf32>
      %555 = arith.mulf %97, %554 : vector<16x128xf32>
      %556 = arith.addf %552, %555 : vector<16x128xf32>
      %c144 = arith.constant 144 : index
      %557 = memref.load %arg1[%c144] : memref<512xf32, #tpu.memory_space<smem>>
      %558 = vector.broadcast %557 : f32 to vector<16x128xf32>
      %559 = arith.mulf %103, %558 : vector<16x128xf32>
      %560 = arith.addf %556, %559 : vector<16x128xf32>
      %c164 = arith.constant 164 : index
      %561 = memref.load %arg1[%c164] : memref<512xf32, #tpu.memory_space<smem>>
      %562 = vector.broadcast %561 : f32 to vector<16x128xf32>
      %563 = arith.mulf %109, %562 : vector<16x128xf32>
      %564 = arith.addf %560, %563 : vector<16x128xf32>
      %c184 = arith.constant 184 : index
      %565 = memref.load %arg1[%c184] : memref<512xf32, #tpu.memory_space<smem>>
      %566 = vector.broadcast %565 : f32 to vector<16x128xf32>
      %567 = arith.mulf %115, %566 : vector<16x128xf32>
      %568 = arith.addf %564, %567 : vector<16x128xf32>
      %c204 = arith.constant 204 : index
      %569 = memref.load %arg1[%c204] : memref<512xf32, #tpu.memory_space<smem>>
      %570 = vector.broadcast %569 : f32 to vector<16x128xf32>
      %571 = arith.mulf %121, %570 : vector<16x128xf32>
      %572 = arith.addf %568, %571 : vector<16x128xf32>
      %c224 = arith.constant 224 : index
      %573 = memref.load %arg1[%c224] : memref<512xf32, #tpu.memory_space<smem>>
      %574 = vector.broadcast %573 : f32 to vector<16x128xf32>
      %575 = arith.mulf %127, %574 : vector<16x128xf32>
      %576 = arith.addf %572, %575 : vector<16x128xf32>
      %c244 = arith.constant 244 : index
      %577 = memref.load %arg1[%c244] : memref<512xf32, #tpu.memory_space<smem>>
      %578 = vector.broadcast %577 : f32 to vector<16x128xf32>
      %579 = arith.mulf %133, %578 : vector<16x128xf32>
      %580 = arith.addf %576, %579 : vector<16x128xf32>
      %c264 = arith.constant 264 : index
      %581 = memref.load %arg1[%c264] : memref<512xf32, #tpu.memory_space<smem>>
      %582 = vector.broadcast %581 : f32 to vector<16x128xf32>
      %583 = arith.mulf %139, %582 : vector<16x128xf32>
      %584 = arith.addf %580, %583 : vector<16x128xf32>
      %c284 = arith.constant 284 : index
      %585 = memref.load %arg1[%c284] : memref<512xf32, #tpu.memory_space<smem>>
      %586 = vector.broadcast %585 : f32 to vector<16x128xf32>
      %587 = arith.mulf %145, %586 : vector<16x128xf32>
      %588 = arith.addf %584, %587 : vector<16x128xf32>
      %c304 = arith.constant 304 : index
      %589 = memref.load %arg1[%c304] : memref<512xf32, #tpu.memory_space<smem>>
      %590 = vector.broadcast %589 : f32 to vector<16x128xf32>
      %591 = arith.mulf %151, %590 : vector<16x128xf32>
      %592 = arith.addf %588, %591 : vector<16x128xf32>
      %c324 = arith.constant 324 : index
      %593 = memref.load %arg1[%c324] : memref<512xf32, #tpu.memory_space<smem>>
      %594 = vector.broadcast %593 : f32 to vector<16x128xf32>
      %595 = arith.mulf %157, %594 : vector<16x128xf32>
      %596 = arith.addf %592, %595 : vector<16x128xf32>
      %c344 = arith.constant 344 : index
      %597 = memref.load %arg1[%c344] : memref<512xf32, #tpu.memory_space<smem>>
      %598 = vector.broadcast %597 : f32 to vector<16x128xf32>
      %599 = arith.mulf %163, %598 : vector<16x128xf32>
      %600 = arith.addf %596, %599 : vector<16x128xf32>
      %c364 = arith.constant 364 : index
      %601 = memref.load %arg1[%c364] : memref<512xf32, #tpu.memory_space<smem>>
      %602 = vector.broadcast %601 : f32 to vector<16x128xf32>
      %603 = arith.mulf %169, %602 : vector<16x128xf32>
      %604 = arith.addf %600, %603 : vector<16x128xf32>
      %c384 = arith.constant 384 : index
      %605 = memref.load %arg1[%c384] : memref<512xf32, #tpu.memory_space<smem>>
      %606 = vector.broadcast %605 : f32 to vector<16x128xf32>
      %607 = arith.mulf %175, %606 : vector<16x128xf32>
      %608 = arith.addf %604, %607 : vector<16x128xf32>
      %c404 = arith.constant 404 : index
      %609 = memref.load %arg1[%c404] : memref<512xf32, #tpu.memory_space<smem>>
      %610 = vector.broadcast %609 : f32 to vector<16x128xf32>
      %611 = arith.mulf %181, %610 : vector<16x128xf32>
      %612 = arith.addf %608, %611 : vector<16x128xf32>
      %c424 = arith.constant 424 : index
      %613 = memref.load %arg1[%c424] : memref<512xf32, #tpu.memory_space<smem>>
      %614 = vector.broadcast %613 : f32 to vector<16x128xf32>
      %615 = arith.mulf %187, %614 : vector<16x128xf32>
      %616 = arith.addf %612, %615 : vector<16x128xf32>
      %cst_27 = arith.constant 0.000000e+00 : f32
      %617 = vector.broadcast %cst_27 : f32 to vector<16x128xf32>
      %618 = arith.maximumf %616, %617 : vector<16x128xf32>
      %619 = vector.broadcast %44 : f32 to vector<16x128xf32>
      %620 = arith.mulf %618, %619 : vector<16x128xf32>
      %621 = arith.addf %534, %620 : vector<16x128xf32>
      %c45 = arith.constant 45 : index
      %622 = memref.load %arg1[%c45] : memref<512xf32, #tpu.memory_space<smem>>
      %623 = vector.broadcast %622 : f32 to vector<16x128xf32>
      %624 = arith.mulf %73, %623 : vector<16x128xf32>
      %c445 = arith.constant 445 : index
      %625 = memref.load %arg1[%c445] : memref<512xf32, #tpu.memory_space<smem>>
      %626 = vector.broadcast %625 : f32 to vector<16x128xf32>
      %627 = arith.addf %624, %626 : vector<16x128xf32>
      %c65 = arith.constant 65 : index
      %628 = memref.load %arg1[%c65] : memref<512xf32, #tpu.memory_space<smem>>
      %629 = vector.broadcast %628 : f32 to vector<16x128xf32>
      %630 = arith.mulf %79, %629 : vector<16x128xf32>
      %631 = arith.addf %627, %630 : vector<16x128xf32>
      %c85 = arith.constant 85 : index
      %632 = memref.load %arg1[%c85] : memref<512xf32, #tpu.memory_space<smem>>
      %633 = vector.broadcast %632 : f32 to vector<16x128xf32>
      %634 = arith.mulf %85, %633 : vector<16x128xf32>
      %635 = arith.addf %631, %634 : vector<16x128xf32>
      %c105 = arith.constant 105 : index
      %636 = memref.load %arg1[%c105] : memref<512xf32, #tpu.memory_space<smem>>
      %637 = vector.broadcast %636 : f32 to vector<16x128xf32>
      %638 = arith.mulf %91, %637 : vector<16x128xf32>
      %639 = arith.addf %635, %638 : vector<16x128xf32>
      %c125 = arith.constant 125 : index
      %640 = memref.load %arg1[%c125] : memref<512xf32, #tpu.memory_space<smem>>
      %641 = vector.broadcast %640 : f32 to vector<16x128xf32>
      %642 = arith.mulf %97, %641 : vector<16x128xf32>
      %643 = arith.addf %639, %642 : vector<16x128xf32>
      %c145 = arith.constant 145 : index
      %644 = memref.load %arg1[%c145] : memref<512xf32, #tpu.memory_space<smem>>
      %645 = vector.broadcast %644 : f32 to vector<16x128xf32>
      %646 = arith.mulf %103, %645 : vector<16x128xf32>
      %647 = arith.addf %643, %646 : vector<16x128xf32>
      %c165 = arith.constant 165 : index
      %648 = memref.load %arg1[%c165] : memref<512xf32, #tpu.memory_space<smem>>
      %649 = vector.broadcast %648 : f32 to vector<16x128xf32>
      %650 = arith.mulf %109, %649 : vector<16x128xf32>
      %651 = arith.addf %647, %650 : vector<16x128xf32>
      %c185 = arith.constant 185 : index
      %652 = memref.load %arg1[%c185] : memref<512xf32, #tpu.memory_space<smem>>
      %653 = vector.broadcast %652 : f32 to vector<16x128xf32>
      %654 = arith.mulf %115, %653 : vector<16x128xf32>
      %655 = arith.addf %651, %654 : vector<16x128xf32>
      %c205 = arith.constant 205 : index
      %656 = memref.load %arg1[%c205] : memref<512xf32, #tpu.memory_space<smem>>
      %657 = vector.broadcast %656 : f32 to vector<16x128xf32>
      %658 = arith.mulf %121, %657 : vector<16x128xf32>
      %659 = arith.addf %655, %658 : vector<16x128xf32>
      %c225 = arith.constant 225 : index
      %660 = memref.load %arg1[%c225] : memref<512xf32, #tpu.memory_space<smem>>
      %661 = vector.broadcast %660 : f32 to vector<16x128xf32>
      %662 = arith.mulf %127, %661 : vector<16x128xf32>
      %663 = arith.addf %659, %662 : vector<16x128xf32>
      %c245 = arith.constant 245 : index
      %664 = memref.load %arg1[%c245] : memref<512xf32, #tpu.memory_space<smem>>
      %665 = vector.broadcast %664 : f32 to vector<16x128xf32>
      %666 = arith.mulf %133, %665 : vector<16x128xf32>
      %667 = arith.addf %663, %666 : vector<16x128xf32>
      %c265 = arith.constant 265 : index
      %668 = memref.load %arg1[%c265] : memref<512xf32, #tpu.memory_space<smem>>
      %669 = vector.broadcast %668 : f32 to vector<16x128xf32>
      %670 = arith.mulf %139, %669 : vector<16x128xf32>
      %671 = arith.addf %667, %670 : vector<16x128xf32>
      %c285 = arith.constant 285 : index
      %672 = memref.load %arg1[%c285] : memref<512xf32, #tpu.memory_space<smem>>
      %673 = vector.broadcast %672 : f32 to vector<16x128xf32>
      %674 = arith.mulf %145, %673 : vector<16x128xf32>
      %675 = arith.addf %671, %674 : vector<16x128xf32>
      %c305 = arith.constant 305 : index
      %676 = memref.load %arg1[%c305] : memref<512xf32, #tpu.memory_space<smem>>
      %677 = vector.broadcast %676 : f32 to vector<16x128xf32>
      %678 = arith.mulf %151, %677 : vector<16x128xf32>
      %679 = arith.addf %675, %678 : vector<16x128xf32>
      %c325 = arith.constant 325 : index
      %680 = memref.load %arg1[%c325] : memref<512xf32, #tpu.memory_space<smem>>
      %681 = vector.broadcast %680 : f32 to vector<16x128xf32>
      %682 = arith.mulf %157, %681 : vector<16x128xf32>
      %683 = arith.addf %679, %682 : vector<16x128xf32>
      %c345 = arith.constant 345 : index
      %684 = memref.load %arg1[%c345] : memref<512xf32, #tpu.memory_space<smem>>
      %685 = vector.broadcast %684 : f32 to vector<16x128xf32>
      %686 = arith.mulf %163, %685 : vector<16x128xf32>
      %687 = arith.addf %683, %686 : vector<16x128xf32>
      %c365 = arith.constant 365 : index
      %688 = memref.load %arg1[%c365] : memref<512xf32, #tpu.memory_space<smem>>
      %689 = vector.broadcast %688 : f32 to vector<16x128xf32>
      %690 = arith.mulf %169, %689 : vector<16x128xf32>
      %691 = arith.addf %687, %690 : vector<16x128xf32>
      %c385 = arith.constant 385 : index
      %692 = memref.load %arg1[%c385] : memref<512xf32, #tpu.memory_space<smem>>
      %693 = vector.broadcast %692 : f32 to vector<16x128xf32>
      %694 = arith.mulf %175, %693 : vector<16x128xf32>
      %695 = arith.addf %691, %694 : vector<16x128xf32>
      %c405 = arith.constant 405 : index
      %696 = memref.load %arg1[%c405] : memref<512xf32, #tpu.memory_space<smem>>
      %697 = vector.broadcast %696 : f32 to vector<16x128xf32>
      %698 = arith.mulf %181, %697 : vector<16x128xf32>
      %699 = arith.addf %695, %698 : vector<16x128xf32>
      %c425 = arith.constant 425 : index
      %700 = memref.load %arg1[%c425] : memref<512xf32, #tpu.memory_space<smem>>
      %701 = vector.broadcast %700 : f32 to vector<16x128xf32>
      %702 = arith.mulf %187, %701 : vector<16x128xf32>
      %703 = arith.addf %699, %702 : vector<16x128xf32>
      %cst_28 = arith.constant 0.000000e+00 : f32
      %704 = vector.broadcast %cst_28 : f32 to vector<16x128xf32>
      %705 = arith.maximumf %703, %704 : vector<16x128xf32>
      %706 = vector.broadcast %45 : f32 to vector<16x128xf32>
      %707 = arith.mulf %705, %706 : vector<16x128xf32>
      %708 = arith.addf %621, %707 : vector<16x128xf32>
      %c46 = arith.constant 46 : index
      %709 = memref.load %arg1[%c46] : memref<512xf32, #tpu.memory_space<smem>>
      %710 = vector.broadcast %709 : f32 to vector<16x128xf32>
      %711 = arith.mulf %73, %710 : vector<16x128xf32>
      %c446 = arith.constant 446 : index
      %712 = memref.load %arg1[%c446] : memref<512xf32, #tpu.memory_space<smem>>
      %713 = vector.broadcast %712 : f32 to vector<16x128xf32>
      %714 = arith.addf %711, %713 : vector<16x128xf32>
      %c66 = arith.constant 66 : index
      %715 = memref.load %arg1[%c66] : memref<512xf32, #tpu.memory_space<smem>>
      %716 = vector.broadcast %715 : f32 to vector<16x128xf32>
      %717 = arith.mulf %79, %716 : vector<16x128xf32>
      %718 = arith.addf %714, %717 : vector<16x128xf32>
      %c86 = arith.constant 86 : index
      %719 = memref.load %arg1[%c86] : memref<512xf32, #tpu.memory_space<smem>>
      %720 = vector.broadcast %719 : f32 to vector<16x128xf32>
      %721 = arith.mulf %85, %720 : vector<16x128xf32>
      %722 = arith.addf %718, %721 : vector<16x128xf32>
      %c106 = arith.constant 106 : index
      %723 = memref.load %arg1[%c106] : memref<512xf32, #tpu.memory_space<smem>>
      %724 = vector.broadcast %723 : f32 to vector<16x128xf32>
      %725 = arith.mulf %91, %724 : vector<16x128xf32>
      %726 = arith.addf %722, %725 : vector<16x128xf32>
      %c126 = arith.constant 126 : index
      %727 = memref.load %arg1[%c126] : memref<512xf32, #tpu.memory_space<smem>>
      %728 = vector.broadcast %727 : f32 to vector<16x128xf32>
      %729 = arith.mulf %97, %728 : vector<16x128xf32>
      %730 = arith.addf %726, %729 : vector<16x128xf32>
      %c146 = arith.constant 146 : index
      %731 = memref.load %arg1[%c146] : memref<512xf32, #tpu.memory_space<smem>>
      %732 = vector.broadcast %731 : f32 to vector<16x128xf32>
      %733 = arith.mulf %103, %732 : vector<16x128xf32>
      %734 = arith.addf %730, %733 : vector<16x128xf32>
      %c166 = arith.constant 166 : index
      %735 = memref.load %arg1[%c166] : memref<512xf32, #tpu.memory_space<smem>>
      %736 = vector.broadcast %735 : f32 to vector<16x128xf32>
      %737 = arith.mulf %109, %736 : vector<16x128xf32>
      %738 = arith.addf %734, %737 : vector<16x128xf32>
      %c186 = arith.constant 186 : index
      %739 = memref.load %arg1[%c186] : memref<512xf32, #tpu.memory_space<smem>>
      %740 = vector.broadcast %739 : f32 to vector<16x128xf32>
      %741 = arith.mulf %115, %740 : vector<16x128xf32>
      %742 = arith.addf %738, %741 : vector<16x128xf32>
      %c206 = arith.constant 206 : index
      %743 = memref.load %arg1[%c206] : memref<512xf32, #tpu.memory_space<smem>>
      %744 = vector.broadcast %743 : f32 to vector<16x128xf32>
      %745 = arith.mulf %121, %744 : vector<16x128xf32>
      %746 = arith.addf %742, %745 : vector<16x128xf32>
      %c226 = arith.constant 226 : index
      %747 = memref.load %arg1[%c226] : memref<512xf32, #tpu.memory_space<smem>>
      %748 = vector.broadcast %747 : f32 to vector<16x128xf32>
      %749 = arith.mulf %127, %748 : vector<16x128xf32>
      %750 = arith.addf %746, %749 : vector<16x128xf32>
      %c246 = arith.constant 246 : index
      %751 = memref.load %arg1[%c246] : memref<512xf32, #tpu.memory_space<smem>>
      %752 = vector.broadcast %751 : f32 to vector<16x128xf32>
      %753 = arith.mulf %133, %752 : vector<16x128xf32>
      %754 = arith.addf %750, %753 : vector<16x128xf32>
      %c266 = arith.constant 266 : index
      %755 = memref.load %arg1[%c266] : memref<512xf32, #tpu.memory_space<smem>>
      %756 = vector.broadcast %755 : f32 to vector<16x128xf32>
      %757 = arith.mulf %139, %756 : vector<16x128xf32>
      %758 = arith.addf %754, %757 : vector<16x128xf32>
      %c286 = arith.constant 286 : index
      %759 = memref.load %arg1[%c286] : memref<512xf32, #tpu.memory_space<smem>>
      %760 = vector.broadcast %759 : f32 to vector<16x128xf32>
      %761 = arith.mulf %145, %760 : vector<16x128xf32>
      %762 = arith.addf %758, %761 : vector<16x128xf32>
      %c306 = arith.constant 306 : index
      %763 = memref.load %arg1[%c306] : memref<512xf32, #tpu.memory_space<smem>>
      %764 = vector.broadcast %763 : f32 to vector<16x128xf32>
      %765 = arith.mulf %151, %764 : vector<16x128xf32>
      %766 = arith.addf %762, %765 : vector<16x128xf32>
      %c326 = arith.constant 326 : index
      %767 = memref.load %arg1[%c326] : memref<512xf32, #tpu.memory_space<smem>>
      %768 = vector.broadcast %767 : f32 to vector<16x128xf32>
      %769 = arith.mulf %157, %768 : vector<16x128xf32>
      %770 = arith.addf %766, %769 : vector<16x128xf32>
      %c346 = arith.constant 346 : index
      %771 = memref.load %arg1[%c346] : memref<512xf32, #tpu.memory_space<smem>>
      %772 = vector.broadcast %771 : f32 to vector<16x128xf32>
      %773 = arith.mulf %163, %772 : vector<16x128xf32>
      %774 = arith.addf %770, %773 : vector<16x128xf32>
      %c366 = arith.constant 366 : index
      %775 = memref.load %arg1[%c366] : memref<512xf32, #tpu.memory_space<smem>>
      %776 = vector.broadcast %775 : f32 to vector<16x128xf32>
      %777 = arith.mulf %169, %776 : vector<16x128xf32>
      %778 = arith.addf %774, %777 : vector<16x128xf32>
      %c386 = arith.constant 386 : index
      %779 = memref.load %arg1[%c386] : memref<512xf32, #tpu.memory_space<smem>>
      %780 = vector.broadcast %779 : f32 to vector<16x128xf32>
      %781 = arith.mulf %175, %780 : vector<16x128xf32>
      %782 = arith.addf %778, %781 : vector<16x128xf32>
      %c406 = arith.constant 406 : index
      %783 = memref.load %arg1[%c406] : memref<512xf32, #tpu.memory_space<smem>>
      %784 = vector.broadcast %783 : f32 to vector<16x128xf32>
      %785 = arith.mulf %181, %784 : vector<16x128xf32>
      %786 = arith.addf %782, %785 : vector<16x128xf32>
      %c426 = arith.constant 426 : index
      %787 = memref.load %arg1[%c426] : memref<512xf32, #tpu.memory_space<smem>>
      %788 = vector.broadcast %787 : f32 to vector<16x128xf32>
      %789 = arith.mulf %187, %788 : vector<16x128xf32>
      %790 = arith.addf %786, %789 : vector<16x128xf32>
      %cst_29 = arith.constant 0.000000e+00 : f32
      %791 = vector.broadcast %cst_29 : f32 to vector<16x128xf32>
      %792 = arith.maximumf %790, %791 : vector<16x128xf32>
      %793 = vector.broadcast %46 : f32 to vector<16x128xf32>
      %794 = arith.mulf %792, %793 : vector<16x128xf32>
      %795 = arith.addf %708, %794 : vector<16x128xf32>
      %c47 = arith.constant 47 : index
      %796 = memref.load %arg1[%c47] : memref<512xf32, #tpu.memory_space<smem>>
      %797 = vector.broadcast %796 : f32 to vector<16x128xf32>
      %798 = arith.mulf %73, %797 : vector<16x128xf32>
      %c447 = arith.constant 447 : index
      %799 = memref.load %arg1[%c447] : memref<512xf32, #tpu.memory_space<smem>>
      %800 = vector.broadcast %799 : f32 to vector<16x128xf32>
      %801 = arith.addf %798, %800 : vector<16x128xf32>
      %c67 = arith.constant 67 : index
      %802 = memref.load %arg1[%c67] : memref<512xf32, #tpu.memory_space<smem>>
      %803 = vector.broadcast %802 : f32 to vector<16x128xf32>
      %804 = arith.mulf %79, %803 : vector<16x128xf32>
      %805 = arith.addf %801, %804 : vector<16x128xf32>
      %c87 = arith.constant 87 : index
      %806 = memref.load %arg1[%c87] : memref<512xf32, #tpu.memory_space<smem>>
      %807 = vector.broadcast %806 : f32 to vector<16x128xf32>
      %808 = arith.mulf %85, %807 : vector<16x128xf32>
      %809 = arith.addf %805, %808 : vector<16x128xf32>
      %c107 = arith.constant 107 : index
      %810 = memref.load %arg1[%c107] : memref<512xf32, #tpu.memory_space<smem>>
      %811 = vector.broadcast %810 : f32 to vector<16x128xf32>
      %812 = arith.mulf %91, %811 : vector<16x128xf32>
      %813 = arith.addf %809, %812 : vector<16x128xf32>
      %c127 = arith.constant 127 : index
      %814 = memref.load %arg1[%c127] : memref<512xf32, #tpu.memory_space<smem>>
      %815 = vector.broadcast %814 : f32 to vector<16x128xf32>
      %816 = arith.mulf %97, %815 : vector<16x128xf32>
      %817 = arith.addf %813, %816 : vector<16x128xf32>
      %c147 = arith.constant 147 : index
      %818 = memref.load %arg1[%c147] : memref<512xf32, #tpu.memory_space<smem>>
      %819 = vector.broadcast %818 : f32 to vector<16x128xf32>
      %820 = arith.mulf %103, %819 : vector<16x128xf32>
      %821 = arith.addf %817, %820 : vector<16x128xf32>
      %c167 = arith.constant 167 : index
      %822 = memref.load %arg1[%c167] : memref<512xf32, #tpu.memory_space<smem>>
      %823 = vector.broadcast %822 : f32 to vector<16x128xf32>
      %824 = arith.mulf %109, %823 : vector<16x128xf32>
      %825 = arith.addf %821, %824 : vector<16x128xf32>
      %c187 = arith.constant 187 : index
      %826 = memref.load %arg1[%c187] : memref<512xf32, #tpu.memory_space<smem>>
      %827 = vector.broadcast %826 : f32 to vector<16x128xf32>
      %828 = arith.mulf %115, %827 : vector<16x128xf32>
      %829 = arith.addf %825, %828 : vector<16x128xf32>
      %c207 = arith.constant 207 : index
      %830 = memref.load %arg1[%c207] : memref<512xf32, #tpu.memory_space<smem>>
      %831 = vector.broadcast %830 : f32 to vector<16x128xf32>
      %832 = arith.mulf %121, %831 : vector<16x128xf32>
      %833 = arith.addf %829, %832 : vector<16x128xf32>
      %c227 = arith.constant 227 : index
      %834 = memref.load %arg1[%c227] : memref<512xf32, #tpu.memory_space<smem>>
      %835 = vector.broadcast %834 : f32 to vector<16x128xf32>
      %836 = arith.mulf %127, %835 : vector<16x128xf32>
      %837 = arith.addf %833, %836 : vector<16x128xf32>
      %c247 = arith.constant 247 : index
      %838 = memref.load %arg1[%c247] : memref<512xf32, #tpu.memory_space<smem>>
      %839 = vector.broadcast %838 : f32 to vector<16x128xf32>
      %840 = arith.mulf %133, %839 : vector<16x128xf32>
      %841 = arith.addf %837, %840 : vector<16x128xf32>
      %c267 = arith.constant 267 : index
      %842 = memref.load %arg1[%c267] : memref<512xf32, #tpu.memory_space<smem>>
      %843 = vector.broadcast %842 : f32 to vector<16x128xf32>
      %844 = arith.mulf %139, %843 : vector<16x128xf32>
      %845 = arith.addf %841, %844 : vector<16x128xf32>
      %c287 = arith.constant 287 : index
      %846 = memref.load %arg1[%c287] : memref<512xf32, #tpu.memory_space<smem>>
      %847 = vector.broadcast %846 : f32 to vector<16x128xf32>
      %848 = arith.mulf %145, %847 : vector<16x128xf32>
      %849 = arith.addf %845, %848 : vector<16x128xf32>
      %c307 = arith.constant 307 : index
      %850 = memref.load %arg1[%c307] : memref<512xf32, #tpu.memory_space<smem>>
      %851 = vector.broadcast %850 : f32 to vector<16x128xf32>
      %852 = arith.mulf %151, %851 : vector<16x128xf32>
      %853 = arith.addf %849, %852 : vector<16x128xf32>
      %c327 = arith.constant 327 : index
      %854 = memref.load %arg1[%c327] : memref<512xf32, #tpu.memory_space<smem>>
      %855 = vector.broadcast %854 : f32 to vector<16x128xf32>
      %856 = arith.mulf %157, %855 : vector<16x128xf32>
      %857 = arith.addf %853, %856 : vector<16x128xf32>
      %c347 = arith.constant 347 : index
      %858 = memref.load %arg1[%c347] : memref<512xf32, #tpu.memory_space<smem>>
      %859 = vector.broadcast %858 : f32 to vector<16x128xf32>
      %860 = arith.mulf %163, %859 : vector<16x128xf32>
      %861 = arith.addf %857, %860 : vector<16x128xf32>
      %c367 = arith.constant 367 : index
      %862 = memref.load %arg1[%c367] : memref<512xf32, #tpu.memory_space<smem>>
      %863 = vector.broadcast %862 : f32 to vector<16x128xf32>
      %864 = arith.mulf %169, %863 : vector<16x128xf32>
      %865 = arith.addf %861, %864 : vector<16x128xf32>
      %c387 = arith.constant 387 : index
      %866 = memref.load %arg1[%c387] : memref<512xf32, #tpu.memory_space<smem>>
      %867 = vector.broadcast %866 : f32 to vector<16x128xf32>
      %868 = arith.mulf %175, %867 : vector<16x128xf32>
      %869 = arith.addf %865, %868 : vector<16x128xf32>
      %c407 = arith.constant 407 : index
      %870 = memref.load %arg1[%c407] : memref<512xf32, #tpu.memory_space<smem>>
      %871 = vector.broadcast %870 : f32 to vector<16x128xf32>
      %872 = arith.mulf %181, %871 : vector<16x128xf32>
      %873 = arith.addf %869, %872 : vector<16x128xf32>
      %c427 = arith.constant 427 : index
      %874 = memref.load %arg1[%c427] : memref<512xf32, #tpu.memory_space<smem>>
      %875 = vector.broadcast %874 : f32 to vector<16x128xf32>
      %876 = arith.mulf %187, %875 : vector<16x128xf32>
      %877 = arith.addf %873, %876 : vector<16x128xf32>
      %cst_30 = arith.constant 0.000000e+00 : f32
      %878 = vector.broadcast %cst_30 : f32 to vector<16x128xf32>
      %879 = arith.maximumf %877, %878 : vector<16x128xf32>
      %880 = vector.broadcast %47 : f32 to vector<16x128xf32>
      %881 = arith.mulf %879, %880 : vector<16x128xf32>
      %882 = arith.addf %795, %881 : vector<16x128xf32>
      %c48 = arith.constant 48 : index
      %883 = memref.load %arg1[%c48] : memref<512xf32, #tpu.memory_space<smem>>
      %884 = vector.broadcast %883 : f32 to vector<16x128xf32>
      %885 = arith.mulf %73, %884 : vector<16x128xf32>
      %c448 = arith.constant 448 : index
      %886 = memref.load %arg1[%c448] : memref<512xf32, #tpu.memory_space<smem>>
      %887 = vector.broadcast %886 : f32 to vector<16x128xf32>
      %888 = arith.addf %885, %887 : vector<16x128xf32>
      %c68 = arith.constant 68 : index
      %889 = memref.load %arg1[%c68] : memref<512xf32, #tpu.memory_space<smem>>
      %890 = vector.broadcast %889 : f32 to vector<16x128xf32>
      %891 = arith.mulf %79, %890 : vector<16x128xf32>
      %892 = arith.addf %888, %891 : vector<16x128xf32>
      %c88 = arith.constant 88 : index
      %893 = memref.load %arg1[%c88] : memref<512xf32, #tpu.memory_space<smem>>
      %894 = vector.broadcast %893 : f32 to vector<16x128xf32>
      %895 = arith.mulf %85, %894 : vector<16x128xf32>
      %896 = arith.addf %892, %895 : vector<16x128xf32>
      %c108 = arith.constant 108 : index
      %897 = memref.load %arg1[%c108] : memref<512xf32, #tpu.memory_space<smem>>
      %898 = vector.broadcast %897 : f32 to vector<16x128xf32>
      %899 = arith.mulf %91, %898 : vector<16x128xf32>
      %900 = arith.addf %896, %899 : vector<16x128xf32>
      %c128 = arith.constant 128 : index
      %901 = memref.load %arg1[%c128] : memref<512xf32, #tpu.memory_space<smem>>
      %902 = vector.broadcast %901 : f32 to vector<16x128xf32>
      %903 = arith.mulf %97, %902 : vector<16x128xf32>
      %904 = arith.addf %900, %903 : vector<16x128xf32>
      %c148 = arith.constant 148 : index
      %905 = memref.load %arg1[%c148] : memref<512xf32, #tpu.memory_space<smem>>
      %906 = vector.broadcast %905 : f32 to vector<16x128xf32>
      %907 = arith.mulf %103, %906 : vector<16x128xf32>
      %908 = arith.addf %904, %907 : vector<16x128xf32>
      %c168 = arith.constant 168 : index
      %909 = memref.load %arg1[%c168] : memref<512xf32, #tpu.memory_space<smem>>
      %910 = vector.broadcast %909 : f32 to vector<16x128xf32>
      %911 = arith.mulf %109, %910 : vector<16x128xf32>
      %912 = arith.addf %908, %911 : vector<16x128xf32>
      %c188 = arith.constant 188 : index
      %913 = memref.load %arg1[%c188] : memref<512xf32, #tpu.memory_space<smem>>
      %914 = vector.broadcast %913 : f32 to vector<16x128xf32>
      %915 = arith.mulf %115, %914 : vector<16x128xf32>
      %916 = arith.addf %912, %915 : vector<16x128xf32>
      %c208 = arith.constant 208 : index
      %917 = memref.load %arg1[%c208] : memref<512xf32, #tpu.memory_space<smem>>
      %918 = vector.broadcast %917 : f32 to vector<16x128xf32>
      %919 = arith.mulf %121, %918 : vector<16x128xf32>
      %920 = arith.addf %916, %919 : vector<16x128xf32>
      %c228 = arith.constant 228 : index
      %921 = memref.load %arg1[%c228] : memref<512xf32, #tpu.memory_space<smem>>
      %922 = vector.broadcast %921 : f32 to vector<16x128xf32>
      %923 = arith.mulf %127, %922 : vector<16x128xf32>
      %924 = arith.addf %920, %923 : vector<16x128xf32>
      %c248 = arith.constant 248 : index
      %925 = memref.load %arg1[%c248] : memref<512xf32, #tpu.memory_space<smem>>
      %926 = vector.broadcast %925 : f32 to vector<16x128xf32>
      %927 = arith.mulf %133, %926 : vector<16x128xf32>
      %928 = arith.addf %924, %927 : vector<16x128xf32>
      %c268 = arith.constant 268 : index
      %929 = memref.load %arg1[%c268] : memref<512xf32, #tpu.memory_space<smem>>
      %930 = vector.broadcast %929 : f32 to vector<16x128xf32>
      %931 = arith.mulf %139, %930 : vector<16x128xf32>
      %932 = arith.addf %928, %931 : vector<16x128xf32>
      %c288 = arith.constant 288 : index
      %933 = memref.load %arg1[%c288] : memref<512xf32, #tpu.memory_space<smem>>
      %934 = vector.broadcast %933 : f32 to vector<16x128xf32>
      %935 = arith.mulf %145, %934 : vector<16x128xf32>
      %936 = arith.addf %932, %935 : vector<16x128xf32>
      %c308 = arith.constant 308 : index
      %937 = memref.load %arg1[%c308] : memref<512xf32, #tpu.memory_space<smem>>
      %938 = vector.broadcast %937 : f32 to vector<16x128xf32>
      %939 = arith.mulf %151, %938 : vector<16x128xf32>
      %940 = arith.addf %936, %939 : vector<16x128xf32>
      %c328 = arith.constant 328 : index
      %941 = memref.load %arg1[%c328] : memref<512xf32, #tpu.memory_space<smem>>
      %942 = vector.broadcast %941 : f32 to vector<16x128xf32>
      %943 = arith.mulf %157, %942 : vector<16x128xf32>
      %944 = arith.addf %940, %943 : vector<16x128xf32>
      %c348 = arith.constant 348 : index
      %945 = memref.load %arg1[%c348] : memref<512xf32, #tpu.memory_space<smem>>
      %946 = vector.broadcast %945 : f32 to vector<16x128xf32>
      %947 = arith.mulf %163, %946 : vector<16x128xf32>
      %948 = arith.addf %944, %947 : vector<16x128xf32>
      %c368 = arith.constant 368 : index
      %949 = memref.load %arg1[%c368] : memref<512xf32, #tpu.memory_space<smem>>
      %950 = vector.broadcast %949 : f32 to vector<16x128xf32>
      %951 = arith.mulf %169, %950 : vector<16x128xf32>
      %952 = arith.addf %948, %951 : vector<16x128xf32>
      %c388 = arith.constant 388 : index
      %953 = memref.load %arg1[%c388] : memref<512xf32, #tpu.memory_space<smem>>
      %954 = vector.broadcast %953 : f32 to vector<16x128xf32>
      %955 = arith.mulf %175, %954 : vector<16x128xf32>
      %956 = arith.addf %952, %955 : vector<16x128xf32>
      %c408 = arith.constant 408 : index
      %957 = memref.load %arg1[%c408] : memref<512xf32, #tpu.memory_space<smem>>
      %958 = vector.broadcast %957 : f32 to vector<16x128xf32>
      %959 = arith.mulf %181, %958 : vector<16x128xf32>
      %960 = arith.addf %956, %959 : vector<16x128xf32>
      %c428 = arith.constant 428 : index
      %961 = memref.load %arg1[%c428] : memref<512xf32, #tpu.memory_space<smem>>
      %962 = vector.broadcast %961 : f32 to vector<16x128xf32>
      %963 = arith.mulf %187, %962 : vector<16x128xf32>
      %964 = arith.addf %960, %963 : vector<16x128xf32>
      %cst_31 = arith.constant 0.000000e+00 : f32
      %965 = vector.broadcast %cst_31 : f32 to vector<16x128xf32>
      %966 = arith.maximumf %964, %965 : vector<16x128xf32>
      %967 = vector.broadcast %48 : f32 to vector<16x128xf32>
      %968 = arith.mulf %966, %967 : vector<16x128xf32>
      %969 = arith.addf %882, %968 : vector<16x128xf32>
      %c49 = arith.constant 49 : index
      %970 = memref.load %arg1[%c49] : memref<512xf32, #tpu.memory_space<smem>>
      %971 = vector.broadcast %970 : f32 to vector<16x128xf32>
      %972 = arith.mulf %73, %971 : vector<16x128xf32>
      %c449 = arith.constant 449 : index
      %973 = memref.load %arg1[%c449] : memref<512xf32, #tpu.memory_space<smem>>
      %974 = vector.broadcast %973 : f32 to vector<16x128xf32>
      %975 = arith.addf %972, %974 : vector<16x128xf32>
      %c69 = arith.constant 69 : index
      %976 = memref.load %arg1[%c69] : memref<512xf32, #tpu.memory_space<smem>>
      %977 = vector.broadcast %976 : f32 to vector<16x128xf32>
      %978 = arith.mulf %79, %977 : vector<16x128xf32>
      %979 = arith.addf %975, %978 : vector<16x128xf32>
      %c89 = arith.constant 89 : index
      %980 = memref.load %arg1[%c89] : memref<512xf32, #tpu.memory_space<smem>>
      %981 = vector.broadcast %980 : f32 to vector<16x128xf32>
      %982 = arith.mulf %85, %981 : vector<16x128xf32>
      %983 = arith.addf %979, %982 : vector<16x128xf32>
      %c109 = arith.constant 109 : index
      %984 = memref.load %arg1[%c109] : memref<512xf32, #tpu.memory_space<smem>>
      %985 = vector.broadcast %984 : f32 to vector<16x128xf32>
      %986 = arith.mulf %91, %985 : vector<16x128xf32>
      %987 = arith.addf %983, %986 : vector<16x128xf32>
      %c129 = arith.constant 129 : index
      %988 = memref.load %arg1[%c129] : memref<512xf32, #tpu.memory_space<smem>>
      %989 = vector.broadcast %988 : f32 to vector<16x128xf32>
      %990 = arith.mulf %97, %989 : vector<16x128xf32>
      %991 = arith.addf %987, %990 : vector<16x128xf32>
      %c149 = arith.constant 149 : index
      %992 = memref.load %arg1[%c149] : memref<512xf32, #tpu.memory_space<smem>>
      %993 = vector.broadcast %992 : f32 to vector<16x128xf32>
      %994 = arith.mulf %103, %993 : vector<16x128xf32>
      %995 = arith.addf %991, %994 : vector<16x128xf32>
      %c169 = arith.constant 169 : index
      %996 = memref.load %arg1[%c169] : memref<512xf32, #tpu.memory_space<smem>>
      %997 = vector.broadcast %996 : f32 to vector<16x128xf32>
      %998 = arith.mulf %109, %997 : vector<16x128xf32>
      %999 = arith.addf %995, %998 : vector<16x128xf32>
      %c189 = arith.constant 189 : index
      %1000 = memref.load %arg1[%c189] : memref<512xf32, #tpu.memory_space<smem>>
      %1001 = vector.broadcast %1000 : f32 to vector<16x128xf32>
      %1002 = arith.mulf %115, %1001 : vector<16x128xf32>
      %1003 = arith.addf %999, %1002 : vector<16x128xf32>
      %c209 = arith.constant 209 : index
      %1004 = memref.load %arg1[%c209] : memref<512xf32, #tpu.memory_space<smem>>
      %1005 = vector.broadcast %1004 : f32 to vector<16x128xf32>
      %1006 = arith.mulf %121, %1005 : vector<16x128xf32>
      %1007 = arith.addf %1003, %1006 : vector<16x128xf32>
      %c229 = arith.constant 229 : index
      %1008 = memref.load %arg1[%c229] : memref<512xf32, #tpu.memory_space<smem>>
      %1009 = vector.broadcast %1008 : f32 to vector<16x128xf32>
      %1010 = arith.mulf %127, %1009 : vector<16x128xf32>
      %1011 = arith.addf %1007, %1010 : vector<16x128xf32>
      %c249 = arith.constant 249 : index
      %1012 = memref.load %arg1[%c249] : memref<512xf32, #tpu.memory_space<smem>>
      %1013 = vector.broadcast %1012 : f32 to vector<16x128xf32>
      %1014 = arith.mulf %133, %1013 : vector<16x128xf32>
      %1015 = arith.addf %1011, %1014 : vector<16x128xf32>
      %c269 = arith.constant 269 : index
      %1016 = memref.load %arg1[%c269] : memref<512xf32, #tpu.memory_space<smem>>
      %1017 = vector.broadcast %1016 : f32 to vector<16x128xf32>
      %1018 = arith.mulf %139, %1017 : vector<16x128xf32>
      %1019 = arith.addf %1015, %1018 : vector<16x128xf32>
      %c289 = arith.constant 289 : index
      %1020 = memref.load %arg1[%c289] : memref<512xf32, #tpu.memory_space<smem>>
      %1021 = vector.broadcast %1020 : f32 to vector<16x128xf32>
      %1022 = arith.mulf %145, %1021 : vector<16x128xf32>
      %1023 = arith.addf %1019, %1022 : vector<16x128xf32>
      %c309 = arith.constant 309 : index
      %1024 = memref.load %arg1[%c309] : memref<512xf32, #tpu.memory_space<smem>>
      %1025 = vector.broadcast %1024 : f32 to vector<16x128xf32>
      %1026 = arith.mulf %151, %1025 : vector<16x128xf32>
      %1027 = arith.addf %1023, %1026 : vector<16x128xf32>
      %c329 = arith.constant 329 : index
      %1028 = memref.load %arg1[%c329] : memref<512xf32, #tpu.memory_space<smem>>
      %1029 = vector.broadcast %1028 : f32 to vector<16x128xf32>
      %1030 = arith.mulf %157, %1029 : vector<16x128xf32>
      %1031 = arith.addf %1027, %1030 : vector<16x128xf32>
      %c349 = arith.constant 349 : index
      %1032 = memref.load %arg1[%c349] : memref<512xf32, #tpu.memory_space<smem>>
      %1033 = vector.broadcast %1032 : f32 to vector<16x128xf32>
      %1034 = arith.mulf %163, %1033 : vector<16x128xf32>
      %1035 = arith.addf %1031, %1034 : vector<16x128xf32>
      %c369 = arith.constant 369 : index
      %1036 = memref.load %arg1[%c369] : memref<512xf32, #tpu.memory_space<smem>>
      %1037 = vector.broadcast %1036 : f32 to vector<16x128xf32>
      %1038 = arith.mulf %169, %1037 : vector<16x128xf32>
      %1039 = arith.addf %1035, %1038 : vector<16x128xf32>
      %c389 = arith.constant 389 : index
      %1040 = memref.load %arg1[%c389] : memref<512xf32, #tpu.memory_space<smem>>
      %1041 = vector.broadcast %1040 : f32 to vector<16x128xf32>
      %1042 = arith.mulf %175, %1041 : vector<16x128xf32>
      %1043 = arith.addf %1039, %1042 : vector<16x128xf32>
      %c409 = arith.constant 409 : index
      %1044 = memref.load %arg1[%c409] : memref<512xf32, #tpu.memory_space<smem>>
      %1045 = vector.broadcast %1044 : f32 to vector<16x128xf32>
      %1046 = arith.mulf %181, %1045 : vector<16x128xf32>
      %1047 = arith.addf %1043, %1046 : vector<16x128xf32>
      %c429 = arith.constant 429 : index
      %1048 = memref.load %arg1[%c429] : memref<512xf32, #tpu.memory_space<smem>>
      %1049 = vector.broadcast %1048 : f32 to vector<16x128xf32>
      %1050 = arith.mulf %187, %1049 : vector<16x128xf32>
      %1051 = arith.addf %1047, %1050 : vector<16x128xf32>
      %cst_32 = arith.constant 0.000000e+00 : f32
      %1052 = vector.broadcast %cst_32 : f32 to vector<16x128xf32>
      %1053 = arith.maximumf %1051, %1052 : vector<16x128xf32>
      %1054 = vector.broadcast %49 : f32 to vector<16x128xf32>
      %1055 = arith.mulf %1053, %1054 : vector<16x128xf32>
      %1056 = arith.addf %969, %1055 : vector<16x128xf32>
      %c50 = arith.constant 50 : index
      %1057 = memref.load %arg1[%c50] : memref<512xf32, #tpu.memory_space<smem>>
      %1058 = vector.broadcast %1057 : f32 to vector<16x128xf32>
      %1059 = arith.mulf %73, %1058 : vector<16x128xf32>
      %c450 = arith.constant 450 : index
      %1060 = memref.load %arg1[%c450] : memref<512xf32, #tpu.memory_space<smem>>
      %1061 = vector.broadcast %1060 : f32 to vector<16x128xf32>
      %1062 = arith.addf %1059, %1061 : vector<16x128xf32>
      %c70 = arith.constant 70 : index
      %1063 = memref.load %arg1[%c70] : memref<512xf32, #tpu.memory_space<smem>>
      %1064 = vector.broadcast %1063 : f32 to vector<16x128xf32>
      %1065 = arith.mulf %79, %1064 : vector<16x128xf32>
      %1066 = arith.addf %1062, %1065 : vector<16x128xf32>
      %c90 = arith.constant 90 : index
      %1067 = memref.load %arg1[%c90] : memref<512xf32, #tpu.memory_space<smem>>
      %1068 = vector.broadcast %1067 : f32 to vector<16x128xf32>
      %1069 = arith.mulf %85, %1068 : vector<16x128xf32>
      %1070 = arith.addf %1066, %1069 : vector<16x128xf32>
      %c110 = arith.constant 110 : index
      %1071 = memref.load %arg1[%c110] : memref<512xf32, #tpu.memory_space<smem>>
      %1072 = vector.broadcast %1071 : f32 to vector<16x128xf32>
      %1073 = arith.mulf %91, %1072 : vector<16x128xf32>
      %1074 = arith.addf %1070, %1073 : vector<16x128xf32>
      %c130 = arith.constant 130 : index
      %1075 = memref.load %arg1[%c130] : memref<512xf32, #tpu.memory_space<smem>>
      %1076 = vector.broadcast %1075 : f32 to vector<16x128xf32>
      %1077 = arith.mulf %97, %1076 : vector<16x128xf32>
      %1078 = arith.addf %1074, %1077 : vector<16x128xf32>
      %c150 = arith.constant 150 : index
      %1079 = memref.load %arg1[%c150] : memref<512xf32, #tpu.memory_space<smem>>
      %1080 = vector.broadcast %1079 : f32 to vector<16x128xf32>
      %1081 = arith.mulf %103, %1080 : vector<16x128xf32>
      %1082 = arith.addf %1078, %1081 : vector<16x128xf32>
      %c170 = arith.constant 170 : index
      %1083 = memref.load %arg1[%c170] : memref<512xf32, #tpu.memory_space<smem>>
      %1084 = vector.broadcast %1083 : f32 to vector<16x128xf32>
      %1085 = arith.mulf %109, %1084 : vector<16x128xf32>
      %1086 = arith.addf %1082, %1085 : vector<16x128xf32>
      %c190 = arith.constant 190 : index
      %1087 = memref.load %arg1[%c190] : memref<512xf32, #tpu.memory_space<smem>>
      %1088 = vector.broadcast %1087 : f32 to vector<16x128xf32>
      %1089 = arith.mulf %115, %1088 : vector<16x128xf32>
      %1090 = arith.addf %1086, %1089 : vector<16x128xf32>
      %c210 = arith.constant 210 : index
      %1091 = memref.load %arg1[%c210] : memref<512xf32, #tpu.memory_space<smem>>
      %1092 = vector.broadcast %1091 : f32 to vector<16x128xf32>
      %1093 = arith.mulf %121, %1092 : vector<16x128xf32>
      %1094 = arith.addf %1090, %1093 : vector<16x128xf32>
      %c230 = arith.constant 230 : index
      %1095 = memref.load %arg1[%c230] : memref<512xf32, #tpu.memory_space<smem>>
      %1096 = vector.broadcast %1095 : f32 to vector<16x128xf32>
      %1097 = arith.mulf %127, %1096 : vector<16x128xf32>
      %1098 = arith.addf %1094, %1097 : vector<16x128xf32>
      %c250 = arith.constant 250 : index
      %1099 = memref.load %arg1[%c250] : memref<512xf32, #tpu.memory_space<smem>>
      %1100 = vector.broadcast %1099 : f32 to vector<16x128xf32>
      %1101 = arith.mulf %133, %1100 : vector<16x128xf32>
      %1102 = arith.addf %1098, %1101 : vector<16x128xf32>
      %c270 = arith.constant 270 : index
      %1103 = memref.load %arg1[%c270] : memref<512xf32, #tpu.memory_space<smem>>
      %1104 = vector.broadcast %1103 : f32 to vector<16x128xf32>
      %1105 = arith.mulf %139, %1104 : vector<16x128xf32>
      %1106 = arith.addf %1102, %1105 : vector<16x128xf32>
      %c290 = arith.constant 290 : index
      %1107 = memref.load %arg1[%c290] : memref<512xf32, #tpu.memory_space<smem>>
      %1108 = vector.broadcast %1107 : f32 to vector<16x128xf32>
      %1109 = arith.mulf %145, %1108 : vector<16x128xf32>
      %1110 = arith.addf %1106, %1109 : vector<16x128xf32>
      %c310 = arith.constant 310 : index
      %1111 = memref.load %arg1[%c310] : memref<512xf32, #tpu.memory_space<smem>>
      %1112 = vector.broadcast %1111 : f32 to vector<16x128xf32>
      %1113 = arith.mulf %151, %1112 : vector<16x128xf32>
      %1114 = arith.addf %1110, %1113 : vector<16x128xf32>
      %c330 = arith.constant 330 : index
      %1115 = memref.load %arg1[%c330] : memref<512xf32, #tpu.memory_space<smem>>
      %1116 = vector.broadcast %1115 : f32 to vector<16x128xf32>
      %1117 = arith.mulf %157, %1116 : vector<16x128xf32>
      %1118 = arith.addf %1114, %1117 : vector<16x128xf32>
      %c350 = arith.constant 350 : index
      %1119 = memref.load %arg1[%c350] : memref<512xf32, #tpu.memory_space<smem>>
      %1120 = vector.broadcast %1119 : f32 to vector<16x128xf32>
      %1121 = arith.mulf %163, %1120 : vector<16x128xf32>
      %1122 = arith.addf %1118, %1121 : vector<16x128xf32>
      %c370 = arith.constant 370 : index
      %1123 = memref.load %arg1[%c370] : memref<512xf32, #tpu.memory_space<smem>>
      %1124 = vector.broadcast %1123 : f32 to vector<16x128xf32>
      %1125 = arith.mulf %169, %1124 : vector<16x128xf32>
      %1126 = arith.addf %1122, %1125 : vector<16x128xf32>
      %c390 = arith.constant 390 : index
      %1127 = memref.load %arg1[%c390] : memref<512xf32, #tpu.memory_space<smem>>
      %1128 = vector.broadcast %1127 : f32 to vector<16x128xf32>
      %1129 = arith.mulf %175, %1128 : vector<16x128xf32>
      %1130 = arith.addf %1126, %1129 : vector<16x128xf32>
      %c410 = arith.constant 410 : index
      %1131 = memref.load %arg1[%c410] : memref<512xf32, #tpu.memory_space<smem>>
      %1132 = vector.broadcast %1131 : f32 to vector<16x128xf32>
      %1133 = arith.mulf %181, %1132 : vector<16x128xf32>
      %1134 = arith.addf %1130, %1133 : vector<16x128xf32>
      %c430 = arith.constant 430 : index
      %1135 = memref.load %arg1[%c430] : memref<512xf32, #tpu.memory_space<smem>>
      %1136 = vector.broadcast %1135 : f32 to vector<16x128xf32>
      %1137 = arith.mulf %187, %1136 : vector<16x128xf32>
      %1138 = arith.addf %1134, %1137 : vector<16x128xf32>
      %cst_33 = arith.constant 0.000000e+00 : f32
      %1139 = vector.broadcast %cst_33 : f32 to vector<16x128xf32>
      %1140 = arith.maximumf %1138, %1139 : vector<16x128xf32>
      %1141 = vector.broadcast %50 : f32 to vector<16x128xf32>
      %1142 = arith.mulf %1140, %1141 : vector<16x128xf32>
      %1143 = arith.addf %1056, %1142 : vector<16x128xf32>
      %c51 = arith.constant 51 : index
      %1144 = memref.load %arg1[%c51] : memref<512xf32, #tpu.memory_space<smem>>
      %1145 = vector.broadcast %1144 : f32 to vector<16x128xf32>
      %1146 = arith.mulf %73, %1145 : vector<16x128xf32>
      %c451 = arith.constant 451 : index
      %1147 = memref.load %arg1[%c451] : memref<512xf32, #tpu.memory_space<smem>>
      %1148 = vector.broadcast %1147 : f32 to vector<16x128xf32>
      %1149 = arith.addf %1146, %1148 : vector<16x128xf32>
      %c71 = arith.constant 71 : index
      %1150 = memref.load %arg1[%c71] : memref<512xf32, #tpu.memory_space<smem>>
      %1151 = vector.broadcast %1150 : f32 to vector<16x128xf32>
      %1152 = arith.mulf %79, %1151 : vector<16x128xf32>
      %1153 = arith.addf %1149, %1152 : vector<16x128xf32>
      %c91 = arith.constant 91 : index
      %1154 = memref.load %arg1[%c91] : memref<512xf32, #tpu.memory_space<smem>>
      %1155 = vector.broadcast %1154 : f32 to vector<16x128xf32>
      %1156 = arith.mulf %85, %1155 : vector<16x128xf32>
      %1157 = arith.addf %1153, %1156 : vector<16x128xf32>
      %c111 = arith.constant 111 : index
      %1158 = memref.load %arg1[%c111] : memref<512xf32, #tpu.memory_space<smem>>
      %1159 = vector.broadcast %1158 : f32 to vector<16x128xf32>
      %1160 = arith.mulf %91, %1159 : vector<16x128xf32>
      %1161 = arith.addf %1157, %1160 : vector<16x128xf32>
      %c131 = arith.constant 131 : index
      %1162 = memref.load %arg1[%c131] : memref<512xf32, #tpu.memory_space<smem>>
      %1163 = vector.broadcast %1162 : f32 to vector<16x128xf32>
      %1164 = arith.mulf %97, %1163 : vector<16x128xf32>
      %1165 = arith.addf %1161, %1164 : vector<16x128xf32>
      %c151 = arith.constant 151 : index
      %1166 = memref.load %arg1[%c151] : memref<512xf32, #tpu.memory_space<smem>>
      %1167 = vector.broadcast %1166 : f32 to vector<16x128xf32>
      %1168 = arith.mulf %103, %1167 : vector<16x128xf32>
      %1169 = arith.addf %1165, %1168 : vector<16x128xf32>
      %c171 = arith.constant 171 : index
      %1170 = memref.load %arg1[%c171] : memref<512xf32, #tpu.memory_space<smem>>
      %1171 = vector.broadcast %1170 : f32 to vector<16x128xf32>
      %1172 = arith.mulf %109, %1171 : vector<16x128xf32>
      %1173 = arith.addf %1169, %1172 : vector<16x128xf32>
      %c191 = arith.constant 191 : index
      %1174 = memref.load %arg1[%c191] : memref<512xf32, #tpu.memory_space<smem>>
      %1175 = vector.broadcast %1174 : f32 to vector<16x128xf32>
      %1176 = arith.mulf %115, %1175 : vector<16x128xf32>
      %1177 = arith.addf %1173, %1176 : vector<16x128xf32>
      %c211 = arith.constant 211 : index
      %1178 = memref.load %arg1[%c211] : memref<512xf32, #tpu.memory_space<smem>>
      %1179 = vector.broadcast %1178 : f32 to vector<16x128xf32>
      %1180 = arith.mulf %121, %1179 : vector<16x128xf32>
      %1181 = arith.addf %1177, %1180 : vector<16x128xf32>
      %c231 = arith.constant 231 : index
      %1182 = memref.load %arg1[%c231] : memref<512xf32, #tpu.memory_space<smem>>
      %1183 = vector.broadcast %1182 : f32 to vector<16x128xf32>
      %1184 = arith.mulf %127, %1183 : vector<16x128xf32>
      %1185 = arith.addf %1181, %1184 : vector<16x128xf32>
      %c251 = arith.constant 251 : index
      %1186 = memref.load %arg1[%c251] : memref<512xf32, #tpu.memory_space<smem>>
      %1187 = vector.broadcast %1186 : f32 to vector<16x128xf32>
      %1188 = arith.mulf %133, %1187 : vector<16x128xf32>
      %1189 = arith.addf %1185, %1188 : vector<16x128xf32>
      %c271 = arith.constant 271 : index
      %1190 = memref.load %arg1[%c271] : memref<512xf32, #tpu.memory_space<smem>>
      %1191 = vector.broadcast %1190 : f32 to vector<16x128xf32>
      %1192 = arith.mulf %139, %1191 : vector<16x128xf32>
      %1193 = arith.addf %1189, %1192 : vector<16x128xf32>
      %c291 = arith.constant 291 : index
      %1194 = memref.load %arg1[%c291] : memref<512xf32, #tpu.memory_space<smem>>
      %1195 = vector.broadcast %1194 : f32 to vector<16x128xf32>
      %1196 = arith.mulf %145, %1195 : vector<16x128xf32>
      %1197 = arith.addf %1193, %1196 : vector<16x128xf32>
      %c311 = arith.constant 311 : index
      %1198 = memref.load %arg1[%c311] : memref<512xf32, #tpu.memory_space<smem>>
      %1199 = vector.broadcast %1198 : f32 to vector<16x128xf32>
      %1200 = arith.mulf %151, %1199 : vector<16x128xf32>
      %1201 = arith.addf %1197, %1200 : vector<16x128xf32>
      %c331 = arith.constant 331 : index
      %1202 = memref.load %arg1[%c331] : memref<512xf32, #tpu.memory_space<smem>>
      %1203 = vector.broadcast %1202 : f32 to vector<16x128xf32>
      %1204 = arith.mulf %157, %1203 : vector<16x128xf32>
      %1205 = arith.addf %1201, %1204 : vector<16x128xf32>
      %c351 = arith.constant 351 : index
      %1206 = memref.load %arg1[%c351] : memref<512xf32, #tpu.memory_space<smem>>
      %1207 = vector.broadcast %1206 : f32 to vector<16x128xf32>
      %1208 = arith.mulf %163, %1207 : vector<16x128xf32>
      %1209 = arith.addf %1205, %1208 : vector<16x128xf32>
      %c371 = arith.constant 371 : index
      %1210 = memref.load %arg1[%c371] : memref<512xf32, #tpu.memory_space<smem>>
      %1211 = vector.broadcast %1210 : f32 to vector<16x128xf32>
      %1212 = arith.mulf %169, %1211 : vector<16x128xf32>
      %1213 = arith.addf %1209, %1212 : vector<16x128xf32>
      %c391 = arith.constant 391 : index
      %1214 = memref.load %arg1[%c391] : memref<512xf32, #tpu.memory_space<smem>>
      %1215 = vector.broadcast %1214 : f32 to vector<16x128xf32>
      %1216 = arith.mulf %175, %1215 : vector<16x128xf32>
      %1217 = arith.addf %1213, %1216 : vector<16x128xf32>
      %c411 = arith.constant 411 : index
      %1218 = memref.load %arg1[%c411] : memref<512xf32, #tpu.memory_space<smem>>
      %1219 = vector.broadcast %1218 : f32 to vector<16x128xf32>
      %1220 = arith.mulf %181, %1219 : vector<16x128xf32>
      %1221 = arith.addf %1217, %1220 : vector<16x128xf32>
      %c431 = arith.constant 431 : index
      %1222 = memref.load %arg1[%c431] : memref<512xf32, #tpu.memory_space<smem>>
      %1223 = vector.broadcast %1222 : f32 to vector<16x128xf32>
      %1224 = arith.mulf %187, %1223 : vector<16x128xf32>
      %1225 = arith.addf %1221, %1224 : vector<16x128xf32>
      %cst_34 = arith.constant 0.000000e+00 : f32
      %1226 = vector.broadcast %cst_34 : f32 to vector<16x128xf32>
      %1227 = arith.maximumf %1225, %1226 : vector<16x128xf32>
      %1228 = vector.broadcast %51 : f32 to vector<16x128xf32>
      %1229 = arith.mulf %1227, %1228 : vector<16x128xf32>
      %1230 = arith.addf %1143, %1229 : vector<16x128xf32>
      %c52 = arith.constant 52 : index
      %1231 = memref.load %arg1[%c52] : memref<512xf32, #tpu.memory_space<smem>>
      %1232 = vector.broadcast %1231 : f32 to vector<16x128xf32>
      %1233 = arith.mulf %73, %1232 : vector<16x128xf32>
      %c452 = arith.constant 452 : index
      %1234 = memref.load %arg1[%c452] : memref<512xf32, #tpu.memory_space<smem>>
      %1235 = vector.broadcast %1234 : f32 to vector<16x128xf32>
      %1236 = arith.addf %1233, %1235 : vector<16x128xf32>
      %c72 = arith.constant 72 : index
      %1237 = memref.load %arg1[%c72] : memref<512xf32, #tpu.memory_space<smem>>
      %1238 = vector.broadcast %1237 : f32 to vector<16x128xf32>
      %1239 = arith.mulf %79, %1238 : vector<16x128xf32>
      %1240 = arith.addf %1236, %1239 : vector<16x128xf32>
      %c92 = arith.constant 92 : index
      %1241 = memref.load %arg1[%c92] : memref<512xf32, #tpu.memory_space<smem>>
      %1242 = vector.broadcast %1241 : f32 to vector<16x128xf32>
      %1243 = arith.mulf %85, %1242 : vector<16x128xf32>
      %1244 = arith.addf %1240, %1243 : vector<16x128xf32>
      %c112 = arith.constant 112 : index
      %1245 = memref.load %arg1[%c112] : memref<512xf32, #tpu.memory_space<smem>>
      %1246 = vector.broadcast %1245 : f32 to vector<16x128xf32>
      %1247 = arith.mulf %91, %1246 : vector<16x128xf32>
      %1248 = arith.addf %1244, %1247 : vector<16x128xf32>
      %c132 = arith.constant 132 : index
      %1249 = memref.load %arg1[%c132] : memref<512xf32, #tpu.memory_space<smem>>
      %1250 = vector.broadcast %1249 : f32 to vector<16x128xf32>
      %1251 = arith.mulf %97, %1250 : vector<16x128xf32>
      %1252 = arith.addf %1248, %1251 : vector<16x128xf32>
      %c152 = arith.constant 152 : index
      %1253 = memref.load %arg1[%c152] : memref<512xf32, #tpu.memory_space<smem>>
      %1254 = vector.broadcast %1253 : f32 to vector<16x128xf32>
      %1255 = arith.mulf %103, %1254 : vector<16x128xf32>
      %1256 = arith.addf %1252, %1255 : vector<16x128xf32>
      %c172 = arith.constant 172 : index
      %1257 = memref.load %arg1[%c172] : memref<512xf32, #tpu.memory_space<smem>>
      %1258 = vector.broadcast %1257 : f32 to vector<16x128xf32>
      %1259 = arith.mulf %109, %1258 : vector<16x128xf32>
      %1260 = arith.addf %1256, %1259 : vector<16x128xf32>
      %c192 = arith.constant 192 : index
      %1261 = memref.load %arg1[%c192] : memref<512xf32, #tpu.memory_space<smem>>
      %1262 = vector.broadcast %1261 : f32 to vector<16x128xf32>
      %1263 = arith.mulf %115, %1262 : vector<16x128xf32>
      %1264 = arith.addf %1260, %1263 : vector<16x128xf32>
      %c212 = arith.constant 212 : index
      %1265 = memref.load %arg1[%c212] : memref<512xf32, #tpu.memory_space<smem>>
      %1266 = vector.broadcast %1265 : f32 to vector<16x128xf32>
      %1267 = arith.mulf %121, %1266 : vector<16x128xf32>
      %1268 = arith.addf %1264, %1267 : vector<16x128xf32>
      %c232 = arith.constant 232 : index
      %1269 = memref.load %arg1[%c232] : memref<512xf32, #tpu.memory_space<smem>>
      %1270 = vector.broadcast %1269 : f32 to vector<16x128xf32>
      %1271 = arith.mulf %127, %1270 : vector<16x128xf32>
      %1272 = arith.addf %1268, %1271 : vector<16x128xf32>
      %c252 = arith.constant 252 : index
      %1273 = memref.load %arg1[%c252] : memref<512xf32, #tpu.memory_space<smem>>
      %1274 = vector.broadcast %1273 : f32 to vector<16x128xf32>
      %1275 = arith.mulf %133, %1274 : vector<16x128xf32>
      %1276 = arith.addf %1272, %1275 : vector<16x128xf32>
      %c272 = arith.constant 272 : index
      %1277 = memref.load %arg1[%c272] : memref<512xf32, #tpu.memory_space<smem>>
      %1278 = vector.broadcast %1277 : f32 to vector<16x128xf32>
      %1279 = arith.mulf %139, %1278 : vector<16x128xf32>
      %1280 = arith.addf %1276, %1279 : vector<16x128xf32>
      %c292 = arith.constant 292 : index
      %1281 = memref.load %arg1[%c292] : memref<512xf32, #tpu.memory_space<smem>>
      %1282 = vector.broadcast %1281 : f32 to vector<16x128xf32>
      %1283 = arith.mulf %145, %1282 : vector<16x128xf32>
      %1284 = arith.addf %1280, %1283 : vector<16x128xf32>
      %c312 = arith.constant 312 : index
      %1285 = memref.load %arg1[%c312] : memref<512xf32, #tpu.memory_space<smem>>
      %1286 = vector.broadcast %1285 : f32 to vector<16x128xf32>
      %1287 = arith.mulf %151, %1286 : vector<16x128xf32>
      %1288 = arith.addf %1284, %1287 : vector<16x128xf32>
      %c332 = arith.constant 332 : index
      %1289 = memref.load %arg1[%c332] : memref<512xf32, #tpu.memory_space<smem>>
      %1290 = vector.broadcast %1289 : f32 to vector<16x128xf32>
      %1291 = arith.mulf %157, %1290 : vector<16x128xf32>
      %1292 = arith.addf %1288, %1291 : vector<16x128xf32>
      %c352 = arith.constant 352 : index
      %1293 = memref.load %arg1[%c352] : memref<512xf32, #tpu.memory_space<smem>>
      %1294 = vector.broadcast %1293 : f32 to vector<16x128xf32>
      %1295 = arith.mulf %163, %1294 : vector<16x128xf32>
      %1296 = arith.addf %1292, %1295 : vector<16x128xf32>
      %c372 = arith.constant 372 : index
      %1297 = memref.load %arg1[%c372] : memref<512xf32, #tpu.memory_space<smem>>
      %1298 = vector.broadcast %1297 : f32 to vector<16x128xf32>
      %1299 = arith.mulf %169, %1298 : vector<16x128xf32>
      %1300 = arith.addf %1296, %1299 : vector<16x128xf32>
      %c392 = arith.constant 392 : index
      %1301 = memref.load %arg1[%c392] : memref<512xf32, #tpu.memory_space<smem>>
      %1302 = vector.broadcast %1301 : f32 to vector<16x128xf32>
      %1303 = arith.mulf %175, %1302 : vector<16x128xf32>
      %1304 = arith.addf %1300, %1303 : vector<16x128xf32>
      %c412 = arith.constant 412 : index
      %1305 = memref.load %arg1[%c412] : memref<512xf32, #tpu.memory_space<smem>>
      %1306 = vector.broadcast %1305 : f32 to vector<16x128xf32>
      %1307 = arith.mulf %181, %1306 : vector<16x128xf32>
      %1308 = arith.addf %1304, %1307 : vector<16x128xf32>
      %c432 = arith.constant 432 : index
      %1309 = memref.load %arg1[%c432] : memref<512xf32, #tpu.memory_space<smem>>
      %1310 = vector.broadcast %1309 : f32 to vector<16x128xf32>
      %1311 = arith.mulf %187, %1310 : vector<16x128xf32>
      %1312 = arith.addf %1308, %1311 : vector<16x128xf32>
      %cst_35 = arith.constant 0.000000e+00 : f32
      %1313 = vector.broadcast %cst_35 : f32 to vector<16x128xf32>
      %1314 = arith.maximumf %1312, %1313 : vector<16x128xf32>
      %1315 = vector.broadcast %52 : f32 to vector<16x128xf32>
      %1316 = arith.mulf %1314, %1315 : vector<16x128xf32>
      %1317 = arith.addf %1230, %1316 : vector<16x128xf32>
      %c53 = arith.constant 53 : index
      %1318 = memref.load %arg1[%c53] : memref<512xf32, #tpu.memory_space<smem>>
      %1319 = vector.broadcast %1318 : f32 to vector<16x128xf32>
      %1320 = arith.mulf %73, %1319 : vector<16x128xf32>
      %c453 = arith.constant 453 : index
      %1321 = memref.load %arg1[%c453] : memref<512xf32, #tpu.memory_space<smem>>
      %1322 = vector.broadcast %1321 : f32 to vector<16x128xf32>
      %1323 = arith.addf %1320, %1322 : vector<16x128xf32>
      %c73 = arith.constant 73 : index
      %1324 = memref.load %arg1[%c73] : memref<512xf32, #tpu.memory_space<smem>>
      %1325 = vector.broadcast %1324 : f32 to vector<16x128xf32>
      %1326 = arith.mulf %79, %1325 : vector<16x128xf32>
      %1327 = arith.addf %1323, %1326 : vector<16x128xf32>
      %c93 = arith.constant 93 : index
      %1328 = memref.load %arg1[%c93] : memref<512xf32, #tpu.memory_space<smem>>
      %1329 = vector.broadcast %1328 : f32 to vector<16x128xf32>
      %1330 = arith.mulf %85, %1329 : vector<16x128xf32>
      %1331 = arith.addf %1327, %1330 : vector<16x128xf32>
      %c113 = arith.constant 113 : index
      %1332 = memref.load %arg1[%c113] : memref<512xf32, #tpu.memory_space<smem>>
      %1333 = vector.broadcast %1332 : f32 to vector<16x128xf32>
      %1334 = arith.mulf %91, %1333 : vector<16x128xf32>
      %1335 = arith.addf %1331, %1334 : vector<16x128xf32>
      %c133 = arith.constant 133 : index
      %1336 = memref.load %arg1[%c133] : memref<512xf32, #tpu.memory_space<smem>>
      %1337 = vector.broadcast %1336 : f32 to vector<16x128xf32>
      %1338 = arith.mulf %97, %1337 : vector<16x128xf32>
      %1339 = arith.addf %1335, %1338 : vector<16x128xf32>
      %c153 = arith.constant 153 : index
      %1340 = memref.load %arg1[%c153] : memref<512xf32, #tpu.memory_space<smem>>
      %1341 = vector.broadcast %1340 : f32 to vector<16x128xf32>
      %1342 = arith.mulf %103, %1341 : vector<16x128xf32>
      %1343 = arith.addf %1339, %1342 : vector<16x128xf32>
      %c173 = arith.constant 173 : index
      %1344 = memref.load %arg1[%c173] : memref<512xf32, #tpu.memory_space<smem>>
      %1345 = vector.broadcast %1344 : f32 to vector<16x128xf32>
      %1346 = arith.mulf %109, %1345 : vector<16x128xf32>
      %1347 = arith.addf %1343, %1346 : vector<16x128xf32>
      %c193 = arith.constant 193 : index
      %1348 = memref.load %arg1[%c193] : memref<512xf32, #tpu.memory_space<smem>>
      %1349 = vector.broadcast %1348 : f32 to vector<16x128xf32>
      %1350 = arith.mulf %115, %1349 : vector<16x128xf32>
      %1351 = arith.addf %1347, %1350 : vector<16x128xf32>
      %c213 = arith.constant 213 : index
      %1352 = memref.load %arg1[%c213] : memref<512xf32, #tpu.memory_space<smem>>
      %1353 = vector.broadcast %1352 : f32 to vector<16x128xf32>
      %1354 = arith.mulf %121, %1353 : vector<16x128xf32>
      %1355 = arith.addf %1351, %1354 : vector<16x128xf32>
      %c233 = arith.constant 233 : index
      %1356 = memref.load %arg1[%c233] : memref<512xf32, #tpu.memory_space<smem>>
      %1357 = vector.broadcast %1356 : f32 to vector<16x128xf32>
      %1358 = arith.mulf %127, %1357 : vector<16x128xf32>
      %1359 = arith.addf %1355, %1358 : vector<16x128xf32>
      %c253 = arith.constant 253 : index
      %1360 = memref.load %arg1[%c253] : memref<512xf32, #tpu.memory_space<smem>>
      %1361 = vector.broadcast %1360 : f32 to vector<16x128xf32>
      %1362 = arith.mulf %133, %1361 : vector<16x128xf32>
      %1363 = arith.addf %1359, %1362 : vector<16x128xf32>
      %c273 = arith.constant 273 : index
      %1364 = memref.load %arg1[%c273] : memref<512xf32, #tpu.memory_space<smem>>
      %1365 = vector.broadcast %1364 : f32 to vector<16x128xf32>
      %1366 = arith.mulf %139, %1365 : vector<16x128xf32>
      %1367 = arith.addf %1363, %1366 : vector<16x128xf32>
      %c293 = arith.constant 293 : index
      %1368 = memref.load %arg1[%c293] : memref<512xf32, #tpu.memory_space<smem>>
      %1369 = vector.broadcast %1368 : f32 to vector<16x128xf32>
      %1370 = arith.mulf %145, %1369 : vector<16x128xf32>
      %1371 = arith.addf %1367, %1370 : vector<16x128xf32>
      %c313 = arith.constant 313 : index
      %1372 = memref.load %arg1[%c313] : memref<512xf32, #tpu.memory_space<smem>>
      %1373 = vector.broadcast %1372 : f32 to vector<16x128xf32>
      %1374 = arith.mulf %151, %1373 : vector<16x128xf32>
      %1375 = arith.addf %1371, %1374 : vector<16x128xf32>
      %c333 = arith.constant 333 : index
      %1376 = memref.load %arg1[%c333] : memref<512xf32, #tpu.memory_space<smem>>
      %1377 = vector.broadcast %1376 : f32 to vector<16x128xf32>
      %1378 = arith.mulf %157, %1377 : vector<16x128xf32>
      %1379 = arith.addf %1375, %1378 : vector<16x128xf32>
      %c353 = arith.constant 353 : index
      %1380 = memref.load %arg1[%c353] : memref<512xf32, #tpu.memory_space<smem>>
      %1381 = vector.broadcast %1380 : f32 to vector<16x128xf32>
      %1382 = arith.mulf %163, %1381 : vector<16x128xf32>
      %1383 = arith.addf %1379, %1382 : vector<16x128xf32>
      %c373 = arith.constant 373 : index
      %1384 = memref.load %arg1[%c373] : memref<512xf32, #tpu.memory_space<smem>>
      %1385 = vector.broadcast %1384 : f32 to vector<16x128xf32>
      %1386 = arith.mulf %169, %1385 : vector<16x128xf32>
      %1387 = arith.addf %1383, %1386 : vector<16x128xf32>
      %c393 = arith.constant 393 : index
      %1388 = memref.load %arg1[%c393] : memref<512xf32, #tpu.memory_space<smem>>
      %1389 = vector.broadcast %1388 : f32 to vector<16x128xf32>
      %1390 = arith.mulf %175, %1389 : vector<16x128xf32>
      %1391 = arith.addf %1387, %1390 : vector<16x128xf32>
      %c413 = arith.constant 413 : index
      %1392 = memref.load %arg1[%c413] : memref<512xf32, #tpu.memory_space<smem>>
      %1393 = vector.broadcast %1392 : f32 to vector<16x128xf32>
      %1394 = arith.mulf %181, %1393 : vector<16x128xf32>
      %1395 = arith.addf %1391, %1394 : vector<16x128xf32>
      %c433 = arith.constant 433 : index
      %1396 = memref.load %arg1[%c433] : memref<512xf32, #tpu.memory_space<smem>>
      %1397 = vector.broadcast %1396 : f32 to vector<16x128xf32>
      %1398 = arith.mulf %187, %1397 : vector<16x128xf32>
      %1399 = arith.addf %1395, %1398 : vector<16x128xf32>
      %cst_36 = arith.constant 0.000000e+00 : f32
      %1400 = vector.broadcast %cst_36 : f32 to vector<16x128xf32>
      %1401 = arith.maximumf %1399, %1400 : vector<16x128xf32>
      %1402 = vector.broadcast %53 : f32 to vector<16x128xf32>
      %1403 = arith.mulf %1401, %1402 : vector<16x128xf32>
      %1404 = arith.addf %1317, %1403 : vector<16x128xf32>
      %c54 = arith.constant 54 : index
      %1405 = memref.load %arg1[%c54] : memref<512xf32, #tpu.memory_space<smem>>
      %1406 = vector.broadcast %1405 : f32 to vector<16x128xf32>
      %1407 = arith.mulf %73, %1406 : vector<16x128xf32>
      %c454 = arith.constant 454 : index
      %1408 = memref.load %arg1[%c454] : memref<512xf32, #tpu.memory_space<smem>>
      %1409 = vector.broadcast %1408 : f32 to vector<16x128xf32>
      %1410 = arith.addf %1407, %1409 : vector<16x128xf32>
      %c74 = arith.constant 74 : index
      %1411 = memref.load %arg1[%c74] : memref<512xf32, #tpu.memory_space<smem>>
      %1412 = vector.broadcast %1411 : f32 to vector<16x128xf32>
      %1413 = arith.mulf %79, %1412 : vector<16x128xf32>
      %1414 = arith.addf %1410, %1413 : vector<16x128xf32>
      %c94 = arith.constant 94 : index
      %1415 = memref.load %arg1[%c94] : memref<512xf32, #tpu.memory_space<smem>>
      %1416 = vector.broadcast %1415 : f32 to vector<16x128xf32>
      %1417 = arith.mulf %85, %1416 : vector<16x128xf32>
      %1418 = arith.addf %1414, %1417 : vector<16x128xf32>
      %c114 = arith.constant 114 : index
      %1419 = memref.load %arg1[%c114] : memref<512xf32, #tpu.memory_space<smem>>
      %1420 = vector.broadcast %1419 : f32 to vector<16x128xf32>
      %1421 = arith.mulf %91, %1420 : vector<16x128xf32>
      %1422 = arith.addf %1418, %1421 : vector<16x128xf32>
      %c134 = arith.constant 134 : index
      %1423 = memref.load %arg1[%c134] : memref<512xf32, #tpu.memory_space<smem>>
      %1424 = vector.broadcast %1423 : f32 to vector<16x128xf32>
      %1425 = arith.mulf %97, %1424 : vector<16x128xf32>
      %1426 = arith.addf %1422, %1425 : vector<16x128xf32>
      %c154 = arith.constant 154 : index
      %1427 = memref.load %arg1[%c154] : memref<512xf32, #tpu.memory_space<smem>>
      %1428 = vector.broadcast %1427 : f32 to vector<16x128xf32>
      %1429 = arith.mulf %103, %1428 : vector<16x128xf32>
      %1430 = arith.addf %1426, %1429 : vector<16x128xf32>
      %c174 = arith.constant 174 : index
      %1431 = memref.load %arg1[%c174] : memref<512xf32, #tpu.memory_space<smem>>
      %1432 = vector.broadcast %1431 : f32 to vector<16x128xf32>
      %1433 = arith.mulf %109, %1432 : vector<16x128xf32>
      %1434 = arith.addf %1430, %1433 : vector<16x128xf32>
      %c194 = arith.constant 194 : index
      %1435 = memref.load %arg1[%c194] : memref<512xf32, #tpu.memory_space<smem>>
      %1436 = vector.broadcast %1435 : f32 to vector<16x128xf32>
      %1437 = arith.mulf %115, %1436 : vector<16x128xf32>
      %1438 = arith.addf %1434, %1437 : vector<16x128xf32>
      %c214 = arith.constant 214 : index
      %1439 = memref.load %arg1[%c214] : memref<512xf32, #tpu.memory_space<smem>>
      %1440 = vector.broadcast %1439 : f32 to vector<16x128xf32>
      %1441 = arith.mulf %121, %1440 : vector<16x128xf32>
      %1442 = arith.addf %1438, %1441 : vector<16x128xf32>
      %c234 = arith.constant 234 : index
      %1443 = memref.load %arg1[%c234] : memref<512xf32, #tpu.memory_space<smem>>
      %1444 = vector.broadcast %1443 : f32 to vector<16x128xf32>
      %1445 = arith.mulf %127, %1444 : vector<16x128xf32>
      %1446 = arith.addf %1442, %1445 : vector<16x128xf32>
      %c254 = arith.constant 254 : index
      %1447 = memref.load %arg1[%c254] : memref<512xf32, #tpu.memory_space<smem>>
      %1448 = vector.broadcast %1447 : f32 to vector<16x128xf32>
      %1449 = arith.mulf %133, %1448 : vector<16x128xf32>
      %1450 = arith.addf %1446, %1449 : vector<16x128xf32>
      %c274 = arith.constant 274 : index
      %1451 = memref.load %arg1[%c274] : memref<512xf32, #tpu.memory_space<smem>>
      %1452 = vector.broadcast %1451 : f32 to vector<16x128xf32>
      %1453 = arith.mulf %139, %1452 : vector<16x128xf32>
      %1454 = arith.addf %1450, %1453 : vector<16x128xf32>
      %c294 = arith.constant 294 : index
      %1455 = memref.load %arg1[%c294] : memref<512xf32, #tpu.memory_space<smem>>
      %1456 = vector.broadcast %1455 : f32 to vector<16x128xf32>
      %1457 = arith.mulf %145, %1456 : vector<16x128xf32>
      %1458 = arith.addf %1454, %1457 : vector<16x128xf32>
      %c314 = arith.constant 314 : index
      %1459 = memref.load %arg1[%c314] : memref<512xf32, #tpu.memory_space<smem>>
      %1460 = vector.broadcast %1459 : f32 to vector<16x128xf32>
      %1461 = arith.mulf %151, %1460 : vector<16x128xf32>
      %1462 = arith.addf %1458, %1461 : vector<16x128xf32>
      %c334 = arith.constant 334 : index
      %1463 = memref.load %arg1[%c334] : memref<512xf32, #tpu.memory_space<smem>>
      %1464 = vector.broadcast %1463 : f32 to vector<16x128xf32>
      %1465 = arith.mulf %157, %1464 : vector<16x128xf32>
      %1466 = arith.addf %1462, %1465 : vector<16x128xf32>
      %c354 = arith.constant 354 : index
      %1467 = memref.load %arg1[%c354] : memref<512xf32, #tpu.memory_space<smem>>
      %1468 = vector.broadcast %1467 : f32 to vector<16x128xf32>
      %1469 = arith.mulf %163, %1468 : vector<16x128xf32>
      %1470 = arith.addf %1466, %1469 : vector<16x128xf32>
      %c374 = arith.constant 374 : index
      %1471 = memref.load %arg1[%c374] : memref<512xf32, #tpu.memory_space<smem>>
      %1472 = vector.broadcast %1471 : f32 to vector<16x128xf32>
      %1473 = arith.mulf %169, %1472 : vector<16x128xf32>
      %1474 = arith.addf %1470, %1473 : vector<16x128xf32>
      %c394 = arith.constant 394 : index
      %1475 = memref.load %arg1[%c394] : memref<512xf32, #tpu.memory_space<smem>>
      %1476 = vector.broadcast %1475 : f32 to vector<16x128xf32>
      %1477 = arith.mulf %175, %1476 : vector<16x128xf32>
      %1478 = arith.addf %1474, %1477 : vector<16x128xf32>
      %c414 = arith.constant 414 : index
      %1479 = memref.load %arg1[%c414] : memref<512xf32, #tpu.memory_space<smem>>
      %1480 = vector.broadcast %1479 : f32 to vector<16x128xf32>
      %1481 = arith.mulf %181, %1480 : vector<16x128xf32>
      %1482 = arith.addf %1478, %1481 : vector<16x128xf32>
      %c434 = arith.constant 434 : index
      %1483 = memref.load %arg1[%c434] : memref<512xf32, #tpu.memory_space<smem>>
      %1484 = vector.broadcast %1483 : f32 to vector<16x128xf32>
      %1485 = arith.mulf %187, %1484 : vector<16x128xf32>
      %1486 = arith.addf %1482, %1485 : vector<16x128xf32>
      %cst_37 = arith.constant 0.000000e+00 : f32
      %1487 = vector.broadcast %cst_37 : f32 to vector<16x128xf32>
      %1488 = arith.maximumf %1486, %1487 : vector<16x128xf32>
      %1489 = vector.broadcast %54 : f32 to vector<16x128xf32>
      %1490 = arith.mulf %1488, %1489 : vector<16x128xf32>
      %1491 = arith.addf %1404, %1490 : vector<16x128xf32>
      %c55 = arith.constant 55 : index
      %1492 = memref.load %arg1[%c55] : memref<512xf32, #tpu.memory_space<smem>>
      %1493 = vector.broadcast %1492 : f32 to vector<16x128xf32>
      %1494 = arith.mulf %73, %1493 : vector<16x128xf32>
      %c455 = arith.constant 455 : index
      %1495 = memref.load %arg1[%c455] : memref<512xf32, #tpu.memory_space<smem>>
      %1496 = vector.broadcast %1495 : f32 to vector<16x128xf32>
      %1497 = arith.addf %1494, %1496 : vector<16x128xf32>
      %c75 = arith.constant 75 : index
      %1498 = memref.load %arg1[%c75] : memref<512xf32, #tpu.memory_space<smem>>
      %1499 = vector.broadcast %1498 : f32 to vector<16x128xf32>
      %1500 = arith.mulf %79, %1499 : vector<16x128xf32>
      %1501 = arith.addf %1497, %1500 : vector<16x128xf32>
      %c95 = arith.constant 95 : index
      %1502 = memref.load %arg1[%c95] : memref<512xf32, #tpu.memory_space<smem>>
      %1503 = vector.broadcast %1502 : f32 to vector<16x128xf32>
      %1504 = arith.mulf %85, %1503 : vector<16x128xf32>
      %1505 = arith.addf %1501, %1504 : vector<16x128xf32>
      %c115 = arith.constant 115 : index
      %1506 = memref.load %arg1[%c115] : memref<512xf32, #tpu.memory_space<smem>>
      %1507 = vector.broadcast %1506 : f32 to vector<16x128xf32>
      %1508 = arith.mulf %91, %1507 : vector<16x128xf32>
      %1509 = arith.addf %1505, %1508 : vector<16x128xf32>
      %c135 = arith.constant 135 : index
      %1510 = memref.load %arg1[%c135] : memref<512xf32, #tpu.memory_space<smem>>
      %1511 = vector.broadcast %1510 : f32 to vector<16x128xf32>
      %1512 = arith.mulf %97, %1511 : vector<16x128xf32>
      %1513 = arith.addf %1509, %1512 : vector<16x128xf32>
      %c155 = arith.constant 155 : index
      %1514 = memref.load %arg1[%c155] : memref<512xf32, #tpu.memory_space<smem>>
      %1515 = vector.broadcast %1514 : f32 to vector<16x128xf32>
      %1516 = arith.mulf %103, %1515 : vector<16x128xf32>
      %1517 = arith.addf %1513, %1516 : vector<16x128xf32>
      %c175 = arith.constant 175 : index
      %1518 = memref.load %arg1[%c175] : memref<512xf32, #tpu.memory_space<smem>>
      %1519 = vector.broadcast %1518 : f32 to vector<16x128xf32>
      %1520 = arith.mulf %109, %1519 : vector<16x128xf32>
      %1521 = arith.addf %1517, %1520 : vector<16x128xf32>
      %c195 = arith.constant 195 : index
      %1522 = memref.load %arg1[%c195] : memref<512xf32, #tpu.memory_space<smem>>
      %1523 = vector.broadcast %1522 : f32 to vector<16x128xf32>
      %1524 = arith.mulf %115, %1523 : vector<16x128xf32>
      %1525 = arith.addf %1521, %1524 : vector<16x128xf32>
      %c215 = arith.constant 215 : index
      %1526 = memref.load %arg1[%c215] : memref<512xf32, #tpu.memory_space<smem>>
      %1527 = vector.broadcast %1526 : f32 to vector<16x128xf32>
      %1528 = arith.mulf %121, %1527 : vector<16x128xf32>
      %1529 = arith.addf %1525, %1528 : vector<16x128xf32>
      %c235 = arith.constant 235 : index
      %1530 = memref.load %arg1[%c235] : memref<512xf32, #tpu.memory_space<smem>>
      %1531 = vector.broadcast %1530 : f32 to vector<16x128xf32>
      %1532 = arith.mulf %127, %1531 : vector<16x128xf32>
      %1533 = arith.addf %1529, %1532 : vector<16x128xf32>
      %c255 = arith.constant 255 : index
      %1534 = memref.load %arg1[%c255] : memref<512xf32, #tpu.memory_space<smem>>
      %1535 = vector.broadcast %1534 : f32 to vector<16x128xf32>
      %1536 = arith.mulf %133, %1535 : vector<16x128xf32>
      %1537 = arith.addf %1533, %1536 : vector<16x128xf32>
      %c275 = arith.constant 275 : index
      %1538 = memref.load %arg1[%c275] : memref<512xf32, #tpu.memory_space<smem>>
      %1539 = vector.broadcast %1538 : f32 to vector<16x128xf32>
      %1540 = arith.mulf %139, %1539 : vector<16x128xf32>
      %1541 = arith.addf %1537, %1540 : vector<16x128xf32>
      %c295 = arith.constant 295 : index
      %1542 = memref.load %arg1[%c295] : memref<512xf32, #tpu.memory_space<smem>>
      %1543 = vector.broadcast %1542 : f32 to vector<16x128xf32>
      %1544 = arith.mulf %145, %1543 : vector<16x128xf32>
      %1545 = arith.addf %1541, %1544 : vector<16x128xf32>
      %c315 = arith.constant 315 : index
      %1546 = memref.load %arg1[%c315] : memref<512xf32, #tpu.memory_space<smem>>
      %1547 = vector.broadcast %1546 : f32 to vector<16x128xf32>
      %1548 = arith.mulf %151, %1547 : vector<16x128xf32>
      %1549 = arith.addf %1545, %1548 : vector<16x128xf32>
      %c335 = arith.constant 335 : index
      %1550 = memref.load %arg1[%c335] : memref<512xf32, #tpu.memory_space<smem>>
      %1551 = vector.broadcast %1550 : f32 to vector<16x128xf32>
      %1552 = arith.mulf %157, %1551 : vector<16x128xf32>
      %1553 = arith.addf %1549, %1552 : vector<16x128xf32>
      %c355 = arith.constant 355 : index
      %1554 = memref.load %arg1[%c355] : memref<512xf32, #tpu.memory_space<smem>>
      %1555 = vector.broadcast %1554 : f32 to vector<16x128xf32>
      %1556 = arith.mulf %163, %1555 : vector<16x128xf32>
      %1557 = arith.addf %1553, %1556 : vector<16x128xf32>
      %c375 = arith.constant 375 : index
      %1558 = memref.load %arg1[%c375] : memref<512xf32, #tpu.memory_space<smem>>
      %1559 = vector.broadcast %1558 : f32 to vector<16x128xf32>
      %1560 = arith.mulf %169, %1559 : vector<16x128xf32>
      %1561 = arith.addf %1557, %1560 : vector<16x128xf32>
      %c395 = arith.constant 395 : index
      %1562 = memref.load %arg1[%c395] : memref<512xf32, #tpu.memory_space<smem>>
      %1563 = vector.broadcast %1562 : f32 to vector<16x128xf32>
      %1564 = arith.mulf %175, %1563 : vector<16x128xf32>
      %1565 = arith.addf %1561, %1564 : vector<16x128xf32>
      %c415 = arith.constant 415 : index
      %1566 = memref.load %arg1[%c415] : memref<512xf32, #tpu.memory_space<smem>>
      %1567 = vector.broadcast %1566 : f32 to vector<16x128xf32>
      %1568 = arith.mulf %181, %1567 : vector<16x128xf32>
      %1569 = arith.addf %1565, %1568 : vector<16x128xf32>
      %c435 = arith.constant 435 : index
      %1570 = memref.load %arg1[%c435] : memref<512xf32, #tpu.memory_space<smem>>
      %1571 = vector.broadcast %1570 : f32 to vector<16x128xf32>
      %1572 = arith.mulf %187, %1571 : vector<16x128xf32>
      %1573 = arith.addf %1569, %1572 : vector<16x128xf32>
      %cst_38 = arith.constant 0.000000e+00 : f32
      %1574 = vector.broadcast %cst_38 : f32 to vector<16x128xf32>
      %1575 = arith.maximumf %1573, %1574 : vector<16x128xf32>
      %1576 = vector.broadcast %55 : f32 to vector<16x128xf32>
      %1577 = arith.mulf %1575, %1576 : vector<16x128xf32>
      %1578 = arith.addf %1491, %1577 : vector<16x128xf32>
      %c56 = arith.constant 56 : index
      %1579 = memref.load %arg1[%c56] : memref<512xf32, #tpu.memory_space<smem>>
      %1580 = vector.broadcast %1579 : f32 to vector<16x128xf32>
      %1581 = arith.mulf %73, %1580 : vector<16x128xf32>
      %c456 = arith.constant 456 : index
      %1582 = memref.load %arg1[%c456] : memref<512xf32, #tpu.memory_space<smem>>
      %1583 = vector.broadcast %1582 : f32 to vector<16x128xf32>
      %1584 = arith.addf %1581, %1583 : vector<16x128xf32>
      %c76 = arith.constant 76 : index
      %1585 = memref.load %arg1[%c76] : memref<512xf32, #tpu.memory_space<smem>>
      %1586 = vector.broadcast %1585 : f32 to vector<16x128xf32>
      %1587 = arith.mulf %79, %1586 : vector<16x128xf32>
      %1588 = arith.addf %1584, %1587 : vector<16x128xf32>
      %c96 = arith.constant 96 : index
      %1589 = memref.load %arg1[%c96] : memref<512xf32, #tpu.memory_space<smem>>
      %1590 = vector.broadcast %1589 : f32 to vector<16x128xf32>
      %1591 = arith.mulf %85, %1590 : vector<16x128xf32>
      %1592 = arith.addf %1588, %1591 : vector<16x128xf32>
      %c116 = arith.constant 116 : index
      %1593 = memref.load %arg1[%c116] : memref<512xf32, #tpu.memory_space<smem>>
      %1594 = vector.broadcast %1593 : f32 to vector<16x128xf32>
      %1595 = arith.mulf %91, %1594 : vector<16x128xf32>
      %1596 = arith.addf %1592, %1595 : vector<16x128xf32>
      %c136 = arith.constant 136 : index
      %1597 = memref.load %arg1[%c136] : memref<512xf32, #tpu.memory_space<smem>>
      %1598 = vector.broadcast %1597 : f32 to vector<16x128xf32>
      %1599 = arith.mulf %97, %1598 : vector<16x128xf32>
      %1600 = arith.addf %1596, %1599 : vector<16x128xf32>
      %c156 = arith.constant 156 : index
      %1601 = memref.load %arg1[%c156] : memref<512xf32, #tpu.memory_space<smem>>
      %1602 = vector.broadcast %1601 : f32 to vector<16x128xf32>
      %1603 = arith.mulf %103, %1602 : vector<16x128xf32>
      %1604 = arith.addf %1600, %1603 : vector<16x128xf32>
      %c176 = arith.constant 176 : index
      %1605 = memref.load %arg1[%c176] : memref<512xf32, #tpu.memory_space<smem>>
      %1606 = vector.broadcast %1605 : f32 to vector<16x128xf32>
      %1607 = arith.mulf %109, %1606 : vector<16x128xf32>
      %1608 = arith.addf %1604, %1607 : vector<16x128xf32>
      %c196 = arith.constant 196 : index
      %1609 = memref.load %arg1[%c196] : memref<512xf32, #tpu.memory_space<smem>>
      %1610 = vector.broadcast %1609 : f32 to vector<16x128xf32>
      %1611 = arith.mulf %115, %1610 : vector<16x128xf32>
      %1612 = arith.addf %1608, %1611 : vector<16x128xf32>
      %c216 = arith.constant 216 : index
      %1613 = memref.load %arg1[%c216] : memref<512xf32, #tpu.memory_space<smem>>
      %1614 = vector.broadcast %1613 : f32 to vector<16x128xf32>
      %1615 = arith.mulf %121, %1614 : vector<16x128xf32>
      %1616 = arith.addf %1612, %1615 : vector<16x128xf32>
      %c236 = arith.constant 236 : index
      %1617 = memref.load %arg1[%c236] : memref<512xf32, #tpu.memory_space<smem>>
      %1618 = vector.broadcast %1617 : f32 to vector<16x128xf32>
      %1619 = arith.mulf %127, %1618 : vector<16x128xf32>
      %1620 = arith.addf %1616, %1619 : vector<16x128xf32>
      %c256 = arith.constant 256 : index
      %1621 = memref.load %arg1[%c256] : memref<512xf32, #tpu.memory_space<smem>>
      %1622 = vector.broadcast %1621 : f32 to vector<16x128xf32>
      %1623 = arith.mulf %133, %1622 : vector<16x128xf32>
      %1624 = arith.addf %1620, %1623 : vector<16x128xf32>
      %c276 = arith.constant 276 : index
      %1625 = memref.load %arg1[%c276] : memref<512xf32, #tpu.memory_space<smem>>
      %1626 = vector.broadcast %1625 : f32 to vector<16x128xf32>
      %1627 = arith.mulf %139, %1626 : vector<16x128xf32>
      %1628 = arith.addf %1624, %1627 : vector<16x128xf32>
      %c296 = arith.constant 296 : index
      %1629 = memref.load %arg1[%c296] : memref<512xf32, #tpu.memory_space<smem>>
      %1630 = vector.broadcast %1629 : f32 to vector<16x128xf32>
      %1631 = arith.mulf %145, %1630 : vector<16x128xf32>
      %1632 = arith.addf %1628, %1631 : vector<16x128xf32>
      %c316 = arith.constant 316 : index
      %1633 = memref.load %arg1[%c316] : memref<512xf32, #tpu.memory_space<smem>>
      %1634 = vector.broadcast %1633 : f32 to vector<16x128xf32>
      %1635 = arith.mulf %151, %1634 : vector<16x128xf32>
      %1636 = arith.addf %1632, %1635 : vector<16x128xf32>
      %c336 = arith.constant 336 : index
      %1637 = memref.load %arg1[%c336] : memref<512xf32, #tpu.memory_space<smem>>
      %1638 = vector.broadcast %1637 : f32 to vector<16x128xf32>
      %1639 = arith.mulf %157, %1638 : vector<16x128xf32>
      %1640 = arith.addf %1636, %1639 : vector<16x128xf32>
      %c356 = arith.constant 356 : index
      %1641 = memref.load %arg1[%c356] : memref<512xf32, #tpu.memory_space<smem>>
      %1642 = vector.broadcast %1641 : f32 to vector<16x128xf32>
      %1643 = arith.mulf %163, %1642 : vector<16x128xf32>
      %1644 = arith.addf %1640, %1643 : vector<16x128xf32>
      %c376 = arith.constant 376 : index
      %1645 = memref.load %arg1[%c376] : memref<512xf32, #tpu.memory_space<smem>>
      %1646 = vector.broadcast %1645 : f32 to vector<16x128xf32>
      %1647 = arith.mulf %169, %1646 : vector<16x128xf32>
      %1648 = arith.addf %1644, %1647 : vector<16x128xf32>
      %c396 = arith.constant 396 : index
      %1649 = memref.load %arg1[%c396] : memref<512xf32, #tpu.memory_space<smem>>
      %1650 = vector.broadcast %1649 : f32 to vector<16x128xf32>
      %1651 = arith.mulf %175, %1650 : vector<16x128xf32>
      %1652 = arith.addf %1648, %1651 : vector<16x128xf32>
      %c416 = arith.constant 416 : index
      %1653 = memref.load %arg1[%c416] : memref<512xf32, #tpu.memory_space<smem>>
      %1654 = vector.broadcast %1653 : f32 to vector<16x128xf32>
      %1655 = arith.mulf %181, %1654 : vector<16x128xf32>
      %1656 = arith.addf %1652, %1655 : vector<16x128xf32>
      %c436 = arith.constant 436 : index
      %1657 = memref.load %arg1[%c436] : memref<512xf32, #tpu.memory_space<smem>>
      %1658 = vector.broadcast %1657 : f32 to vector<16x128xf32>
      %1659 = arith.mulf %187, %1658 : vector<16x128xf32>
      %1660 = arith.addf %1656, %1659 : vector<16x128xf32>
      %cst_39 = arith.constant 0.000000e+00 : f32
      %1661 = vector.broadcast %cst_39 : f32 to vector<16x128xf32>
      %1662 = arith.maximumf %1660, %1661 : vector<16x128xf32>
      %1663 = vector.broadcast %56 : f32 to vector<16x128xf32>
      %1664 = arith.mulf %1662, %1663 : vector<16x128xf32>
      %1665 = arith.addf %1578, %1664 : vector<16x128xf32>
      %c57 = arith.constant 57 : index
      %1666 = memref.load %arg1[%c57] : memref<512xf32, #tpu.memory_space<smem>>
      %1667 = vector.broadcast %1666 : f32 to vector<16x128xf32>
      %1668 = arith.mulf %73, %1667 : vector<16x128xf32>
      %c457 = arith.constant 457 : index
      %1669 = memref.load %arg1[%c457] : memref<512xf32, #tpu.memory_space<smem>>
      %1670 = vector.broadcast %1669 : f32 to vector<16x128xf32>
      %1671 = arith.addf %1668, %1670 : vector<16x128xf32>
      %c77 = arith.constant 77 : index
      %1672 = memref.load %arg1[%c77] : memref<512xf32, #tpu.memory_space<smem>>
      %1673 = vector.broadcast %1672 : f32 to vector<16x128xf32>
      %1674 = arith.mulf %79, %1673 : vector<16x128xf32>
      %1675 = arith.addf %1671, %1674 : vector<16x128xf32>
      %c97 = arith.constant 97 : index
      %1676 = memref.load %arg1[%c97] : memref<512xf32, #tpu.memory_space<smem>>
      %1677 = vector.broadcast %1676 : f32 to vector<16x128xf32>
      %1678 = arith.mulf %85, %1677 : vector<16x128xf32>
      %1679 = arith.addf %1675, %1678 : vector<16x128xf32>
      %c117 = arith.constant 117 : index
      %1680 = memref.load %arg1[%c117] : memref<512xf32, #tpu.memory_space<smem>>
      %1681 = vector.broadcast %1680 : f32 to vector<16x128xf32>
      %1682 = arith.mulf %91, %1681 : vector<16x128xf32>
      %1683 = arith.addf %1679, %1682 : vector<16x128xf32>
      %c137 = arith.constant 137 : index
      %1684 = memref.load %arg1[%c137] : memref<512xf32, #tpu.memory_space<smem>>
      %1685 = vector.broadcast %1684 : f32 to vector<16x128xf32>
      %1686 = arith.mulf %97, %1685 : vector<16x128xf32>
      %1687 = arith.addf %1683, %1686 : vector<16x128xf32>
      %c157 = arith.constant 157 : index
      %1688 = memref.load %arg1[%c157] : memref<512xf32, #tpu.memory_space<smem>>
      %1689 = vector.broadcast %1688 : f32 to vector<16x128xf32>
      %1690 = arith.mulf %103, %1689 : vector<16x128xf32>
      %1691 = arith.addf %1687, %1690 : vector<16x128xf32>
      %c177 = arith.constant 177 : index
      %1692 = memref.load %arg1[%c177] : memref<512xf32, #tpu.memory_space<smem>>
      %1693 = vector.broadcast %1692 : f32 to vector<16x128xf32>
      %1694 = arith.mulf %109, %1693 : vector<16x128xf32>
      %1695 = arith.addf %1691, %1694 : vector<16x128xf32>
      %c197 = arith.constant 197 : index
      %1696 = memref.load %arg1[%c197] : memref<512xf32, #tpu.memory_space<smem>>
      %1697 = vector.broadcast %1696 : f32 to vector<16x128xf32>
      %1698 = arith.mulf %115, %1697 : vector<16x128xf32>
      %1699 = arith.addf %1695, %1698 : vector<16x128xf32>
      %c217 = arith.constant 217 : index
      %1700 = memref.load %arg1[%c217] : memref<512xf32, #tpu.memory_space<smem>>
      %1701 = vector.broadcast %1700 : f32 to vector<16x128xf32>
      %1702 = arith.mulf %121, %1701 : vector<16x128xf32>
      %1703 = arith.addf %1699, %1702 : vector<16x128xf32>
      %c237 = arith.constant 237 : index
      %1704 = memref.load %arg1[%c237] : memref<512xf32, #tpu.memory_space<smem>>
      %1705 = vector.broadcast %1704 : f32 to vector<16x128xf32>
      %1706 = arith.mulf %127, %1705 : vector<16x128xf32>
      %1707 = arith.addf %1703, %1706 : vector<16x128xf32>
      %c257 = arith.constant 257 : index
      %1708 = memref.load %arg1[%c257] : memref<512xf32, #tpu.memory_space<smem>>
      %1709 = vector.broadcast %1708 : f32 to vector<16x128xf32>
      %1710 = arith.mulf %133, %1709 : vector<16x128xf32>
      %1711 = arith.addf %1707, %1710 : vector<16x128xf32>
      %c277 = arith.constant 277 : index
      %1712 = memref.load %arg1[%c277] : memref<512xf32, #tpu.memory_space<smem>>
      %1713 = vector.broadcast %1712 : f32 to vector<16x128xf32>
      %1714 = arith.mulf %139, %1713 : vector<16x128xf32>
      %1715 = arith.addf %1711, %1714 : vector<16x128xf32>
      %c297 = arith.constant 297 : index
      %1716 = memref.load %arg1[%c297] : memref<512xf32, #tpu.memory_space<smem>>
      %1717 = vector.broadcast %1716 : f32 to vector<16x128xf32>
      %1718 = arith.mulf %145, %1717 : vector<16x128xf32>
      %1719 = arith.addf %1715, %1718 : vector<16x128xf32>
      %c317 = arith.constant 317 : index
      %1720 = memref.load %arg1[%c317] : memref<512xf32, #tpu.memory_space<smem>>
      %1721 = vector.broadcast %1720 : f32 to vector<16x128xf32>
      %1722 = arith.mulf %151, %1721 : vector<16x128xf32>
      %1723 = arith.addf %1719, %1722 : vector<16x128xf32>
      %c337 = arith.constant 337 : index
      %1724 = memref.load %arg1[%c337] : memref<512xf32, #tpu.memory_space<smem>>
      %1725 = vector.broadcast %1724 : f32 to vector<16x128xf32>
      %1726 = arith.mulf %157, %1725 : vector<16x128xf32>
      %1727 = arith.addf %1723, %1726 : vector<16x128xf32>
      %c357 = arith.constant 357 : index
      %1728 = memref.load %arg1[%c357] : memref<512xf32, #tpu.memory_space<smem>>
      %1729 = vector.broadcast %1728 : f32 to vector<16x128xf32>
      %1730 = arith.mulf %163, %1729 : vector<16x128xf32>
      %1731 = arith.addf %1727, %1730 : vector<16x128xf32>
      %c377 = arith.constant 377 : index
      %1732 = memref.load %arg1[%c377] : memref<512xf32, #tpu.memory_space<smem>>
      %1733 = vector.broadcast %1732 : f32 to vector<16x128xf32>
      %1734 = arith.mulf %169, %1733 : vector<16x128xf32>
      %1735 = arith.addf %1731, %1734 : vector<16x128xf32>
      %c397 = arith.constant 397 : index
      %1736 = memref.load %arg1[%c397] : memref<512xf32, #tpu.memory_space<smem>>
      %1737 = vector.broadcast %1736 : f32 to vector<16x128xf32>
      %1738 = arith.mulf %175, %1737 : vector<16x128xf32>
      %1739 = arith.addf %1735, %1738 : vector<16x128xf32>
      %c417 = arith.constant 417 : index
      %1740 = memref.load %arg1[%c417] : memref<512xf32, #tpu.memory_space<smem>>
      %1741 = vector.broadcast %1740 : f32 to vector<16x128xf32>
      %1742 = arith.mulf %181, %1741 : vector<16x128xf32>
      %1743 = arith.addf %1739, %1742 : vector<16x128xf32>
      %c437 = arith.constant 437 : index
      %1744 = memref.load %arg1[%c437] : memref<512xf32, #tpu.memory_space<smem>>
      %1745 = vector.broadcast %1744 : f32 to vector<16x128xf32>
      %1746 = arith.mulf %187, %1745 : vector<16x128xf32>
      %1747 = arith.addf %1743, %1746 : vector<16x128xf32>
      %cst_40 = arith.constant 0.000000e+00 : f32
      %1748 = vector.broadcast %cst_40 : f32 to vector<16x128xf32>
      %1749 = arith.maximumf %1747, %1748 : vector<16x128xf32>
      %1750 = vector.broadcast %57 : f32 to vector<16x128xf32>
      %1751 = arith.mulf %1749, %1750 : vector<16x128xf32>
      %1752 = arith.addf %1665, %1751 : vector<16x128xf32>
      %c58 = arith.constant 58 : index
      %1753 = memref.load %arg1[%c58] : memref<512xf32, #tpu.memory_space<smem>>
      %1754 = vector.broadcast %1753 : f32 to vector<16x128xf32>
      %1755 = arith.mulf %73, %1754 : vector<16x128xf32>
      %c458 = arith.constant 458 : index
      %1756 = memref.load %arg1[%c458] : memref<512xf32, #tpu.memory_space<smem>>
      %1757 = vector.broadcast %1756 : f32 to vector<16x128xf32>
      %1758 = arith.addf %1755, %1757 : vector<16x128xf32>
      %c78 = arith.constant 78 : index
      %1759 = memref.load %arg1[%c78] : memref<512xf32, #tpu.memory_space<smem>>
      %1760 = vector.broadcast %1759 : f32 to vector<16x128xf32>
      %1761 = arith.mulf %79, %1760 : vector<16x128xf32>
      %1762 = arith.addf %1758, %1761 : vector<16x128xf32>
      %c98 = arith.constant 98 : index
      %1763 = memref.load %arg1[%c98] : memref<512xf32, #tpu.memory_space<smem>>
      %1764 = vector.broadcast %1763 : f32 to vector<16x128xf32>
      %1765 = arith.mulf %85, %1764 : vector<16x128xf32>
      %1766 = arith.addf %1762, %1765 : vector<16x128xf32>
      %c118 = arith.constant 118 : index
      %1767 = memref.load %arg1[%c118] : memref<512xf32, #tpu.memory_space<smem>>
      %1768 = vector.broadcast %1767 : f32 to vector<16x128xf32>
      %1769 = arith.mulf %91, %1768 : vector<16x128xf32>
      %1770 = arith.addf %1766, %1769 : vector<16x128xf32>
      %c138 = arith.constant 138 : index
      %1771 = memref.load %arg1[%c138] : memref<512xf32, #tpu.memory_space<smem>>
      %1772 = vector.broadcast %1771 : f32 to vector<16x128xf32>
      %1773 = arith.mulf %97, %1772 : vector<16x128xf32>
      %1774 = arith.addf %1770, %1773 : vector<16x128xf32>
      %c158 = arith.constant 158 : index
      %1775 = memref.load %arg1[%c158] : memref<512xf32, #tpu.memory_space<smem>>
      %1776 = vector.broadcast %1775 : f32 to vector<16x128xf32>
      %1777 = arith.mulf %103, %1776 : vector<16x128xf32>
      %1778 = arith.addf %1774, %1777 : vector<16x128xf32>
      %c178 = arith.constant 178 : index
      %1779 = memref.load %arg1[%c178] : memref<512xf32, #tpu.memory_space<smem>>
      %1780 = vector.broadcast %1779 : f32 to vector<16x128xf32>
      %1781 = arith.mulf %109, %1780 : vector<16x128xf32>
      %1782 = arith.addf %1778, %1781 : vector<16x128xf32>
      %c198 = arith.constant 198 : index
      %1783 = memref.load %arg1[%c198] : memref<512xf32, #tpu.memory_space<smem>>
      %1784 = vector.broadcast %1783 : f32 to vector<16x128xf32>
      %1785 = arith.mulf %115, %1784 : vector<16x128xf32>
      %1786 = arith.addf %1782, %1785 : vector<16x128xf32>
      %c218 = arith.constant 218 : index
      %1787 = memref.load %arg1[%c218] : memref<512xf32, #tpu.memory_space<smem>>
      %1788 = vector.broadcast %1787 : f32 to vector<16x128xf32>
      %1789 = arith.mulf %121, %1788 : vector<16x128xf32>
      %1790 = arith.addf %1786, %1789 : vector<16x128xf32>
      %c238 = arith.constant 238 : index
      %1791 = memref.load %arg1[%c238] : memref<512xf32, #tpu.memory_space<smem>>
      %1792 = vector.broadcast %1791 : f32 to vector<16x128xf32>
      %1793 = arith.mulf %127, %1792 : vector<16x128xf32>
      %1794 = arith.addf %1790, %1793 : vector<16x128xf32>
      %c258 = arith.constant 258 : index
      %1795 = memref.load %arg1[%c258] : memref<512xf32, #tpu.memory_space<smem>>
      %1796 = vector.broadcast %1795 : f32 to vector<16x128xf32>
      %1797 = arith.mulf %133, %1796 : vector<16x128xf32>
      %1798 = arith.addf %1794, %1797 : vector<16x128xf32>
      %c278 = arith.constant 278 : index
      %1799 = memref.load %arg1[%c278] : memref<512xf32, #tpu.memory_space<smem>>
      %1800 = vector.broadcast %1799 : f32 to vector<16x128xf32>
      %1801 = arith.mulf %139, %1800 : vector<16x128xf32>
      %1802 = arith.addf %1798, %1801 : vector<16x128xf32>
      %c298 = arith.constant 298 : index
      %1803 = memref.load %arg1[%c298] : memref<512xf32, #tpu.memory_space<smem>>
      %1804 = vector.broadcast %1803 : f32 to vector<16x128xf32>
      %1805 = arith.mulf %145, %1804 : vector<16x128xf32>
      %1806 = arith.addf %1802, %1805 : vector<16x128xf32>
      %c318 = arith.constant 318 : index
      %1807 = memref.load %arg1[%c318] : memref<512xf32, #tpu.memory_space<smem>>
      %1808 = vector.broadcast %1807 : f32 to vector<16x128xf32>
      %1809 = arith.mulf %151, %1808 : vector<16x128xf32>
      %1810 = arith.addf %1806, %1809 : vector<16x128xf32>
      %c338 = arith.constant 338 : index
      %1811 = memref.load %arg1[%c338] : memref<512xf32, #tpu.memory_space<smem>>
      %1812 = vector.broadcast %1811 : f32 to vector<16x128xf32>
      %1813 = arith.mulf %157, %1812 : vector<16x128xf32>
      %1814 = arith.addf %1810, %1813 : vector<16x128xf32>
      %c358 = arith.constant 358 : index
      %1815 = memref.load %arg1[%c358] : memref<512xf32, #tpu.memory_space<smem>>
      %1816 = vector.broadcast %1815 : f32 to vector<16x128xf32>
      %1817 = arith.mulf %163, %1816 : vector<16x128xf32>
      %1818 = arith.addf %1814, %1817 : vector<16x128xf32>
      %c378 = arith.constant 378 : index
      %1819 = memref.load %arg1[%c378] : memref<512xf32, #tpu.memory_space<smem>>
      %1820 = vector.broadcast %1819 : f32 to vector<16x128xf32>
      %1821 = arith.mulf %169, %1820 : vector<16x128xf32>
      %1822 = arith.addf %1818, %1821 : vector<16x128xf32>
      %c398 = arith.constant 398 : index
      %1823 = memref.load %arg1[%c398] : memref<512xf32, #tpu.memory_space<smem>>
      %1824 = vector.broadcast %1823 : f32 to vector<16x128xf32>
      %1825 = arith.mulf %175, %1824 : vector<16x128xf32>
      %1826 = arith.addf %1822, %1825 : vector<16x128xf32>
      %c418 = arith.constant 418 : index
      %1827 = memref.load %arg1[%c418] : memref<512xf32, #tpu.memory_space<smem>>
      %1828 = vector.broadcast %1827 : f32 to vector<16x128xf32>
      %1829 = arith.mulf %181, %1828 : vector<16x128xf32>
      %1830 = arith.addf %1826, %1829 : vector<16x128xf32>
      %c438 = arith.constant 438 : index
      %1831 = memref.load %arg1[%c438] : memref<512xf32, #tpu.memory_space<smem>>
      %1832 = vector.broadcast %1831 : f32 to vector<16x128xf32>
      %1833 = arith.mulf %187, %1832 : vector<16x128xf32>
      %1834 = arith.addf %1830, %1833 : vector<16x128xf32>
      %cst_41 = arith.constant 0.000000e+00 : f32
      %1835 = vector.broadcast %cst_41 : f32 to vector<16x128xf32>
      %1836 = arith.maximumf %1834, %1835 : vector<16x128xf32>
      %1837 = vector.broadcast %58 : f32 to vector<16x128xf32>
      %1838 = arith.mulf %1836, %1837 : vector<16x128xf32>
      %1839 = arith.addf %1752, %1838 : vector<16x128xf32>
      %c59 = arith.constant 59 : index
      %1840 = memref.load %arg1[%c59] : memref<512xf32, #tpu.memory_space<smem>>
      %1841 = vector.broadcast %1840 : f32 to vector<16x128xf32>
      %1842 = arith.mulf %73, %1841 : vector<16x128xf32>
      %c459 = arith.constant 459 : index
      %1843 = memref.load %arg1[%c459] : memref<512xf32, #tpu.memory_space<smem>>
      %1844 = vector.broadcast %1843 : f32 to vector<16x128xf32>
      %1845 = arith.addf %1842, %1844 : vector<16x128xf32>
      %c79 = arith.constant 79 : index
      %1846 = memref.load %arg1[%c79] : memref<512xf32, #tpu.memory_space<smem>>
      %1847 = vector.broadcast %1846 : f32 to vector<16x128xf32>
      %1848 = arith.mulf %79, %1847 : vector<16x128xf32>
      %1849 = arith.addf %1845, %1848 : vector<16x128xf32>
      %c99 = arith.constant 99 : index
      %1850 = memref.load %arg1[%c99] : memref<512xf32, #tpu.memory_space<smem>>
      %1851 = vector.broadcast %1850 : f32 to vector<16x128xf32>
      %1852 = arith.mulf %85, %1851 : vector<16x128xf32>
      %1853 = arith.addf %1849, %1852 : vector<16x128xf32>
      %c119 = arith.constant 119 : index
      %1854 = memref.load %arg1[%c119] : memref<512xf32, #tpu.memory_space<smem>>
      %1855 = vector.broadcast %1854 : f32 to vector<16x128xf32>
      %1856 = arith.mulf %91, %1855 : vector<16x128xf32>
      %1857 = arith.addf %1853, %1856 : vector<16x128xf32>
      %c139 = arith.constant 139 : index
      %1858 = memref.load %arg1[%c139] : memref<512xf32, #tpu.memory_space<smem>>
      %1859 = vector.broadcast %1858 : f32 to vector<16x128xf32>
      %1860 = arith.mulf %97, %1859 : vector<16x128xf32>
      %1861 = arith.addf %1857, %1860 : vector<16x128xf32>
      %c159 = arith.constant 159 : index
      %1862 = memref.load %arg1[%c159] : memref<512xf32, #tpu.memory_space<smem>>
      %1863 = vector.broadcast %1862 : f32 to vector<16x128xf32>
      %1864 = arith.mulf %103, %1863 : vector<16x128xf32>
      %1865 = arith.addf %1861, %1864 : vector<16x128xf32>
      %c179 = arith.constant 179 : index
      %1866 = memref.load %arg1[%c179] : memref<512xf32, #tpu.memory_space<smem>>
      %1867 = vector.broadcast %1866 : f32 to vector<16x128xf32>
      %1868 = arith.mulf %109, %1867 : vector<16x128xf32>
      %1869 = arith.addf %1865, %1868 : vector<16x128xf32>
      %c199 = arith.constant 199 : index
      %1870 = memref.load %arg1[%c199] : memref<512xf32, #tpu.memory_space<smem>>
      %1871 = vector.broadcast %1870 : f32 to vector<16x128xf32>
      %1872 = arith.mulf %115, %1871 : vector<16x128xf32>
      %1873 = arith.addf %1869, %1872 : vector<16x128xf32>
      %c219 = arith.constant 219 : index
      %1874 = memref.load %arg1[%c219] : memref<512xf32, #tpu.memory_space<smem>>
      %1875 = vector.broadcast %1874 : f32 to vector<16x128xf32>
      %1876 = arith.mulf %121, %1875 : vector<16x128xf32>
      %1877 = arith.addf %1873, %1876 : vector<16x128xf32>
      %c239 = arith.constant 239 : index
      %1878 = memref.load %arg1[%c239] : memref<512xf32, #tpu.memory_space<smem>>
      %1879 = vector.broadcast %1878 : f32 to vector<16x128xf32>
      %1880 = arith.mulf %127, %1879 : vector<16x128xf32>
      %1881 = arith.addf %1877, %1880 : vector<16x128xf32>
      %c259 = arith.constant 259 : index
      %1882 = memref.load %arg1[%c259] : memref<512xf32, #tpu.memory_space<smem>>
      %1883 = vector.broadcast %1882 : f32 to vector<16x128xf32>
      %1884 = arith.mulf %133, %1883 : vector<16x128xf32>
      %1885 = arith.addf %1881, %1884 : vector<16x128xf32>
      %c279 = arith.constant 279 : index
      %1886 = memref.load %arg1[%c279] : memref<512xf32, #tpu.memory_space<smem>>
      %1887 = vector.broadcast %1886 : f32 to vector<16x128xf32>
      %1888 = arith.mulf %139, %1887 : vector<16x128xf32>
      %1889 = arith.addf %1885, %1888 : vector<16x128xf32>
      %c299 = arith.constant 299 : index
      %1890 = memref.load %arg1[%c299] : memref<512xf32, #tpu.memory_space<smem>>
      %1891 = vector.broadcast %1890 : f32 to vector<16x128xf32>
      %1892 = arith.mulf %145, %1891 : vector<16x128xf32>
      %1893 = arith.addf %1889, %1892 : vector<16x128xf32>
      %c319 = arith.constant 319 : index
      %1894 = memref.load %arg1[%c319] : memref<512xf32, #tpu.memory_space<smem>>
      %1895 = vector.broadcast %1894 : f32 to vector<16x128xf32>
      %1896 = arith.mulf %151, %1895 : vector<16x128xf32>
      %1897 = arith.addf %1893, %1896 : vector<16x128xf32>
      %c339 = arith.constant 339 : index
      %1898 = memref.load %arg1[%c339] : memref<512xf32, #tpu.memory_space<smem>>
      %1899 = vector.broadcast %1898 : f32 to vector<16x128xf32>
      %1900 = arith.mulf %157, %1899 : vector<16x128xf32>
      %1901 = arith.addf %1897, %1900 : vector<16x128xf32>
      %c359 = arith.constant 359 : index
      %1902 = memref.load %arg1[%c359] : memref<512xf32, #tpu.memory_space<smem>>
      %1903 = vector.broadcast %1902 : f32 to vector<16x128xf32>
      %1904 = arith.mulf %163, %1903 : vector<16x128xf32>
      %1905 = arith.addf %1901, %1904 : vector<16x128xf32>
      %c379 = arith.constant 379 : index
      %1906 = memref.load %arg1[%c379] : memref<512xf32, #tpu.memory_space<smem>>
      %1907 = vector.broadcast %1906 : f32 to vector<16x128xf32>
      %1908 = arith.mulf %169, %1907 : vector<16x128xf32>
      %1909 = arith.addf %1905, %1908 : vector<16x128xf32>
      %c399 = arith.constant 399 : index
      %1910 = memref.load %arg1[%c399] : memref<512xf32, #tpu.memory_space<smem>>
      %1911 = vector.broadcast %1910 : f32 to vector<16x128xf32>
      %1912 = arith.mulf %175, %1911 : vector<16x128xf32>
      %1913 = arith.addf %1909, %1912 : vector<16x128xf32>
      %c419 = arith.constant 419 : index
      %1914 = memref.load %arg1[%c419] : memref<512xf32, #tpu.memory_space<smem>>
      %1915 = vector.broadcast %1914 : f32 to vector<16x128xf32>
      %1916 = arith.mulf %181, %1915 : vector<16x128xf32>
      %1917 = arith.addf %1913, %1916 : vector<16x128xf32>
      %c439 = arith.constant 439 : index
      %1918 = memref.load %arg1[%c439] : memref<512xf32, #tpu.memory_space<smem>>
      %1919 = vector.broadcast %1918 : f32 to vector<16x128xf32>
      %1920 = arith.mulf %187, %1919 : vector<16x128xf32>
      %1921 = arith.addf %1917, %1920 : vector<16x128xf32>
      %cst_42 = arith.constant 0.000000e+00 : f32
      %1922 = vector.broadcast %cst_42 : f32 to vector<16x128xf32>
      %1923 = arith.maximumf %1921, %1922 : vector<16x128xf32>
      %1924 = vector.broadcast %59 : f32 to vector<16x128xf32>
      %1925 = arith.mulf %1923, %1924 : vector<16x128xf32>
      %1926 = arith.addf %1839, %1925 : vector<16x128xf32>
      %1927 = vector.broadcast %60 : f32 to vector<16x128xf32>
      %1928 = arith.addf %1926, %1927 : vector<16x128xf32>
      %1929 = arith.index_cast %65 : i32 to index
      %c0_43 = arith.constant 0 : index
      %1930 = vector.load %arg3[%1929, %c0_43] : memref<32x128xf32, #tpu.memory_space<vmem>>, vector<16x128xf32>
      tpu.vector_store %arg3[%1929, %c0_43], %1928 {strides = array<i32>} : memref<32x128xf32, #tpu.memory_space<vmem>>, vector<16x128xf32>,
    }
    %c2_i32_0 = arith.constant 2 : i32
    return
  }
  func.func @transform_0(%arg0: i32) -> i32 {
    %c0_i32 = arith.constant 0 : i32
    %c0_i32_0 = arith.constant 0 : i32
    return %c0_i32 : i32
  }
  func.func @transform_1(%arg0: i32) -> (i32, i32) {
    %c0_i32 = arith.constant 0 : i32
    %c0_i32_0 = arith.constant 0 : i32
    return %arg0, %c0_i32 : i32, i32
  }
  func.func @transform_2(%arg0: i32) -> (i32, i32) {
    %c0_i32 = arith.constant 0 : i32
    %c0_i32_0 = arith.constant 0 : i32
    return %arg0, %c0_i32 : i32, i32
  }
}

</mosaic_0001>

<bundles_post_ra>
// kernel: tpu_custom_call.1
= control target key start
LH: loop header
LB: loop body
LE: loop exit
PB: predicated region body
PF: predicated region fallthrough
CT: control target
= control target key end

     0   :  { %s6687_s0 = inlined_call_operand.hbm [shape: f32[512], index: 0, kind: input, shape index: {}]   ;;  %s6688_s1 = inlined_call_operand.hbm [shape: f32[64,128], index: 1, kind: input, shape index: {}]   ;;  %s6689_s2 = inlined_call_operand.hbm [shape: f32[64,128], index: 2, kind: output, shape index: {}]  }
   0x1   :  { %6862 = sst [smem:[#allocation102_spill]] %s6687_s0 }
   0x2   :  { %6863 = sst [smem:[#allocation103_spill]] %s6688_s1 }
   0x3   :  { %6864 = sst [smem:[#allocation104_spill]] %s6689_s2 }
   0x4   :  { %7 = vsyncpa [#allocation5], 0 }
   0x5   :  { %8 = vsyncpa [#allocation3], 0 }
   0x6   :  { %10 = vsyncpa [#allocation3 + $0x1], 0 }
   0x7   :  { %11 = vsyncpa [#allocation4], 0 }
   0x8   :  { %13 = vsyncpa [#allocation4 + $0x1], 0  ;;  %s3812_s9 = smov 0   ;;  %s3814_s10 = smov 0  }
   0x9   :  { %s3816_s11 = smov 0   ;;  %s3818_s12 = smov 0  }
   0xa LB: > { %6865 = sst [smem:[#allocation11_spill]] %s3772_s9  ;;  %s3833_s13 = sadd.s32 4294967295, %s3784_s12   ;;  %s3784_s12 = sphi %s3818_s12, %s7220_s12   ;;  %s3780_s11 = sphi %s3816_s11, %s7223_s11   ;;  %s3776_s10 = sphi %s3814_s10, %s7222_s10   ;;  %s3772_s9 = sphi %s3812_s9, %s7221_s9  }
   0xb   : > { %6866 = sst [smem:[#allocation12_spill]] %s3776_s10  ;;  %s3099_s14 = sadd.s32 4294967294, %s3784_s12  }
   0xc   : > { %6867 = sst [smem:[#allocation13_spill]] %s3780_s11  ;;  %s3837_s15 = sadd.s32 1, %s3784_s12  }
   0xd   : > { %6868 = sst [smem:[#allocation14_spill]] %s3784_s12  ;;  %s47_s16 = sadd.s32 1, %s3780_s11 }
   0xe   : > { %6869 = sst [smem:[#allocation15_spill]] %s3833_s13  ;;  %s44_s17 = ssub.s32 %s3784_s12, %s3837_s15 }
   0xf   : > { %6870 = sst [smem:[#allocation16_spill]] %s3837_s15  ;;  %p54_p0 = scmp.ne.s32.totalorder %s3780_s11, %s3776_s10 }
  0x10   : > { %p45_p1 = scmp.eq.s32.totalorder %s44_s17, 0  ;;  %p55_p2 = scmp.eq.s32.totalorder %s3784_s12, 0 }
  0x11   : > { %p60_p3 = scmp.ne.s32.totalorder %s3776_s10, %s3772_s9  ;;  %p6690_p4 = scmp.eq.s32.totalorder %s3833_s13, 0 }
  0x12   : > { %s3849_s18 = scalar_select %p45_p1, %s3780_s11, %s47_s16  }
  0x13   : > { %p3851_p5 = por %p55_p2, %p54_p0  ;;  %p3857_p6 = por %p6690_p4, %p60_p3 }
  0x14   : > { %6871 = sst [smem:[#allocation17_spill]] %s3849_s18  ;;  %p84_p7 = scmp.eq.s32.totalorder %s3833_s13, 1 }
  0x15   : > { %s6873_s20 = scalar_select %p3857_p6, 1, 0 }
  0x16   : > { %p90_p8 = scmp.eq.s32.totalorder %s3099_s14, 1  ;;  %p3100_p9 = scmp.ge.s32.totalorder %s3784_s12, 1 }
  0x17   : > { %p97_p10 = scmp.lt.s32.totalorder %s3784_s12, 3  ;;  %p3864_p11 = por %p84_p7, %p54_p0 }
  0x18   : > { %p3868_p12 = por %p90_p8, %p60_p3  ;;  %p3619_p4 = scmp.lt.s32.totalorder %s3784_s12, 2 }
  0x19   : > { %s6874_s21 = scalar_select %p3864_p11, 1, 0 }
  0x1a   : > { %s6876_s22 = scalar_select %p3868_p12, 1, 0 }
  0x1b   : > { %6875 = sst [smem:[#allocation18_spill]] %s6874_s21  ;;  %p3872_p13 = pnand %p3100_p9, %p97_p10 }
  0x1c   : > { %6877 = sst [smem:[#allocation19_spill]] %s6876_s22  ;;  %s119_s24 = sand.u32 1, %s3780_s11  }
  0x1d   : > { %p3606_p2 = pneg %p3872_p13  ;;  %s3596_s25 = sshll.u32 %s3784_s12, 9 }
  0x1e   : > { %p6879_p6 = scmp.eq.s32.totalorder %s3833_s13, 0  ;;  %p3886_p7 = pnand %p3619_p4, %p3851_p5 }
  0x1f   : > { %s3103_s27 = sshll.u32 %s119_s24, 5  ;;  %s6881_s0 = sld [smem:[#allocation102_spill]] }
  0x20   : > { %p3607_p0 = pnand %p3606_p2, %p6879_p6 }
  0x22   : > { %p3669_p8 = pneg %p3607_p0 }
  0x25   : > { %s3667_s30 = scalar_lea.hbm %s6881_s0, 64 }
  0x26   : > { %p3668_p3 = scmp.ne.s32.totalorder %s6881_s0, %s3667_s30  ;;  %p3674_p6 = scmp.lt.u32.totalorder %s3667_s30, %s6881_s0 }
  0x28   : > { %p3670_p9 = pnand %p3669_p8, %p3668_p3 }
  0x2a   : > { %p3671_p10 = pneg %p3670_p9 }
  0x2c   : > { %p3676_p4 = pnand %p3674_p6, %p3671_p10 }
  0x2e   : > { %3679 = shalt.err (!%p3676_p4)
}
  0x2f   : > { %s3790_s7 = smov [#allocation2]   ;;  %s6882_s1 = sld [smem:[#allocation103_spill]] }
  0x30   : > { %3609 = dma.hbm_to_smem (!%p3607_p0), %s6881_s0, 64, %s3790_s7, [#allocation5]  }
  0x31   : > { %s123_s28 = scalar_lea.vmem [#allocation6], %s3103_s27  ;;  %s3909_s30 = scalar_lea.sflag [#allocation3], %s119_s24 }
  0x32   : > { %s130_s29 = sshll.u32 %s123_s28, 4  ;;  %p3682_p2 = pneg %p3886_p7  ;;  %s3907_s29 = int_to_ptr.vmem [resolvable:$true] %s130_s29 }
  0x35   : > { %s3905_s19 = scalar_lea.hbm %s6882_s1, %s3596_s25  ;;  %s3685_s5 = scalar_lea.hbm %s6882_s1, 1024 }
  0x36   : > { %s3680_s3 = scalar_lea.hbm %s3905_s19, 512  ;;  %p3686_p8 = scmp.lt.u32.totalorder %s3905_s19, %s6882_s1 }
  0x37   : > { %p3681_p5 = scmp.ne.s32.totalorder %s3905_s19, %s3680_s3  ;;  %p3687_p9 = scmp.lt.u32.totalorder %s3685_s5, %s3680_s3 }
  0x38   : > { %p3689_p6 = scmp.lt.u32.totalorder %s3680_s3, %s3905_s19 }
  0x39   : > { %p3683_p0 = pnand %p3682_p2, %p3681_p5  ;;  %p3688_p10 = por %p3687_p9, %p3686_p8 }
  0x3b   : > { %p3684_p3 = pneg %p3683_p0  ;;  %p3690_p4 = por %p3689_p6, %p3688_p10 }
  0x3d   : > { %p3691_p1 = pnand %p3690_p4, %p3684_p3 }
  0x3f   : > { %3694 = shalt.err (!%p3691_p1)
}
  0x40   : > { %s3695_s24 = scalar_lea.vmem %s3907_s29, 512  ;;  %s3791_s27 = smov [#allocation6]  }
  0x41   : > { %p3696_p5 = scmp.ne.s32.totalorder %s3907_s29, %s3695_s24  ;;  %s3700_s8 = sshll.u32 %s3791_s27, 4  ;;  %s3701_s8 = int_to_ptr.vmem [resolvable:$false] %s3700_s8 }
  0x42   : > { %s3702_s14 = scalar_lea.vmem %s3701_s8, 1024  ;;  %p3703_p11 = scmp.lt.s32.totalorder %s3907_s29, %s3701_s8 }
  0x43   : > { %p3698_p0 = pnand %p3696_p5, %p3682_p2  ;;  %p3704_p8 = scmp.lt.s32.totalorder %s3702_s14, %s3695_s24 }
  0x45   : > { %p3699_p12 = pneg %p3698_p0  ;;  %p3705_p9 = por %p3704_p8, %p3703_p11 }
  0x47   : > { %p3706_p10 = pnand %p3705_p9, %p3699_p12 }
  0x49   : > { %3709 = shalt.err (!%p3706_p10)
}
  0x4a   : > { %s3792_s16 = smov 128   ;;  %s3793_s17 = smov 8  }
  0x4b   : > { %3613 = dma.hbm_to_vmem [thread:$0]  (!%p3886_p7), %s3905_s19, 512, %s3907_s29, %s3909_s30, %s3792_s16, %s3792_s16, %s3793_s17  }
  0x4c   : > { %142 = sbr.rel (%p3872_p13) target bundleno = 760 (0x2f8), region = 28 }
  0x53   : > { %p6883_p1 = scmp.eq.s32.totalorder %s3833_s13, 0 }
  0x55   : > { %3759 = dma.done.wait (%p6883_p1), [#allocation5], 64   ;;  %p6884_p2 = pmov %p6883_p1 }
  0x56   : > { %s3944_s28 = sand.u32 1, %s3776_s10   ;;  %p6886_p11 = scmp.ne.s32.totalorder %s6873_s20, 0 }
  0x57   : > { %3761 = vsyncadd (%p6884_p2), [#allocation5], 4294967232  ;;  %6885 = sst [smem:[#allocation20_spill]] %s3944_s28  ;;  %s6693_s3 = sshll.u32 %s3944_s28, 5 }
  0x58   : > { %s149_s25 = scalar_lea.sflag [#allocation3], %s3944_s28  ;;  %s3950_s26 = scalar_lea.vmem [#allocation6], %s6693_s3 }
  0x59   : > { %3763 = dma.done.wait (%p6886_p11), %s149_s25, 512  }
  0x5a   : > { %3765 = vsyncadd (%p6886_p11), %s149_s25, 4294966784 }
  0x5b   : > { %157 = sfence }
  0x5c   : > { %s3956_s23 = sld [smem:[#allocation2]]  ;;  %s3958_s19 = sld [smem:[#allocation2 + $0x1]] }
  0x5d   : > { %s3960_s29 = sld [smem:[#allocation2 + $0x2]]  ;;  %s3962_s30 = sld [smem:[#allocation2 + $0x3]] }
  0x5e   : > { %s3964_s4 = sld [smem:[#allocation2 + $0x4]]  ;;  %s3966_s5 = sld [smem:[#allocation2 + $0x5]] }
  0x5f   : > { %s3968_s6 = sld [smem:[#allocation2 + $0x6]]  ;;  %s3970_s7 = sld [smem:[#allocation2 + $0x7]] }
  0x60   : > { %s3972_s24 = sld [smem:[#allocation2 + $0x8]]  ;;  %s3974_s20 = sld [smem:[#allocation2 + $0x9]] }
  0x61   : > { %s3976_s27 = sld [smem:[#allocation2 + $0xa]]  ;;  %s3978_s8 = sld [smem:[#allocation2 + $0xb]] }
  0x62   : > { %6887 = sst [smem:[#allocation21_spill]] %s3958_s19  ;;  %s3980_s14 = sld [smem:[#allocation2 + $0xc]] }
  0x63   : > { %s3982_s16 = sld [smem:[#allocation2 + $0xd]]  ;;  %s3984_s17 = sld [smem:[#allocation2 + $0xe]] }
  0x64   : > { %6888 = sst [smem:[#allocation22_spill]] %s3964_s4  ;;  %s3986_s25 = sld [smem:[#allocation2 + $0xf]] }
  0x65   : > { %6889 = sst [smem:[#allocation23_spill]] %s3966_s5  ;;  %s3988_s3 = sld [smem:[#allocation2 + $0x10]] }
  0x66   : > { %6890 = sst [smem:[#allocation24_spill]] %s3968_s6  ;;  %s3990_s0 = sld [smem:[#allocation2 + $0x11]] }
  0x67   : > { %6891 = sst [smem:[#allocation25_spill]] %s3970_s7  ;;  %s3992_s1 = sld [smem:[#allocation2 + $0x12]] }
  0x68   : > { %6892 = sst [smem:[#allocation26_spill]] %s3974_s20  ;;  %s3994_s18 = sld [smem:[#allocation2 + $0x13]] }
  0x69   : > { %6893 = sst [smem:[#allocation27_spill]] %s3976_s27  ;;  %s3996_s11 = sld [smem:[#allocation2 + $0x14]] }
  0x6a   : > { %6894 = sst [smem:[#allocation28_spill]] %s3978_s8  ;;  %s3998_s10 = sld [smem:[#allocation2 + $0x15]] }
  0x6b   : > { %6895 = sst [smem:[#allocation29_spill]] %s3980_s14  ;;  %s4000_s15 = sld [smem:[#allocation2 + $0x16]] }
  0x6c   : > { %6896 = sst [smem:[#allocation30_spill]] %s3982_s16  ;;  %s4002_s12 = sld [smem:[#allocation2 + $0x17]] }
  0x6d   : > { %6897 = sst [smem:[#allocation31_spill]] %s3984_s17  ;;  %s4004_s22 = sld [smem:[#allocation2 + $0x18]] }
  0x6e   : > { %6898 = sst [smem:[#allocation32_spill]] %s3986_s25  ;;  %s4006_s9 = sld [smem:[#allocation2 + $0x19]] }
  0x6f   : > { %6899 = sst [smem:[#allocation33_spill]] %s3988_s3  ;;  %s4008_s2 = sld [smem:[#allocation2 + $0x1a]] }
  0x70   : > { %6900 = sst [smem:[#allocation34_spill]] %s3990_s0  ;;  %s4010_s21 = sld [smem:[#allocation2 + $0x1b]] }
  0x71   : > { %6901 = sst [smem:[#allocation35_spill]] %s3992_s1  ;;  %s4012_s13 = sld [smem:[#allocation2 + $0x1c]] }
  0x72   : > { %6902 = sst [smem:[#allocation36_spill]] %s3994_s18  ;;  %s4014_s1 = sld [smem:[#allocation2 + $0x1d]] }
  0x73   : > { %6903 = sst [smem:[#allocation37_spill]] %s3996_s11  ;;  %s4016_s18 = sld [smem:[#allocation2 + $0x1e]] }
  0x74   : > { %6904 = sst [smem:[#allocation38_spill]] %s3998_s10  ;;  %s4018_s0 = sld [smem:[#allocation2 + $0x1f]] }
  0x75   : > { %6905 = sst [smem:[#allocation39_spill]] %s4000_s15  ;;  %s4020_s3 = sld [smem:[#allocation2 + $0x20]] }
  0x76   : > { %6906 = sst [smem:[#allocation40_spill]] %s4002_s12  ;;  %s4022_s25 = sld [smem:[#allocation2 + $0x21]] }
  0x77   : > { %6907 = sst [smem:[#allocation41_spill]] %s4006_s9  ;;  %s4024_s17 = sld [smem:[#allocation2 + $0x22]] }
  0x78   : > { %6908 = sst [smem:[#allocation42_spill]] %s4008_s2  ;;  %s4026_s16 = sld [smem:[#allocation2 + $0x23]] }
  0x79   : > { %6909 = sst [smem:[#allocation43_spill]] %s4012_s13  ;;  %s4028_s14 = sld [smem:[#allocation2 + $0x24]] }
  0x7a   : > { %6910 = sst [smem:[#allocation44_spill]] %s4014_s1  ;;  %s4030_s8 = sld [smem:[#allocation2 + $0x25]] }
  0x7b   : > { %6911 = sst [smem:[#allocation45_spill]] %s4016_s18  ;;  %s4032_s27 = sld [smem:[#allocation2 + $0x26]] }
  0x7c   : > { %6912 = sst [smem:[#allocation46_spill]] %s4018_s0  ;;  %s4034_s20 = sld [smem:[#allocation2 + $0x27]] }
  0x7d   : > { %6913 = sst [smem:[#allocation47_spill]] %s4020_s3  ;;  %s4038_s18 = sld [smem:[#allocation2 + $0x1cd]] }
  0x7e   : > { %6914 = sst [smem:[#allocation48_spill]] %s4022_s25  ;;  %s4036_s1 = sld [smem:[#allocation2 + $0x1cc]] }
  0x7f   : > { %6915 = sst [smem:[#allocation49_spill]] %s4024_s17  ;;  %s4042_s3 = sld [smem:[#allocation2 + $0x1cf]] }
  0x80   : > { %6916 = sst [smem:[#allocation50_spill]] %s4026_s16  ;;  %s4040_s0 = sld [smem:[#allocation2 + $0x1ce]] }
  0x81   : > { %6917 = sst [smem:[#allocation51_spill]] %s4028_s14  ;;  %s4046_s17 = sld [smem:[#allocation2 + $0x1d1]] }
  0x82   : > { %6918 = sst [smem:[#allocation52_spill]] %s4030_s8  ;;  %s4044_s25 = sld [smem:[#allocation2 + $0x1d0]] }
  0x83   : > { %6919 = sst [smem:[#allocation53_spill]] %s4032_s27  ;;  %s4050_s8 = sld [smem:[#allocation2 + $0x1d3]] }
  0x84   : > { %6920 = sst [smem:[#allocation54_spill]] %s4034_s20  ;;  %s4048_s14 = sld [smem:[#allocation2 + $0x1d2]] }
  0x85   : > { %6921 = sst [smem:[#allocation55_spill]] %s4036_s1  ;;  %s4054_s20 = sld [smem:[#allocation2 + $0x1d5]] }
  0x86   : > { %6922 = sst [smem:[#allocation56_spill]] %s4038_s18  ;;  %s4052_s27 = sld [smem:[#allocation2 + $0x1d4]] }
  0x87   : > { %6923 = sst [smem:[#allocation57_spill]] %s4040_s0  ;;  %s4058_s18 = sld [smem:[#allocation2 + $0x1d7]] }
  0x88   : > { %6924 = sst [smem:[#allocation58_spill]] %s4042_s3  ;;  %s4056_s1 = sld [smem:[#allocation2 + $0x1d6]] }
  0x89   : > { %6925 = sst [smem:[#allocation59_spill]] %s4044_s25  ;;  %s4062_s3 = sld [smem:[#allocation2 + $0x1d9]] }
  0x8a   : > { %6926 = sst [smem:[#allocation60_spill]] %s4046_s17  ;;  %s4060_s0 = sld [smem:[#allocation2 + $0x1d8]] }
  0x8b   : > { %6927 = sst [smem:[#allocation61_spill]] %s4048_s14  ;;  %s4066_s17 = sld [smem:[#allocation2 + $0x1db]] }
  0x8c   : > { %6928 = sst [smem:[#allocation62_spill]] %s4050_s8  ;;  %s4064_s25 = sld [smem:[#allocation2 + $0x1da]] }
  0x8d   : > { %6929 = sst [smem:[#allocation63_spill]] %s4052_s27  ;;  %s4070_s14 = sld [smem:[#allocation2 + $0x1dd]] }
  0x8e   : > { %6930 = sst [smem:[#allocation64_spill]] %s4054_s20  ;;  %s4068_s16 = sld [smem:[#allocation2 + $0x1dc]] }
  0x8f   : > { %6931 = sst [smem:[#allocation65_spill]] %s4056_s1  ;;  %s4074_s27 = sld [smem:[#allocation2 + $0x1df]] }
  0x90   : > { %6932 = sst [smem:[#allocation66_spill]] %s4058_s18  ;;  %s4072_s8 = sld [smem:[#allocation2 + $0x1de]] }
  0x91   : > { %6933 = sst [smem:[#allocation67_spill]] %s4060_s0  ;;  %s6935_s1 = sshll.u32 %s3944_s28, 5 }
  0x92   : > { %6934 = sst [smem:[#allocation68_spill]] %s4062_s3  ;;  %s4076_s20 = sld [smem:[#allocation2 + $0x1e0]] }
  0x93   : > { %s4080_s18 = scalar_lea.vmem [#allocation7], %s6935_s1  ;;  %s4082_s0 = smov 0  }
  0x94 LB: >> { %s6936_s3 = sld [smem:[#allocation68_spill]]  ;;  %s6937_s11 = sld [smem:[#allocation37_spill]]  ;;  %v247_v0 = vstv %s3956_s23  ;;  %v263_v6 = vstv %s3960_s29  ;;  %v271_v9 = vstv %s3962_s30  ;;  %v282_v14 = vstv %s4004_s22  ;;  %s3788_s0 = sphi %s4082_s0, %s242_s0  }
  0x95   : >> { %s6938_s19 = sld [smem:[#allocation21_spill]]  ;;  %s6939_s10 = sld [smem:[#allocation38_spill]]  ;;  %v306_v26 = vstv %s4010_s21  ;;  %v311_v29 = vstv %s3972_s24 }
  0x96   : >> { %s6940_s15 = sld [smem:[#allocation39_spill]]  ;;  %s6941_s12 = sld [smem:[#allocation40_spill]] }
  0x97   : >> { %s6942_s4 = sld [smem:[#allocation22_spill]]  ;;  %s6719_s1 = sshll.u32 %s3788_s0, 4 }
  0x98   : >> { %s244_s28 = scalar_lea.vmem %s3950_s26, %s6719_s1 [#allocation6]  ;;  %s6943_s5 = sld [smem:[#allocation23_spill]] }
  0x99   : >> { %s6944_s9 = sld [smem:[#allocation41_spill]]  ;;  %v4094_v3 = vld [vmem:[%s244_s28] sm:$0xff]  ;;  %v4096_v4 = vld [vmem:[%s244_s28 + $0x8] sm:$0xff]  ;;  %s6945_s6 = sld [smem:[#allocation24_spill]] }
  0x9a   : >> { %v250_v1 = vstv %s6937_s11  ;;  %s6946_s2 = sld [smem:[#allocation42_spill]]  ;;  %v248_v7 = vmul.f32 %v247_v0, %v4094_v3  ;;  %s6947_s7 = sld [smem:[#allocation25_spill]]  ;;  %v249_v11 = vmul.f32 %v247_v0, %v4096_v4  ;;  %v264_v16 = vmul.f32 %v263_v6, %v4094_v3 }
  0x9b   : >> { %v255_v2 = vstv %s6938_s19  ;;  %v258_v5 = vstv %s6939_s10  ;;  %s6948_s13 = sld [smem:[#allocation43_spill]]  ;;  %v265_v19 = vmul.f32 %v263_v6, %v4096_v4  ;;  %v272_v20 = vmul.f32 %v271_v9, %v4094_v3  ;;  %s6950_s28 = sld [smem:[#allocation26_spill]] }
  0x9c   : >> { %v266_v8 = vstv %s6940_s15  ;;  %v274_v10 = vstv %s6941_s12  ;;  %v256_v12 = vmul.f32 %v255_v2, %v4094_v3  ;;  %v257_v15 = vmul.f32 %v255_v2, %v4096_v4  ;;  %s6955_s1 = sld [smem:[#allocation27_spill]]  ;;  %s6977_s10 = sld [smem:[#allocation49_spill]] }
  0x9d   : >> { %v279_v13 = vstv %s6942_s4  ;;  %v251_v23 = vadd.f32 %v250_v1, %v248_v7  ;;  %v273_v24 = vmul.f32 %v271_v9, %v4096_v4  ;;  %v252_v27 = vadd.f32 %v250_v1, %v249_v11  ;;  %s6959_s4 = sld [smem:[#allocation28_spill]]  ;;  %s6988_s11 = sld [smem:[#allocation53_spill]] }
  0x9e   : >> { %v287_v17 = vstv %s6943_s5  ;;  %v259_v28 = vadd.f32 %v258_v5, %v256_v12  ;;  %v260_v31 = vadd.f32 %v258_v5, %v257_v15  ;;  %v267_v32 = vadd.f32 %v266_v8, %v264_v16  ;;  %s6963_s5 = sld [smem:[#allocation45_spill]]  ;;  %s6992_s12 = sld [smem:[#allocation36_spill]] }
  0x9f   : >> { %v290_v18 = vstv %s6944_s9  ;;  %v295_v21 = vstv %s6945_s6  ;;  %v280_v33 = vmul.f32 %v279_v13, %v4094_v3  ;;  %v281_v34 = vmul.f32 %v279_v13, %v4096_v4  ;;  %s6964_s6 = sld [smem:[#allocation29_spill]]  ;;  %s6971_s9 = sld [smem:[#allocation31_spill]] }
  0xa0   : >> { %v298_v22 = vstv %s6946_s2  ;;  %v303_v25 = vstv %s6947_s7  ;;  %v268_v35 = vadd.f32 %v266_v8, %v265_v19  ;;  %v275_v36 = vadd.f32 %v274_v10, %v272_v20  ;;  %s6958_s2 = sld [smem:[#allocation44_spill]]  ;;  %s6970_s7 = sld [smem:[#allocation30_spill]] }
  0xa1   : >> { %v314_v30 = vstv %s6948_s13  ;;  %v288_v37 = vmul.f32 %v287_v17, %v4094_v3  ;;  %v289_v38 = vmul.f32 %v287_v17, %v4096_v4  ;;  %v4125_v39 = vmax.f32 %v251_v23, 0.0  ;;  %s6995_s13 = sld [smem:[#allocation54_spill]]  ;;  %s4241_s15 = sld [smem:[#allocation2 + $0x8c]] }
  0xa2   : >> { %v276_v40 = vadd.f32 %v274_v10, %v273_v24  ;;  %v296_v41 = vmul.f32 %v295_v21, %v4094_v3  ;;  %v297_v42 = vmul.f32 %v295_v21, %v4096_v4  ;;  %v4129_v43 = vmax.f32 %v252_v27, 0.0  ;;  %s4717_s19 = sld [smem:[#allocation2 + $0x193]] }
  0xa3   : >> { %6949 = vst [vmem:[#allocation69_spill] sm:$0xff] %v4125_v39  ;;  %v4131_v44 = vmax.f32 %v259_v28, 0.0  ;;  %v304_v45 = vmul.f32 %v303_v25, %v4094_v3  ;;  %v305_v46 = vmul.f32 %v303_v25, %v4096_v4  ;;  %v4135_v47 = vmax.f32 %v260_v31, 0.0 }
  0xa4   : >> { %6951 = vst [vmem:[#allocation70_spill] sm:$0xff] %v4129_v43  ;;  %v4137_v48 = vmax.f32 %v267_v32, 0.0  ;;  %v283_v49 = vadd.f32 %v282_v14, %v280_v33  ;;  %v284_v50 = vadd.f32 %v282_v14, %v281_v34  ;;  %v4139_v51 = vmax.f32 %v268_v35, 0.0 }
  0xa5   : >> { %6952 = vst [vmem:[#allocation71_spill] sm:$0xff] %v4131_v44  ;;  %6953 = vst [vmem:[#allocation72_spill] sm:$0xff] %v4135_v47  ;;  %v4141_v52 = vmax.f32 %v275_v36, 0.0  ;;  %v291_v53 = vadd.f32 %v290_v18, %v288_v37  ;;  %v292_v54 = vadd.f32 %v290_v18, %v289_v38  ;;  %v299_v55 = vadd.f32 %v298_v22, %v296_v41 }
  0xa6   : >> { %6954 = vst [vmem:[#allocation73_spill] sm:$0xff] %v4137_v48  ;;  %6956 = vst [vmem:[#allocation74_spill] sm:$0xff] %v4139_v51  ;;  %v300_v56 = vadd.f32 %v298_v22, %v297_v42  ;;  %v312_v57 = vmul.f32 %v311_v29, %v4094_v3  ;;  %v319_v58 = vstv %s6950_s28  ;;  %v4145_v59 = vmax.f32 %v276_v40, 0.0  ;;  %s6966_s28 = sld [smem:[#allocation46_spill]] }
  0xa7   : >> { %6957 = vst [vmem:[#allocation75_spill] sm:$0xff] %v4141_v52  ;;  %v307_v60 = vadd.f32 %v306_v26, %v304_v45  ;;  %v308_v61 = vadd.f32 %v306_v26, %v305_v46  ;;  %v313_v62 = vmul.f32 %v311_v29, %v4096_v4  ;;  %v4148_v63 = vmax.f32 %v283_v49, 0.0 }
  0xa8   : >> { %6960 = vst [vmem:[#allocation76_spill] sm:$0xff] %v4145_v59  ;;  %v4150_v0 = vmax.f32 %v284_v50, 0.0  ;;  %v320_v1 = vmul.f32 %v319_v58, %v4094_v3  ;;  %v327_v2 = vstv %s6955_s1  ;;  %v4154_v5 = vmax.f32 %v291_v53, 0.0  ;;  %s6972_s1 = sld [smem:[#allocation47_spill]] }
  0xa9   : >> { %6961 = vst [vmem:[#allocation77_spill] sm:$0xff] %v4148_v63  ;;  %v315_v6 = vadd.f32 %v314_v30, %v312_v57  ;;  %v321_v7 = vmul.f32 %v319_v58, %v4096_v4  ;;  %v322_v8 = vstv %s6958_s2  ;;  %v4158_v9 = vmax.f32 %v292_v54, 0.0  ;;  %s6975_s2 = sld [smem:[#allocation48_spill]] }
  0xaa   : >> { %6962 = vst [vmem:[#allocation78_spill] sm:$0xff] %v4150_v0  ;;  %6965 = vst [vmem:[#allocation79_spill] sm:$0xff] %v4154_v5  ;;  %v4160_v10 = vmax.f32 %v299_v55, 0.0  ;;  %v4162_v11 = vmax.f32 %v300_v56, 0.0  ;;  %v335_v12 = vstv %s6959_s4  ;;  %v4165_v13 = vmax.f32 %v307_v60, 0.0  ;;  %s6976_s4 = sld [smem:[#allocation32_spill]] }
  0xab   : >> { %6967 = vst [vmem:[#allocation80_spill] sm:$0xff] %v4158_v9  ;;  %v316_v14 = vadd.f32 %v314_v30, %v313_v62  ;;  %v328_v15 = vmul.f32 %v327_v2, %v4094_v3  ;;  %v329_v16 = vmul.f32 %v327_v2, %v4096_v4  ;;  %v4169_v17 = vmax.f32 %v308_v61, 0.0 }
  0xac   : >> { %6968 = vst [vmem:[#allocation81_spill] sm:$0xff] %v4160_v10  ;;  %6969 = vst [vmem:[#allocation82_spill] sm:$0xff] %v4162_v11  ;;  %v323_v18 = vadd.f32 %v322_v8, %v320_v1  ;;  %v330_v19 = vstv %s6963_s5  ;;  %v343_v20 = vstv %s6964_s6  ;;  %v4173_v21 = vmax.f32 %v315_v6, 0.0  ;;  %s6978_s5 = sld [smem:[#allocation50_spill]]  ;;  %s6979_s6 = sld [smem:[#allocation33_spill]] }
  0xad   : >> { %6973 = vst [vmem:[#allocation83_spill] sm:$0xff] %v4169_v17  ;;  %v324_v22 = vadd.f32 %v322_v8, %v321_v7  ;;  %v336_v23 = vmul.f32 %v335_v12, %v4094_v3  ;;  %v338_v24 = vstv %s6966_s28  ;;  %v337_v25 = vmul.f32 %v335_v12, %v4096_v4  ;;  %s4202_s28 = sld [smem:[#allocation2 + $0x1b8]] }
  0xae   : >> { %6974 = vst [vmem:[#allocation84_spill] sm:$0xff] %v4173_v21  ;;  %v344_v26 = vmul.f32 %v343_v20, %v4094_v3  ;;  %v351_v27 = vstv %s6970_s7  ;;  %v359_v28 = vstv %s6971_s9  ;;  %v4181_v29 = vmax.f32 %v316_v14, 0.0  ;;  %s6980_s9 = sld [smem:[#allocation51_spill]] }
  0xaf   : >> { %v331_v30 = vadd.f32 %v330_v19, %v328_v15  ;;  %v332_v31 = vadd.f32 %v330_v19, %v329_v16  ;;  %v346_v32 = vstv %s6972_s1  ;;  %v4184_v33 = vmax.f32 %v323_v18, 0.0  ;;  %s4198_s7 = sld [smem:[#allocation2 + $0x28]]  ;;  %s4207_s1 = sld [smem:[#allocation2 + $0x3c]] }
  0xb0   : >> { %v345_v34 = vmul.f32 %v343_v20, %v4096_v4  ;;  %v352_v35 = vmul.f32 %v351_v27, %v4094_v3  ;;  %v353_v36 = vmul.f32 %v351_v27, %v4096_v4  ;;  %v339_v37 = vadd.f32 %v338_v24, %v336_v23 }
  0xb1   : >> { %v354_v38 = vstv %s6975_s2  ;;  %v360_v40 = vmul.f32 %v359_v28, %v4094_v3  ;;  %v367_v41 = vstv %s6976_s4  ;;  %v340_v42 = vadd.f32 %v338_v24, %v337_v25  ;;  %s6985_s2 = sld [smem:[#allocation35_spill]] }
  0xb2   : >> { %v347_v45 = vadd.f32 %v346_v32, %v344_v26  ;;  %v361_v46 = vmul.f32 %v359_v28, %v4096_v4  ;;  %v362_v49 = vstv %s6977_s10  ;;  %v368_v50 = vmul.f32 %v367_v41, %v4094_v3  ;;  %s6982_s10 = sld [smem:[#allocation34_spill]]  ;;  %s4213_s4 = sld [smem:[#allocation2 + $0x50]] }
  0xb3   : >> { %v369_v53 = vmul.f32 %v367_v41, %v4096_v4  ;;  %v370_v54 = vstv %s6978_s5  ;;  %v375_v55 = vstv %s6979_s6  ;;  %v4200_v56 = vmax.f32 %v324_v22, 0.0  ;;  %s4215_s5 = sld [smem:[#allocation2 + $0x64]]  ;;  %s6986_s6 = sld [smem:[#allocation52_spill]] }
  0xb4   : >> { %v348_v57 = vadd.f32 %v346_v32, %v345_v34  ;;  %v355_v58 = vadd.f32 %v354_v38, %v352_v35  ;;  %v356_v60 = vadd.f32 %v354_v38, %v353_v36  ;;  %v363_v61 = vadd.f32 %v362_v49, %v360_v40 }
  0xb5   : >> { %6981 = vst [vmem:[#allocation85_spill] sm:$0xff] %v4200_v56  ;;  %v376_v62 = vmul.f32 %v375_v55, %v4094_v3  ;;  %v377_v1 = vmul.f32 %v375_v55, %v4096_v4  ;;  %v378_v2 = vstv %s6980_s9  ;;  %v4209_v6 = vmax.f32 %v331_v30, 0.0  ;;  %s4223_s9 = sld [smem:[#allocation2 + $0x78]] }
  0xb6   : >> { %v4211_v7 = vmax.f32 %v332_v31, 0.0  ;;  %v364_v8 = vadd.f32 %v362_v49, %v361_v46  ;;  %v371_v12 = vadd.f32 %v370_v54, %v368_v50  ;;  %v4217_v14 = vmax.f32 %v339_v37, 0.0 }
  0xb7   : >> { %6983 = vst [vmem:[#allocation86_spill] sm:$0xff] %v4209_v6  ;;  %v4219_v15 = vmax.f32 %v340_v42, 0.0  ;;  %v4221_v16 = vmax.f32 %v347_v45, 0.0  ;;  %v372_v18 = vadd.f32 %v370_v54, %v369_v53  ;;  %v4225_v19 = vmax.f32 %v348_v57, 0.0 }
  0xb8   : >> { %6984 = vst [vmem:[#allocation87_spill] sm:$0xff] %v4211_v7  ;;  %6987 = vst [vmem:[#allocation88_spill] sm:$0xff] %v4217_v14  ;;  %v4227_v20 = vmax.f32 %v355_v58, 0.0  ;;  %v379_v22 = vadd.f32 %v378_v2, %v376_v62  ;;  %v383_v23 = vstv %s6982_s10  ;;  %v4230_v24 = vmax.f32 %v356_v60, 0.0  ;;  %s4266_s10 = sld [smem:[#allocation2 + $0xc8]] }
  0xb9   : >> { %v4232_v25 = vmax.f32 %v363_v61, 0.0  ;;  %v380_v26 = vadd.f32 %v378_v2, %v377_v1  ;;  %v391_v27 = vstv %s6985_s2  ;;  %v4235_v28 = vmax.f32 %v364_v8, 0.0  ;;  %s4293_s2 = sld [smem:[#allocation2 + $0x140]] }
  0xba   : >> { %6989 = vst [vmem:[#allocation89_spill] sm:$0xff] %v4227_v20  ;;  %6990 = vst [vmem:[#allocation90_spill] sm:$0xff] %v4230_v24  ;;  %v4237_v30 = vmax.f32 %v371_v12, 0.0  ;;  %v386_v31 = vstv %s6986_s6  ;;  %v394_v32 = vstv %s6988_s11  ;;  %v4243_v34 = vmax.f32 %v372_v18, 0.0  ;;  %s4253_s11 = sld [smem:[#allocation2 + $0xa0]]  ;;  %s4319_s6 = sld [smem:[#allocation2 + $0x29]] }
  0xbb   : >> { %6991 = vst [vmem:[#allocation91_spill] sm:$0xff] %v4232_v25  ;;  %6993 = vst [vmem:[#allocation92_spill] sm:$0xff] %v4235_v28  ;;  %v384_v35 = vmul.f32 %v383_v23, %v4094_v3  ;;  %v385_v36 = vmul.f32 %v383_v23, %v4096_v4  ;;  %v408_v37 = vstv %s4198_s7  ;;  %v4248_v38 = vmax.f32 %v379_v22, 0.0  ;;  %s4264_s7 = sld [smem:[#allocation2 + $0xb4]] }
  0xbc   : >> { %6994 = vst [vmem:[#allocation93_spill] sm:$0xff] %v4237_v30  ;;  %6996 = vst [vmem:[#allocation94_spill] sm:$0xff] %v4243_v34  ;;  %v392_v40 = vmul.f32 %v391_v27, %v4094_v3  ;;  %v393_v41 = vmul.f32 %v391_v27, %v4096_v4  ;;  %v412_v42 = vstv %s4202_s28  ;;  %v4255_v45 = vmax.f32 %v380_v26, 0.0  ;;  %s4281_s28 = sld [smem:[#allocation2 + $0x104]] }
  0xbd   : >> { %6997 = vst [vmem:[#allocation95_spill] sm:$0xff] %v4248_v38  ;;  %v399_v46 = vstv %s6992_s12  ;;  %v409_v49 = vmul.f32 %v408_v37, %v4125_v39  ;;  %v410_v50 = vmul.f32 %v408_v37, %v4129_v43  ;;  %v402_v53 = vstv %s6995_s13  ;;  %s4273_s12 = sld [smem:[#allocation2 + $0xdc]]  ;;  %s4279_s13 = sld [smem:[#allocation2 + $0xf0]] }
  0xbe   : >> { %6998 = vst [vmem:[#allocation96_spill] sm:$0xff] %v4255_v45  ;;  %v416_v54 = vstv %s4207_s1  ;;  %v422_v55 = vstv %s4213_s4  ;;  %v428_v57 = vstv %s4215_s5  ;;  %v387_v58 = vadd.f32 %v386_v31, %v384_v35  ;;  %s4287_s1 = sld [smem:[#allocation2 + $0x118]]  ;;  %s4301_s4 = sld [smem:[#allocation2 + $0x154]] }
  0xbf   : >> { %v413_v60 = vadd.f32 %v412_v42, %v409_v49  ;;  %v414_v61 = vadd.f32 %v412_v42, %v410_v50  ;;  %v434_v62 = vstv %s4223_s9  ;;  %v417_v1 = vmul.f32 %v416_v54, %v4131_v44  ;;  %s4312_s5 = sld [smem:[#allocation2 + $0x168]]  ;;  %s4321_s9 = sld [smem:[#allocation2 + $0x1b9]] }
  0xc0   : >> { %v418_v2 = vmul.f32 %v416_v54, %v4135_v47  ;;  %v423_v8 = vmul.f32 %v422_v55, %v4137_v48  ;;  %v424_v12 = vmul.f32 %v422_v55, %v4139_v51  ;;  %v388_v18 = vadd.f32 %v386_v31, %v385_v36 }
  0xc1   : >> { %v395_v22 = vadd.f32 %v394_v32, %v392_v40  ;;  %v400_v23 = vmul.f32 %v399_v46, %v4094_v3  ;;  %v429_v26 = vmul.f32 %v428_v57, %v4141_v52  ;;  %v419_v27 = vadd.f32 %v417_v1, %v413_v60 }
  0xc2   : >> { %v420_v35 = vadd.f32 %v418_v2, %v414_v61  ;;  %v430_v37 = vmul.f32 %v428_v57, %v4145_v59  ;;  %v440_v42 = vstv %s4241_s15  ;;  %v4283_v49 = vmax.f32 %v387_v58, 0.0  ;;  %s4291_s15 = sld [smem:[#allocation2 + $0x12c]] }
  0xc3   : >> { %v396_v50 = vadd.f32 %v394_v32, %v393_v41  ;;  %v401_v31 = vmul.f32 %v399_v46, %v4096_v4  ;;  %v435_v3 = vmul.f32 %v434_v62, %v4148_v63  ;;  %v425_v36 = vadd.f32 %v423_v8, %v419_v27 }
  0xc4   : >> { %6999 = vst [vmem:[#allocation97_spill] sm:$0xff] %v4283_v49  ;;  %v426_v40 = vadd.f32 %v424_v12, %v420_v35  ;;  %v436_v54 = vmul.f32 %v434_v62, %v4150_v0  ;;  %v446_v55 = vstv %s4253_s11  ;;  %v4295_v57 = vmax.f32 %v388_v18, 0.0  ;;  %s4325_s11 = sld [smem:[#allocation2 + $0x3d]] }
  0xc5   : >> { %v403_v32 = vadd.f32 %v402_v53, %v400_v23  ;;  %v441_v4 = vmul.f32 %v440_v42, %v4154_v5  ;;  %v442_v41 = vmul.f32 %v440_v42, %v4158_v9  ;;  %v431_v46 = vadd.f32 %v429_v26, %v425_v36 }
  0xc6   : >> { %7000 = vst [vmem:[#allocation98_spill] sm:$0xff] %v4295_v57  ;;  %v432_v58 = vadd.f32 %v430_v37, %v426_v40  ;;  %v452_v60 = vstv %s4264_s7  ;;  %v458_v61 = vstv %s4266_s10  ;;  %v4303_v62 = vmax.f32 %v395_v22, 0.0  ;;  %s4327_s7 = sld [smem:[#allocation2 + $0x51]]  ;;  %s4333_s10 = sld [smem:[#allocation2 + $0x65]] }
  0xc7   : >> { %v4305_v1 = vmax.f32 %v396_v50, 0.0  ;;  %v4307_v2 = vadd.f32 %v402_v53, %v401_v31  ;;  %v447_v8 = vmul.f32 %v446_v55, %v4160_v10  ;;  %v437_v12 = vadd.f32 %v435_v3, %v431_v46 }
  0xc8   : >> { %7001 = vst [vmem:[#allocation99_spill] sm:$0xff] %v4303_v62  ;;  %v438_v18 = vadd.f32 %v436_v54, %v432_v58  ;;  %v448_v23 = vmul.f32 %v446_v55, %v4162_v11  ;;  %v464_v26 = vstv %s4273_s12  ;;  %v4314_v27 = vmax.f32 %v403_v32, 0.0  ;;  %s4335_s12 = sld [smem:[#allocation2 + $0x79]] }
  0xc9   : >> { %v453_v22 = vmul.f32 %v452_v60, %v4165_v13  ;;  %v454_v35 = vmul.f32 %v452_v60, %v4169_v17  ;;  %v459_v53 = vmul.f32 %v458_v61, %v4173_v21  ;;  %v443_v37 = vadd.f32 %v441_v4, %v437_v12 }
  0xca   : >> { %7002 = vst [vmem:[#allocation100_spill] sm:$0xff] %v4314_v27  ;;  %v444_v42 = vadd.f32 %v442_v41, %v438_v18  ;;  %v470_v50 = vstv %s4279_s13  ;;  %v476_v31 = vstv %s4281_s28  ;;  %v460_v3 = vmul.f32 %v458_v61, %v4181_v29  ;;  %s4351_s13 = sld [smem:[#allocation2 + $0x8d]]  ;;  %s4357_s28 = sld [smem:[#allocation2 + $0xa1]] }
  0xcb   : >> { %v465_v36 = vmul.f32 %v464_v26, %v4184_v33  ;;  %v466_v40 = vmul.f32 %v464_v26, %v4200_v56  ;;  %v482_v54 = vstv %s4287_s1  ;;  %v449_v55 = vadd.f32 %v447_v8, %v443_v37  ;;  %s4359_s1 = sld [smem:[#allocation2 + $0x17c]] }
  0xcc   : >> { %v450_v32 = vadd.f32 %v448_v23, %v444_v42  ;;  %v488_v4 = vstv %s4291_s15  ;;  %v494_v41 = vstv %s4293_s2  ;;  %v471_v46 = vmul.f32 %v470_v50, %v4209_v6  ;;  %s4361_s15 = sld [smem:[#allocation2 + $0x190]]  ;;  %s4369_s2 = sld [smem:[#allocation2 + $0xb5]] }
  0xcd   : >> { %v472_v58 = vmul.f32 %v470_v50, %v4211_v7  ;;  %v477_v60 = vmul.f32 %v476_v31, %v4217_v14  ;;  %v478_v61 = vmul.f32 %v476_v31, %v4219_v15  ;;  %v455_v12 = vadd.f32 %v453_v22, %v449_v55 }
  0xce   : >> { %v456_v18 = vadd.f32 %v454_v35, %v450_v32  ;;  %v483_v26 = vmul.f32 %v482_v54, %v4221_v16  ;;  %v500_v27 = vstv %s4301_s4  ;;  %v484_v8 = vmul.f32 %v482_v54, %v4225_v19  ;;  %s4375_s4 = sld [smem:[#allocation2 + $0xc9]] }
  0xcf   : >> { %v489_v23 = vmul.f32 %v488_v4, %v4227_v20  ;;  %v490_v37 = vmul.f32 %v488_v4, %v4230_v24  ;;  %v495_v42 = vmul.f32 %v494_v41, %v4232_v25  ;;  %v461_v50 = vadd.f32 %v459_v53, %v455_v12 }
  0xd0   : >> { %v462_v14 = vadd.f32 %v460_v3, %v456_v18  ;;  %v496_v31 = vmul.f32 %v494_v41, %v4235_v28  ;;  %v506_v22 = vstv %s4312_s5  ;;  %v501_v35 = vmul.f32 %v500_v27, %v4237_v30  ;;  %s4383_s5 = sld [smem:[#allocation2 + $0xdd]] }
  0xd1   : >> { %v502_v54 = vmul.f32 %v500_v27, %v4243_v34  ;;  %v535_v55 = vstv %s4319_s6  ;;  %v539_v32 = vstv %s4321_s9  ;;  %v467_v4 = vadd.f32 %v465_v36, %v461_v50  ;;  %s4387_s6 = sld [smem:[#allocation2 + $0xf1]]  ;;  %s4391_s9 = sld [smem:[#allocation2 + $0x1a4]] }
  0xd2   : >> { %v468_v53 = vadd.f32 %v466_v40, %v462_v14  ;;  %v536_v3 = vmul.f32 %v535_v55, %v4125_v39  ;;  %v537_v41 = vmul.f32 %v535_v55, %v4129_v43  ;;  %v543_v12 = vstv %s4325_s11  ;;  %s4397_s11 = sld [smem:[#allocation2 + $0x105]] }
  0xd3   : >> { %v549_v18 = vstv %s4327_s7  ;;  %v555_v28 = vstv %s4333_s10  ;;  %v561_v30 = vstv %s4335_s12  ;;  %v473_v25 = vadd.f32 %v471_v46, %v467_v4  ;;  %s4401_s7 = sld [smem:[#allocation2 + $0x119]]  ;;  %s4409_s10 = sld [smem:[#allocation2 + $0x12d]] }
  0xd4   : >> { %v474_v27 = vadd.f32 %v472_v58, %v468_v53  ;;  %v540_v34 = vadd.f32 %v539_v32, %v536_v3  ;;  %v541_v24 = vadd.f32 %v539_v32, %v537_v41  ;;  %v544_v14 = vmul.f32 %v543_v12, %v4131_v44  ;;  %s4413_s12 = sld [smem:[#allocation2 + $0x141]] }
  0xd5   : >> { %v545_v36 = vmul.f32 %v543_v12, %v4135_v47  ;;  %v550_v40 = vmul.f32 %v549_v18, %v4137_v48  ;;  %v551_v50 = vmul.f32 %v549_v18, %v4139_v51  ;;  %v479_v55 = vadd.f32 %v477_v60, %v473_v25 }
  0xd6   : >> { %v480_v43 = vadd.f32 %v478_v61, %v474_v27  ;;  %v507_v46 = vmul.f32 %v506_v22, %v4248_v38  ;;  %v508_v58 = vmul.f32 %v506_v22, %v4255_v45  ;;  %v546_v32 = vadd.f32 %v544_v14, %v540_v34 }
  0xd7   : >> { %v547_v4 = vadd.f32 %v545_v36, %v541_v24  ;;  %v556_v53 = vmul.f32 %v555_v28, %v4141_v52  ;;  %v557_v3 = vmul.f32 %v555_v28, %v4145_v59  ;;  %v485_v41 = vadd.f32 %v483_v26, %v479_v55 }
  0xd8   : >> { %v486_v12 = vadd.f32 %v484_v8, %v480_v43  ;;  %v562_v18 = vmul.f32 %v561_v30, %v4148_v63  ;;  %v567_v51 = vstv %s4351_s13  ;;  %v552_v25 = vadd.f32 %v550_v40, %v546_v32  ;;  %s4425_s13 = sld [smem:[#allocation2 + $0x155]] }
  0xd9   : >> { %v553_v60 = vadd.f32 %v551_v50, %v547_v4  ;;  %v563_v61 = vmul.f32 %v561_v30, %v4150_v0  ;;  %v573_v34 = vstv %s4357_s28  ;;  %v491_v24 = vadd.f32 %v489_v23, %v485_v41  ;;  %s4427_s28 = sld [smem:[#allocation2 + $0x169]] }
  0xda   : >> { %v492_v22 = vadd.f32 %v490_v37, %v486_v12  ;;  %v512_v27 = vstv %s4359_s1  ;;  %v518_v28 = vstv %s4361_s15  ;;  %v558_v43 = vadd.f32 %v556_v53, %v552_v25  ;;  %s4431_s1 = sld [smem:[#allocation2 + $0x2a]] }
  0xdb   : >> { %v559_v26 = vadd.f32 %v557_v3, %v553_v60  ;;  %v568_v8 = vmul.f32 %v567_v51, %v4154_v5  ;;  %v569_v14 = vmul.f32 %v567_v51, %v4158_v9  ;;  %v497_v36 = vadd.f32 %v495_v42, %v491_v24  ;;  %s4433_s15 = sld [smem:[#allocation2 + $0x1ba]] }
  0xdc   : >> { %v498_v40 = vadd.f32 %v496_v31, %v492_v22  ;;  %v574_v30 = vmul.f32 %v573_v34, %v4160_v10  ;;  %v579_v50 = vstv %s4369_s2  ;;  %v564_v23 = vadd.f32 %v562_v18, %v558_v43  ;;  %s7005_s2 = sld [smem:[#allocation55_spill]] }
  0xdd   : >> { %v565_v37 = vadd.f32 %v563_v61, %v559_v26  ;;  %v575_v55 = vmul.f32 %v573_v34, %v4162_v11  ;;  %v585_v32 = vstv %s4375_s4  ;;  %v503_v4 = vadd.f32 %v501_v35, %v497_v36  ;;  %s4437_s4 = sld [smem:[#allocation2 + $0x3e]] }
  0xde   : >> { %v504_v53 = vadd.f32 %v502_v54, %v498_v40  ;;  %v513_v51 = vmul.f32 %v512_v27, %v4283_v49  ;;  %v514_v42 = vmul.f32 %v512_v27, %v4295_v57  ;;  %v570_v31 = vadd.f32 %v568_v8, %v564_v23 }
  0xdf   : >> { %v571_v3 = vadd.f32 %v569_v14, %v565_v37  ;;  %v580_v41 = vmul.f32 %v579_v50, %v4165_v13  ;;  %v581_v12 = vmul.f32 %v579_v50, %v4169_v17  ;;  %v509_v18 = vadd.f32 %v507_v46, %v503_v4 }
  0xe0   : >> { %v510_v25 = vadd.f32 %v508_v58, %v504_v53  ;;  %v586_v60 = vmul.f32 %v585_v32, %v4173_v21  ;;  %v591_v61 = vstv %s4383_s5  ;;  %v576_v35 = vadd.f32 %v574_v30, %v570_v31  ;;  %s4439_s5 = sld [smem:[#allocation2 + $0x52]] }
  0xe1   : >> { %v577_v54 = vadd.f32 %v575_v55, %v571_v3  ;;  %v587_v34 = vmul.f32 %v585_v32, %v4181_v29  ;;  %v597_v24 = vstv %s4387_s6  ;;  %v4416_v22 = vmax.f32 %v4307_v2, 0.0  ;;  %v7004_v55 = vld [vmem:[#allocation100_spill] sm:$0xff]  ;;  %s4448_s6 = sld [smem:[#allocation2 + $0x66]] }
  0xe2   : >> { %v519_v27 = vmul.f32 %v518_v28, %v4303_v62  ;;  %v520_v46 = vmul.f32 %v518_v28, %v4305_v1  ;;  %v524_v58 = vstv %s4391_s9  ;;  %v582_v43 = vadd.f32 %v580_v41, %v576_v35  ;;  %s4450_s9 = sld [smem:[#allocation2 + $0x7a]] }
  0xe3   : >> { %7003 = vst [vmem:[#allocation101_spill] sm:$0xff] %v4416_v22  ;;  %v583_v26 = vadd.f32 %v581_v12, %v577_v54  ;;  %v592_v8 = vmul.f32 %v591_v61, %v4184_v33  ;;  %v593_v14 = vmul.f32 %v591_v61, %v4200_v56  ;;  %v515_v36 = vadd.f32 %v513_v51, %v509_v18 }
  0xe4   : >> { %v516_v40 = vadd.f32 %v514_v42, %v510_v25  ;;  %v598_v30 = vmul.f32 %v597_v24, %v4209_v6  ;;  %v603_v50 = vstv %s4397_s11  ;;  %v588_v2 = vadd.f32 %v586_v60, %v582_v43  ;;  %v7006_v42 = vld [vmem:[#allocation88_spill] sm:$0xff]  ;;  %s4454_s11 = sld [smem:[#allocation2 + $0x17d]] }
  0xe5   : >> { %v589_v23 = vadd.f32 %v587_v34, %v583_v26  ;;  %v599_v28 = vmul.f32 %v597_v24, %v4211_v7  ;;  %v609_v37 = vstv %s4401_s7  ;;  %v525_v32 = vmul.f32 %v524_v58, %v7004_v55  ;;  %s4462_s7 = sld [smem:[#allocation2 + $0x8e]] }
  0xe6   : >> { %v526_v4 = vmul.f32 %v524_v58, %v4416_v22  ;;  %v594_v53 = vadd.f32 %v592_v8, %v588_v2  ;;  %v604_v31 = vmul.f32 %v603_v50, %v7006_v42  ;;  %v605_v3 = vmul.f32 %v603_v50, %v4219_v15  ;;  %v7007_v58 = vld [vmem:[#allocation90_spill] sm:$0xff] }
  0xe7   : >> { %v595_v51 = vadd.f32 %v593_v14, %v589_v23  ;;  %v521_v41 = vadd.f32 %v519_v27, %v515_v36  ;;  %v522_v12 = vadd.f32 %v520_v46, %v516_v40  ;;  %v610_v18 = vmul.f32 %v609_v37, %v4221_v16  ;;  %v7008_v14 = vld [vmem:[#allocation91_spill] sm:$0xff]  ;;  %v7009_v40 = vld [vmem:[#allocation92_spill] sm:$0xff] }
  0xe8   : >> { %v615_v25 = vstv %s4409_s10  ;;  %v600_v60 = vadd.f32 %v598_v30, %v594_v53  ;;  %v611_v35 = vmul.f32 %v609_v37, %v4225_v19  ;;  %v621_v54 = vstv %s4413_s12  ;;  %s4466_s10 = sld [smem:[#allocation2 + $0x191]]  ;;  %s4472_s12 = sld [smem:[#allocation2 + $0xa2]] }
  0xe9   : >> { %v601_v61 = vadd.f32 %v599_v28, %v595_v51  ;;  %v616_v46 = vmul.f32 %v615_v25, %v4227_v20  ;;  %v617_v43 = vmul.f32 %v615_v25, %v7007_v58  ;;  %v4456_v26 = vadd.f32 %v525_v32, %v521_v41  ;;  %v7010_v41 = vld [vmem:[#allocation70_spill] sm:$0xff] }
  0xea   : >> { %v606_v24 = vadd.f32 %v604_v31, %v600_v60  ;;  %v4458_v8 = vadd.f32 %v526_v4, %v522_v12  ;;  %v622_v36 = vmul.f32 %v621_v54, %v7008_v14  ;;  %v623_v30 = vmul.f32 %v621_v54, %v7009_v40 }
  0xeb   : >> { %v607_v27 = vadd.f32 %v605_v3, %v601_v61  ;;  %v627_v23 = vstv %s4425_s13  ;;  %v633_v28 = vstv %s4427_s28  ;;  %v664_v37 = vstv %s4431_s1  ;;  %s4480_s13 = sld [smem:[#allocation2 + $0xb6]]  ;;  %s4486_s28 = sld [smem:[#allocation2 + $0xca]] }
  0xec   : >> { %v612_v50 = vadd.f32 %v610_v18, %v606_v24  ;;  %v668_v53 = vstv %s4433_s15  ;;  %v672_v51 = vstv %s4437_s4  ;;  %v678_v31 = vstv %s4439_s5  ;;  %v7011_v18 = vld [vmem:[#allocation93_spill] sm:$0xff]  ;;  %s4490_s1 = sld [smem:[#allocation2 + $0x1a5]]  ;;  %s4495_s15 = sld [smem:[#allocation2 + $0xde]] }
  0xed   : >> { %v613_v2 = vadd.f32 %v611_v35, %v607_v27  ;;  %v665_v3 = vmul.f32 %v664_v37, %v4125_v39  ;;  %v666_v12 = vmul.f32 %v664_v37, %v7010_v41  ;;  %v628_v25 = vmul.f32 %v627_v23, %v7011_v18  ;;  %s4497_s4 = sld [smem:[#allocation2 + $0xf2]]  ;;  %s4509_s5 = sld [smem:[#allocation2 + $0x106]] }
  0xee   : >> { %v618_v32 = vadd.f32 %v616_v46, %v612_v50  ;;  %v673_v60 = vmul.f32 %v672_v51, %v4131_v44  ;;  %v674_v61 = vmul.f32 %v672_v51, %v4135_v47  ;;  %v679_v35 = vmul.f32 %v678_v31, %v4137_v48  ;;  %v7012_v46 = vld [vmem:[#allocation74_spill] sm:$0xff] }
  0xef   : >> { %v619_v4 = vadd.f32 %v617_v43, %v613_v2  ;;  %v669_v24 = vadd.f32 %v668_v53, %v665_v3  ;;  %v670_v27 = vadd.f32 %v668_v53, %v666_v12  ;;  %v680_v43 = vmul.f32 %v678_v31, %v7012_v46  ;;  %v7013_v2 = vld [vmem:[#allocation94_spill] sm:$0xff] }
  0xf0   : >> { %v624_v54 = vadd.f32 %v622_v36, %v618_v32  ;;  %v629_v37 = vmul.f32 %v627_v23, %v7013_v2  ;;  %v684_v34 = vstv %s4448_s6  ;;  %v690_v41 = vstv %s4450_s9  ;;  %s4513_s6 = sld [smem:[#allocation2 + $0x11a]]  ;;  %s4518_s9 = sld [smem:[#allocation2 + $0x12e]] }
  0xf1   : >> { %v625_v50 = vadd.f32 %v623_v30, %v619_v4  ;;  %v634_v44 = vmul.f32 %v633_v28, %v4248_v38  ;;  %v639_v51 = vstv %s4454_s11  ;;  %v675_v36 = vadd.f32 %v673_v60, %v669_v24  ;;  %s4520_s11 = sld [smem:[#allocation2 + $0x142]] }
  0xf2   : >> { %v676_v32 = vadd.f32 %v674_v61, %v670_v27  ;;  %v630_v3 = vadd.f32 %v628_v25, %v624_v54  ;;  %v685_v53 = vmul.f32 %v684_v34, %v4141_v52  ;;  %v686_v30 = vmul.f32 %v684_v34, %v4145_v59 }
  0xf3   : >> { %v696_v31 = vstv %s4462_s7  ;;  %v681_v23 = vadd.f32 %v679_v35, %v675_v36  ;;  %v691_v12 = vmul.f32 %v690_v41, %v4148_v63  ;;  %v692_v46 = vmul.f32 %v690_v41, %v4150_v0  ;;  %s4527_s7 = sld [smem:[#allocation2 + $0x156]] }
  0xf4   : >> { %v682_v4 = vadd.f32 %v680_v43, %v676_v32  ;;  %v631_v48 = vadd.f32 %v629_v37, %v625_v50  ;;  %v635_v60 = vmul.f32 %v633_v28, %v4255_v45  ;;  %v645_v25 = vstv %s4466_s10  ;;  %s4531_s10 = sld [smem:[#allocation2 + $0x16a]] }
  0xf5   : >> { %v702_v61 = vstv %s4472_s12  ;;  %v687_v54 = vadd.f32 %v685_v53, %v681_v23  ;;  %v697_v34 = vmul.f32 %v696_v31, %v4154_v5  ;;  %v698_v27 = vmul.f32 %v696_v31, %v4158_v9  ;;  %s4544_s12 = sld [smem:[#allocation2 + $0x2b]] }
  0xf6   : >> { %v688_v24 = vadd.f32 %v686_v30, %v682_v4  ;;  %v529_v59 = vmax.f32 %v4456_v26, 0.0  ;;  %v636_v35 = vadd.f32 %v634_v44, %v630_v3  ;;  %v640_v43 = vmul.f32 %v639_v51, %v4283_v49 }
  0xf7   : >> { %v708_v36 = vstv %s4480_s13  ;;  %v693_v41 = vadd.f32 %v691_v12, %v687_v54  ;;  %v703_v50 = vmul.f32 %v702_v61, %v4160_v10  ;;  %v704_v37 = vmul.f32 %v702_v61, %v4162_v11  ;;  %s4546_s13 = sld [smem:[#allocation2 + $0x1bb]] }
  0xf8   : >> { %v694_v28 = vadd.f32 %v692_v46, %v688_v24  ;;  %v637_v32 = vadd.f32 %v635_v60, %v631_v48  ;;  %v641_v26 = vmul.f32 %v639_v51, %v4295_v57  ;;  %v646_v44 = vmul.f32 %v645_v25, %v4303_v62 }
  0xf9   : >> { %v714_v3 = vstv %s4486_s28  ;;  %v699_v46 = vadd.f32 %v697_v34, %v693_v41  ;;  %v709_v30 = vmul.f32 %v708_v36, %v4165_v13  ;;  %v710_v31 = vmul.f32 %v708_v36, %v4169_v17  ;;  %s7015_s28 = sld [smem:[#allocation56_spill]] }
  0xfa   : >> { %v700_v53 = vadd.f32 %v698_v27, %v694_v28  ;;  %v642_v23 = vadd.f32 %v640_v43, %v636_v35  ;;  %v651_v4 = vstv %s4490_s1  ;;  %v720_v12 = vstv %s4495_s15  ;;  %s4550_s1 = sld [smem:[#allocation2 + $0x3f]]  ;;  %s4552_s15 = sld [smem:[#allocation2 + $0x53]] }
  0xfb   : >> { %v726_v48 = vstv %s4497_s4  ;;  %v705_v51 = vadd.f32 %v703_v50, %v699_v46  ;;  %v715_v61 = vmul.f32 %v714_v3, %v4173_v21  ;;  %v716_v54 = vmul.f32 %v714_v3, %v4181_v29  ;;  %s4557_s4 = sld [smem:[#allocation2 + $0x67]] }
  0xfc   : >> { %v706_v60 = vadd.f32 %v704_v37, %v700_v53  ;;  %v7014_v34 = vstv %s7005_s2  ;;  %v643_v35 = vadd.f32 %v641_v26, %v637_v32  ;;  %v647_v43 = vmul.f32 %v645_v25, %v4305_v1 }
  0xfd   : >> { %v4536_v27 = vmul.f32 %v7014_v34, %v529_v59  ;;  %v711_v36 = vadd.f32 %v709_v30, %v705_v51  ;;  %v721_v28 = vmul.f32 %v720_v12, %v4184_v33  ;;  %v722_v50 = vmul.f32 %v720_v12, %v4200_v56 }
  0xfe   : >> { %v712_v41 = vadd.f32 %v710_v31, %v706_v60  ;;  %v648_v37 = vadd.f32 %v646_v44, %v642_v23  ;;  %v652_v3 = vmul.f32 %v651_v4, %v7004_v55  ;;  %v727_v46 = vmul.f32 %v726_v48, %v4209_v6 }
  0xff   : >> { %v732_v53 = vstv %s4509_s5  ;;  %v717_v59 = vadd.f32 %v715_v61, %v711_v36  ;;  %v728_v32 = vmul.f32 %v726_v48, %v4211_v7  ;;  %v738_v26 = vstv %s4513_s6  ;;  %s4559_s5 = sld [smem:[#allocation2 + $0x7b]]  ;;  %s4570_s6 = sld [smem:[#allocation2 + $0x17e]] }
 0x100   : >> { %v718_v25 = vadd.f32 %v716_v54, %v712_v41  ;;  %v649_v44 = vadd.f32 %v647_v43, %v643_v35  ;;  %v653_v30 = vmul.f32 %v651_v4, %v4416_v22  ;;  %v744_v31 = vstv %s4518_s9  ;;  %s4579_s9 = sld [smem:[#allocation2 + $0x192]] }
 0x101   : >> { %v750_v23 = vstv %s4520_s11  ;;  %v723_v12 = vadd.f32 %v721_v28, %v717_v59  ;;  %v733_v48 = vmul.f32 %v732_v53, %v7006_v42  ;;  %v734_v60 = vmul.f32 %v732_v53, %v4219_v15  ;;  %s4581_s11 = sld [smem:[#allocation2 + $0x8f]] }
 0x102   : >> { %v724_v51 = vadd.f32 %v722_v50, %v718_v25  ;;  %v4563_v61 = vadd.f32 %v652_v3, %v648_v37  ;;  %v739_v34 = vmul.f32 %v738_v26, %v4221_v16  ;;  %v756_v35 = vstv %s4527_s7  ;;  %s4587_s7 = sld [smem:[#allocation2 + $0xa3]] }
 0x103   : >> { %v729_v4 = vadd.f32 %v727_v46, %v723_v12  ;;  %v740_v36 = vmul.f32 %v738_v26, %v4225_v19  ;;  %v762_v41 = vstv %s4531_s10  ;;  %v4572_v28 = vadd.f32 %v653_v30, %v649_v44  ;;  %s4595_s10 = sld [smem:[#allocation2 + $0xb7]] }
 0x104   : >> { %v730_v43 = vadd.f32 %v728_v32, %v724_v51  ;;  %v745_v50 = vmul.f32 %v744_v31, %v4227_v20  ;;  %v746_v37 = vmul.f32 %v744_v31, %v7007_v58  ;;  %v751_v3 = vmul.f32 %v750_v23, %v7008_v14 }
 0x105   : >> { %v735_v53 = vadd.f32 %v733_v48, %v729_v4  ;;  %v752_v59 = vmul.f32 %v750_v23, %v7009_v40  ;;  %v757_v25 = vmul.f32 %v756_v35, %v7011_v18  ;;  %v758_v32 = vmul.f32 %v756_v35, %v7013_v2  ;;  %v7016_v23 = vld [vmem:[#allocation70_spill] sm:$0xff]  ;;  %v7017_v18 = vld [vmem:[#allocation71_spill] sm:$0xff] }
 0x106   : >> { %v736_v46 = vadd.f32 %v734_v60, %v730_v43  ;;  %v763_v26 = vmul.f32 %v762_v41, %v4248_v38  ;;  %v793_v44 = vstv %s4544_s12  ;;  %v797_v30 = vstv %s4546_s13  ;;  %s4601_s12 = sld [smem:[#allocation2 + $0xcb]]  ;;  %s4605_s13 = sld [smem:[#allocation2 + $0x1a6]] }
 0x107   : >> { %v741_v31 = vadd.f32 %v739_v34, %v735_v53  ;;  %v794_v51 = vmul.f32 %v793_v44, %v4125_v39  ;;  %v795_v48 = vmul.f32 %v793_v44, %v7016_v23  ;;  %v801_v60 = vstv %s4550_s1  ;;  %s4609_s1 = sld [smem:[#allocation2 + $0xdf]] }
 0x108   : >> { %v742_v12 = vadd.f32 %v740_v36, %v736_v46  ;;  %v807_v4 = vstv %s4552_s15  ;;  %v813_v43 = vstv %s4557_s4  ;;  %v819_v24 = vstv %s4559_s5  ;;  %v7018_v36 = vld [vmem:[#allocation73_spill] sm:$0xff]  ;;  %v7019_v46 = vld [vmem:[#allocation74_spill] sm:$0xff]  ;;  %s4616_s15 = sld [smem:[#allocation2 + $0xf3]]  ;;  %s4622_s4 = sld [smem:[#allocation2 + $0x107]] }
 0x109   : >> { %v747_v35 = vadd.f32 %v745_v50, %v741_v31  ;;  %v798_v38 = vadd.f32 %v797_v30, %v794_v51  ;;  %v799_v2 = vadd.f32 %v797_v30, %v795_v48  ;;  %v802_v40 = vmul.f32 %v801_v60, %v7017_v18  ;;  %v7020_v51 = vld [vmem:[#allocation76_spill] sm:$0xff]  ;;  %s4630_s5 = sld [smem:[#allocation2 + $0x11b]] }
 0x10a   : >> { %v748_v54 = vadd.f32 %v746_v37, %v742_v12  ;;  %v803_v34 = vmul.f32 %v801_v60, %v4135_v47  ;;  %v808_v53 = vmul.f32 %v807_v4, %v7018_v36  ;;  %v809_v44 = vmul.f32 %v807_v4, %v7019_v46 }
 0x10b   : >> { %v753_v23 = vadd.f32 %v751_v3, %v747_v35  ;;  %v764_v50 = vmul.f32 %v762_v41, %v4255_v45  ;;  %v768_v37 = vstv %s4570_s6  ;;  %v804_v30 = vadd.f32 %v802_v40, %v798_v38  ;;  %s4636_s6 = sld [smem:[#allocation2 + $0x12f]] }
 0x10c   : >> { %v754_v39 = vadd.f32 %v752_v59, %v748_v54  ;;  %v805_v31 = vadd.f32 %v803_v34, %v799_v2  ;;  %v814_v12 = vmul.f32 %v813_v43, %v4141_v52  ;;  %v815_v48 = vmul.f32 %v813_v43, %v7020_v51 }
 0x10d   : >> { %v759_v60 = vadd.f32 %v757_v25, %v753_v23  ;;  %v774_v4 = vstv %s4579_s9  ;;  %v820_v3 = vmul.f32 %v819_v24, %v4148_v63  ;;  %v825_v54 = vstv %s4581_s11  ;;  %s4643_s9 = sld [smem:[#allocation2 + $0x143]]  ;;  %s4647_s11 = sld [smem:[#allocation2 + $0x157]] }
 0x10e   : >> { %v810_v59 = vadd.f32 %v808_v53, %v804_v30  ;;  %v811_v35 = vadd.f32 %v809_v44, %v805_v31  ;;  %v821_v41 = vmul.f32 %v819_v24, %v4150_v0  ;;  %v831_v45 = vstv %s4587_s7  ;;  %s4653_s7 = sld [smem:[#allocation2 + $0x16b]] }
 0x10f   : >> { %v760_v38 = vadd.f32 %v758_v32, %v754_v39  ;;  %v765_v40 = vadd.f32 %v763_v26, %v759_v60  ;;  %v769_v2 = vmul.f32 %v768_v37, %v4283_v49  ;;  %v826_v43 = vmul.f32 %v825_v54, %v4154_v5 }
 0x110   : >> { %v816_v25 = vadd.f32 %v814_v12, %v810_v59  ;;  %v817_v23 = vadd.f32 %v815_v48, %v811_v35  ;;  %v827_v34 = vmul.f32 %v825_v54, %v4158_v9  ;;  %v837_v63 = vstv %s4595_s10  ;;  %s4665_s10 = sld [smem:[#allocation2 + $0x2c]] }
 0x111   : >> { %v656_v24 = vmax.f32 %v4563_v61, 0.0  ;;  %v770_v53 = vmul.f32 %v768_v37, %v4295_v57  ;;  %v775_v39 = vmul.f32 %v774_v4, %v4303_v62  ;;  %v832_v32 = vmul.f32 %v831_v45, %v4160_v10 }
 0x112   : >> { %v822_v26 = vadd.f32 %v820_v3, %v816_v25  ;;  %v823_v44 = vadd.f32 %v821_v41, %v817_v23  ;;  %v833_v30 = vmul.f32 %v831_v45, %v4162_v11  ;;  %v843_v31 = vstv %s4601_s12  ;;  %s4667_s12 = sld [smem:[#allocation2 + $0x1bc]] }
 0x113   : >> { %v766_v12 = vadd.f32 %v764_v50, %v760_v38  ;;  %v771_v48 = vadd.f32 %v769_v2, %v765_v40  ;;  %v780_v60 = vstv %s4605_s13  ;;  %v838_v61 = vmul.f32 %v837_v63, %v4165_v13  ;;  %s7025_s13 = sld [smem:[#allocation57_spill]] }
 0x114   : >> { %v828_v54 = vadd.f32 %v826_v43, %v822_v26  ;;  %v829_v37 = vadd.f32 %v827_v34, %v823_v44  ;;  %v839_v59 = vmul.f32 %v837_v63, %v4169_v17  ;;  %v849_v35 = vstv %s4609_s1  ;;  %s4671_s1 = sld [smem:[#allocation2 + $0x40]] }
 0x115   : >> { %v657_v3 = vmax.f32 %v4572_v28, 0.0  ;;  %v7021_v41 = vstv %s7015_s28  ;;  %v776_v25 = vmul.f32 %v774_v4, %v4305_v1  ;;  %v844_v50 = vmul.f32 %v843_v31, %v4173_v21 }
 0x116   : >> { %v659_v45 = vmul.f32 %v7021_v41, %v656_v24  ;;  %v834_v38 = vadd.f32 %v832_v32, %v828_v54  ;;  %v835_v40 = vadd.f32 %v833_v30, %v829_v37  ;;  %v845_v63 = vmul.f32 %v843_v31, %v4181_v29 }
 0x117   : >> { %v855_v2 = vstv %s4616_s15  ;;  %v772_v43 = vadd.f32 %v770_v53, %v766_v12  ;;  %v777_v28 = vadd.f32 %v775_v39, %v771_v48  ;;  %v781_v23 = vmul.f32 %v780_v60, %v7004_v55  ;;  %s4673_s15 = sld [smem:[#allocation2 + $0x54]] }
 0x118   : >> { %v850_v4 = vmul.f32 %v849_v35, %v4184_v33  ;;  %v840_v34 = vadd.f32 %v838_v61, %v834_v38  ;;  %v841_v24 = vadd.f32 %v839_v59, %v835_v40  ;;  %v851_v26 = vmul.f32 %v849_v35, %v4200_v56 }
 0x119   : >> { %v861_v44 = vstv %s4622_s4  ;;  %v7022_v32 = vmax.f32 %v4458_v8, 0.0  ;;  %v7023_v30 = vstv %s7005_s2  ;;  %v7024_v54 = vmov %v7021_v41  ;;  %s4679_s4 = sld [smem:[#allocation2 + $0x68]]  ;;  %s4681_s2 = sld [smem:[#allocation2 + $0x7c]] }
 0x11a   : >> { %v660_v37 = vmul.f32 %v7024_v54, %v657_v3  ;;  %v4662_v53 = vadd.f32 %v659_v45, %v4536_v27  ;;  %v856_v39 = vmul.f32 %v855_v2, %v4209_v6  ;;  %v846_v12 = vadd.f32 %v844_v50, %v840_v34 }
 0x11b   : >> { %v533_v31 = vmul.f32 %v7023_v30, %v7022_v32  ;;  %v847_v48 = vadd.f32 %v845_v63, %v841_v24  ;;  %v857_v61 = vmul.f32 %v855_v2, %v4211_v7  ;;  %v867_v8 = vstv %s4630_s5  ;;  %s4699_s5 = sld [smem:[#allocation2 + $0x17f]] }
 0x11c   : >> { %v778_v27 = vadd.f32 %v776_v25, %v772_v43  ;;  %v782_v59 = vmul.f32 %v780_v60, %v4416_v22  ;;  %v4676_v35 = vadd.f32 %v781_v23, %v777_v28  ;;  %v862_v3 = vmul.f32 %v861_v44, %v7006_v42 }
 0x11d   : >> { %v852_v41 = vadd.f32 %v850_v4, %v846_v12  ;;  %v853_v45 = vadd.f32 %v851_v26, %v847_v48  ;;  %v863_v50 = vmul.f32 %v861_v44, %v4219_v15  ;;  %v873_v38 = vstv %s4636_s6  ;;  %s4701_s6 = sld [smem:[#allocation2 + $0x90]] }
 0x11e   : >> { %v4685_v40 = vadd.f32 %v660_v37, %v533_v31  ;;  %v868_v25 = vmul.f32 %v867_v8, %v4221_v16  ;;  %v879_v60 = vstv %s4643_s9  ;;  %v869_v28 = vmul.f32 %v867_v8, %v4225_v19  ;;  %v7027_v31 = vld [vmem:[#allocation92_spill] sm:$0xff]  ;;  %v7028_v37 = vld [vmem:[#allocation93_spill] sm:$0xff]  ;;  %s4707_s9 = sld [smem:[#allocation2 + $0xa4]] }
 0x11f   : >> { %v858_v2 = vadd.f32 %v856_v39, %v852_v41  ;;  %v859_v43 = vadd.f32 %v857_v61, %v853_v45  ;;  %v885_v23 = vstv %s4647_s11  ;;  %v4692_v34 = vadd.f32 %v782_v59, %v778_v27  ;;  %v7029_v59 = vld [vmem:[#allocation69_spill] sm:$0xff]  ;;  %v7030_v41 = vld [vmem:[#allocation70_spill] sm:$0xff]  ;;  %s4715_s11 = sld [smem:[#allocation2 + $0xb8]] }
 0x120   : >> { %7026 = vst [vmem:[#allocation100_spill] sm:$0xff] %v4685_v40  ;;  %v874_v24 = vmul.f32 %v873_v38, %v4227_v20  ;;  %v875_v26 = vmul.f32 %v873_v38, %v7007_v58  ;;  %v880_v30 = vmul.f32 %v879_v60, %v7008_v14  ;;  %v881_v54 = vmul.f32 %v879_v60, %v7027_v31 }
 0x121   : >> { %v864_v44 = vadd.f32 %v862_v3, %v858_v2  ;;  %v865_v32 = vadd.f32 %v863_v50, %v859_v43  ;;  %v886_v39 = vmul.f32 %v885_v23, %v7028_v37  ;;  %v891_v12 = vstv %s4653_s7  ;;  %s4723_s7 = sld [smem:[#allocation2 + $0xcc]] }
 0x122   : >> { %v922_v48 = vstv %s4665_s10  ;;  %v926_v61 = vstv %s4667_s12  ;;  %v930_v50 = vstv %s4671_s1  ;;  %v936_v38 = vstv %s4673_s15  ;;  %s4732_s10 = sld [smem:[#allocation2 + $0x1a7]]  ;;  %s4738_s12 = sld [smem:[#allocation2 + $0xf4]] }
 0x123   : >> { %v870_v8 = vadd.f32 %v868_v25, %v864_v44  ;;  %v871_v27 = vadd.f32 %v869_v28, %v865_v32  ;;  %v923_v3 = vmul.f32 %v922_v48, %v7029_v59  ;;  %v924_v45 = vmul.f32 %v922_v48, %v7030_v41  ;;  %s4745_s1 = sld [smem:[#allocation2 + $0x108]]  ;;  %s4752_s15 = sld [smem:[#allocation2 + $0x11c]] }
 0x124   : >> { %v942_v60 = vstv %s4679_s4  ;;  %v948_v2 = vstv %s4681_s2  ;;  %v931_v25 = vmul.f32 %v930_v50, %v7017_v18  ;;  %v932_v28 = vmul.f32 %v930_v50, %v4135_v47  ;;  %s4729_s2 = sld [smem:[#allocation2 + $0xe0]]  ;;  %s4764_s4 = sld [smem:[#allocation2 + $0x144]] }
 0x125   : >> { %v876_v43 = vadd.f32 %v874_v24, %v870_v8  ;;  %v877_v63 = vadd.f32 %v875_v26, %v871_v27  ;;  %v927_v4 = vadd.f32 %v926_v61, %v923_v3  ;;  %v928_v40 = vadd.f32 %v926_v61, %v924_v45  ;;  %v7031_v24 = vld [vmem:[#allocation94_spill] sm:$0xff]  ;;  %v7032_v8 = vld [vmem:[#allocation95_spill] sm:$0xff] }
 0x126   : >> { %v937_v44 = vmul.f32 %v936_v38, %v7018_v36  ;;  %v938_v32 = vmul.f32 %v936_v38, %v7019_v46  ;;  %v887_v26 = vmul.f32 %v885_v23, %v7031_v24  ;;  %v892_v27 = vmul.f32 %v891_v12, %v7032_v8 }
 0x127   : >> { %v882_v48 = vadd.f32 %v880_v30, %v876_v43  ;;  %v883_v41 = vadd.f32 %v881_v54, %v877_v63  ;;  %v933_v61 = vadd.f32 %v931_v25, %v927_v4  ;;  %v934_v3 = vadd.f32 %v932_v28, %v928_v40  ;;  %v7033_v30 = vld [vmem:[#allocation77_spill] sm:$0xff] }
 0x128   : >> { %v943_v45 = vmul.f32 %v942_v60, %v4141_v52  ;;  %v944_v50 = vmul.f32 %v942_v60, %v7020_v51  ;;  %v897_v47 = vstv %s4699_s5  ;;  %v949_v63 = vmul.f32 %v948_v2, %v7033_v30  ;;  %s4769_s5 = sld [smem:[#allocation2 + $0x158]] }
 0x129   : >> { %v888_v36 = vadd.f32 %v886_v39, %v882_v48  ;;  %v954_v54 = vstv %s4701_s6  ;;  %v939_v38 = vadd.f32 %v937_v44, %v933_v61  ;;  %v940_v23 = vadd.f32 %v938_v32, %v934_v3  ;;  %v7034_v39 = vld [vmem:[#allocation96_spill] sm:$0xff]  ;;  %s4773_s6 = sld [smem:[#allocation2 + $0x16c]] }
 0x12a   : >> { %v950_v4 = vmul.f32 %v948_v2, %v4150_v0  ;;  %v960_v40 = vstv %s4707_s9  ;;  %v786_v60 = vmax.f32 %v4692_v34, 0.0  ;;  %v889_v43 = vadd.f32 %v887_v26, %v883_v41  ;;  %s4788_s9 = sld [smem:[#allocation2 + $0x2d]] }
 0x12b   : >> { %v893_v25 = vmul.f32 %v891_v12, %v7034_v39  ;;  %v955_v28 = vmul.f32 %v954_v54, %v4154_v5  ;;  %v945_v48 = vadd.f32 %v943_v45, %v939_v38  ;;  %v946_v30 = vadd.f32 %v944_v50, %v940_v23 }
 0x12c   : >> { %v956_v44 = vmul.f32 %v954_v54, %v4158_v9  ;;  %v966_v61 = vstv %s4715_s11  ;;  %v894_v2 = vadd.f32 %v892_v27, %v888_v36  ;;  %v898_v32 = vmul.f32 %v897_v47, %v4283_v49  ;;  %s4790_s11 = sld [smem:[#allocation2 + $0x1bd]] }
 0x12d   : >> { %v903_v3 = vstv %s4717_s19  ;;  %v961_v34 = vmul.f32 %v960_v40, %v4160_v10  ;;  %v951_v41 = vadd.f32 %v949_v63, %v945_v48  ;;  %v952_v26 = vadd.f32 %v950_v4, %v946_v30  ;;  %s4762_s19 = sld [smem:[#allocation2 + $0x130]] }
 0x12e   : >> { %v962_v12 = vmul.f32 %v960_v40, %v4162_v11  ;;  %v972_v5 = vstv %s4723_s7  ;;  %v7035_v45 = vmax.f32 %v4676_v35, 0.0  ;;  %v7036_v50 = vstv %s7025_s13  ;;  %s7038_s7 = sld [smem:[#allocation58_spill]]  ;;  %s4959_s13 = sld [smem:[#allocation2 + $0xba]] }
 0x12f   : >> { %v895_v38 = vadd.f32 %v893_v25, %v889_v43  ;;  %v899_v36 = vmul.f32 %v897_v47, %v4295_v57  ;;  %v967_v27 = vmul.f32 %v966_v61, %v4165_v13  ;;  %v957_v23 = vadd.f32 %v955_v28, %v951_v41 }
 0x130   : >> { %v788_v54 = vmul.f32 %v7036_v50, %v7035_v45  ;;  %v958_v63 = vadd.f32 %v956_v44, %v952_v26  ;;  %v968_v30 = vmul.f32 %v966_v61, %v4169_v17  ;;  %v978_v4 = vstv %s4729_s2  ;;  %s4794_s2 = sld [smem:[#allocation2 + $0x41]] }
 0x131   : >> { %v900_v40 = vadd.f32 %v898_v32, %v894_v2  ;;  %v904_v35 = vmul.f32 %v903_v3, %v4303_v62  ;;  %v909_v43 = vstv %s4732_s10  ;;  %v973_v47 = vmul.f32 %v972_v5, %v4173_v21  ;;  %s4796_s10 = sld [smem:[#allocation2 + $0x55]] }
 0x132   : >> { %v963_v25 = vadd.f32 %v961_v34, %v957_v23  ;;  %v964_v28 = vadd.f32 %v962_v12, %v958_v63  ;;  %v974_v48 = vmul.f32 %v972_v5, %v4181_v29  ;;  %v984_v44 = vstv %s4738_s12  ;;  %s4801_s12 = sld [smem:[#allocation2 + $0x69]] }
 0x133   : >> { %v7037_v61 = vmov %v7036_v50  ;;  %v901_v26 = vadd.f32 %v899_v36, %v895_v38  ;;  %v905_v2 = vmul.f32 %v903_v3, %v4305_v1  ;;  %v979_v32 = vmul.f32 %v978_v4, %v4184_v33 }
 0x134   : >> { %v4777_v41 = vmul.f32 %v7037_v61, %v786_v60  ;;  %v969_v45 = vadd.f32 %v967_v27, %v963_v25  ;;  %v970_v50 = vadd.f32 %v968_v30, %v964_v28  ;;  %v980_v21 = vmul.f32 %v978_v4, %v4200_v56 }
 0x135   : >> { %v990_v34 = vstv %s4745_s1  ;;  %v4784_v12 = vadd.f32 %v788_v54, %v4662_v53  ;;  %v906_v5 = vadd.f32 %v904_v35, %v900_v40  ;;  %v910_v23 = vmul.f32 %v909_v43, %v7004_v55  ;;  %s4803_s1 = sld [smem:[#allocation2 + $0x7d]] }
 0x136   : >> { %v985_v60 = vmul.f32 %v984_v44, %v4209_v6  ;;  %v975_v3 = vadd.f32 %v973_v47, %v969_v45  ;;  %v976_v38 = vadd.f32 %v974_v48, %v970_v50  ;;  %v986_v36 = vmul.f32 %v984_v44, %v4211_v7 }
 0x137   : >> { %v996_v27 = vstv %s4752_s15  ;;  %v907_v53 = vadd.f32 %v905_v2, %v901_v26  ;;  %v911_v54 = vmul.f32 %v909_v43, %v4416_v22  ;;  %v991_v63 = vmul.f32 %v990_v34, %v7006_v42  ;;  %s4814_s15 = sld [smem:[#allocation2 + $0x180]] }
 0x138   : >> { %v992_v30 = vmul.f32 %v990_v34, %v4219_v15  ;;  %v981_v4 = vadd.f32 %v979_v32, %v975_v3  ;;  %v982_v40 = vadd.f32 %v980_v21, %v976_v38  ;;  %v1002_v35 = vstv %s4762_s19  ;;  %s4823_s19 = sld [smem:[#allocation2 + $0x194]] }
 0x139   : >> { %v1008_v47 = vstv %s4764_s4  ;;  %v4807_v25 = vadd.f32 %v910_v23, %v906_v5  ;;  %v997_v48 = vmul.f32 %v996_v27, %v4221_v16  ;;  %v1014_v44 = vstv %s4769_s5  ;;  %s4825_s4 = sld [smem:[#allocation2 + $0x91]]  ;;  %s4831_s5 = sld [smem:[#allocation2 + $0xa5]] }
 0x13a   : >> { %v987_v43 = vadd.f32 %v985_v60, %v981_v4  ;;  %v988_v61 = vadd.f32 %v986_v36, %v982_v40  ;;  %v998_v26 = vmul.f32 %v996_v27, %v4225_v19  ;;  %v1020_v2 = vstv %s4773_s6  ;;  %s4839_s6 = sld [smem:[#allocation2 + $0xb9]] }
 0x13b   : >> { %v4816_v45 = vadd.f32 %v911_v54, %v907_v53  ;;  %v1003_v21 = vmul.f32 %v1002_v35, %v4227_v20  ;;  %v1004_v32 = vmul.f32 %v1002_v35, %v7007_v58  ;;  %v1009_v50 = vmul.f32 %v1008_v47, %v7008_v14 }
 0x13c   : >> { %v993_v34 = vadd.f32 %v991_v63, %v987_v43  ;;  %v994_v5 = vadd.f32 %v992_v30, %v988_v61  ;;  %v1010_v23 = vmul.f32 %v1008_v47, %v7027_v31  ;;  %v1015_v60 = vmul.f32 %v1014_v44, %v7028_v37  ;;  %v7039_v30 = vld [vmem:[#allocation70_spill] sm:$0xff]  ;;  %v7040_v37 = vld [vmem:[#allocation72_spill] sm:$0xff] }
 0x13d   : >> { %v1016_v3 = vmul.f32 %v1014_v44, %v7031_v24  ;;  %v1021_v38 = vmul.f32 %v1020_v2, %v7032_v8  ;;  %v1051_v36 = vstv %s4788_s9  ;;  %v1055_v27 = vstv %s4790_s11  ;;  %s4845_s9 = sld [smem:[#allocation2 + $0xcd]]  ;;  %s4849_s11 = sld [smem:[#allocation2 + $0x1a8]] }
 0x13e   : >> { %v999_v53 = vadd.f32 %v997_v48, %v993_v34  ;;  %v1000_v54 = vadd.f32 %v998_v26, %v994_v5  ;;  %v1052_v63 = vmul.f32 %v1051_v36, %v7029_v59  ;;  %v1053_v4 = vmul.f32 %v1051_v36, %v7039_v30  ;;  %v7041_v26 = vld [vmem:[#allocation73_spill] sm:$0xff] }
 0x13f   : >> { %v1059_v40 = vstv %s4794_s2  ;;  %v1065_v35 = vstv %s4796_s10  ;;  %v1071_v47 = vstv %s4801_s12  ;;  %v1077_v43 = vstv %s4803_s1  ;;  %s4853_s2 = sld [smem:[#allocation2 + $0xe1]]  ;;  %s4860_s10 = sld [smem:[#allocation2 + $0xf5]] }
 0x140   : >> { %v1005_v44 = vadd.f32 %v1003_v21, %v999_v53  ;;  %v1006_v61 = vadd.f32 %v1004_v32, %v1000_v54  ;;  %v1056_v28 = vadd.f32 %v1055_v27, %v1052_v63  ;;  %v1057_v8 = vadd.f32 %v1055_v27, %v1053_v4  ;;  %s4866_s12 = sld [smem:[#allocation2 + $0x109]]  ;;  %s4874_s1 = sld [smem:[#allocation2 + $0x11d]] }
 0x141   : >> { %v1060_v24 = vmul.f32 %v1059_v40, %v7017_v18  ;;  %v1061_v48 = vmul.f32 %v1059_v40, %v7040_v37  ;;  %v1066_v34 = vmul.f32 %v1065_v35, %v7041_v26  ;;  %v1067_v5 = vmul.f32 %v1065_v35, %v7019_v46  ;;  %v7042_v35 = vld [vmem:[#allocation77_spill] sm:$0xff] }
 0x142   : >> { %v1011_v36 = vadd.f32 %v1009_v50, %v1005_v44  ;;  %v1012_v30 = vadd.f32 %v1010_v23, %v1006_v61  ;;  %v1022_v21 = vmul.f32 %v1020_v2, %v7034_v39  ;;  %v1026_v32 = vstv %s4814_s15  ;;  %s4880_s15 = sld [smem:[#allocation2 + $0x131]] }
 0x143   : >> { %v1062_v27 = vadd.f32 %v1060_v24, %v1056_v28  ;;  %v1063_v53 = vadd.f32 %v1061_v48, %v1057_v8  ;;  %v1072_v54 = vmul.f32 %v1071_v47, %v4141_v52  ;;  %v1073_v63 = vmul.f32 %v1071_v47, %v7020_v51  ;;  %v7043_v47 = vld [vmem:[#allocation79_spill] sm:$0xff] }
 0x144   : >> { %v1017_v4 = vadd.f32 %v1015_v60, %v1011_v36  ;;  %v1032_v40 = vstv %s4823_s19  ;;  %v1078_v50 = vmul.f32 %v1077_v43, %v7042_v35  ;;  %v1083_v23 = vstv %s4825_s4  ;;  %s4887_s19 = sld [smem:[#allocation2 + $0x145]]  ;;  %s4891_s4 = sld [smem:[#allocation2 + $0x159]] }
 0x145   : >> { %v1068_v44 = vadd.f32 %v1066_v34, %v1062_v27  ;;  %v1069_v61 = vadd.f32 %v1067_v5, %v1063_v53  ;;  %v1079_v2 = vmul.f32 %v1077_v43, %v4150_v0  ;;  %v1089_v39 = vstv %s4831_s5  ;;  %s4897_s5 = sld [smem:[#allocation2 + $0x2e]] }
 0x146   : >> { %v1018_v24 = vadd.f32 %v1016_v3, %v1012_v30  ;;  %v1023_v8 = vadd.f32 %v1021_v38, %v1017_v4  ;;  %v1027_v28 = vmul.f32 %v1026_v32, %v4283_v49  ;;  %v1084_v48 = vmul.f32 %v1083_v23, %v7043_v47 }
 0x147   : >> { %v1074_v60 = vadd.f32 %v1072_v54, %v1068_v44  ;;  %v1075_v36 = vadd.f32 %v1073_v63, %v1069_v61  ;;  %v1085_v35 = vmul.f32 %v1083_v23, %v4158_v9  ;;  %v1095_v51 = vstv %s4839_s6  ;;  %s4907_s6 = sld [smem:[#allocation2 + $0x16d]] }
 0x148   : >> { %v914_v43 = vmax.f32 %v4807_v25, 0.0  ;;  %v1028_v34 = vmul.f32 %v1026_v32, %v4295_v57  ;;  %v1033_v3 = vmul.f32 %v1032_v40, %v4303_v62  ;;  %v1090_v38 = vmul.f32 %v1089_v39, %v4160_v10 }
 0x149   : >> { %v1080_v30 = vadd.f32 %v1078_v50, %v1074_v60  ;;  %v1081_v5 = vadd.f32 %v1079_v2, %v1075_v36  ;;  %v1091_v27 = vmul.f32 %v1089_v39, %v4162_v11  ;;  %v1101_v53 = vstv %s4845_s9  ;;  %s4909_s9 = sld [smem:[#allocation2 + $0x1be]] }
 0x14a   : >> { %v1024_v54 = vadd.f32 %v1022_v21, %v1018_v24  ;;  %v1029_v63 = vadd.f32 %v1027_v28, %v1023_v8  ;;  %v1038_v4 = vstv %s4849_s11  ;;  %v1096_v25 = vmul.f32 %v1095_v51, %v4165_v13  ;;  %v7045_v21 = vld [vmem:[#allocation84_spill] sm:$0xff]  ;;  %s7049_s11 = sld [smem:[#allocation59_spill]] }
 0x14b   : >> { %v1086_v23 = vadd.f32 %v1084_v48, %v1080_v30  ;;  %v1087_v32 = vadd.f32 %v1085_v35, %v1081_v5  ;;  %v1097_v44 = vmul.f32 %v1095_v51, %v4169_v17  ;;  %v1107_v61 = vstv %s4853_s2  ;;  %s4913_s2 = sld [smem:[#allocation2 + $0x42]] }
 0x14c   : >> { %v915_v50 = vmax.f32 %v4816_v45, 0.0  ;;  %v7044_v2 = vstv %s7038_s7  ;;  %v1034_v60 = vmul.f32 %v1032_v40, %v4305_v1  ;;  %v1102_v24 = vmul.f32 %v1101_v53, %v7045_v21 }
 0x14d   : >> { %v917_v39 = vmul.f32 %v7044_v2, %v914_v43  ;;  %v1092_v8 = vadd.f32 %v1090_v38, %v1086_v23  ;;  %v1093_v28 = vadd.f32 %v1091_v27, %v1087_v32  ;;  %v1103_v35 = vmul.f32 %v1101_v53, %v4181_v29  ;;  %v7046_v38 = vld [vmem:[#allocation100_spill] sm:$0xff] }
 0x14e   : >> { %v1113_v51 = vstv %s4860_s10  ;;  %v1030_v48 = vadd.f32 %v1028_v34, %v1024_v54  ;;  %v1035_v36 = vadd.f32 %v1033_v3, %v1029_v63  ;;  %v1039_v45 = vmul.f32 %v1038_v4, %v7004_v55  ;;  %s4915_s10 = sld [smem:[#allocation2 + $0x56]] }
 0x14f   : >> { %v1108_v43 = vmul.f32 %v1107_v61, %v4184_v33  ;;  %v1098_v40 = vadd.f32 %v1096_v25, %v1092_v8  ;;  %v1099_v30 = vadd.f32 %v1097_v44, %v1093_v28  ;;  %v1109_v5 = vmul.f32 %v1107_v61, %v4200_v56 }
 0x150   : >> { %v1119_v2 = vstv %s4866_s12  ;;  %v791_v27 = vadd.f32 %v4777_v41, %v7046_v38  ;;  %v7047_v53 = vstv %s7038_s7  ;;  %v4904_v34 = vadd.f32 %v917_v39, %v4784_v12  ;;  %s4921_s12 = sld [smem:[#allocation2 + $0x6a]]  ;;  %s4923_s7 = sld [smem:[#allocation2 + $0x7e]] }
 0x151   : >> { %v918_v23 = vmul.f32 %v7047_v53, %v915_v50  ;;  %v1114_v3 = vmul.f32 %v1113_v51, %v4209_v6  ;;  %v1104_v54 = vadd.f32 %v1102_v24, %v1098_v40  ;;  %v1105_v63 = vadd.f32 %v1103_v35, %v1099_v30 }
 0x152   : >> { %7048 = vst [vmem:[#allocation88_spill] sm:$0xff] %v4904_v34  ;;  %v1115_v25 = vmul.f32 %v1113_v51, %v4211_v7  ;;  %v1125_v32 = vstv %s4874_s1  ;;  %v1036_v41 = vadd.f32 %v1034_v60, %v1030_v48  ;;  %v1040_v12 = vmul.f32 %v1038_v4, %v4416_v22  ;;  %s4934_s1 = sld [smem:[#allocation2 + $0x181]] }
 0x153   : >> { %v4918_v44 = vadd.f32 %v1039_v45, %v1035_v36  ;;  %v1120_v61 = vmul.f32 %v1119_v2, %v7006_v42  ;;  %v1110_v50 = vadd.f32 %v1108_v43, %v1104_v54  ;;  %v1111_v39 = vadd.f32 %v1109_v5, %v1105_v63 }
 0x154   : >> { %v1121_v24 = vmul.f32 %v1119_v2, %v4219_v15  ;;  %v1131_v8 = vstv %s4880_s15  ;;  %v4927_v28 = vadd.f32 %v918_v23, %v791_v27  ;;  %v1126_v60 = vmul.f32 %v1125_v32, %v4221_v16  ;;  %s4943_s15 = sld [smem:[#allocation2 + $0x92]]  ;;  %v7051_v23 = vld [vmem:[#allocation93_spill] sm:$0xff] }
 0x155   : >> { %v1137_v4 = vstv %s4887_s19  ;;  %v1116_v51 = vadd.f32 %v1114_v3, %v1110_v50  ;;  %v1117_v48 = vadd.f32 %v1115_v25, %v1111_v39  ;;  %v1127_v36 = vmul.f32 %v1125_v32, %v4225_v19  ;;  %s4949_s19 = sld [smem:[#allocation2 + $0xa6]] }
 0x156   : >> { %7050 = vst [vmem:[#allocation100_spill] sm:$0xff] %v4927_v28  ;;  %v1143_v45 = vstv %s4891_s4  ;;  %v4936_v43 = vadd.f32 %v1040_v12, %v1036_v41  ;;  %v1132_v30 = vmul.f32 %v1131_v8, %v4227_v20  ;;  %v1133_v5 = vmul.f32 %v1131_v8, %v7007_v58  ;;  %s4951_s4 = sld [smem:[#allocation2 + $0x195]]  ;;  %v7053_v28 = vld [vmem:[#allocation94_spill] sm:$0xff] }
 0x157   : >> { %v1122_v2 = vadd.f32 %v1120_v61, %v1116_v51  ;;  %v1123_v38 = vadd.f32 %v1121_v24, %v1117_v48  ;;  %v1138_v27 = vmul.f32 %v1137_v4, %v7008_v14  ;;  %v1139_v53 = vmul.f32 %v1137_v4, %v7027_v31  ;;  %v7052_v61 = vld [vmem:[#allocation70_spill] sm:$0xff] }
 0x158   : >> { %v1144_v3 = vmul.f32 %v1143_v45, %v7051_v23  ;;  %v1149_v54 = vstv %s4907_s6  ;;  %v1180_v63 = vstv %s4897_s5  ;;  %v1184_v25 = vstv %s4909_s9  ;;  %s4965_s5 = sld [smem:[#allocation2 + $0xce]]  ;;  %s4974_s6 = sld [smem:[#allocation2 + $0x1a9]] }
 0x159   : >> { %v1128_v32 = vadd.f32 %v1126_v60, %v1122_v2  ;;  %v1129_v41 = vadd.f32 %v1127_v36, %v1123_v38  ;;  %v1181_v12 = vmul.f32 %v1180_v63, %v7029_v59  ;;  %v1182_v50 = vmul.f32 %v1180_v63, %v7052_v61  ;;  %v7054_v61 = vld [vmem:[#allocation95_spill] sm:$0xff]  ;;  %s4980_s9 = sld [smem:[#allocation2 + $0xf6]] }
 0x15a   : >> { %v1188_v39 = vstv %s4913_s2  ;;  %v1194_v24 = vstv %s4915_s10  ;;  %v1200_v8 = vstv %s4921_s12  ;;  %v1206_v4 = vstv %s4923_s7  ;;  %s4972_s7 = sld [smem:[#allocation2 + $0xe2]]  ;;  %s4994_s10 = sld [smem:[#allocation2 + $0x11e]] }
 0x15b   : >> { %v1134_v51 = vadd.f32 %v1132_v30, %v1128_v32  ;;  %v1135_v48 = vadd.f32 %v1133_v5, %v1129_v41  ;;  %v1185_v35 = vadd.f32 %v1184_v25, %v1181_v12  ;;  %v1186_v40 = vadd.f32 %v1184_v25, %v1182_v50  ;;  %v7055_v12 = vld [vmem:[#allocation76_spill] sm:$0xff]  ;;  %s4988_s2 = sld [smem:[#allocation2 + $0x10a]]  ;;  %s7060_s12 = sld [smem:[#allocation60_spill]] }
 0x15c   : >> { %v1189_v60 = vmul.f32 %v1188_v39, %v7017_v18  ;;  %v1190_v36 = vmul.f32 %v1188_v39, %v7040_v37  ;;  %v1195_v2 = vmul.f32 %v1194_v24, %v7041_v26  ;;  %v1196_v38 = vmul.f32 %v1194_v24, %v7019_v46 }
 0x15d   : >> { %v1140_v63 = vadd.f32 %v1138_v27, %v1134_v51  ;;  %v1145_v34 = vmul.f32 %v1143_v45, %v7053_v28  ;;  %v1150_v30 = vmul.f32 %v1149_v54, %v7054_v61  ;;  %v1155_v5 = vstv %s4934_s1  ;;  %v7056_v27 = vld [vmem:[#allocation77_spill] sm:$0xff]  ;;  %s5009_s1 = sld [smem:[#allocation2 + $0x146]] }
 0x15e   : >> { %v1191_v32 = vadd.f32 %v1189_v60, %v1185_v35  ;;  %v1192_v25 = vadd.f32 %v1190_v36, %v1186_v40  ;;  %v1201_v41 = vmul.f32 %v1200_v8, %v4141_v52  ;;  %v1202_v50 = vmul.f32 %v1200_v8, %v7055_v12  ;;  %v7057_v8 = vld [vmem:[#allocation96_spill] sm:$0xff] }
 0x15f   : >> { %v1141_v39 = vadd.f32 %v1139_v53, %v1135_v48  ;;  %v1146_v24 = vadd.f32 %v1144_v3, %v1140_v63  ;;  %v1207_v45 = vmul.f32 %v1206_v4, %v7056_v27  ;;  %v1212_v51 = vstv %s4943_s15  ;;  %s5011_s15 = sld [smem:[#allocation2 + $0x15a]] }
 0x160   : >> { %v1197_v46 = vadd.f32 %v1195_v2, %v1191_v32  ;;  %v1198_v26 = vadd.f32 %v1196_v38, %v1192_v25  ;;  %v1208_v35 = vmul.f32 %v1206_v4, %v4150_v0  ;;  %v1218_v40 = vstv %s4949_s19  ;;  %s5015_s19 = sld [smem:[#allocation2 + $0x16e]] }
 0x161   : >> { %v1044_v60 = vmax.f32 %v4936_v43, 0.0  ;;  %v1151_v36 = vmul.f32 %v1149_v54, %v7057_v8  ;;  %v1161_v53 = vstv %s4951_s4  ;;  %v1213_v3 = vmul.f32 %v1212_v51, %v7043_v47  ;;  %s5028_s4 = sld [smem:[#allocation2 + $0x2f]] }
 0x162   : >> { %v1203_v48 = vadd.f32 %v1201_v41, %v1197_v46  ;;  %v1204_v63 = vadd.f32 %v1202_v50, %v1198_v26  ;;  %v1214_v27 = vmul.f32 %v1212_v51, %v4158_v9  ;;  %v1224_v2 = vstv %s4959_s13  ;;  %s5005_s13 = sld [smem:[#allocation2 + $0x132]] }
 0x163   : >> { %v1147_v4 = vadd.f32 %v1145_v34, %v1141_v39  ;;  %v1152_v38 = vadd.f32 %v1150_v30, %v1146_v24  ;;  %v1156_v32 = vmul.f32 %v1155_v5, %v4283_v49  ;;  %v1219_v43 = vmul.f32 %v1218_v40, %v4160_v10 }
 0x164   : >> { %v1209_v25 = vadd.f32 %v1207_v45, %v1203_v48  ;;  %v1210_v54 = vadd.f32 %v1208_v35, %v1204_v63  ;;  %v1220_v0 = vmul.f32 %v1218_v40, %v4162_v11  ;;  %v1230_v47 = vstv %s4965_s5  ;;  %s5032_s5 = sld [smem:[#allocation2 + $0x182]] }
 0x165   : >> { %v7058_v46 = vmax.f32 %v4918_v44, 0.0  ;;  %v7059_v26 = vstv %s7049_s11  ;;  %v1157_v34 = vmul.f32 %v1155_v5, %v4295_v57  ;;  %v1162_v30 = vmul.f32 %v1161_v53, %v4303_v62  ;;  %s5050_s11 = sld [smem:[#allocation2 + $0x6b]] }
 0x166   : >> { %v1225_v50 = vmul.f32 %v1224_v2, %v4165_v13  ;;  %v1215_v39 = vadd.f32 %v1213_v3, %v1209_v25  ;;  %v1216_v24 = vadd.f32 %v1214_v27, %v1210_v54  ;;  %v1226_v45 = vmul.f32 %v1224_v2, %v4169_v17 }
 0x167   : >> { %v5000_v41 = vmul.f32 %v7059_v26, %v7058_v46  ;;  %v1236_v51 = vstv %s4972_s7  ;;  %v1153_v44 = vadd.f32 %v1151_v36, %v1147_v4  ;;  %v1158_v5 = vadd.f32 %v1156_v32, %v1152_v38  ;;  %s5034_s7 = sld [smem:[#allocation2 + $0x1bf]]  ;;  %v7062_v46 = vld [vmem:[#allocation70_spill] sm:$0xff] }
 0x168   : >> { %v1167_v35 = vstv %s4974_s6  ;;  %v1231_v40 = vmul.f32 %v1230_v47, %v7045_v21  ;;  %v1221_v48 = vadd.f32 %v1219_v43, %v1215_v39  ;;  %v1222_v63 = vadd.f32 %v1220_v0, %v1216_v24  ;;  %s5038_s6 = sld [smem:[#allocation2 + $0x43]] }
 0x169   : >> { %v1232_v27 = vmul.f32 %v1230_v47, %v4181_v29  ;;  %v1242_v3 = vstv %s4980_s9  ;;  %v7061_v25 = vmov %v7059_v26  ;;  %v1163_v54 = vmul.f32 %v1161_v53, %v4305_v1  ;;  %s5040_s9 = sld [smem:[#allocation2 + $0x57]] }
 0x16a   : >> { %v5021_v2 = vmul.f32 %v7061_v25, %v1044_v60  ;;  %v1237_v36 = vmul.f32 %v1236_v51, %v4184_v33  ;;  %v1227_v4 = vadd.f32 %v1225_v50, %v1221_v48  ;;  %v1228_v38 = vadd.f32 %v1226_v45, %v1222_v63 }
 0x16b   : >> { %v1238_v32 = vmul.f32 %v1236_v51, %v4200_v56  ;;  %v1248_v26 = vstv %s4988_s2  ;;  %v1159_v0 = vadd.f32 %v1157_v34, %v1153_v44  ;;  %v1164_v47 = vadd.f32 %v1162_v30, %v1158_v5  ;;  %s5048_s2 = sld [smem:[#allocation2 + $0x196]] }
 0x16c   : >> { %v1168_v43 = vmul.f32 %v1167_v35, %v7004_v55  ;;  %v1243_v60 = vmul.f32 %v1242_v3, %v4209_v6  ;;  %v1233_v53 = vadd.f32 %v1231_v40, %v1227_v4  ;;  %v1234_v50 = vadd.f32 %v1232_v27, %v1228_v38 }
 0x16d   : >> { %v1244_v39 = vmul.f32 %v1242_v3, %v4211_v7  ;;  %v1254_v24 = vstv %s4994_s10  ;;  %v5043_v34 = vmul.f32 %v1167_v35, %v4416_v22  ;;  %v1249_v30 = vmul.f32 %v1248_v26, %v7006_v42  ;;  %s5062_s10 = sld [smem:[#allocation2 + $0x7f]] }
 0x16e   : >> { %v1250_v45 = vmul.f32 %v1248_v26, %v4219_v15  ;;  %v1260_v51 = vstv %s5005_s13  ;;  %v1239_v44 = vadd.f32 %v1237_v36, %v1233_v53  ;;  %v1240_v5 = vadd.f32 %v1238_v32, %v1234_v50  ;;  %s5070_s13 = sld [smem:[#allocation2 + $0x93]] }
 0x16f   : >> { %v1266_v40 = vstv %s5009_s1  ;;  %v1272_v48 = vstv %s5011_s15  ;;  %v5054_v63 = vadd.f32 %v1163_v54, %v1159_v0  ;;  %v5056_v27 = vadd.f32 %v1168_v43, %v1164_v47  ;;  %s5078_s1 = sld [smem:[#allocation2 + $0xa7]]  ;;  %s5084_s15 = sld [smem:[#allocation2 + $0xbb]] }
 0x170   : >> { %v1255_v35 = vmul.f32 %v1254_v24, %v4221_v16  ;;  %v1278_v3 = vstv %s5015_s19  ;;  %v1245_v25 = vadd.f32 %v1243_v60, %v1239_v44  ;;  %v1246_v4 = vadd.f32 %v1244_v39, %v1240_v5  ;;  %s5086_s19 = sld [smem:[#allocation2 + $0x1aa]] }
 0x171   : >> { %v1256_v38 = vmul.f32 %v1254_v24, %v4225_v19  ;;  %v1261_v26 = vmul.f32 %v1260_v51, %v4227_v20  ;;  %v1262_v36 = vmul.f32 %v1260_v51, %v7007_v58  ;;  %v1267_v54 = vmul.f32 %v1266_v40, %v7008_v14 }
 0x172   : >> { %v1268_v32 = vmul.f32 %v1266_v40, %v7027_v31  ;;  %v1273_v0 = vmul.f32 %v1272_v48, %v7051_v23  ;;  %v1251_v47 = vadd.f32 %v1249_v30, %v1245_v25  ;;  %v1252_v43 = vadd.f32 %v1250_v45, %v1246_v4 }
 0x173   : >> { %v1274_v60 = vmul.f32 %v1272_v48, %v7053_v28  ;;  %v1279_v53 = vmul.f32 %v1278_v3, %v7054_v61  ;;  %v1280_v50 = vmul.f32 %v1278_v3, %v7057_v8  ;;  %v1284_v39 = vstv %s5032_s5  ;;  %v7064_v28 = vld [vmem:[#allocation74_spill] sm:$0xff]  ;;  %s5106_s5 = sld [smem:[#allocation2 + $0xf7]] }
 0x174   : >> { %v1309_v24 = vstv %s5028_s4  ;;  %v1313_v51 = vstv %s5034_s7  ;;  %v1257_v44 = vadd.f32 %v1255_v35, %v1251_v47  ;;  %v1258_v5 = vadd.f32 %v1256_v38, %v1252_v43  ;;  %v7063_v43 = vld [vmem:[#allocation73_spill] sm:$0xff]  ;;  %s5098_s4 = sld [smem:[#allocation2 + $0xe3]] }
 0x175   : >> { %v1310_v40 = vmul.f32 %v1309_v24, %v7029_v59  ;;  %v1311_v30 = vmul.f32 %v1309_v24, %v7062_v46  ;;  %v1290_v45 = vstv %s5048_s2  ;;  %v1317_v25 = vstv %s5038_s6  ;;  %s5110_s7 = sld [smem:[#allocation2 + $0x10b]]  ;;  %s5121_s6 = sld [smem:[#allocation2 + $0x11f]] }
 0x176   : >> { %v1323_v48 = vstv %s5040_s9  ;;  %v1329_v4 = vstv %s5050_s11  ;;  %v1263_v61 = vadd.f32 %v1261_v26, %v1257_v44  ;;  %v1264_v3 = vadd.f32 %v1262_v36, %v1258_v5  ;;  %s5094_s11 = sld [smem:[#allocation2 + $0xcf]]  ;;  %s5125_s9 = sld [smem:[#allocation2 + $0x133]] }
 0x177   : >> { %v1314_v8 = vadd.f32 %v1313_v51, %v1310_v40  ;;  %v1315_v35 = vadd.f32 %v1313_v51, %v1311_v30  ;;  %v1318_v38 = vmul.f32 %v1317_v25, %v7017_v18  ;;  %v1319_v47 = vmul.f32 %v1317_v25, %v7040_v37  ;;  %v7065_v25 = vld [vmem:[#allocation77_spill] sm:$0xff]  ;;  %s5130_s2 = sld [smem:[#allocation2 + $0x147]] }
 0x178   : >> { %v1324_v24 = vmul.f32 %v1323_v48, %v7063_v43  ;;  %v1325_v23 = vmul.f32 %v1323_v48, %v7064_v28  ;;  %v1269_v46 = vadd.f32 %v1267_v54, %v1263_v61  ;;  %v1270_v59 = vadd.f32 %v1268_v32, %v1264_v3 }
 0x179   : >> { %v1285_v31 = vmul.f32 %v1284_v39, %v4283_v49  ;;  %v1335_v14 = vstv %s5062_s10  ;;  %v1320_v26 = vadd.f32 %v1318_v38, %v1314_v8  ;;  %v1321_v36 = vadd.f32 %v1319_v47, %v1315_v35  ;;  %v7066_v8 = vld [vmem:[#allocation78_spill] sm:$0xff]  ;;  %v7067_v47 = vld [vmem:[#allocation79_spill] sm:$0xff]  ;;  %s5138_s10 = sld [smem:[#allocation2 + $0x30]] }
 0x17a   : >> { %v1330_v51 = vmul.f32 %v1329_v4, %v4141_v52  ;;  %v1331_v44 = vmul.f32 %v1329_v4, %v7055_v12  ;;  %v1275_v5 = vadd.f32 %v1273_v0, %v1269_v46  ;;  %v1276_v40 = vadd.f32 %v1274_v60, %v1270_v59 }
 0x17b   : >> { %v1286_v61 = vmul.f32 %v1284_v39, %v4295_v57  ;;  %v1341_v54 = vstv %s5070_s13  ;;  %v1326_v32 = vadd.f32 %v1324_v24, %v1320_v26  ;;  %v1327_v30 = vadd.f32 %v1325_v23, %v1321_v36  ;;  %s5148_s13 = sld [smem:[#allocation2 + $0x15b]] }
 0x17c   : >> { %v1336_v48 = vmul.f32 %v1335_v14, %v7065_v25  ;;  %v1337_v3 = vmul.f32 %v1335_v14, %v7066_v8  ;;  %v1281_v35 = vadd.f32 %v1279_v53, %v1275_v5  ;;  %v1282_v38 = vadd.f32 %v1280_v50, %v1276_v40 }
 0x17d   : >> { %v1342_v49 = vmul.f32 %v1341_v54, %v7067_v47  ;;  %v1347_v4 = vstv %s5078_s1  ;;  %v1332_v46 = vadd.f32 %v1330_v51, %v1326_v32  ;;  %v1333_v59 = vadd.f32 %v1331_v44, %v1327_v30  ;;  %s5150_s1 = sld [smem:[#allocation2 + $0x1c0]] }
 0x17e   : >> { %v1343_v0 = vmul.f32 %v1341_v54, %v4158_v9  ;;  %v1353_v60 = vstv %s5084_s15  ;;  %v1171_v23 = vadd.f32 %v5043_v34, %v5054_v63  ;;  %v1291_v14 = vmul.f32 %v1290_v45, %v4303_v62  ;;  %s5154_s15 = sld [smem:[#allocation2 + $0x44]] }
 0x17f   : >> { %v1292_v53 = vmul.f32 %v1290_v45, %v4305_v1  ;;  %v1296_v50 = vstv %s5086_s19  ;;  %v1338_v39 = vadd.f32 %v1336_v48, %v1332_v46  ;;  %v1339_v24 = vadd.f32 %v1337_v3, %v1333_v59  ;;  %s5156_s19 = sld [smem:[#allocation2 + $0x58]] }
 0x180   : >> { %v1348_v26 = vmul.f32 %v1347_v4, %v4160_v10  ;;  %v1349_v36 = vmul.f32 %v1347_v4, %v4162_v11  ;;  %v1287_v51 = vadd.f32 %v1285_v31, %v1281_v35  ;;  %v1288_v44 = vadd.f32 %v1286_v61, %v1282_v38 }
 0x181   : >> { %v1354_v5 = vmul.f32 %v1353_v60, %v4165_v13  ;;  %v1359_v40 = vstv %s5094_s11  ;;  %v1344_v34 = vadd.f32 %v1342_v49, %v1338_v39  ;;  %v1345_v63 = vadd.f32 %v1343_v0, %v1339_v24  ;;  %v7069_v24 = vld [vmem:[#allocation100_spill] sm:$0xff]  ;;  %s5162_s11 = sld [smem:[#allocation2 + $0x6c]] }
 0x182   : >> { %v1355_v54 = vmul.f32 %v1353_v60, %v4169_v17  ;;  %v1365_v45 = vstv %s5098_s4  ;;  %v1172_v32 = vmax.f32 %v5056_v27, 0.0  ;;  %v1173_v30 = vmax.f32 %v1171_v23, 0.0  ;;  %s7072_s4 = sld [smem:[#allocation61_spill]] }
 0x183   : >> { %v1297_v31 = vmul.f32 %v1296_v50, %v7004_v55  ;;  %v1298_v61 = vmul.f32 %v1296_v50, %v4416_v22  ;;  %v1350_v48 = vadd.f32 %v1348_v26, %v1344_v34  ;;  %v1351_v49 = vadd.f32 %v1349_v36, %v1345_v63  ;;  %v7068_v50 = vld [vmem:[#allocation88_spill] sm:$0xff] }
 0x184   : >> { %v1360_v3 = vmul.f32 %v1359_v40, %v7045_v21  ;;  %v1361_v35 = vmul.f32 %v1359_v40, %v4181_v29  ;;  %v1293_v38 = vadd.f32 %v1291_v14, %v1287_v51  ;;  %v1294_v4 = vadd.f32 %v1292_v53, %v1288_v44 }
 0x185   : >> { %v1366_v27 = vmul.f32 %v1365_v45, %v4184_v33  ;;  %v1371_v46 = vstv %s5106_s5  ;;  %v1356_v59 = vadd.f32 %v1354_v5, %v1350_v48  ;;  %v1357_v0 = vadd.f32 %v1355_v54, %v1351_v49  ;;  %s5164_s5 = sld [smem:[#allocation2 + $0x80]] }
 0x186   : >> { %v1367_v60 = vmul.f32 %v1365_v45, %v4200_v56  ;;  %v1377_v23 = vstv %s5110_s7  ;;  %v1048_v39 = vadd.f32 %v5000_v41, %v7068_v50  ;;  %v1049_v26 = vadd.f32 %v5021_v2, %v7069_v24  ;;  %s5175_s7 = sld [smem:[#allocation2 + $0x16f]] }
 0x187   : >> { %v7070_v36 = vstv %s7060_s12  ;;  %v1362_v44 = vadd.f32 %v1360_v3, %v1356_v59  ;;  %v1363_v5 = vadd.f32 %v1361_v35, %v1357_v0  ;;  %v1372_v40 = vmul.f32 %v1371_v46, %v4209_v6  ;;  %s5321_s12 = sld [smem:[#allocation2 + $0x1ac]] }
 0x188   : >> { %v1175_v14 = vmul.f32 %v7070_v36, %v1172_v32  ;;  %v7071_v53 = vmov %v7070_v36  ;;  %v1373_v34 = vmul.f32 %v1371_v46, %v4211_v7  ;;  %v1299_v41 = vadd.f32 %v1297_v31, %v1293_v38 }
 0x189   : >> { %v1176_v51 = vmul.f32 %v7071_v53, %v1173_v30  ;;  %v5158_v2 = vadd.f32 %v1298_v61, %v1294_v4  ;;  %v1378_v63 = vmul.f32 %v1377_v23, %v7006_v42  ;;  %v1383_v54 = vstv %s5121_s6  ;;  %s5182_s6 = sld [smem:[#allocation2 + $0x94]] }
 0x18a   : >> { %v1368_v45 = vadd.f32 %v1366_v27, %v1362_v44  ;;  %v1369_v32 = vadd.f32 %v1367_v60, %v1363_v5  ;;  %v1379_v30 = vmul.f32 %v1377_v23, %v4219_v15  ;;  %v1389_v48 = vstv %s5125_s9  ;;  %s5188_s9 = sld [smem:[#allocation2 + $0xa8]] }
 0x18b   : >> { %v5168_v49 = vadd.f32 %v1175_v14, %v1048_v39  ;;  %v5170_v3 = vadd.f32 %v1176_v51, %v1049_v26  ;;  %v1395_v31 = vstv %s5130_s2  ;;  %v1384_v38 = vmul.f32 %v1383_v54, %v4221_v16  ;;  %v7074_v39 = vld [vmem:[#allocation91_spill] sm:$0xff]  ;;  %v7075_v26 = vld [vmem:[#allocation92_spill] sm:$0xff]  ;;  %s5190_s2 = sld [smem:[#allocation2 + $0x183]] }
 0x18c   : >> { %v1374_v61 = vadd.f32 %v1372_v40, %v1368_v45  ;;  %v1375_v35 = vadd.f32 %v1373_v34, %v1369_v32  ;;  %v1385_v4 = vmul.f32 %v1383_v54, %v4225_v19  ;;  %v1301_v27 = vmax.f32 %v1299_v41, 0.0  ;;  %v7076_v40 = vld [vmem:[#allocation69_spill] sm:$0xff]  ;;  %v7077_v41 = vld [vmem:[#allocation70_spill] sm:$0xff] }
 0x18d   : >> { %7073 = vst [vmem:[#allocation88_spill] sm:$0xff] %v5170_v3  ;;  %v1302_v46 = vmax.f32 %v5158_v2, 0.0  ;;  %v1303_v59 = vstv %s7072_s4  ;;  %v1390_v0 = vmul.f32 %v1389_v48, %v4227_v20  ;;  %v1391_v50 = vmul.f32 %v1389_v48, %v7007_v58  ;;  %s5198_s4 = sld [smem:[#allocation2 + $0xbc]]  ;;  %v7078_v3 = vld [vmem:[#allocation93_spill] sm:$0xff] }
 0x18e   : >> { %v1380_v60 = vadd.f32 %v1378_v63, %v1374_v61  ;;  %v1381_v23 = vadd.f32 %v1379_v30, %v1375_v35  ;;  %v1396_v24 = vmul.f32 %v1395_v31, %v7074_v39  ;;  %v1397_v36 = vmul.f32 %v1395_v31, %v7075_v26 }
 0x18f   : >> { %v1401_v14 = vstv %s5148_s13  ;;  %v1438_v53 = vstv %s5138_s10  ;;  %v1442_v51 = vstv %s5150_s1  ;;  %v1446_v63 = vstv %s5154_s15  ;;  %s5204_s10 = sld [smem:[#allocation2 + $0xd0]]  ;;  %s5208_s13 = sld [smem:[#allocation2 + $0x197]] }
 0x190   : >> { %v1386_v44 = vadd.f32 %v1384_v38, %v1380_v60  ;;  %v1387_v5 = vadd.f32 %v1385_v4, %v1381_v23  ;;  %v1439_v34 = vmul.f32 %v1438_v53, %v7076_v40  ;;  %v1440_v2 = vmul.f32 %v1438_v53, %v7077_v41  ;;  %s5212_s1 = sld [smem:[#allocation2 + $0xe4]]  ;;  %s5219_s15 = sld [smem:[#allocation2 + $0xf8]] }
 0x191   : >> { %v1452_v54 = vstv %s5156_s19  ;;  %v1458_v45 = vstv %s5162_s11  ;;  %v1464_v32 = vstv %s5164_s5  ;;  %v1447_v35 = vmul.f32 %v1446_v63, %v7017_v18  ;;  %s5223_s19 = sld [smem:[#allocation2 + $0x1ab]]  ;;  %s5228_s11 = sld [smem:[#allocation2 + $0x10c]] }
 0x192   : >> { %v1392_v30 = vadd.f32 %v1390_v0, %v1386_v44  ;;  %v1393_v48 = vadd.f32 %v1391_v50, %v1387_v5  ;;  %v1443_v31 = vadd.f32 %v1442_v51, %v1439_v34  ;;  %v1444_v61 = vadd.f32 %v1442_v51, %v1440_v2  ;;  %v7079_v2 = vld [vmem:[#allocation94_spill] sm:$0xff]  ;;  %s5236_s5 = sld [smem:[#allocation2 + $0x120]] }
 0x193   : >> { %v1448_v38 = vmul.f32 %v1446_v63, %v7040_v37  ;;  %v1453_v4 = vmul.f32 %v1452_v54, %v7063_v43  ;;  %v1454_v60 = vmul.f32 %v1452_v54, %v7064_v28  ;;  %v1304_v23 = vmul.f32 %v1303_v59, %v1301_v27 }
 0x194   : >> { %v1398_v53 = vadd.f32 %v1396_v24, %v1392_v30  ;;  %v1402_v41 = vmul.f32 %v1401_v14, %v7078_v3  ;;  %v1407_v0 = vstv %s5175_s7  ;;  %v1449_v50 = vadd.f32 %v1447_v35, %v1443_v31  ;;  %v7080_v35 = vld [vmem:[#allocation95_spill] sm:$0xff]  ;;  %s5243_s7 = sld [smem:[#allocation2 + $0x134]] }
 0x195   : >> { %v1450_v51 = vadd.f32 %v1448_v38, %v1444_v61  ;;  %v1459_v44 = vmul.f32 %v1458_v45, %v4141_v52  ;;  %v1460_v5 = vmul.f32 %v1458_v45, %v7055_v12  ;;  %v1399_v34 = vadd.f32 %v1397_v36, %v1393_v48 }
 0x196   : >> { %v1403_v63 = vmul.f32 %v1401_v14, %v7079_v2  ;;  %v1465_v27 = vmul.f32 %v1464_v32, %v7065_v25  ;;  %v1470_v24 = vstv %s5182_s6  ;;  %v1455_v54 = vadd.f32 %v1453_v4, %v1449_v50  ;;  %s5245_s6 = sld [smem:[#allocation2 + $0x148]] }
 0x197   : >> { %v1456_v30 = vadd.f32 %v1454_v60, %v1450_v51  ;;  %v1466_v28 = vmul.f32 %v1464_v32, %v7066_v8  ;;  %v1476_v31 = vstv %s5188_s9  ;;  %v1404_v61 = vadd.f32 %v1402_v41, %v1398_v53  ;;  %v7081_v53 = vld [vmem:[#allocation96_spill] sm:$0xff]  ;;  %s5252_s9 = sld [smem:[#allocation2 + $0x15c]] }
 0x198   : >> { %v1408_v38 = vmul.f32 %v1407_v0, %v7080_v35  ;;  %v1413_v45 = vstv %s5190_s2  ;;  %v1471_v36 = vmul.f32 %v1470_v24, %v7067_v47  ;;  %v1461_v14 = vadd.f32 %v1459_v44, %v1455_v54  ;;  %s7083_s2 = sld [smem:[#allocation62_spill]] }
 0x199   : >> { %v1462_v48 = vadd.f32 %v1460_v5, %v1456_v30  ;;  %v1472_v4 = vmul.f32 %v1470_v24, %v4158_v9  ;;  %v1482_v60 = vstv %s5198_s4  ;;  %v5230_v32 = vmul.f32 %v1303_v59, %v1302_v46  ;;  %v7082_v24 = vld [vmem:[#allocation97_spill] sm:$0xff]  ;;  %s5256_s4 = sld [smem:[#allocation2 + $0x170]] }
 0x19a   : >> { %v1405_v41 = vadd.f32 %v1403_v63, %v1399_v34  ;;  %v1409_v50 = vmul.f32 %v1407_v0, %v7081_v53  ;;  %v1477_v51 = vmul.f32 %v1476_v31, %v4160_v10  ;;  %v1467_v8 = vadd.f32 %v1465_v27, %v1461_v14 }
 0x19b   : >> { %v1468_v25 = vadd.f32 %v1466_v28, %v1462_v48  ;;  %v1478_v47 = vmul.f32 %v1476_v31, %v4162_v11  ;;  %v1488_v44 = vstv %s5204_s10  ;;  %v1410_v5 = vadd.f32 %v1408_v38, %v1404_v61  ;;  %s5266_s10 = sld [smem:[#allocation2 + $0x31]] }
 0x19c   : >> { %v1414_v54 = vmul.f32 %v1413_v45, %v7082_v24  ;;  %v1419_v30 = vstv %s5208_s13  ;;  %v1483_v46 = vmul.f32 %v1482_v60, %v4165_v13  ;;  %v1473_v59 = vadd.f32 %v1471_v36, %v1467_v8  ;;  %s5268_s13 = sld [smem:[#allocation2 + $0x1c1]] }
 0x19d   : >> { %v1474_v34 = vadd.f32 %v1472_v4, %v1468_v25  ;;  %v1484_v0 = vmul.f32 %v1482_v60, %v4169_v17  ;;  %v1494_v63 = vstv %s5212_s1  ;;  %v5248_v28 = vadd.f32 %v1304_v23, %v5168_v49  ;;  %s5272_s1 = sld [smem:[#allocation2 + $0x45]] }
 0x19e   : >> { %v1411_v27 = vadd.f32 %v1409_v50, %v1405_v41  ;;  %v1415_v31 = vmul.f32 %v1413_v45, %v4295_v57  ;;  %v1489_v61 = vmul.f32 %v1488_v44, %v7045_v21  ;;  %v1479_v25 = vadd.f32 %v1477_v51, %v1473_v59 }
 0x19f   : >> { %v1480_v8 = vadd.f32 %v1478_v47, %v1474_v34  ;;  %v1490_v38 = vmul.f32 %v1488_v44, %v4181_v29  ;;  %v1500_v36 = vstv %s5219_s15  ;;  %v1416_v14 = vadd.f32 %v1414_v54, %v1410_v5  ;;  %s5274_s15 = sld [smem:[#allocation2 + $0x59]] }
 0x1a0   : >> { %v1420_v49 = vmul.f32 %v1419_v30, %v4303_v62  ;;  %v1425_v23 = vstv %s5223_s19  ;;  %v1495_v48 = vmul.f32 %v1494_v63, %v4184_v33  ;;  %v1485_v45 = vadd.f32 %v1483_v46, %v1479_v25  ;;  %s5279_s19 = sld [smem:[#allocation2 + $0x184]] }
 0x1a1   : >> { %v1486_v4 = vadd.f32 %v1484_v0, %v1480_v8  ;;  %v1496_v60 = vmul.f32 %v1494_v63, %v4200_v56  ;;  %v1506_v41 = vstv %s5228_s11  ;;  %v1417_v50 = vadd.f32 %v1415_v31, %v1411_v27  ;;  %s5281_s11 = sld [smem:[#allocation2 + $0x6d]] }
 0x1a2   : >> { %v1421_v47 = vmul.f32 %v1419_v30, %v4305_v1  ;;  %v1501_v44 = vmul.f32 %v1500_v36, %v4209_v6  ;;  %v1491_v5 = vadd.f32 %v1489_v61, %v1485_v45  ;;  %v1502_v46 = vmul.f32 %v1500_v36, %v4211_v7 }
 0x1a3   : >> { %v1492_v54 = vadd.f32 %v1490_v38, %v1486_v4  ;;  %v1512_v59 = vstv %s5236_s5  ;;  %v1422_v30 = vadd.f32 %v1420_v49, %v1416_v14  ;;  %v1426_v34 = vmul.f32 %v1425_v23, %v7004_v55  ;;  %s5294_s5 = sld [smem:[#allocation2 + $0x81]] }
 0x1a4   : >> { %v1507_v0 = vmul.f32 %v1506_v41, %v7006_v42  ;;  %v1508_v63 = vmul.f32 %v1506_v41, %v4219_v15  ;;  %v1497_v27 = vadd.f32 %v1495_v48, %v1491_v5  ;;  %v1518_v61 = vstv %s5243_s7  ;;  %s5303_s7 = sld [smem:[#allocation2 + $0x198]] }
 0x1a5   : >> { %v1498_v31 = vadd.f32 %v1496_v60, %v1492_v54  ;;  %v1524_v25 = vstv %s5245_s6  ;;  %v5285_v8 = vadd.f32 %v1421_v47, %v1417_v50  ;;  %v5288_v38 = vmul.f32 %v1425_v23, %v4416_v22  ;;  %s5305_s6 = sld [smem:[#allocation2 + $0x95]] }
 0x1a6   : >> { %v1513_v36 = vmul.f32 %v1512_v59, %v4221_v16  ;;  %v1530_v14 = vstv %s5252_s9  ;;  %v1503_v49 = vadd.f32 %v1501_v44, %v1497_v27  ;;  %v1514_v4 = vmul.f32 %v1512_v59, %v4225_v19  ;;  %s5313_s9 = sld [smem:[#allocation2 + $0xa9]] }
 0x1a7   : >> { %v1504_v45 = vadd.f32 %v1502_v46, %v1498_v31  ;;  %v1536_v41 = vstv %s5256_s4  ;;  %v5296_v48 = vadd.f32 %v1426_v34, %v1422_v30  ;;  %v1519_v60 = vmul.f32 %v1518_v61, %v4227_v20  ;;  %v7084_v31 = vld [vmem:[#allocation70_spill] sm:$0xff]  ;;  %s5319_s4 = sld [smem:[#allocation2 + $0xbd]] }
 0x1a8   : >> { %v1520_v50 = vmul.f32 %v1518_v61, %v7007_v58  ;;  %v1525_v23 = vmul.f32 %v1524_v25, %v7074_v39  ;;  %v1509_v47 = vadd.f32 %v1507_v0, %v1503_v49  ;;  %v1526_v5 = vmul.f32 %v1524_v25, %v7075_v26 }
 0x1a9   : >> { %v1510_v44 = vadd.f32 %v1508_v63, %v1504_v45  ;;  %v1531_v54 = vmul.f32 %v1530_v14, %v7078_v3  ;;  %v1532_v46 = vmul.f32 %v1530_v14, %v7079_v2  ;;  %v1537_v59 = vmul.f32 %v1536_v41, %v7080_v35 }
 0x1aa   : >> { %v1567_v30 = vstv %s5266_s10  ;;  %v1571_v34 = vstv %s5268_s13  ;;  %v1515_v27 = vadd.f32 %v1513_v36, %v1509_v47  ;;  %v1542_v25 = vstv %s5279_s19  ;;  %s5329_s10 = sld [smem:[#allocation2 + $0xd1]]  ;;  %s5333_s13 = sld [smem:[#allocation2 + $0xe5]] }
 0x1ab   : >> { %v1516_v0 = vadd.f32 %v1514_v4, %v1510_v44  ;;  %v1568_v63 = vmul.f32 %v1567_v30, %v7076_v40  ;;  %v1569_v61 = vmul.f32 %v1567_v30, %v7084_v31  ;;  %v1575_v49 = vstv %s5272_s1  ;;  %v7085_v30 = vld [vmem:[#allocation74_spill] sm:$0xff]  ;;  %s5342_s1 = sld [smem:[#allocation2 + $0xf9]] }
 0x1ac   : >> { %v1581_v45 = vstv %s5274_s15  ;;  %v1587_v51 = vstv %s5281_s11  ;;  %v1521_v14 = vadd.f32 %v1519_v60, %v1515_v27  ;;  %v1576_v4 = vmul.f32 %v1575_v49, %v7017_v18  ;;  %s5346_s15 = sld [smem:[#allocation2 + $0x10d]]  ;;  %s5357_s19 = sld [smem:[#allocation2 + $0x121]] }
 0x1ad   : >> { %v1522_v2 = vadd.f32 %v1520_v50, %v1516_v0  ;;  %v1572_v35 = vadd.f32 %v1571_v34, %v1568_v63  ;;  %v1573_v36 = vadd.f32 %v1571_v34, %v1569_v61  ;;  %v1577_v47 = vmul.f32 %v1575_v49, %v7040_v37  ;;  %v7086_v49 = vld [vmem:[#allocation77_spill] sm:$0xff]  ;;  %s5366_s11 = sld [smem:[#allocation2 + $0x149]] }
 0x1ae   : >> { %v1582_v44 = vmul.f32 %v1581_v45, %v7063_v43  ;;  %v1583_v3 = vmul.f32 %v1581_v45, %v7085_v30  ;;  %v1527_v31 = vadd.f32 %v1525_v23, %v1521_v14  ;;  %v1538_v26 = vmul.f32 %v1536_v41, %v7081_v53 }
 0x1af   : >> { %v1528_v40 = vadd.f32 %v1526_v5, %v1522_v2  ;;  %v1593_v60 = vstv %s5294_s5  ;;  %v1578_v50 = vadd.f32 %v1576_v4, %v1572_v35  ;;  %v1579_v34 = vadd.f32 %v1577_v47, %v1573_v36  ;;  %v7087_v35 = vld [vmem:[#allocation78_spill] sm:$0xff]  ;;  %v7088_v47 = vld [vmem:[#allocation79_spill] sm:$0xff]  ;;  %s5374_s5 = sld [smem:[#allocation2 + $0x32]] }
 0x1b0   : >> { %v1588_v27 = vmul.f32 %v1587_v51, %v4141_v52  ;;  %v1589_v0 = vmul.f32 %v1587_v51, %v7055_v12  ;;  %v1533_v63 = vadd.f32 %v1531_v54, %v1527_v31  ;;  %v1543_v61 = vmul.f32 %v1542_v25, %v7082_v24 }
 0x1b1   : >> { %v1548_v23 = vstv %s5303_s7  ;;  %v1599_v2 = vstv %s5305_s6  ;;  %v1584_v5 = vadd.f32 %v1582_v44, %v1578_v50  ;;  %v1585_v41 = vadd.f32 %v1583_v3, %v1579_v34  ;;  %s5383_s7 = sld [smem:[#allocation2 + $0x15d]]  ;;  %s5385_s6 = sld [smem:[#allocation2 + $0x1c2]] }
 0x1b2   : >> { %v1594_v45 = vmul.f32 %v1593_v60, %v7086_v49  ;;  %v1595_v14 = vmul.f32 %v1593_v60, %v7087_v35  ;;  %v1534_v36 = vadd.f32 %v1532_v46, %v1528_v40  ;;  %v1539_v4 = vadd.f32 %v1537_v59, %v1533_v63 }
 0x1b3   : >> { %v1600_v53 = vmul.f32 %v1599_v2, %v7088_v47  ;;  %v1605_v51 = vstv %s5313_s9  ;;  %v1590_v54 = vadd.f32 %v1588_v27, %v1584_v5  ;;  %v1591_v31 = vadd.f32 %v1589_v0, %v1585_v41  ;;  %s5389_s9 = sld [smem:[#allocation2 + $0x46]] }
 0x1b4   : >> { %v1601_v24 = vmul.f32 %v1599_v2, %v4158_v9  ;;  %v1611_v12 = vstv %s5319_s4  ;;  %v1429_v3 = vadd.f32 %v5288_v38, %v5285_v8  ;;  %v1544_v40 = vmul.f32 %v1542_v25, %v4295_v57  ;;  %s5391_s4 = sld [smem:[#allocation2 + $0x5a]] }
 0x1b5   : >> { %v1549_v46 = vmul.f32 %v1548_v23, %v4303_v62  ;;  %v1554_v59 = vstv %s5321_s12  ;;  %v1596_v44 = vadd.f32 %v1594_v45, %v1590_v54  ;;  %v1597_v60 = vadd.f32 %v1595_v14, %v1591_v31  ;;  %s5361_s12 = sld [smem:[#allocation2 + $0x135]] }
 0x1b6   : >> { %v1606_v50 = vmul.f32 %v1605_v51, %v4160_v10  ;;  %v1607_v34 = vmul.f32 %v1605_v51, %v4162_v11  ;;  %v1540_v27 = vadd.f32 %v1538_v26, %v1534_v36  ;;  %v1545_v0 = vadd.f32 %v1543_v61, %v1539_v4 }
 0x1b7   : >> { %v1612_v63 = vmul.f32 %v1611_v12, %v4165_v13  ;;  %v1617_v2 = vstv %s5329_s10  ;;  %v1602_v8 = vadd.f32 %v1600_v53, %v1596_v44  ;;  %v1603_v38 = vadd.f32 %v1601_v24, %v1597_v60  ;;  %v7089_v44 = vld [vmem:[#allocation88_spill] sm:$0xff]  ;;  %s5397_s10 = sld [smem:[#allocation2 + $0x6e]] }
 0x1b8   : >> { %v1613_v25 = vmul.f32 %v1611_v12, %v4169_v17  ;;  %v1623_v5 = vstv %s5333_s13  ;;  %v1430_v41 = vmax.f32 %v5296_v48, 0.0  ;;  %v1431_v45 = vmax.f32 %v1429_v3, 0.0  ;;  %s7092_s13 = sld [smem:[#allocation63_spill]] }
 0x1b9   : >> { %v1550_v26 = vmul.f32 %v1548_v23, %v4305_v1  ;;  %v1555_v61 = vmul.f32 %v1554_v59, %v7004_v55  ;;  %v1608_v53 = vadd.f32 %v1606_v50, %v1602_v8  ;;  %v1609_v24 = vadd.f32 %v1607_v34, %v1603_v38 }
 0x1ba   : >> { %v1618_v14 = vmul.f32 %v1617_v2, %v7045_v21  ;;  %v1619_v12 = vmul.f32 %v1617_v2, %v4181_v29  ;;  %v1546_v36 = vadd.f32 %v1544_v40, %v1540_v27  ;;  %v1551_v4 = vadd.f32 %v1549_v46, %v1545_v0 }
 0x1bb   : >> { %v1624_v48 = vmul.f32 %v1623_v5, %v4184_v33  ;;  %v1629_v51 = vstv %s5342_s1  ;;  %v1614_v54 = vadd.f32 %v1612_v63, %v1608_v53  ;;  %v1615_v31 = vadd.f32 %v1613_v25, %v1609_v24  ;;  %s5399_s1 = sld [smem:[#allocation2 + $0x82]] }
 0x1bc   : >> { %v1625_v23 = vmul.f32 %v1623_v5, %v4200_v56  ;;  %v1635_v3 = vstv %s5346_s15  ;;  %v1307_v60 = vadd.f32 %v5230_v32, %v7089_v44  ;;  %v7090_v50 = vstv %s7083_s2  ;;  %s5411_s15 = sld [smem:[#allocation2 + $0x171]]  ;;  %s5436_s2 = sld [smem:[#allocation2 + $0xbe]] }
 0x1bd   : >> { %v1433_v34 = vmul.f32 %v7090_v50, %v1430_v41  ;;  %v7091_v8 = vmov %v7090_v50  ;;  %v1556_v40 = vmul.f32 %v1554_v59, %v4416_v22  ;;  %v1620_v46 = vadd.f32 %v1618_v14, %v1614_v54 }
 0x1be   : >> { %v1434_v2 = vmul.f32 %v7091_v8, %v1431_v45  ;;  %v1621_v27 = vadd.f32 %v1619_v12, %v1615_v31  ;;  %v1630_v0 = vmul.f32 %v1629_v51, %v4209_v6  ;;  %v1631_v63 = vmul.f32 %v1629_v51, %v4211_v7 }
 0x1bf   : >> { %v1552_v32 = vadd.f32 %v1550_v26, %v1546_v36  ;;  %v5393_v38 = vadd.f32 %v1555_v61, %v1551_v4  ;;  %v1636_v59 = vmul.f32 %v1635_v3, %v7006_v42  ;;  %v1641_v25 = vstv %s5357_s19  ;;  %s5420_s19 = sld [smem:[#allocation2 + $0x96]] }
 0x1c0   : >> { %v1626_v5 = vadd.f32 %v1624_v48, %v1620_v46  ;;  %v1627_v41 = vadd.f32 %v1625_v23, %v1621_v27  ;;  %v1637_v45 = vmul.f32 %v1635_v3, %v4219_v15  ;;  %v1647_v53 = vstv %s5361_s12  ;;  %s5426_s12 = sld [smem:[#allocation2 + $0xaa]]  ;;  %v7095_v27 = vld [vmem:[#allocation69_spill] sm:$0xff] }
 0x1c1   : >> { %v5404_v24 = vadd.f32 %v1433_v34, %v5248_v28  ;;  %v5406_v14 = vadd.f32 %v1434_v2, %v1307_v60  ;;  %v1653_v26 = vstv %s5366_s11  ;;  %v1642_v36 = vmul.f32 %v1641_v25, %v4221_v16  ;;  %v7094_v60 = vld [vmem:[#allocation92_spill] sm:$0xff]  ;;  %s5428_s11 = sld [smem:[#allocation2 + $0x185]] }
 0x1c2   : >> { %v1632_v61 = vadd.f32 %v1630_v0, %v1626_v5  ;;  %v1633_v12 = vadd.f32 %v1631_v63, %v1627_v41  ;;  %v1643_v4 = vmul.f32 %v1641_v25, %v4225_v19  ;;  %v5413_v48 = vadd.f32 %v1556_v40, %v1552_v32  ;;  %v7096_v63 = vld [vmem:[#allocation70_spill] sm:$0xff] }
 0x1c3   : >> { %7093 = vst [vmem:[#allocation100_spill] sm:$0xff] %v5406_v14  ;;  %v1559_v51 = vmax.f32 %v5393_v38, 0.0  ;;  %v1648_v54 = vmul.f32 %v1647_v53, %v4227_v20  ;;  %v1649_v3 = vmul.f32 %v1647_v53, %v7007_v58  ;;  %v1654_v44 = vmul.f32 %v1653_v26, %v7074_v39 }
 0x1c4   : >> { %v1638_v31 = vadd.f32 %v1636_v59, %v1632_v61  ;;  %v1639_v23 = vadd.f32 %v1637_v45, %v1633_v12  ;;  %v1655_v50 = vmul.f32 %v1653_v26, %v7094_v60  ;;  %v1659_v34 = vstv %s5383_s7  ;;  %s5447_s7 = sld [smem:[#allocation2 + $0x199]] }
 0x1c5   : >> { %v1696_v8 = vstv %s5374_s5  ;;  %v1700_v2 = vstv %s5385_s6  ;;  %v1704_v38 = vstv %s5389_s9  ;;  %v1710_v59 = vstv %s5391_s4  ;;  %s5442_s5 = sld [smem:[#allocation2 + $0xd2]]  ;;  %s5451_s6 = sld [smem:[#allocation2 + $0xe6]] }
 0x1c6   : >> { %v1644_v40 = vadd.f32 %v1642_v36, %v1638_v31  ;;  %v1645_v46 = vadd.f32 %v1643_v4, %v1639_v23  ;;  %v1697_v0 = vmul.f32 %v1696_v8, %v7095_v27  ;;  %v1698_v32 = vmul.f32 %v1696_v8, %v7096_v63  ;;  %v7097_v8 = vld [vmem:[#allocation93_spill] sm:$0xff]  ;;  %s5458_s9 = sld [smem:[#allocation2 + $0xfa]]  ;;  %s5462_s4 = sld [smem:[#allocation2 + $0x1ad]] }
 0x1c7   : >> { %v1716_v25 = vstv %s5397_s10  ;;  %v1722_v5 = vstv %s5399_s1  ;;  %v1705_v61 = vmul.f32 %v1704_v38, %v7017_v18  ;;  %v1706_v12 = vmul.f32 %v1704_v38, %v7040_v37  ;;  %s5467_s10 = sld [smem:[#allocation2 + $0x10e]]  ;;  %s5475_s1 = sld [smem:[#allocation2 + $0x122]] }
 0x1c8   : >> { %v1650_v41 = vadd.f32 %v1648_v54, %v1644_v40  ;;  %v1651_v45 = vadd.f32 %v1649_v3, %v1645_v46  ;;  %v1701_v53 = vadd.f32 %v1700_v2, %v1697_v0  ;;  %v1702_v26 = vadd.f32 %v1700_v2, %v1698_v32  ;;  %v7098_v0 = vld [vmem:[#allocation76_spill] sm:$0xff] }
 0x1c9   : >> { %v1711_v36 = vmul.f32 %v1710_v59, %v7063_v43  ;;  %v1712_v4 = vmul.f32 %v1710_v59, %v7085_v30  ;;  %v1560_v31 = vmax.f32 %v5413_v48, 0.0  ;;  %v1660_v54 = vmul.f32 %v1659_v34, %v7097_v8  ;;  %v7099_v59 = vld [vmem:[#allocation94_spill] sm:$0xff] }
 0x1ca   : >> { %v1656_v23 = vadd.f32 %v1654_v44, %v1650_v41  ;;  %v1665_v3 = vstv %s5411_s15  ;;  %v1707_v2 = vadd.f32 %v1705_v61, %v1701_v53  ;;  %v1708_v40 = vadd.f32 %v1706_v12, %v1702_v26  ;;  %v7100_v12 = vld [vmem:[#allocation95_spill] sm:$0xff]  ;;  %s5484_s15 = sld [smem:[#allocation2 + $0x14a]] }
 0x1cb   : >> { %v1717_v46 = vmul.f32 %v1716_v25, %v4141_v52  ;;  %v1718_v32 = vmul.f32 %v1716_v25, %v7098_v0  ;;  %v1657_v38 = vadd.f32 %v1655_v50, %v1651_v45  ;;  %v1661_v28 = vmul.f32 %v1659_v34, %v7099_v59 }
 0x1cc   : >> { %v1723_v48 = vmul.f32 %v1722_v5, %v7086_v49  ;;  %v1728_v44 = vstv %s5420_s19  ;;  %v1713_v41 = vadd.f32 %v1711_v36, %v1707_v2  ;;  %v1714_v14 = vadd.f32 %v1712_v4, %v1708_v40  ;;  %s5494_s19 = sld [smem:[#allocation2 + $0x15e]] }
 0x1cd   : >> { %v1724_v53 = vmul.f32 %v1722_v5, %v7087_v35  ;;  %v1734_v61 = vstv %s5426_s12  ;;  %v1662_v26 = vadd.f32 %v1660_v54, %v1656_v23  ;;  %v1666_v25 = vmul.f32 %v1665_v3, %v7100_v12  ;;  %v7102_v54 = vld [vmem:[#allocation96_spill] sm:$0xff]  ;;  %s5501_s12 = sld [smem:[#allocation2 + $0x172]] }
 0x1ce   : >> { %v1671_v0 = vstv %s5428_s11  ;;  %v1729_v50 = vmul.f32 %v1728_v44, %v7088_v47  ;;  %v1719_v34 = vadd.f32 %v1717_v46, %v1713_v41  ;;  %v1720_v45 = vadd.f32 %v1718_v32, %v1714_v14  ;;  %v7103_v32 = vld [vmem:[#allocation97_spill] sm:$0xff]  ;;  %s5508_s11 = sld [smem:[#allocation2 + $0x33]] }
 0x1cf   : >> { %v1730_v36 = vmul.f32 %v1728_v44, %v4158_v9  ;;  %v1740_v4 = vstv %s5436_s2  ;;  %v7101_v5 = vstv %s7092_s13  ;;  %v1663_v23 = vadd.f32 %v1661_v28, %v1657_v38  ;;  %s5482_s2 = sld [smem:[#allocation2 + $0x136]] }
 0x1d0   : >> { %v1562_v2 = vmul.f32 %v7101_v5, %v1559_v51  ;;  %v1667_v40 = vmul.f32 %v1665_v3, %v7102_v54  ;;  %v1735_v35 = vmul.f32 %v1734_v61, %v4160_v10  ;;  %v1725_v49 = vadd.f32 %v1723_v48, %v1719_v34 }
 0x1d1   : >> { %v1726_v52 = vadd.f32 %v1724_v53, %v1720_v45  ;;  %v1736_v46 = vmul.f32 %v1734_v61, %v4162_v11  ;;  %v1746_v41 = vstv %s5442_s5  ;;  %v1668_v14 = vadd.f32 %v1666_v25, %v1662_v26  ;;  %s5510_s5 = sld [smem:[#allocation2 + $0x1c3]] }
 0x1d2   : >> { %v1672_v44 = vmul.f32 %v1671_v0, %v7103_v32  ;;  %v1677_v9 = vstv %s5447_s7  ;;  %v1741_v51 = vmul.f32 %v1740_v4, %v4165_v13  ;;  %v1731_v28 = vadd.f32 %v1729_v50, %v1725_v49  ;;  %s7105_s7 = sld [smem:[#allocation64_spill]] }
 0x1d3   : >> { %v1732_v38 = vadd.f32 %v1730_v36, %v1726_v52  ;;  %v1742_v3 = vmul.f32 %v1740_v4, %v4169_v17  ;;  %v1752_v5 = vstv %s5451_s6  ;;  %v7104_v48 = vstv %s7092_s13  ;;  %s5514_s6 = sld [smem:[#allocation2 + $0x47]]  ;;  %s5918_s13 = sld [smem:[#allocation2 + $0x189]] }
 0x1d4   : >> { %v5488_v53 = vmul.f32 %v7104_v48, %v1560_v31  ;;  %v1669_v61 = vadd.f32 %v1667_v40, %v1663_v23  ;;  %v1673_v26 = vmul.f32 %v1671_v0, %v4295_v57  ;;  %v1747_v25 = vmul.f32 %v1746_v41, %v7045_v21 }
 0x1d5   : >> { %v1737_v34 = vadd.f32 %v1735_v35, %v1731_v28  ;;  %v1738_v49 = vadd.f32 %v1736_v46, %v1732_v38  ;;  %v1748_v52 = vmul.f32 %v1746_v41, %v4181_v29  ;;  %v1758_v50 = vstv %s5458_s9  ;;  %s5516_s9 = sld [smem:[#allocation2 + $0x5b]] }
 0x1d6   : >> { %v1674_v45 = vadd.f32 %v1672_v44, %v1668_v14  ;;  %v1678_v36 = vmul.f32 %v1677_v9, %v4303_v62  ;;  %v1683_v4 = vstv %s5462_s4  ;;  %v1753_v31 = vmul.f32 %v1752_v5, %v4184_v33  ;;  %s5521_s4 = sld [smem:[#allocation2 + $0x6f]] }
 0x1d7   : >> { %v1743_v48 = vadd.f32 %v1741_v51, %v1737_v34  ;;  %v1744_v23 = vadd.f32 %v1742_v3, %v1738_v49  ;;  %v1754_v0 = vmul.f32 %v1752_v5, %v4200_v56  ;;  %v1764_v40 = vstv %s5467_s10  ;;  %s5523_s10 = sld [smem:[#allocation2 + $0x83]] }
 0x1d8   : >> { %v5504_v35 = vadd.f32 %v1562_v2, %v5404_v24  ;;  %v1675_v46 = vadd.f32 %v1673_v26, %v1669_v61  ;;  %v1679_v41 = vmul.f32 %v1677_v9, %v4305_v1  ;;  %v1759_v14 = vmul.f32 %v1758_v50, %v4209_v6 }
 0x1d9   : >> { %v1749_v44 = vadd.f32 %v1747_v25, %v1743_v48  ;;  %v1750_v51 = vadd.f32 %v1748_v52, %v1744_v23  ;;  %v1760_v28 = vmul.f32 %v1758_v50, %v4211_v7  ;;  %v1770_v38 = vstv %s5475_s1  ;;  %s5536_s1 = sld [smem:[#allocation2 + $0x186]] }
 0x1da   : >> { %v1680_v24 = vadd.f32 %v1678_v36, %v1674_v45  ;;  %v1684_v9 = vmul.f32 %v1683_v4, %v7004_v55  ;;  %v1765_v2 = vmul.f32 %v1764_v40, %v7006_v42  ;;  %v1766_v3 = vmul.f32 %v1764_v40, %v4219_v15 }
 0x1db   : >> { %v1755_v5 = vadd.f32 %v1753_v31, %v1749_v44  ;;  %v1756_v61 = vadd.f32 %v1754_v0, %v1750_v51  ;;  %v1776_v26 = vstv %s5482_s2  ;;  %v1782_v25 = vstv %s5484_s15  ;;  %s5545_s2 = sld [smem:[#allocation2 + $0x97]]  ;;  %s5551_s15 = sld [smem:[#allocation2 + $0xab]] }
 0x1dc   : >> { %v5527_v34 = vadd.f32 %v1679_v41, %v1675_v46  ;;  %v5530_v49 = vmul.f32 %v1683_v4, %v4416_v22  ;;  %v1771_v50 = vmul.f32 %v1770_v38, %v4221_v16  ;;  %v1772_v48 = vmul.f32 %v1770_v38, %v4225_v19 }
 0x1dd   : >> { %v1761_v45 = vadd.f32 %v1759_v14, %v1755_v5  ;;  %v1762_v36 = vadd.f32 %v1760_v28, %v1756_v61  ;;  %v1788_v23 = vstv %s5494_s19  ;;  %v5538_v31 = vadd.f32 %v1684_v9, %v1680_v24  ;;  %s5553_s19 = sld [smem:[#allocation2 + $0x19a]] }
 0x1de   : >> { %v1777_v0 = vmul.f32 %v1776_v26, %v4227_v20  ;;  %v1778_v40 = vmul.f32 %v1776_v26, %v7007_v58  ;;  %v1783_v4 = vmul.f32 %v1782_v25, %v7074_v39  ;;  %v1784_v14 = vmul.f32 %v1782_v25, %v7094_v60 }
 0x1df   : >> { %v1767_v46 = vadd.f32 %v1765_v2, %v1761_v45  ;;  %v1768_v41 = vadd.f32 %v1766_v3, %v1762_v36  ;;  %v1794_v44 = vstv %s5501_s12  ;;  %v1789_v51 = vmul.f32 %v1788_v23, %v7097_v8  ;;  %s5561_s12 = sld [smem:[#allocation2 + $0xbf]] }
 0x1e0   : >> { %v1790_v28 = vmul.f32 %v1788_v23, %v7099_v59  ;;  %v1825_v38 = vstv %s5508_s11  ;;  %v1829_v24 = vstv %s5510_s5  ;;  %v1833_v61 = vstv %s5514_s6  ;;  %s5567_s11 = sld [smem:[#allocation2 + $0xd3]]  ;;  %s5571_s5 = sld [smem:[#allocation2 + $0x1ae]] }
 0x1e1   : >> { %v1773_v9 = vadd.f32 %v1771_v50, %v1767_v46  ;;  %v1774_v5 = vadd.f32 %v1772_v48, %v1768_v41  ;;  %v1826_v2 = vmul.f32 %v1825_v38, %v7095_v27  ;;  %v1827_v3 = vmul.f32 %v1825_v38, %v7096_v63  ;;  %s5578_s6 = sld [smem:[#allocation2 + $0xe7]] }
 0x1e2   : >> { %v1839_v26 = vstv %s5516_s9  ;;  %v1845_v25 = vstv %s5521_s4  ;;  %v1851_v45 = vstv %s5523_s10  ;;  %v1834_v50 = vmul.f32 %v1833_v61, %v7017_v18  ;;  %s5582_s9 = sld [smem:[#allocation2 + $0xfb]]  ;;  %s5593_s4 = sld [smem:[#allocation2 + $0x10f]] }
 0x1e3   : >> { %v1779_v36 = vadd.f32 %v1777_v0, %v1773_v9  ;;  %v1780_v52 = vadd.f32 %v1778_v40, %v1774_v5  ;;  %v1830_v23 = vadd.f32 %v1829_v24, %v1826_v2  ;;  %v1831_v59 = vadd.f32 %v1829_v24, %v1827_v3  ;;  %v7106_v5 = vld [vmem:[#allocation75_spill] sm:$0xff]  ;;  %v7107_v3 = vld [vmem:[#allocation76_spill] sm:$0xff]  ;;  %s5597_s10 = sld [smem:[#allocation2 + $0x123]] }
 0x1e4   : >> { %v1835_v48 = vmul.f32 %v1833_v61, %v7040_v37  ;;  %v1840_v46 = vmul.f32 %v1839_v26, %v7063_v43  ;;  %v1841_v41 = vmul.f32 %v1839_v26, %v7085_v30  ;;  %v1795_v0 = vmul.f32 %v1794_v44, %v7100_v12  ;;  %v7108_v30 = vld [vmem:[#allocation77_spill] sm:$0xff] }
 0x1e5   : >> { %v1785_v38 = vadd.f32 %v1783_v4, %v1779_v36  ;;  %v1786_v8 = vadd.f32 %v1784_v14, %v1780_v52  ;;  %v1800_v40 = vstv %s5536_s1  ;;  %v1836_v24 = vadd.f32 %v1834_v50, %v1830_v23  ;;  %v7109_v36 = vld [vmem:[#allocation78_spill] sm:$0xff]  ;;  %s5608_s1 = sld [smem:[#allocation2 + $0x137]] }
 0x1e6   : >> { %v1837_v9 = vadd.f32 %v1835_v48, %v1831_v59  ;;  %v1846_v2 = vmul.f32 %v1845_v25, %v7106_v5  ;;  %v1847_v61 = vmul.f32 %v1845_v25, %v7107_v3  ;;  %v1796_v26 = vmul.f32 %v1794_v44, %v7102_v54  ;;  %v7110_v54 = vld [vmem:[#allocation80_spill] sm:$0xff] }
 0x1e7   : >> { %v1791_v60 = vadd.f32 %v1789_v51, %v1785_v38  ;;  %v1852_v43 = vmul.f32 %v1851_v45, %v7108_v30  ;;  %v1857_v4 = vstv %s5545_s2  ;;  %v1842_v52 = vadd.f32 %v1840_v46, %v1836_v24  ;;  %s5614_s2 = sld [smem:[#allocation2 + $0x14b]] }
 0x1e8   : >> { %v1843_v14 = vadd.f32 %v1841_v41, %v1837_v9  ;;  %v1853_v12 = vmul.f32 %v1851_v45, %v7109_v36  ;;  %v1863_v23 = vstv %s5551_s15  ;;  %v1792_v59 = vadd.f32 %v1790_v28, %v1786_v8  ;;  %s5622_s15 = sld [smem:[#allocation2 + $0x34]] }
 0x1e9   : >> { %v1797_v50 = vadd.f32 %v1795_v0, %v1791_v60  ;;  %v1801_v51 = vmul.f32 %v1800_v40, %v7103_v32  ;;  %v1806_v25 = vstv %s5553_s19  ;;  %v1848_v44 = vadd.f32 %v1846_v2, %v1842_v52  ;;  %s5624_s19 = sld [smem:[#allocation2 + $0x1c4]] }
 0x1ea   : >> { %v1849_v48 = vadd.f32 %v1847_v61, %v1843_v14  ;;  %v1858_v38 = vmul.f32 %v1857_v4, %v7088_v47  ;;  %v1859_v46 = vmul.f32 %v1857_v4, %v7110_v54  ;;  %v1687_v41 = vadd.f32 %v5530_v49, %v5527_v34 }
 0x1eb   : >> { %v1802_v45 = vmul.f32 %v1800_v40, %v4295_v57  ;;  %v1864_v24 = vmul.f32 %v1863_v23, %v4160_v10  ;;  %v1869_v8 = vstv %s5561_s12  ;;  %v1854_v60 = vadd.f32 %v1852_v43, %v1848_v44  ;;  %s5633_s12 = sld [smem:[#allocation2 + $0x48]] }
 0x1ec   : >> { %v1855_v28 = vadd.f32 %v1853_v12, %v1849_v48  ;;  %v1865_v0 = vmul.f32 %v1863_v23, %v4162_v11  ;;  %v1875_v9 = vstv %s5567_s11  ;;  %v1798_v2 = vadd.f32 %v1796_v26, %v1792_v59  ;;  %s5635_s11 = sld [smem:[#allocation2 + $0x5c]] }
 0x1ed   : >> { %v1803_v61 = vadd.f32 %v1801_v51, %v1797_v50  ;;  %v1807_v34 = vmul.f32 %v1806_v25, %v4303_v62  ;;  %v1812_v49 = vstv %s5571_s5  ;;  %v1860_v40 = vadd.f32 %v1858_v38, %v1854_v60  ;;  %v7111_v60 = vld [vmem:[#allocation100_spill] sm:$0xff]  ;;  %s7114_s5 = sld [smem:[#allocation65_spill]] }
 0x1ee   : >> { %v1861_v4 = vadd.f32 %v1859_v46, %v1855_v28  ;;  %v1870_v52 = vmul.f32 %v1869_v8, %v4165_v13  ;;  %v1871_v14 = vmul.f32 %v1869_v8, %v4169_v17  ;;  %v1688_v43 = vmax.f32 %v5538_v31, 0.0 }
 0x1ef   : >> { %v1689_v12 = vmax.f32 %v1687_v41, 0.0  ;;  %v1876_v23 = vmul.f32 %v1875_v9, %v7045_v21  ;;  %v1881_v44 = vstv %s5578_s6  ;;  %v1866_v48 = vadd.f32 %v1864_v24, %v1860_v40  ;;  %s5639_s6 = sld [smem:[#allocation2 + $0x15f]] }
 0x1f0   : >> { %v1867_v57 = vadd.f32 %v1865_v0, %v1861_v4  ;;  %v1877_v26 = vmul.f32 %v1875_v9, %v4181_v29  ;;  %v1887_v59 = vstv %s5582_s9  ;;  %v1804_v50 = vadd.f32 %v1802_v45, %v1798_v2  ;;  %s5641_s9 = sld [smem:[#allocation2 + $0x70]] }
 0x1f1   : >> { %v1808_v51 = vmul.f32 %v1806_v25, %v4305_v1  ;;  %v1809_v38 = vadd.f32 %v1807_v34, %v1803_v61  ;;  %v1813_v31 = vmul.f32 %v1812_v49, %v7004_v55  ;;  %v1872_v46 = vadd.f32 %v1870_v52, %v1866_v48 }
 0x1f2   : >> { %v1873_v41 = vadd.f32 %v1871_v14, %v1867_v57  ;;  %v1882_v8 = vmul.f32 %v1881_v44, %v4184_v33  ;;  %v1883_v24 = vmul.f32 %v1881_v44, %v4200_v56  ;;  %v1565_v28 = vadd.f32 %v5488_v53, %v7111_v60 }
 0x1f3   : >> { %v7112_v0 = vstv %s7105_s7  ;;  %v1888_v25 = vmul.f32 %v1887_v59, %v4209_v6  ;;  %v1893_v9 = vstv %s5593_s4  ;;  %v1878_v2 = vadd.f32 %v1876_v23, %v1872_v46  ;;  %s5646_s4 = sld [smem:[#allocation2 + $0x84]] }
 0x1f4   : >> { %v1691_v45 = vmul.f32 %v7112_v0, %v1688_v43  ;;  %v1879_v57 = vadd.f32 %v1877_v26, %v1873_v41  ;;  %v1889_v61 = vmul.f32 %v1887_v59, %v4211_v7  ;;  %v1899_v34 = vstv %s5597_s10  ;;  %s5658_s10 = sld [smem:[#allocation2 + $0x173]]  ;;  %s5668_s7 = sld [smem:[#allocation2 + $0xac]] }
 0x1f5   : >> { %v7113_v40 = vmov %v7112_v0  ;;  %v1810_v52 = vadd.f32 %v1808_v51, %v1804_v50  ;;  %v1814_v53 = vmul.f32 %v1812_v49, %v4416_v22  ;;  %v5631_v14 = vadd.f32 %v1813_v31, %v1809_v38 }
 0x1f6   : >> { %v1692_v4 = vmul.f32 %v7113_v40, %v1689_v12  ;;  %v1884_v43 = vadd.f32 %v1882_v8, %v1878_v2  ;;  %v1885_v44 = vadd.f32 %v1883_v24, %v1879_v57  ;;  %v1894_v23 = vmul.f32 %v1893_v9, %v7006_v42 }
 0x1f7   : >> { %v1895_v48 = vmul.f32 %v1893_v9, %v4219_v15  ;;  %v1900_v49 = vmul.f32 %v1899_v34, %v4221_v16  ;;  %v1901_v59 = vmul.f32 %v1899_v34, %v4225_v19  ;;  %v1905_v50 = vstv %s5608_s1  ;;  %s5660_s1 = sld [smem:[#allocation2 + $0x98]] }
 0x1f8   : >> { %v1890_v12 = vadd.f32 %v1888_v25, %v1884_v43  ;;  %v1891_v26 = vadd.f32 %v1889_v61, %v1885_v44  ;;  %v5649_v51 = vadd.f32 %v1691_v45, %v5504_v35  ;;  %v5651_v38 = vadd.f32 %v1692_v4, %v1565_v28 }
 0x1f9   : >> { %v5653_v31 = vadd.f32 %v1814_v53, %v1810_v52  ;;  %v1817_v41 = vmax.f32 %v5631_v14, 0.0  ;;  %v1911_v60 = vstv %s5614_s2  ;;  %v1906_v35 = vmul.f32 %v1905_v50, %v4227_v20  ;;  %s5674_s2 = sld [smem:[#allocation2 + $0xc0]] }
 0x1fa   : >> { %7115 = vst [vmem:[#allocation88_spill] sm:$0xff] %v5651_v38  ;;  %v1896_v8 = vadd.f32 %v1894_v23, %v1890_v12  ;;  %v1897_v24 = vadd.f32 %v1895_v48, %v1891_v26  ;;  %v1907_v28 = vmul.f32 %v1905_v50, %v7007_v58  ;;  %v1954_v0 = vstv %s5622_s15  ;;  %s5677_s15 = sld [smem:[#allocation2 + $0x187]]  ;;  %v7116_v48 = vld [vmem:[#allocation73_spill] sm:$0xff]  ;;  %v7117_v12 = vld [vmem:[#allocation74_spill] sm:$0xff] }
 0x1fb   : >> { %v1958_v45 = vstv %s5624_s19  ;;  %v1955_v2 = vmul.f32 %v1954_v0, %v7095_v27  ;;  %v1956_v57 = vmul.f32 %v1954_v0, %v7096_v63  ;;  %v1818_v61 = vmax.f32 %v5653_v31, 0.0  ;;  %v7118_v31 = vld [vmem:[#allocation92_spill] sm:$0xff]  ;;  %s5686_s19 = sld [smem:[#allocation2 + $0xd4]]  ;;  %v7120_v38 = vld [vmem:[#allocation94_spill] sm:$0xff] }
 0x1fc   : >> { %v1902_v25 = vadd.f32 %v1900_v49, %v1896_v8  ;;  %v1903_v9 = vadd.f32 %v1901_v59, %v1897_v24  ;;  %v1912_v34 = vmul.f32 %v1911_v60, %v7074_v39  ;;  %v1962_v40 = vstv %s5633_s12  ;;  %s5690_s12 = sld [smem:[#allocation2 + $0xe8]] }
 0x1fd   : >> { %v1968_v4 = vstv %s5635_s11  ;;  %v1917_v52 = vstv %s5639_s6  ;;  %v1959_v53 = vadd.f32 %v1958_v45, %v1955_v2  ;;  %v1960_v14 = vadd.f32 %v1958_v45, %v1956_v57  ;;  %s5695_s11 = sld [smem:[#allocation2 + $0x19b]]  ;;  %s5702_s6 = sld [smem:[#allocation2 + $0xfc]] }
 0x1fe   : >> { %v1974_v43 = vstv %s5641_s9  ;;  %v1963_v44 = vmul.f32 %v1962_v40, %v7017_v18  ;;  %v1964_v23 = vmul.f32 %v1962_v40, %v7040_v37  ;;  %v1969_v49 = vmul.f32 %v1968_v4, %v7116_v48  ;;  %v7119_v40 = vld [vmem:[#allocation93_spill] sm:$0xff]  ;;  %s5706_s9 = sld [smem:[#allocation2 + $0x110]] }
 0x1ff   : >> { %v1970_v26 = vmul.f32 %v1968_v4, %v7117_v12  ;;  %v1908_v59 = vadd.f32 %v1906_v35, %v1902_v25  ;;  %v1909_v50 = vadd.f32 %v1907_v28, %v1903_v9  ;;  %v1913_v8 = vmul.f32 %v1911_v60, %v7118_v31 }
 0x200   : >> { %v1980_v24 = vstv %s5646_s4  ;;  %v1965_v0 = vadd.f32 %v1963_v44, %v1959_v53  ;;  %v1966_v45 = vadd.f32 %v1964_v23, %v1960_v14  ;;  %v1975_v2 = vmul.f32 %v1974_v43, %v7106_v5  ;;  %s5719_s4 = sld [smem:[#allocation2 + $0x124]] }
 0x201   : >> { %v1976_v57 = vmul.f32 %v1974_v43, %v7107_v3  ;;  %v1918_v46 = vmul.f32 %v1917_v52, %v7119_v40  ;;  %v1919_v4 = vmul.f32 %v1917_v52, %v7120_v38  ;;  %v1923_v35 = vstv %s5658_s10  ;;  %s5723_s10 = sld [smem:[#allocation2 + $0x138]] }
 0x202   : >> { %v1986_v60 = vstv %s5660_s1  ;;  %v1971_v28 = vadd.f32 %v1969_v49, %v1965_v0  ;;  %v1972_v25 = vadd.f32 %v1970_v26, %v1966_v45  ;;  %v1981_v9 = vmul.f32 %v1980_v24, %v7108_v30  ;;  %v7122_v0 = vld [vmem:[#allocation95_spill] sm:$0xff]  ;;  %s5732_s1 = sld [smem:[#allocation2 + $0x14c]] }
 0x203   : >> { %v1982_v53 = vmul.f32 %v1980_v24, %v7109_v36  ;;  %v1914_v14 = vadd.f32 %v1912_v34, %v1908_v59  ;;  %v1915_v43 = vadd.f32 %v1913_v8, %v1909_v50  ;;  %v1987_v44 = vmul.f32 %v1986_v60, %v7088_v47  ;;  %v7123_v24 = vld [vmem:[#allocation96_spill] sm:$0xff] }
 0x204   : >> { %v1992_v23 = vstv %s5668_s7  ;;  %v1977_v52 = vadd.f32 %v1975_v2, %v1971_v28  ;;  %v1978_v3 = vadd.f32 %v1976_v57, %v1972_v25  ;;  %v1988_v5 = vmul.f32 %v1986_v60, %v7110_v54  ;;  %s5713_s7 = sld [smem:[#allocation2 + $0x1af]] }
 0x205   : >> { %v1998_v38 = vstv %s5674_s2  ;;  %v7121_v49 = vstv %s7114_s5  ;;  %v1924_v45 = vmul.f32 %v1923_v35, %v7122_v0  ;;  %v1925_v34 = vmul.f32 %v1923_v35, %v7123_v24  ;;  %s5740_s2 = sld [smem:[#allocation2 + $0x35]] }
 0x206   : >> { %v1820_v26 = vmul.f32 %v7121_v49, %v1817_v41  ;;  %v1929_v59 = vstv %s5677_s15  ;;  %v1983_v50 = vadd.f32 %v1981_v9, %v1977_v52  ;;  %v1984_v8 = vadd.f32 %v1982_v53, %v1978_v3  ;;  %s5742_s15 = sld [smem:[#allocation2 + $0x1c5]] }
 0x207   : >> { %v1993_v2 = vmul.f32 %v1992_v23, %v4160_v10  ;;  %v1994_v57 = vmul.f32 %v1992_v23, %v4162_v11  ;;  %v1920_v60 = vadd.f32 %v1918_v46, %v1914_v14  ;;  %v1921_v28 = vadd.f32 %v1919_v4, %v1915_v43  ;;  %v7126_v4 = vld [vmem:[#allocation98_spill] sm:$0xff] }
 0x208   : >> { %v1999_v41 = vmul.f32 %v1998_v38, %v4165_v13  ;;  %v2004_v25 = vstv %s5686_s19  ;;  %v1989_v49 = vadd.f32 %v1987_v44, %v1983_v50  ;;  %v1990_v35 = vadd.f32 %v1988_v5, %v1984_v8  ;;  %s5750_s19 = sld [smem:[#allocation2 + $0x160]] }
 0x209   : >> { %v2000_v54 = vmul.f32 %v1998_v38, %v4169_v17  ;;  %v2010_v47 = vstv %s5690_s12  ;;  %v7124_v3 = vstv %s7114_s5  ;;  %v1930_v46 = vmul.f32 %v1929_v59, %v7103_v32  ;;  %s5752_s12 = sld [smem:[#allocation2 + $0x174]]  ;;  %s5764_s5 = sld [smem:[#allocation2 + $0x85]] }
 0x20a   : >> { %v5727_v9 = vmul.f32 %v7124_v3, %v1818_v61  ;;  %v1931_v53 = vmul.f32 %v1929_v59, %v7126_v4  ;;  %v1935_v14 = vstv %s5695_s11  ;;  %v1995_v43 = vadd.f32 %v1993_v2, %v1989_v49  ;;  %s7127_s11 = sld [smem:[#allocation66_spill]] }
 0x20b   : >> { %v1996_v44 = vadd.f32 %v1994_v57, %v1990_v35  ;;  %v2005_v5 = vmul.f32 %v2004_v25, %v7045_v21  ;;  %v2006_v38 = vmul.f32 %v2004_v25, %v4181_v29  ;;  %v1926_v23 = vadd.f32 %v1924_v45, %v1920_v60 }
 0x20c   : >> { %7125 = vst [vmem:[#allocation69_spill] sm:$0xff] %v5727_v9  ;;  %v1927_v52 = vadd.f32 %v1925_v34, %v1921_v28  ;;  %v2011_v61 = vmul.f32 %v2010_v47, %v4184_v33  ;;  %v2016_v50 = vstv %s5702_s6  ;;  %v2001_v8 = vadd.f32 %v1999_v41, %v1995_v43  ;;  %s5756_s6 = sld [smem:[#allocation2 + $0x49]] }
 0x20d   : >> { %v2002_v3 = vadd.f32 %v2000_v54, %v1996_v44  ;;  %v2012_v9 = vmul.f32 %v2010_v47, %v4200_v56  ;;  %v2022_v59 = vstv %s5706_s9  ;;  %v5745_v2 = vadd.f32 %v1820_v26, %v5649_v51  ;;  %s5758_s9 = sld [smem:[#allocation2 + $0x5d]] }
 0x20e   : >> { %v1936_v57 = vmul.f32 %v1935_v14, %v4303_v62  ;;  %v1937_v45 = vmul.f32 %v1935_v14, %v4305_v1  ;;  %v1941_v34 = vstv %s5713_s7  ;;  %v2007_v47 = vadd.f32 %v2005_v5, %v2001_v8  ;;  %s5762_s7 = sld [smem:[#allocation2 + $0x71]] }
 0x20f   : >> { %v2008_v54 = vadd.f32 %v2006_v38, %v2002_v3  ;;  %v2017_v60 = vmul.f32 %v2016_v50, %v4209_v6  ;;  %v2018_v28 = vmul.f32 %v2016_v50, %v4211_v7  ;;  %v1932_v51 = vadd.f32 %v1930_v46, %v1926_v23 }
 0x210   : >> { %v1933_v26 = vadd.f32 %v1931_v53, %v1927_v52  ;;  %v2023_v41 = vmul.f32 %v2022_v59, %v7006_v42  ;;  %v2028_v25 = vstv %s5719_s4  ;;  %v2013_v49 = vadd.f32 %v2011_v61, %v2007_v47  ;;  %s5780_s4 = sld [smem:[#allocation2 + $0x99]] }
 0x211   : >> { %v2014_v35 = vadd.f32 %v2012_v9, %v2008_v54  ;;  %v2024_v14 = vmul.f32 %v2022_v59, %v4219_v15  ;;  %v2034_v43 = vstv %s5723_s10  ;;  %v1942_v44 = vmul.f32 %v1941_v34, %v7004_v55  ;;  %s5786_s10 = sld [smem:[#allocation2 + $0xad]] }
 0x212   : >> { %v5770_v5 = vmul.f32 %v1941_v34, %v4416_v22  ;;  %v2040_v53 = vstv %s5732_s1  ;;  %v2019_v38 = vadd.f32 %v2017_v60, %v2013_v49  ;;  %v2029_v52 = vmul.f32 %v2028_v25, %v4221_v16  ;;  %s5788_s1 = sld [smem:[#allocation2 + $0x188]] }
 0x213   : >> { %v2020_v23 = vadd.f32 %v2018_v28, %v2014_v35  ;;  %v2030_v9 = vmul.f32 %v2028_v25, %v4225_v19  ;;  %v1938_v61 = vadd.f32 %v1936_v57, %v1932_v51  ;;  %v1939_v50 = vadd.f32 %v1937_v45, %v1933_v26 }
 0x214   : >> { %v2035_v8 = vmul.f32 %v2034_v43, %v4227_v20  ;;  %v2036_v3 = vmul.f32 %v2034_v43, %v7007_v58  ;;  %v2025_v59 = vadd.f32 %v2023_v41, %v2019_v38  ;;  %v2041_v47 = vmul.f32 %v2040_v53, %v7074_v39 }
 0x215   : >> { %v2026_v34 = vadd.f32 %v2024_v14, %v2020_v23  ;;  %v2042_v54 = vmul.f32 %v2040_v53, %v7118_v31  ;;  %v2046_v60 = vstv %s5750_s19  ;;  %v2052_v28 = vstv %s5752_s12  ;;  %s5796_s19 = sld [smem:[#allocation2 + $0x19c]]  ;;  %s5817_s12 = sld [smem:[#allocation2 + $0xfd]] }
 0x216   : >> { %v2083_v57 = vstv %s5740_s2  ;;  %v2087_v45 = vstv %s5742_s15  ;;  %v2031_v51 = vadd.f32 %v2029_v52, %v2025_v59  ;;  %v2091_v49 = vstv %s5756_s6  ;;  %s5798_s2 = sld [smem:[#allocation2 + $0xc1]]  ;;  %s5804_s15 = sld [smem:[#allocation2 + $0xd5]] }
 0x217   : >> { %v2032_v26 = vadd.f32 %v2030_v9, %v2026_v34  ;;  %v2084_v41 = vmul.f32 %v2083_v57, %v7095_v27  ;;  %v2085_v25 = vmul.f32 %v2083_v57, %v7096_v63  ;;  %v2097_v35 = vstv %s5758_s9  ;;  %s5821_s6 = sld [smem:[#allocation2 + $0x1b0]]  ;;  %s5831_s9 = sld [smem:[#allocation2 + $0x111]] }
 0x218   : >> { %v2103_v14 = vstv %s5762_s7  ;;  %v2109_v43 = vstv %s5764_s5  ;;  %v2037_v53 = vadd.f32 %v2035_v8, %v2031_v51  ;;  %v2092_v52 = vmul.f32 %v2091_v49, %v7017_v18  ;;  %v7128_v51 = vld [vmem:[#allocation94_spill] sm:$0xff]  ;;  %v7130_v18 = vld [vmem:[#allocation76_spill] sm:$0xff]  ;;  %s5813_s5 = sld [smem:[#allocation2 + $0xe9]]  ;;  %s5835_s7 = sld [smem:[#allocation2 + $0x125]] }
 0x219   : >> { %v2038_v38 = vadd.f32 %v2036_v3, %v2032_v26  ;;  %v2088_v23 = vadd.f32 %v2087_v45, %v2084_v41  ;;  %v2089_v46 = vadd.f32 %v2087_v45, %v2085_v25  ;;  %v2093_v9 = vmul.f32 %v2091_v49, %v7040_v37  ;;  %v7129_v25 = vld [vmem:[#allocation75_spill] sm:$0xff] }
 0x21a   : >> { %v2098_v59 = vmul.f32 %v2097_v35, %v7116_v48  ;;  %v2099_v34 = vmul.f32 %v2097_v35, %v7117_v12  ;;  %v2043_v57 = vadd.f32 %v2041_v47, %v2037_v53  ;;  %v2047_v3 = vmul.f32 %v2046_v60, %v7119_v40 }
 0x21b   : >> { %v2044_v8 = vadd.f32 %v2042_v54, %v2038_v38  ;;  %v2048_v45 = vmul.f32 %v2046_v60, %v7128_v51  ;;  %v2094_v26 = vadd.f32 %v2092_v52, %v2088_v23  ;;  %v2095_v41 = vadd.f32 %v2093_v9, %v2089_v46  ;;  %v7131_v52 = vld [vmem:[#allocation79_spill] sm:$0xff] }
 0x21c   : >> { %v2104_v31 = vmul.f32 %v2103_v14, %v7129_v25  ;;  %v2105_v49 = vmul.f32 %v2103_v14, %v7130_v18  ;;  %v1944_v37 = vadd.f32 %v1942_v44, %v1938_v61  ;;  %v2053_v48 = vmul.f32 %v2052_v28, %v7122_v0 }
 0x21d   : >> { %v2110_v35 = vmul.f32 %v2109_v43, %v7108_v30  ;;  %v2115_v12 = vstv %s5780_s4  ;;  %v2100_v47 = vadd.f32 %v2098_v59, %v2094_v26  ;;  %v2101_v54 = vadd.f32 %v2099_v34, %v2095_v41  ;;  %v7132_v59 = vld [vmem:[#allocation80_spill] sm:$0xff]  ;;  %s5844_s4 = sld [smem:[#allocation2 + $0x139]] }
 0x21e   : >> { %v2111_v60 = vmul.f32 %v2109_v43, %v7109_v36  ;;  %v2121_v46 = vstv %s5786_s10  ;;  %v2049_v53 = vadd.f32 %v2047_v3, %v2043_v57  ;;  %v2050_v38 = vadd.f32 %v2048_v45, %v2044_v8  ;;  %s5848_s10 = sld [smem:[#allocation2 + $0x14d]] }
 0x21f   : >> { %v2054_v44 = vmul.f32 %v2052_v28, %v7123_v24  ;;  %v2058_v61 = vstv %s5788_s1  ;;  %v2106_v14 = vadd.f32 %v2104_v31, %v2100_v47  ;;  %v2107_v23 = vadd.f32 %v2105_v49, %v2101_v54  ;;  %s5859_s1 = sld [smem:[#allocation2 + $0x36]] }
 0x220   : >> { %v2116_v9 = vmul.f32 %v2115_v12, %v7131_v52  ;;  %v2117_v34 = vmul.f32 %v2115_v12, %v7132_v59  ;;  %v5826_v26 = vadd.f32 %v5770_v5, %v1939_v50  ;;  %v2064_v43 = vstv %s5796_s19  ;;  %s5861_s19 = sld [smem:[#allocation2 + $0x1c6]] }
 0x221   : >> { %v2122_v41 = vmul.f32 %v2121_v46, %v4160_v10  ;;  %v2127_v57 = vstv %s5798_s2  ;;  %v2112_v8 = vadd.f32 %v2110_v35, %v2106_v14  ;;  %v2113_v28 = vadd.f32 %v2111_v60, %v2107_v23  ;;  %s5865_s2 = sld [smem:[#allocation2 + $0x161]] }
 0x222   : >> { %v2123_v3 = vmul.f32 %v2121_v46, %v4162_v11  ;;  %v2133_v31 = vstv %s5804_s15  ;;  %v2055_v45 = vadd.f32 %v2053_v48, %v2049_v53  ;;  %v2056_v12 = vadd.f32 %v2054_v44, %v2050_v38  ;;  %s5867_s15 = sld [smem:[#allocation2 + $0x4a]] }
 0x223   : >> { %v2059_v5 = vmul.f32 %v2058_v61, %v7103_v32  ;;  %v2060_v50 = vmul.f32 %v2058_v61, %v7126_v4  ;;  %v2118_v49 = vadd.f32 %v2116_v9, %v2112_v8  ;;  %v2119_v47 = vadd.f32 %v2117_v34, %v2113_v28 }
 0x224   : >> { %v2128_v54 = vmul.f32 %v2127_v57, %v4165_v13  ;;  %v2129_v35 = vmul.f32 %v2127_v57, %v4169_v17  ;;  %v1946_v60 = vmax.f32 %v1944_v37, 0.0  ;;  %v2065_v46 = vmul.f32 %v2064_v43, %v4303_v62 }
 0x225   : >> { %v2134_v14 = vmul.f32 %v2133_v31, %v7045_v21  ;;  %v2139_v23 = vstv %s5813_s5  ;;  %v2124_v48 = vadd.f32 %v2122_v41, %v2118_v49  ;;  %v2125_v53 = vadd.f32 %v2123_v3, %v2119_v47  ;;  %s5871_s5 = sld [smem:[#allocation2 + $0x5e]] }
 0x226   : >> { %v2135_v38 = vmul.f32 %v2133_v31, %v4181_v29  ;;  %v2145_v44 = vstv %s5817_s12  ;;  %v2061_v61 = vadd.f32 %v2059_v5, %v2055_v45  ;;  %v2062_v9 = vadd.f32 %v2060_v50, %v2056_v12  ;;  %s5873_s12 = sld [smem:[#allocation2 + $0x72]] }
 0x227   : >> { %v2066_v37 = vmul.f32 %v2064_v43, %v4305_v1  ;;  %v2070_v34 = vstv %s5821_s6  ;;  %v2130_v57 = vadd.f32 %v2128_v54, %v2124_v48  ;;  %v2131_v8 = vadd.f32 %v2129_v35, %v2125_v53  ;;  %s7134_s6 = sld [smem:[#allocation67_spill]]  ;;  %v7136_v53 = vld [vmem:[#allocation69_spill] sm:$0xff] }
 0x228   : >> { %v2140_v28 = vmul.f32 %v2139_v23, %v4184_v33  ;;  %v2141_v62 = vmul.f32 %v2139_v23, %v4200_v56  ;;  %v1947_v41 = vmax.f32 %v5826_v26, 0.0  ;;  %v7133_v3 = vstv %s7127_s11  ;;  %s5916_s11 = sld [smem:[#allocation2 + $0xc2]] }
 0x229   : >> { %v1949_v49 = vmul.f32 %v7133_v3, %v1946_v60  ;;  %v2146_v31 = vmul.f32 %v2145_v44, %v4209_v6  ;;  %v2151_v47 = vstv %s5831_s9  ;;  %v2136_v45 = vadd.f32 %v2134_v14, %v2130_v57  ;;  %s5877_s9 = sld [smem:[#allocation2 + $0x86]] }
 0x22a   : >> { %v2137_v43 = vadd.f32 %v2135_v38, %v2131_v8  ;;  %v2147_v12 = vmul.f32 %v2145_v44, %v4211_v7  ;;  %v2157_v5 = vstv %s5835_s7  ;;  %v2067_v26 = vadd.f32 %v2065_v46, %v2061_v61  ;;  %v7135_v46 = vld [vmem:[#allocation88_spill] sm:$0xff]  ;;  %s5887_s7 = sld [smem:[#allocation2 + $0x175]] }
 0x22b   : >> { %v2068_v50 = vadd.f32 %v2066_v37, %v2062_v9  ;;  %v2071_v54 = vmul.f32 %v2070_v34, %v7004_v55  ;;  %v2072_v35 = vmul.f32 %v2070_v34, %v4416_v22  ;;  %v2142_v60 = vadd.f32 %v2140_v28, %v2136_v45 }
 0x22c   : >> { %v2143_v14 = vadd.f32 %v2141_v62, %v2137_v43  ;;  %v2152_v23 = vmul.f32 %v2151_v47, %v7006_v42  ;;  %v2153_v48 = vmul.f32 %v2151_v47, %v4219_v15  ;;  %v5881_v38 = vadd.f32 %v7136_v53, %v7135_v46 }
 0x22d   : >> { %v2158_v44 = vmul.f32 %v2157_v5, %v4221_v16  ;;  %v2163_v61 = vstv %s5844_s4  ;;  %v2148_v9 = vadd.f32 %v2146_v31, %v2142_v60  ;;  %v2159_v34 = vmul.f32 %v2157_v5, %v4225_v19  ;;  %s5902_s4 = sld [smem:[#allocation2 + $0x9a]] }
 0x22e   : >> { %7137 = vst [vmem:[#allocation70_spill] sm:$0xff] %v5881_v38  ;;  %v2149_v37 = vadd.f32 %v2147_v12, %v2143_v14  ;;  %v2169_v62 = vstv %s5848_s10  ;;  %v7138_v57 = vmov %v7133_v3  ;;  %v5894_v28 = vadd.f32 %v1949_v49, %v5745_v2  ;;  %s5908_s10 = sld [smem:[#allocation2 + $0xae]] }
 0x22f   : >> { %v5891_v8 = vmul.f32 %v7138_v57, %v1947_v41  ;;  %v5896_v3 = vadd.f32 %v2071_v54, %v2067_v26  ;;  %v5899_v31 = vadd.f32 %v2072_v35, %v2068_v50  ;;  %v2154_v45 = vadd.f32 %v2152_v23, %v2148_v9 }
 0x230   : >> { %7140 = vst [vmem:[#allocation78_spill] sm:$0xff] %v5894_v28  ;;  %v2155_v43 = vadd.f32 %v2153_v48, %v2149_v37  ;;  %v2164_v12 = vmul.f32 %v2163_v61, %v4227_v20  ;;  %v2165_v41 = vmul.f32 %v2163_v61, %v7007_v58  ;;  %v2170_v2 = vmul.f32 %v2169_v62, %v7074_v39  ;;  %v7142_v37 = vld [vmem:[#allocation71_spill] sm:$0xff] }
 0x231   : >> { %7139 = vst [vmem:[#allocation77_spill] sm:$0xff] %v5891_v8  ;;  %7141 = vst [vmem:[#allocation100_spill] sm:$0xff] %v5899_v31  ;;  %v2212_v49 = vstv %s5859_s1  ;;  %v2216_v5 = vstv %s5861_s19  ;;  %v2160_v26 = vadd.f32 %v2158_v44, %v2154_v45  ;;  %v2175_v60 = vstv %s5865_s2  ;;  %v7144_v45 = vld [vmem:[#allocation73_spill] sm:$0xff]  ;;  %s5925_s1 = sld [smem:[#allocation2 + $0xd6]]  ;;  %s5930_s19 = sld [smem:[#allocation2 + $0x19d]] }
 0x232   : >> { %v2161_v50 = vadd.f32 %v2159_v34, %v2155_v43  ;;  %v2213_v54 = vmul.f32 %v2212_v49, %v7095_v27  ;;  %v2214_v35 = vmul.f32 %v2212_v49, %v7096_v63  ;;  %v2220_v14 = vstv %s5867_s15  ;;  %v7143_v34 = vld [vmem:[#allocation72_spill] sm:$0xff]  ;;  %v7145_v49 = vld [vmem:[#allocation74_spill] sm:$0xff]  ;;  %s5934_s2 = sld [smem:[#allocation2 + $0xea]]  ;;  %s5941_s15 = sld [smem:[#allocation2 + $0xfe]] }
 0x233   : >> { %v2226_v23 = vstv %s5871_s5  ;;  %v2232_v48 = vstv %s5873_s12  ;;  %v2166_v46 = vadd.f32 %v2164_v12, %v2160_v26  ;;  %v2238_v9 = vstv %s5877_s9  ;;  %v7146_v12 = vld [vmem:[#allocation92_spill] sm:$0xff]  ;;  %s5948_s5 = sld [smem:[#allocation2 + $0x112]]  ;;  %s5952_s12 = sld [smem:[#allocation2 + $0x1b1]] }
 0x234   : >> { %v2217_v53 = vadd.f32 %v2216_v5, %v2213_v54  ;;  %v2218_v61 = vadd.f32 %v2216_v5, %v2214_v35  ;;  %v2221_v44 = vmul.f32 %v2220_v14, %v7142_v37  ;;  %v2222_v57 = vmul.f32 %v2220_v14, %v7143_v34  ;;  %s5957_s9 = sld [smem:[#allocation2 + $0x126]] }
 0x235   : >> { %v2227_v43 = vmul.f32 %v2226_v23, %v7144_v45  ;;  %v2228_v47 = vmul.f32 %v2226_v23, %v7145_v49  ;;  %v2075_v28 = vmax.f32 %v5896_v3, 0.0  ;;  %v2167_v8 = vadd.f32 %v2165_v41, %v2161_v50 }
 0x236   : >> { %v2171_v26 = vmul.f32 %v2169_v62, %v7146_v12  ;;  %v2181_v54 = vstv %s5887_s7  ;;  %v2223_v5 = vadd.f32 %v2221_v44, %v2217_v53  ;;  %v2224_v35 = vadd.f32 %v2222_v57, %v2218_v61  ;;  %s5976_s7 = sld [smem:[#allocation2 + $0x162]] }
 0x237   : >> { %v2233_v14 = vmul.f32 %v2232_v48, %v7129_v25  ;;  %v2234_v38 = vmul.f32 %v2232_v48, %v7130_v18  ;;  %v2172_v23 = vadd.f32 %v2170_v2, %v2166_v46  ;;  %v2176_v49 = vmul.f32 %v2175_v60, %v7119_v40 }
 0x238   : >> { %v2239_v3 = vmul.f32 %v2238_v9, %v7108_v30  ;;  %v2244_v41 = vstv %s5902_s4  ;;  %v2229_v50 = vadd.f32 %v2227_v43, %v2223_v5  ;;  %v2230_v62 = vadd.f32 %v2228_v47, %v2224_v35  ;;  %s5983_s4 = sld [smem:[#allocation2 + $0x176]] }
 0x239   : >> { %v2240_v45 = vmul.f32 %v2238_v9, %v7109_v36  ;;  %v2250_v53 = vstv %s5908_s10  ;;  %v2173_v48 = vadd.f32 %v2171_v26, %v2167_v8  ;;  %v2177_v2 = vmul.f32 %v2175_v60, %v7128_v51  ;;  %s5988_s10 = sld [smem:[#allocation2 + $0x37]] }
 0x23a   : >> { %v2245_v46 = vmul.f32 %v2244_v41, %v7131_v52  ;;  %v2235_v44 = vadd.f32 %v2233_v14, %v2229_v50  ;;  %v2236_v57 = vadd.f32 %v2234_v38, %v2230_v62  ;;  %v2246_v43 = vmul.f32 %v2244_v41, %v7132_v59 }
 0x23b   : >> { %v2256_v5 = vstv %s5916_s11  ;;  %v2178_v47 = vadd.f32 %v2176_v49, %v2172_v23  ;;  %v2182_v9 = vmul.f32 %v2181_v54, %v7122_v0  ;;  %v2187_v35 = vstv %s5918_s13  ;;  %s5964_s13 = sld [smem:[#allocation2 + $0x13a]]  ;;  %s5966_s11 = sld [smem:[#allocation2 + $0x14e]] }
 0x23c   : >> { %v2251_v8 = vmul.f32 %v2250_v53, %v4160_v10  ;;  %v2241_v60 = vadd.f32 %v2239_v3, %v2235_v44  ;;  %v2242_v26 = vadd.f32 %v2240_v45, %v2236_v57  ;;  %v2252_v38 = vmul.f32 %v2250_v53, %v4162_v11 }
 0x23d   : >> { %v2262_v14 = vstv %s5925_s1  ;;  %v2179_v41 = vadd.f32 %v2177_v2, %v2173_v48  ;;  %v2183_v50 = vmul.f32 %v2181_v54, %v7123_v24  ;;  %v2193_v49 = vstv %s5930_s19  ;;  %s5990_s1 = sld [smem:[#allocation2 + $0x1c7]]  ;;  %s5994_s19 = sld [smem:[#allocation2 + $0x4b]] }
 0x23e   : >> { %v2257_v23 = vmul.f32 %v2256_v5, %v4165_v13  ;;  %v2247_v62 = vadd.f32 %v2245_v46, %v2241_v60  ;;  %v2248_v61 = vadd.f32 %v2246_v43, %v2242_v26  ;;  %v2258_v31 = vmul.f32 %v2256_v5, %v4169_v17  ;;  %v7148_v60 = vld [vmem:[#allocation99_spill] sm:$0xff] }
 0x23f   : >> { %v2268_v10 = vstv %s5934_s2  ;;  %v7147_v45 = vstv %s7134_s6  ;;  %v2184_v53 = vadd.f32 %v2182_v9, %v2178_v47  ;;  %v2188_v54 = vmul.f32 %v2187_v35, %v7103_v32  ;;  %s5999_s2 = sld [smem:[#allocation2 + $0x5f]] }
 0x240   : >> { %v5970_v3 = vmul.f32 %v7147_v45, %v2075_v28  ;;  %v2263_v48 = vmul.f32 %v2262_v14, %v7045_v21  ;;  %v2253_v2 = vadd.f32 %v2251_v8, %v2247_v62  ;;  %v2254_v46 = vadd.f32 %v2252_v38, %v2248_v61 }
 0x241   : >> { %v2264_v44 = vmul.f32 %v2262_v14, %v4181_v29  ;;  %v2274_v57 = vstv %s5941_s15  ;;  %v2185_v43 = vadd.f32 %v2183_v50, %v2179_v41  ;;  %v2189_v5 = vmul.f32 %v2187_v35, %v7126_v4  ;;  %s6001_s15 = sld [smem:[#allocation2 + $0x73]] }
 0x242   : >> { %v2194_v28 = vmul.f32 %v2193_v49, %v7148_v60  ;;  %v2269_v47 = vmul.f32 %v2268_v10, %v4184_v33  ;;  %v2259_v9 = vadd.f32 %v2257_v23, %v2253_v2  ;;  %v2260_v26 = vadd.f32 %v2258_v31, %v2254_v46 }
 0x243   : >> { %v2270_v8 = vmul.f32 %v2268_v10, %v4200_v56  ;;  %v2280_v62 = vstv %s5948_s5  ;;  %v2190_v61 = vadd.f32 %v2188_v54, %v2184_v53  ;;  %v2195_v38 = vmul.f32 %v2193_v49, %v4305_v1  ;;  %s6016_s5 = sld [smem:[#allocation2 + $0x18a]] }
 0x244   : >> { %v2199_v14 = vstv %s5952_s12  ;;  %v2275_v41 = vmul.f32 %v2274_v57, %v4209_v6  ;;  %v2265_v35 = vadd.f32 %v2263_v48, %v2259_v9  ;;  %v2266_v31 = vadd.f32 %v2264_v44, %v2260_v26  ;;  %s6018_s12 = sld [smem:[#allocation2 + $0x87]] }
 0x245   : >> { %v2276_v50 = vmul.f32 %v2274_v57, %v4211_v7  ;;  %v2286_v10 = vstv %s5957_s9  ;;  %v2191_v23 = vadd.f32 %v2189_v5, %v2185_v43  ;;  %v2281_v49 = vmul.f32 %v2280_v62, %v7006_v42  ;;  %s6027_s9 = sld [smem:[#allocation2 + $0x19e]] }
 0x246   : >> { %v2282_v53 = vmul.f32 %v2280_v62, %v4219_v15  ;;  %v2271_v54 = vadd.f32 %v2269_v47, %v2265_v35  ;;  %v2272_v2 = vadd.f32 %v2270_v8, %v2266_v31  ;;  %v2292_v48 = vstv %s5964_s13  ;;  %s6029_s13 = sld [smem:[#allocation2 + $0x9b]] }
 0x247   : >> { %v2298_v46 = vstv %s5966_s11  ;;  %v6005_v44 = vadd.f32 %v2194_v28, %v2190_v61  ;;  %v6008_v57 = vmul.f32 %v2199_v14, %v7004_v55  ;;  %v6011_v43 = vmul.f32 %v2199_v14, %v4416_v22  ;;  %s6037_s11 = sld [smem:[#allocation2 + $0xaf]] }
 0x248   : >> { %v2287_v5 = vmul.f32 %v2286_v10, %v4221_v16  ;;  %v2277_v9 = vadd.f32 %v2275_v41, %v2271_v54  ;;  %v2278_v26 = vadd.f32 %v2276_v50, %v2272_v2  ;;  %v2288_v62 = vmul.f32 %v2286_v10, %v4225_v19 }
 0x249   : >> { %v2304_v47 = vstv %s5976_s7  ;;  %v6020_v28 = vadd.f32 %v2195_v38, %v2191_v23  ;;  %v2293_v8 = vmul.f32 %v2292_v48, %v4227_v20  ;;  %v2294_v61 = vmul.f32 %v2292_v48, %v7007_v58  ;;  %s6043_s7 = sld [smem:[#allocation2 + $0xc3]] }
 0x24a   : >> { %v2299_v14 = vmul.f32 %v2298_v46, %v7074_v39  ;;  %v2283_v35 = vadd.f32 %v2281_v49, %v2277_v9  ;;  %v2284_v41 = vadd.f32 %v2282_v53, %v2278_v26  ;;  %v2300_v31 = vmul.f32 %v2298_v46, %v7146_v12 }
 0x24b   : >> { %v2310_v50 = vstv %s5983_s4  ;;  %v2305_v38 = vmul.f32 %v2304_v47, %v7119_v40  ;;  %v2306_v10 = vmul.f32 %v2304_v47, %v7128_v51  ;;  %v2341_v23 = vstv %s5988_s10  ;;  %s6050_s4 = sld [smem:[#allocation2 + $0x1b2]]  ;;  %s6053_s10 = sld [smem:[#allocation2 + $0xd7]] }
 0x24c   : >> { %v2345_v54 = vstv %s5990_s1  ;;  %v2289_v2 = vadd.f32 %v2287_v5, %v2283_v35  ;;  %v2290_v48 = vadd.f32 %v2288_v62, %v2284_v41  ;;  %v2342_v49 = vmul.f32 %v2341_v23, %v7095_v27  ;;  %v7149_v35 = vld [vmem:[#allocation73_spill] sm:$0xff]  ;;  %s6060_s1 = sld [smem:[#allocation2 + $0xeb]] }
 0x24d   : >> { %v2343_v53 = vmul.f32 %v2341_v23, %v7096_v63  ;;  %v2311_v46 = vmul.f32 %v2310_v50, %v7122_v0  ;;  %v2349_v9 = vstv %s5994_s19  ;;  %v2355_v26 = vstv %s5999_s2  ;;  %v7150_v23 = vld [vmem:[#allocation74_spill] sm:$0xff]  ;;  %s6066_s19 = sld [smem:[#allocation2 + $0xff]]  ;;  %s6079_s2 = sld [smem:[#allocation2 + $0x113]] }
 0x24e   : >> { %v2361_v45 = vstv %s6001_s15  ;;  %v2295_v40 = vadd.f32 %v2293_v8, %v2289_v2  ;;  %v2296_v12 = vadd.f32 %v2294_v61, %v2290_v48  ;;  %v2346_v47 = vadd.f32 %v2345_v54, %v2342_v49  ;;  %s6087_s15 = sld [smem:[#allocation2 + $0x127]] }
 0x24f   : >> { %v2347_v51 = vadd.f32 %v2345_v54, %v2343_v53  ;;  %v2350_v5 = vmul.f32 %v2349_v9, %v7142_v37  ;;  %v2351_v62 = vmul.f32 %v2349_v9, %v7143_v34  ;;  %v2356_v41 = vmul.f32 %v2355_v26, %v7149_v35 }
 0x250   : >> { %v2357_v0 = vmul.f32 %v2355_v26, %v7150_v23  ;;  %v2301_v39 = vadd.f32 %v2299_v14, %v2295_v40  ;;  %v2302_v58 = vadd.f32 %v2300_v31, %v2296_v12  ;;  %v2316_v20 = vstv %s6016_s5  ;;  %s6103_s5 = sld [smem:[#allocation2 + $0x38]] }
 0x251   : >> { %v2367_v8 = vstv %s6018_s12  ;;  %v2352_v61 = vadd.f32 %v2350_v5, %v2346_v47  ;;  %v2353_v54 = vadd.f32 %v2351_v62, %v2347_v51  ;;  %v2362_v2 = vmul.f32 %v2361_v45, %v7129_v25  ;;  %s6105_s12 = sld [smem:[#allocation2 + $0x1c8]] }
 0x252   : >> { %v2363_v48 = vmul.f32 %v2361_v45, %v7130_v18  ;;  %v2307_v49 = vadd.f32 %v2305_v38, %v2301_v39  ;;  %v2312_v53 = vmul.f32 %v2310_v50, %v7123_v24  ;;  %v2322_v9 = vstv %s6027_s9  ;;  %s6109_s9 = sld [smem:[#allocation2 + $0x13b]] }
 0x253   : >> { %v2373_v26 = vstv %s6029_s13  ;;  %v2358_v40 = vadd.f32 %v2356_v41, %v2352_v61  ;;  %v2359_v12 = vadd.f32 %v2357_v0, %v2353_v54  ;;  %v2368_v14 = vmul.f32 %v2367_v8, %v7108_v30  ;;  %v7151_v61 = vld [vmem:[#allocation81_spill] sm:$0xff]  ;;  %s6111_s13 = sld [smem:[#allocation2 + $0x14f]] }
 0x254   : >> { %v2369_v31 = vmul.f32 %v2367_v8, %v7109_v36  ;;  %v2308_v47 = vadd.f32 %v2306_v10, %v2302_v58  ;;  %v2313_v51 = vadd.f32 %v2311_v46, %v2307_v49  ;;  %v2317_v5 = vmul.f32 %v2316_v20, %v7103_v32 }
 0x255   : >> { %v2379_v62 = vstv %s6037_s11  ;;  %v2364_v39 = vadd.f32 %v2362_v2, %v2358_v40  ;;  %v2365_v45 = vadd.f32 %v2363_v48, %v2359_v12  ;;  %v2374_v50 = vmul.f32 %v2373_v26, %v7131_v52  ;;  %s6117_s11 = sld [smem:[#allocation2 + $0x4c]] }
 0x256   : >> { %v2375_v38 = vmul.f32 %v2373_v26, %v7132_v59  ;;  %v2202_v0 = vadd.f32 %v6008_v57, %v6005_v44  ;;  %v2318_v41 = vmul.f32 %v2316_v20, %v7126_v4  ;;  %v2323_v58 = vmul.f32 %v2322_v9, %v7148_v60 }
 0x257   : >> { %v2385_v10 = vstv %s6043_s7  ;;  %v2370_v46 = vadd.f32 %v2368_v14, %v2364_v39  ;;  %v2371_v8 = vadd.f32 %v2369_v31, %v2365_v45  ;;  %v2380_v54 = vmul.f32 %v2379_v62, %v7151_v61  ;;  %s6119_s7 = sld [smem:[#allocation2 + $0x60]] }
 0x258   : >> { %v2381_v2 = vmul.f32 %v2379_v62, %v4162_v11  ;;  %v2314_v48 = vadd.f32 %v2312_v53, %v2308_v47  ;;  %v2319_v49 = vadd.f32 %v2317_v5, %v2313_v51  ;;  %v2328_v40 = vstv %s6050_s4  ;;  %s6123_s4 = sld [smem:[#allocation2 + $0x74]] }
 0x259   : >> { %v2391_v12 = vstv %s6053_s10  ;;  %v2376_v26 = vadd.f32 %v2374_v50, %v2370_v46  ;;  %v2377_v44 = vadd.f32 %v2375_v38, %v2371_v8  ;;  %v2386_v20 = vmul.f32 %v2385_v10, %v4165_v13  ;;  %v7153_v8 = vld [vmem:[#allocation77_spill] sm:$0xff]  ;;  %s6125_s10 = sld [smem:[#allocation2 + $0x88]] }
 0x25a   : >> { %v2387_v57 = vmul.f32 %v2385_v10, %v4169_v17  ;;  %v2203_v14 = vadd.f32 %v6011_v43, %v6020_v28  ;;  %v2204_v31 = vmax.f32 %v2202_v0, 0.0  ;;  %v2324_v39 = vmul.f32 %v2322_v9, %v4305_v1  ;;  %v7152_v0 = vld [vmem:[#allocation70_spill] sm:$0xff] }
 0x25b   : >> { %v2397_v53 = vstv %s6060_s1  ;;  %v2382_v47 = vadd.f32 %v2380_v54, %v2376_v26  ;;  %v2383_v51 = vadd.f32 %v2381_v2, %v2377_v44  ;;  %v2392_v5 = vmul.f32 %v2391_v12, %v7045_v21  ;;  %v7154_v2 = vld [vmem:[#allocation100_spill] sm:$0xff]  ;;  %s6142_s1 = sld [smem:[#allocation2 + $0x163]] }
 0x25c   : >> { %v2393_v62 = vmul.f32 %v2391_v12, %v4181_v29  ;;  %v2320_v45 = vadd.f32 %v2318_v41, %v2314_v48  ;;  %v2325_v50 = vadd.f32 %v2323_v58, %v2319_v49  ;;  %v2329_v38 = vmul.f32 %v2328_v40, %v7004_v55  ;;  %v7157_v41 = vld [vmem:[#allocation78_spill] sm:$0xff] }
 0x25d   : >> { %v2403_v10 = vstv %s6066_s19  ;;  %v2388_v46 = vadd.f32 %v2386_v20, %v2382_v47  ;;  %v2389_v43 = vadd.f32 %v2387_v57, %v2383_v51  ;;  %v2398_v28 = vmul.f32 %v2397_v53, %v4184_v33  ;;  %s6144_s19 = sld [smem:[#allocation2 + $0x9c]] }
 0x25e   : >> { %v2399_v9 = vmul.f32 %v2397_v53, %v4200_v56  ;;  %v1952_v54 = vadd.f32 %v7153_v8, %v7152_v0  ;;  %v7155_v26 = vmax.f32 %v7154_v2, 0.0  ;;  %v7156_v44 = vstv %s7134_s6 }
 0x25f   : >> { %v2080_v58 = vadd.f32 %v5970_v3, %v7157_v41  ;;  %v2394_v48 = vadd.f32 %v2392_v5, %v2388_v46  ;;  %v2395_v49 = vadd.f32 %v2393_v62, %v2389_v43  ;;  %v2404_v20 = vmul.f32 %v2403_v10, %v4209_v6 }
 0x260   : >> { %v2079_v12 = vmul.f32 %v7156_v44, %v7155_v26  ;;  %v2405_v57 = vmul.f32 %v2403_v10, %v4211_v7  ;;  %v2205_v53 = vmax.f32 %v2203_v14, 0.0  ;;  %v7158_v47 = vstv %s6936_s3  ;;  %s6160_s3 = sld [smem:[#allocation2 + $0x177]] }
 0x261   : >> { %v2207_v51 = vmul.f32 %v7158_v47, %v2204_v31  ;;  %v2330_v3 = vmul.f32 %v2328_v40, %v4416_v22  ;;  %v2409_v0 = vstv %s6079_s2  ;;  %v2326_v5 = vadd.f32 %v2324_v39, %v2320_v45  ;;  %s6150_s2 = sld [smem:[#allocation2 + $0xb0]] }
 0x262   : >> { %v6121_v62 = vadd.f32 %v2329_v38, %v2325_v50  ;;  %v2400_v10 = vadd.f32 %v2398_v28, %v2394_v48  ;;  %v2401_v46 = vadd.f32 %v2399_v9, %v2395_v49  ;;  %v2415_v14 = vstv %s6087_s15  ;;  %s6158_s15 = sld [smem:[#allocation2 + $0xc4]]  ;;  %v7167_v28 = vld [vmem:[#allocation91_spill] sm:$0xff] }
 0x263   : >> { %v2410_v43 = vmul.f32 %v2409_v0, %v7006_v42  ;;  %v2411_v8 = vmul.f32 %v2409_v0, %v4219_v15  ;;  %v6130_v2 = vadd.f32 %v2079_v12, %v1952_v54  ;;  %v7161_v39 = vmov %v7158_v47 }
 0x264   : >> { %7159 = vst [vmem:[#allocation98_spill] sm:$0xff] %v6121_v62  ;;  %v2406_v40 = vadd.f32 %v2404_v20, %v2400_v10  ;;  %v2407_v31 = vadd.f32 %v2405_v57, %v2401_v46  ;;  %v6134_v45 = vmul.f32 %v7161_v39, %v2205_v53  ;;  %v6136_v50 = vadd.f32 %v2207_v51, %v2080_v58 }
 0x265   : >> { %7160 = vst [vmem:[#allocation75_spill] sm:$0xff] %v6130_v2  ;;  %v6138_v38 = vadd.f32 %v2330_v3, %v2326_v5  ;;  %v2416_v54 = vmul.f32 %v2415_v14, %v4221_v16  ;;  %v2417_v26 = vmul.f32 %v2415_v14, %v4225_v19  ;;  %v2470_v44 = vstv %s6103_s5  ;;  %s6168_s5 = sld [smem:[#allocation2 + $0xd8]] }
 0x266   : >> { %7162 = vst [vmem:[#allocation76_spill] sm:$0xff] %v6134_v45  ;;  %7163 = vst [vmem:[#allocation79_spill] sm:$0xff] %v6136_v50  ;;  %v2474_v12 = vstv %s6105_s12  ;;  %v2412_v41 = vadd.f32 %v2410_v43, %v2406_v40  ;;  %v2413_v58 = vadd.f32 %v2411_v8, %v2407_v31  ;;  %v2471_v48 = vmul.f32 %v2470_v44, %v7095_v27  ;;  %v7165_v8 = vld [vmem:[#allocation89_spill] sm:$0xff]  ;;  %s6174_s12 = sld [smem:[#allocation2 + $0xec]] }
 0x267   : >> { %7164 = vst [vmem:[#allocation88_spill] sm:$0xff] %v6138_v38  ;;  %v2472_v49 = vmul.f32 %v2470_v44, %v7096_v63  ;;  %v2421_v20 = vstv %s6109_s9  ;;  %v2427_v57 = vstv %s6111_s13  ;;  %v2478_v53 = vstv %s6117_s11  ;;  %v7166_v44 = vld [vmem:[#allocation90_spill] sm:$0xff]  ;;  %s6178_s9 = sld [smem:[#allocation2 + $0x18b]]  ;;  %s6184_s13 = sld [smem:[#allocation2 + $0x100]] }
 0x268   : >> { %v2484_v47 = vstv %s6119_s7  ;;  %v2475_v51 = vadd.f32 %v2474_v12, %v2471_v48  ;;  %v2490_v0 = vstv %s6123_s4  ;;  %v2496_v5 = vstv %s6125_s10  ;;  %s6187_s11 = sld [smem:[#allocation2 + $0x19f]]  ;;  %s6192_s7 = sld [smem:[#allocation2 + $0x114]] }
 0x269   : >> { %v2476_v3 = vadd.f32 %v2474_v12, %v2472_v49  ;;  %v2479_v10 = vmul.f32 %v2478_v53, %v7142_v37  ;;  %v2480_v46 = vmul.f32 %v2478_v53, %v7143_v34  ;;  %v2485_v14 = vmul.f32 %v2484_v47, %v7149_v35  ;;  %s6197_s4 = sld [smem:[#allocation2 + $0x1b3]]  ;;  %s6202_s10 = sld [smem:[#allocation2 + $0x128]] }
 0x26a   : >> { %v2486_v40 = vmul.f32 %v2484_v47, %v7150_v23  ;;  %v2418_v31 = vadd.f32 %v2416_v54, %v2412_v41  ;;  %v2419_v43 = vadd.f32 %v2417_v26, %v2413_v58  ;;  %v2422_v39 = vmul.f32 %v2421_v20, %v7165_v8 }
 0x26b   : >> { %v2423_v12 = vmul.f32 %v2421_v20, %v7166_v44  ;;  %v2481_v48 = vadd.f32 %v2479_v10, %v2475_v51  ;;  %v2482_v49 = vadd.f32 %v2480_v46, %v2476_v3  ;;  %v2491_v9 = vmul.f32 %v2490_v0, %v7129_v25  ;;  %v7168_v10 = vld [vmem:[#allocation92_spill] sm:$0xff] }
 0x26c   : >> { %v2492_v53 = vmul.f32 %v2490_v0, %v7130_v18  ;;  %v2428_v50 = vmul.f32 %v2427_v57, %v7167_v28  ;;  %v2433_v47 = vstv %s6142_s1  ;;  %v2497_v54 = vmul.f32 %v2496_v5, %v7108_v30  ;;  %s6214_s1 = sld [smem:[#allocation2 + $0x150]] }
 0x26d   : >> { %v2502_v26 = vstv %s6144_s19  ;;  %v2487_v41 = vadd.f32 %v2485_v14, %v2481_v48  ;;  %v2488_v58 = vadd.f32 %v2486_v40, %v2482_v49  ;;  %v2498_v20 = vmul.f32 %v2496_v5, %v7109_v36  ;;  %v7169_v48 = vld [vmem:[#allocation93_spill] sm:$0xff]  ;;  %s6218_s19 = sld [smem:[#allocation2 + $0x164]] }
 0x26e   : >> { %v2508_v51 = vstv %s6150_s2  ;;  %v2424_v3 = vadd.f32 %v2422_v39, %v2418_v31  ;;  %v2425_v0 = vadd.f32 %v2423_v12, %v2419_v43  ;;  %v2429_v46 = vmul.f32 %v2427_v57, %v7168_v10  ;;  %s6224_s2 = sld [smem:[#allocation2 + $0x39]] }
 0x26f   : >> { %v2503_v62 = vmul.f32 %v2502_v26, %v7131_v52  ;;  %v2493_v45 = vadd.f32 %v2491_v9, %v2487_v41  ;;  %v2494_v2 = vadd.f32 %v2492_v53, %v2488_v58  ;;  %v2504_v14 = vmul.f32 %v2502_v26, %v7132_v59  ;;  %v7170_v41 = vld [vmem:[#allocation94_spill] sm:$0xff] }
 0x270   : >> { %v2514_v40 = vstv %s6158_s15  ;;  %v2434_v49 = vmul.f32 %v2433_v47, %v7169_v48  ;;  %v2439_v31 = vstv %s6160_s3  ;;  %v2509_v57 = vmul.f32 %v2508_v51, %v7151_v61  ;;  %s6208_s3 = sld [smem:[#allocation2 + $0x13c]]  ;;  %s6230_s15 = sld [smem:[#allocation2 + $0x178]] }
 0x271   : >> { %v2499_v43 = vadd.f32 %v2497_v54, %v2493_v45  ;;  %v2500_v39 = vadd.f32 %v2498_v20, %v2494_v2  ;;  %v2510_v9 = vmul.f32 %v2508_v51, %v4162_v11  ;;  %v2520_v12 = vstv %s6168_s5  ;;  %v7171_v2 = vld [vmem:[#allocation95_spill] sm:$0xff]  ;;  %s6232_s5 = sld [smem:[#allocation2 + $0x1c9]] }
 0x272   : >> { %v2430_v53 = vadd.f32 %v2428_v50, %v2424_v3  ;;  %v2431_v26 = vadd.f32 %v2429_v46, %v2425_v0  ;;  %v2435_v58 = vmul.f32 %v2433_v47, %v7170_v41  ;;  %v2515_v5 = vmul.f32 %v2514_v40, %v4165_v13 }
 0x273   : >> { %v2505_v38 = vadd.f32 %v2503_v62, %v2499_v43  ;;  %v2506_v59 = vadd.f32 %v2504_v14, %v2500_v39  ;;  %v2516_v61 = vmul.f32 %v2514_v40, %v4169_v17  ;;  %v2526_v45 = vstv %s6174_s12  ;;  %s6236_s12 = sld [smem:[#allocation2 + $0x4d]] }
 0x274   : >> { %v2440_v54 = vmul.f32 %v2439_v31, %v7171_v2  ;;  %v2441_v20 = vmul.f32 %v2439_v31, %v7123_v24  ;;  %v2445_v50 = vstv %s6178_s9  ;;  %v2521_v51 = vmul.f32 %v2520_v12, %v7045_v21  ;;  %s6238_s9 = sld [smem:[#allocation2 + $0x61]] }
 0x275   : >> { %v2511_v47 = vadd.f32 %v2509_v57, %v2505_v38  ;;  %v2512_v62 = vadd.f32 %v2510_v9, %v2506_v59  ;;  %v2522_v3 = vmul.f32 %v2520_v12, %v4181_v29  ;;  %v2532_v0 = vstv %s6184_s13  ;;  %s6242_s13 = sld [smem:[#allocation2 + $0x75]] }
 0x276   : >> { %v2436_v46 = vadd.f32 %v2434_v49, %v2430_v53  ;;  %v2437_v14 = vadd.f32 %v2435_v58, %v2431_v26  ;;  %v2451_v40 = vstv %s6187_s11  ;;  %v2527_v31 = vmul.f32 %v2526_v45, %v4184_v33  ;;  %s6244_s11 = sld [smem:[#allocation2 + $0x89]] }
 0x277   : >> { %v2517_v43 = vadd.f32 %v2515_v5, %v2511_v47  ;;  %v2518_v39 = vadd.f32 %v2516_v61, %v2512_v62  ;;  %v2528_v21 = vmul.f32 %v2526_v45, %v4200_v56  ;;  %v2538_v17 = vstv %s6192_s7  ;;  %s6260_s7 = sld [smem:[#allocation2 + $0x18c]] }
 0x278   : >> { %v2446_v59 = vmul.f32 %v2445_v50, %v7103_v32  ;;  %v2447_v38 = vmul.f32 %v2445_v50, %v7126_v4  ;;  %v6847_v57 = vstv %s6197_s4  ;;  %v2533_v9 = vmul.f32 %v2532_v0, %v4209_v6 }
 0x279   : >> { %v2523_v49 = vadd.f32 %v2521_v51, %v2517_v43  ;;  %v2524_v5 = vadd.f32 %v2522_v3, %v2518_v39  ;;  %v2534_v61 = vmul.f32 %v2532_v0, %v4211_v7  ;;  %v2544_v12 = vstv %s6202_s10  ;;  %s6262_s10 = sld [smem:[#allocation2 + $0x9d]] }
 0x27a   : >> { %v2442_v53 = vadd.f32 %v2440_v54, %v2436_v46  ;;  %v2443_v26 = vadd.f32 %v2441_v20, %v2437_v14  ;;  %v2452_v58 = vmul.f32 %v2451_v40, %v7148_v60  ;;  %v2539_v45 = vmul.f32 %v2538_v17, %v7006_v42 }
 0x27b   : >> { %v2529_v50 = vadd.f32 %v2527_v31, %v2523_v49  ;;  %v2530_v51 = vadd.f32 %v2528_v21, %v2524_v5  ;;  %v2540_v47 = vmul.f32 %v2538_v17, %v4219_v15  ;;  %v2550_v62 = vstv %s6208_s3  ;;  %s6270_s3 = sld [smem:[#allocation2 + $0xb1]] }
 0x27c   : >> { %v2453_v3 = vmul.f32 %v2451_v40, %v4305_v1  ;;  %v2458_v54 = vmul.f32 %v6847_v57, %v7004_v55  ;;  %v2545_v20 = vmul.f32 %v2544_v12, %v4221_v16  ;;  %v2556_v0 = vstv %s6214_s1  ;;  %s6276_s1 = sld [smem:[#allocation2 + $0xc5]] }
 0x27d   : >> { %v2535_v46 = vadd.f32 %v2533_v9, %v2529_v50  ;;  %v2536_v14 = vadd.f32 %v2534_v61, %v2530_v51  ;;  %v2546_v43 = vmul.f32 %v2544_v12, %v4225_v19  ;;  %v2562_v31 = vstv %s6218_s19  ;;  %s6284_s19 = sld [smem:[#allocation2 + $0x1a0]] }
 0x27e   : >> { %v2448_v21 = vadd.f32 %v2446_v59, %v2442_v53  ;;  %v2449_v39 = vadd.f32 %v2447_v38, %v2443_v26  ;;  %v2551_v17 = vmul.f32 %v2550_v62, %v7165_v8  ;;  %v2552_v40 = vmul.f32 %v2550_v62, %v7166_v44 }
 0x27f   : >> { %v2541_v49 = vadd.f32 %v2539_v45, %v2535_v46  ;;  %v2542_v5 = vadd.f32 %v2540_v47, %v2536_v14  ;;  %v2557_v57 = vmul.f32 %v2556_v0, %v7167_v28  ;;  %v2558_v9 = vmul.f32 %v2556_v0, %v7168_v10 }
 0x280   : >> { %v2563_v59 = vmul.f32 %v2562_v31, %v7169_v48  ;;  %v2568_v38 = vstv %s6230_s15  ;;  %v2599_v61 = vstv %s6224_s2  ;;  %v2603_v12 = vstv %s6232_s5  ;;  %s6291_s2 = sld [smem:[#allocation2 + $0xd9]]  ;;  %s6297_s15 = sld [smem:[#allocation2 + $0x1b4]] }
 0x281   : >> { %v2547_v53 = vadd.f32 %v2545_v20, %v2541_v49  ;;  %v2548_v26 = vadd.f32 %v2546_v43, %v2542_v5  ;;  %v2600_v45 = vmul.f32 %v2599_v61, %v7095_v27  ;;  %v2601_v50 = vmul.f32 %v2599_v61, %v7096_v63  ;;  %s6323_s5 = sld [smem:[#allocation2 + $0x101]] }
 0x282   : >> { %v2607_v51 = vstv %s6236_s12  ;;  %v2613_v47 = vstv %s6238_s9  ;;  %v2619_v62 = vstv %s6242_s13  ;;  %v2625_v0 = vstv %s6244_s11  ;;  %s6330_s12 = sld [smem:[#allocation2 + $0x115]]  ;;  %s6334_s9 = sld [smem:[#allocation2 + $0x3a]] }
 0x283   : >> { %v2553_v46 = vadd.f32 %v2551_v17, %v2547_v53  ;;  %v2554_v14 = vadd.f32 %v2552_v40, %v2548_v26  ;;  %v2604_v10 = vadd.f32 %v2603_v12, %v2600_v45  ;;  %v2605_v28 = vadd.f32 %v2603_v12, %v2601_v50  ;;  %s6336_s13 = sld [smem:[#allocation2 + $0x1ca]]  ;;  %s6340_s11 = sld [smem:[#allocation2 + $0x129]] }
 0x284   : >> { %v2608_v20 = vmul.f32 %v2607_v51, %v7142_v37  ;;  %v2609_v43 = vmul.f32 %v2607_v51, %v7143_v34  ;;  %v2614_v49 = vmul.f32 %v2613_v47, %v7149_v35  ;;  %v2615_v5 = vmul.f32 %v2613_v47, %v7150_v23 }
 0x285   : >> { %v2454_v61 = vadd.f32 %v2452_v58, %v2448_v21  ;;  %v2559_v48 = vadd.f32 %v2557_v57, %v2553_v46  ;;  %v2564_v44 = vmul.f32 %v2562_v31, %v7170_v41  ;;  %v2569_v17 = vmul.f32 %v2568_v38, %v7171_v2 }
 0x286   : >> { %v2610_v40 = vadd.f32 %v2608_v20, %v2604_v10  ;;  %v2611_v12 = vadd.f32 %v2609_v43, %v2605_v28  ;;  %v2620_v53 = vmul.f32 %v2619_v62, %v7129_v25  ;;  %v2621_v26 = vmul.f32 %v2619_v62, %v7130_v18 }
 0x287   : >> { %v2560_v45 = vadd.f32 %v2558_v9, %v2554_v14  ;;  %v2574_v50 = vstv %s6260_s7  ;;  %v2626_v51 = vmul.f32 %v2625_v0, %v7108_v30  ;;  %v2631_v58 = vstv %s6262_s10  ;;  %s6343_s7 = sld [smem:[#allocation2 + $0x4e]]  ;;  %s6345_s10 = sld [smem:[#allocation2 + $0x62]] }
 0x288   : >> { %v2565_v57 = vadd.f32 %v2563_v59, %v2559_v48  ;;  %v2616_v31 = vadd.f32 %v2614_v49, %v2610_v40  ;;  %v2617_v21 = vadd.f32 %v2615_v5, %v2611_v12  ;;  %v2627_v47 = vmul.f32 %v2625_v0, %v7109_v36  ;;  %v7173_v48 = vld [vmem:[#allocation80_spill] sm:$0xff]  ;;  %v7174_v40 = vld [vmem:[#allocation81_spill] sm:$0xff] }
 0x289   : >> { %v2455_v10 = vadd.f32 %v2453_v3, %v2449_v39  ;;  %v7172_v28 = vstv %s6197_s4  ;;  %v2460_v20 = vadd.f32 %v2458_v54, %v2454_v61  ;;  %v2637_v9 = vstv %s6270_s3  ;;  %s6305_s4 = sld [smem:[#allocation2 + $0xed]]  ;;  %s6348_s3 = sld [smem:[#allocation2 + $0x76]] }
 0x28a   : >> { %v2459_v46 = vmul.f32 %v7172_v28, %v4416_v22  ;;  %v2622_v62 = vadd.f32 %v2620_v53, %v2616_v31  ;;  %v2623_v14 = vadd.f32 %v2621_v26, %v2617_v21  ;;  %v2632_v43 = vmul.f32 %v2631_v58, %v7131_v52  ;;  %v7175_v53 = vld [vmem:[#allocation75_spill] sm:$0xff]  ;;  %v7176_v26 = vld [vmem:[#allocation76_spill] sm:$0xff] }
 0x28b   : >> { %v2633_v59 = vmul.f32 %v2631_v58, %v7173_v48  ;;  %v2566_v49 = vadd.f32 %v2564_v44, %v2560_v45  ;;  %v2570_v5 = vmul.f32 %v2568_v38, %v7123_v24  ;;  %v2575_v3 = vmul.f32 %v2574_v50, %v7103_v32  ;;  %v7177_v38 = vld [vmem:[#allocation98_spill] sm:$0xff] }
 0x28c   : >> { %v2643_v39 = vstv %s6276_s1  ;;  %v2571_v54 = vadd.f32 %v2569_v17, %v2565_v57  ;;  %v2628_v0 = vadd.f32 %v2626_v51, %v2622_v62  ;;  %v2629_v61 = vadd.f32 %v2627_v47, %v2623_v14  ;;  %v7180_v51 = vld [vmem:[#allocation88_spill] sm:$0xff]  ;;  %s6352_s1 = sld [smem:[#allocation2 + $0x8a]] }
 0x28d   : >> { %v2638_v12 = vmul.f32 %v2637_v9, %v7174_v40  ;;  %v2210_v31 = vadd.f32 %v7176_v26, %v7175_v53  ;;  %v2461_v21 = vadd.f32 %v2459_v46, %v2455_v10  ;;  %v2580_v58 = vstv %s6284_s19  ;;  %s6362_s19 = sld [smem:[#allocation2 + $0x13d]] }
 0x28e   : >> { %v2639_v44 = vmul.f32 %v2637_v9, %v4162_v11  ;;  %v7178_v45 = vmax.f32 %v7177_v38, 0.0  ;;  %v7179_v28 = vstv %s4064_s25  ;;  %v2634_v24 = vadd.f32 %v2632_v43, %v2628_v0  ;;  %v7183_v38 = vld [vmem:[#allocation83_spill] sm:$0xff] }
 0x28f   : >> { %v2635_v2 = vadd.f32 %v2633_v59, %v2629_v61  ;;  %v2644_v17 = vmul.f32 %v2643_v39, %v4165_v13  ;;  %v7181_v57 = vmax.f32 %v7180_v51, 0.0  ;;  %v7182_v47 = vmov %v7179_v28 }
 0x290   : >> { %v2336_v32 = vmul.f32 %v7179_v28, %v7178_v45  ;;  %v2572_v14 = vadd.f32 %v2570_v5, %v2566_v49  ;;  %v2576_v10 = vmul.f32 %v2574_v50, %v7126_v4  ;;  %v2649_v46 = vstv %s6291_s2  ;;  %s6364_s2 = sld [smem:[#allocation2 + $0x9e]] }
 0x291   : >> { %v2337_v62 = vmul.f32 %v7182_v47, %v7181_v57  ;;  %v2462_v9 = vmax.f32 %v2460_v20, 0.0  ;;  %v2577_v53 = vadd.f32 %v2575_v3, %v2571_v54  ;;  %v2581_v26 = vmul.f32 %v2580_v58, %v7148_v60  ;;  %v7184_v57 = vld [vmem:[#allocation84_spill] sm:$0xff] }
 0x292   : >> { %v2640_v43 = vadd.f32 %v2638_v12, %v2634_v24  ;;  %v2463_v0 = vmax.f32 %v2461_v21, 0.0  ;;  %v2586_v59 = vstv %s6297_s15  ;;  %v2641_v61 = vadd.f32 %v2639_v44, %v2635_v2  ;;  %v7185_v24 = vld [vmem:[#allocation79_spill] sm:$0xff]  ;;  %s6372_s15 = sld [smem:[#allocation2 + $0x151]] }
 0x293   : >> { %v2645_v45 = vmul.f32 %v2643_v39, %v7183_v38  ;;  %v2464_v28 = vstv %s4066_s17  ;;  %v2650_v49 = vmul.f32 %v2649_v46, %v7184_v57  ;;  %v2578_v50 = vadd.f32 %v2576_v10, %v2572_v14 }
 0x294   : >> { %v2646_v51 = vadd.f32 %v2644_v17, %v2640_v43  ;;  %v2582_v5 = vmul.f32 %v2580_v58, %v4305_v1  ;;  %v2655_v47 = vstv %s6305_s4  ;;  %v2338_v20 = vadd.f32 %v2336_v32, %v7185_v24  ;;  %s6376_s4 = sld [smem:[#allocation2 + $0xb2]] }
 0x295   : >> { %v2339_v2 = vadd.f32 %v2337_v62, %v2210_v31  ;;  %v2583_v3 = vadd.f32 %v2581_v26, %v2577_v53  ;;  %v2587_v39 = vmul.f32 %v2586_v59, %v7004_v55  ;;  %v2465_v54 = vmul.f32 %v2464_v28, %v2462_v9 }
 0x296   : >> { %v2466_v12 = vmul.f32 %v2464_v28, %v2463_v0  ;;  %v2647_v21 = vadd.f32 %v2645_v45, %v2641_v61  ;;  %v2651_v58 = vmul.f32 %v2649_v46, %v4181_v29  ;;  %v2652_v44 = vadd.f32 %v2650_v49, %v2646_v51 }
 0x297   : >> { %v2656_v32 = vmul.f32 %v2655_v47, %v4184_v33  ;;  %v2584_v31 = vadd.f32 %v2582_v5, %v2578_v50  ;;  %v2588_v17 = vmul.f32 %v2586_v59, %v4416_v22  ;;  %v2661_v62 = vstv %s6323_s5  ;;  %s6382_s5 = sld [smem:[#allocation2 + $0xc6]] }
 0x298   : >> { %v2589_v14 = vadd.f32 %v2587_v39, %v2583_v3  ;;  %v6354_v10 = vadd.f32 %v2465_v54, %v2338_v20  ;;  %v6356_v46 = vadd.f32 %v2466_v12, %v2339_v2  ;;  %v2653_v9 = vadd.f32 %v2651_v58, %v2647_v21 }
 0x299   : >> { %v2657_v53 = vmul.f32 %v2655_v47, %v4200_v56  ;;  %v2658_v43 = vadd.f32 %v2656_v32, %v2652_v44  ;;  %v2662_v0 = vmul.f32 %v2661_v62, %v4209_v6  ;;  %v2667_v59 = vstv %s6330_s12  ;;  %s6391_s12 = sld [smem:[#allocation2 + $0x165]] }
 0x29a   : >> { %7186 = vst [vmem:[#allocation69_spill] sm:$0xff] %v6354_v10  ;;  %7187 = vst [vmem:[#allocation71_spill] sm:$0xff] %v6356_v46  ;;  %v6366_v61 = vadd.f32 %v2588_v17, %v2584_v31  ;;  %v2663_v45 = vmul.f32 %v2661_v62, %v4211_v7  ;;  %v2728_v28 = vstv %s6334_s9  ;;  %v2732_v51 = vstv %s6336_s13  ;;  %s6394_s9 = sld [smem:[#allocation2 + $0xda]]  ;;  %s6400_s13 = sld [smem:[#allocation2 + $0xee]] }
 0x29b   : >> { %v2591_v49 = vmax.f32 %v2589_v14, 0.0  ;;  %v2673_v50 = vstv %s6340_s11  ;;  %v2729_v5 = vmul.f32 %v2728_v28, %v7095_v27  ;;  %v2730_v47 = vmul.f32 %v2728_v28, %v7096_v63  ;;  %s6410_s11 = sld [smem:[#allocation2 + $0x179]] }
 0x29c   : >> { %7188 = vst [vmem:[#allocation72_spill] sm:$0xff] %v6366_v61  ;;  %v2659_v24 = vadd.f32 %v2657_v53, %v2653_v9  ;;  %v2668_v20 = vmul.f32 %v2667_v59, %v7006_v42  ;;  %v2736_v2 = vstv %s6343_s7  ;;  %v2742_v3 = vstv %s6345_s10  ;;  %s6413_s7 = sld [smem:[#allocation2 + $0x102]]  ;;  %s6418_s10 = sld [smem:[#allocation2 + $0x18d]] }
 0x29d   : >> { %v2664_v39 = vadd.f32 %v2662_v0, %v2658_v43  ;;  %v2733_v54 = vadd.f32 %v2732_v51, %v2729_v5  ;;  %v2734_v12 = vadd.f32 %v2732_v51, %v2730_v47  ;;  %v2748_v21 = vstv %s6348_s3  ;;  %s6421_s3 = sld [smem:[#allocation2 + $0x116]] }
 0x29e   : >> { %v2737_v58 = vmul.f32 %v2736_v2, %v7142_v37  ;;  %v2738_v44 = vmul.f32 %v2736_v2, %v7143_v34  ;;  %v2743_v32 = vmul.f32 %v2742_v3, %v7149_v35  ;;  %v2744_v31 = vmul.f32 %v2742_v3, %v7150_v23 }
 0x29f   : >> { %v2669_v62 = vmul.f32 %v2667_v59, %v4219_v15  ;;  %v2674_v14 = vmul.f32 %v2673_v50, %v4221_v16  ;;  %v2754_v9 = vstv %s6352_s1  ;;  %v2749_v0 = vmul.f32 %v2748_v21, %v7129_v25  ;;  %s6423_s1 = sld [smem:[#allocation2 + $0x1a1]] }
 0x2a0   : >> { %v2739_v53 = vadd.f32 %v2737_v58, %v2733_v54  ;;  %v2740_v43 = vadd.f32 %v2738_v44, %v2734_v12  ;;  %v2750_v28 = vmul.f32 %v2748_v21, %v7130_v18  ;;  %v2665_v51 = vadd.f32 %v2663_v45, %v2659_v24 }
 0x2a1   : >> { %v2670_v5 = vadd.f32 %v2668_v20, %v2664_v39  ;;  %v2679_v47 = vstv %s6362_s19  ;;  %v2760_v59 = vstv %s6364_s2  ;;  %v2755_v17 = vmul.f32 %v2754_v9, %v7108_v30  ;;  %s6430_s19 = sld [smem:[#allocation2 + $0x1b5]]  ;;  %s6433_s2 = sld [smem:[#allocation2 + $0x12a]] }
 0x2a2   : >> { %v2745_v2 = vadd.f32 %v2743_v32, %v2739_v53  ;;  %v2746_v3 = vadd.f32 %v2744_v31, %v2740_v43  ;;  %v2756_v26 = vmul.f32 %v2754_v9, %v7109_v36  ;;  %v7189_v54 = vstv %s4068_s16 }
 0x2a3   : >> { %v6406_v12 = vmul.f32 %v7189_v54, %v2591_v49  ;;  %v2675_v58 = vmul.f32 %v2673_v50, %v4225_v19  ;;  %v2685_v44 = vstv %s6372_s15  ;;  %v2766_v45 = vstv %s6376_s4  ;;  %s6445_s15 = sld [smem:[#allocation2 + $0x13e]]  ;;  %s6451_s4 = sld [smem:[#allocation2 + $0x3b]] }
 0x2a4   : >> { %v2751_v24 = vadd.f32 %v2749_v0, %v2745_v2  ;;  %v2752_v20 = vadd.f32 %v2750_v28, %v2746_v3  ;;  %v2761_v39 = vmul.f32 %v2760_v59, %v7131_v52  ;;  %v2762_v21 = vmul.f32 %v2760_v59, %v7173_v48  ;;  %v7191_v28 = vld [vmem:[#allocation90_spill] sm:$0xff] }
 0x2a5   : >> { %7190 = vst [vmem:[#allocation99_spill] sm:$0xff] %v6406_v12  ;;  %v2671_v32 = vadd.f32 %v2669_v62, %v2665_v51  ;;  %v2676_v31 = vadd.f32 %v2674_v14, %v2670_v5  ;;  %v2680_v49 = vmul.f32 %v2679_v47, %v7165_v8  ;;  %v2772_v50 = vstv %s6382_s5  ;;  %v7192_v62 = vld [vmem:[#allocation91_spill] sm:$0xff]  ;;  %s6453_s5 = sld [smem:[#allocation2 + $0x1cb]] }
 0x2a6   : >> { %v2757_v9 = vadd.f32 %v2755_v17, %v2751_v24  ;;  %v2758_v53 = vadd.f32 %v2756_v26, %v2752_v20  ;;  %v2767_v43 = vmul.f32 %v2766_v45, %v7174_v40  ;;  %v2768_v0 = vmul.f32 %v2766_v45, %v4162_v11  ;;  %v7193_v24 = vld [vmem:[#allocation92_spill] sm:$0xff]  ;;  %v7194_v11 = vld [vmem:[#allocation93_spill] sm:$0xff] }
 0x2a7   : >> { %v2681_v59 = vmul.f32 %v2679_v47, %v7191_v28  ;;  %v2686_v14 = vmul.f32 %v2685_v44, %v7192_v62  ;;  %v2691_v51 = vstv %s6391_s12  ;;  %v2778_v5 = vstv %s6394_s9  ;;  %s6457_s12 = sld [smem:[#allocation2 + $0x152]]  ;;  %s6463_s9 = sld [smem:[#allocation2 + $0x4f]] }
 0x2a8   : >> { %v2763_v2 = vadd.f32 %v2761_v39, %v2757_v9  ;;  %v2764_v17 = vadd.f32 %v2762_v21, %v2758_v53  ;;  %v2773_v26 = vmul.f32 %v2772_v50, %v4165_v13  ;;  %v2774_v3 = vmul.f32 %v2772_v50, %v7183_v38 }
 0x2a9   : >> { %v2677_v54 = vadd.f32 %v2675_v58, %v2671_v32  ;;  %v2682_v45 = vadd.f32 %v2680_v49, %v2676_v31  ;;  %v2687_v47 = vmul.f32 %v2685_v44, %v7193_v24  ;;  %v2784_v20 = vstv %s6400_s13  ;;  %s6465_s13 = sld [smem:[#allocation2 + $0x63]] }
 0x2aa   : >> { %v2769_v46 = vadd.f32 %v2767_v43, %v2763_v2  ;;  %v2770_v12 = vadd.f32 %v2768_v0, %v2764_v17  ;;  %v2779_v10 = vmul.f32 %v2778_v5, %v7184_v57  ;;  %v2780_v61 = vmul.f32 %v2778_v5, %v4181_v29  ;;  %v7195_v2 = vld [vmem:[#allocation95_spill] sm:$0xff] }
 0x2ab   : >> { %v2692_v39 = vmul.f32 %v2691_v51, %v7194_v11  ;;  %v2693_v21 = vmul.f32 %v2691_v51, %v7170_v41  ;;  %v2697_v9 = vstv %s6410_s11  ;;  %v2790_v53 = vstv %s6413_s7  ;;  %s6469_s11 = sld [smem:[#allocation2 + $0x77]]  ;;  %s6479_s7 = sld [smem:[#allocation2 + $0x166]] }
 0x2ac   : >> { %v2775_v58 = vadd.f32 %v2773_v26, %v2769_v46  ;;  %v2776_v44 = vadd.f32 %v2774_v3, %v2770_v12  ;;  %v2785_v32 = vmul.f32 %v2784_v20, %v4184_v33  ;;  %v2786_v31 = vmul.f32 %v2784_v20, %v4200_v56 }
 0x2ad   : >> { %v2683_v49 = vadd.f32 %v2681_v59, %v2677_v54  ;;  %v2688_v50 = vadd.f32 %v2686_v14, %v2682_v45  ;;  %v2703_v43 = vstv %s6418_s10  ;;  %v2796_v0 = vstv %s6421_s3  ;;  %s6481_s10 = sld [smem:[#allocation2 + $0x8b]]  ;;  %s6495_s3 = sld [smem:[#allocation2 + $0x9f]] }
 0x2ae   : >> { %v2781_v51 = vadd.f32 %v2779_v10, %v2775_v58  ;;  %v2782_v5 = vadd.f32 %v2780_v61, %v2776_v44  ;;  %v2791_v46 = vmul.f32 %v2790_v53, %v4209_v6  ;;  %v2792_v12 = vmul.f32 %v2790_v53, %v4211_v7  ;;  %v7196_v53 = vld [vmem:[#allocation96_spill] sm:$0xff]  ;;  %v7197_v44 = vld [vmem:[#allocation97_spill] sm:$0xff] }
 0x2af   : >> { %v2698_v17 = vmul.f32 %v2697_v9, %v7195_v2  ;;  %v2709_v26 = vstv %s6423_s1  ;;  %v2715_v3 = vstv %s6430_s19  ;;  %v2802_v59 = vstv %s6433_s2  ;;  %s6501_s1 = sld [smem:[#allocation2 + $0x17a]]  ;;  %s6505_s19 = sld [smem:[#allocation2 + $0xb3]] }
 0x2b0   : >> { %v2787_v14 = vadd.f32 %v2785_v32, %v2781_v51  ;;  %v2788_v54 = vadd.f32 %v2786_v31, %v2782_v5  ;;  %v2797_v10 = vmul.f32 %v2796_v0, %v7006_v42  ;;  %v2798_v61 = vmul.f32 %v2796_v0, %v4219_v15  ;;  %s6511_s2 = sld [smem:[#allocation2 + $0xc7]] }
 0x2b1   : >> { %v2689_v45 = vadd.f32 %v2687_v47, %v2683_v49  ;;  %v2694_v20 = vadd.f32 %v2692_v39, %v2688_v50  ;;  %v2699_v58 = vmul.f32 %v2697_v9, %v7196_v53  ;;  %v2704_v7 = vmul.f32 %v2703_v43, %v7197_v44 }
 0x2b2   : >> { %v6474_v6 = vmul.f32 %v2703_v43, %v7126_v4  ;;  %v6477_v56 = vmul.f32 %v2709_v26, %v7148_v60  ;;  %v2793_v32 = vadd.f32 %v2791_v46, %v2787_v14  ;;  %v2794_v31 = vadd.f32 %v2792_v12, %v2788_v54 }
 0x2b3   : >> { %v6484_v47 = vmul.f32 %v2709_v26, %v4305_v1  ;;  %v6487_v39 = vmul.f32 %v2715_v3, %v7004_v55  ;;  %v2803_v9 = vmul.f32 %v2802_v59, %v4221_v16  ;;  %v2808_v49 = vstv %s6445_s15  ;;  %s6519_s15 = sld [smem:[#allocation2 + $0x18e]] }
 0x2b4   : >> { %v6492_v50 = vmul.f32 %v2715_v3, %v4416_v22  ;;  %v2799_v43 = vadd.f32 %v2797_v10, %v2793_v32  ;;  %v2800_v0 = vadd.f32 %v2798_v61, %v2794_v31  ;;  %v2804_v51 = vmul.f32 %v2802_v59, %v4225_v19 }
 0x2b5   : >> { %v2695_v5 = vadd.f32 %v2693_v21, %v2689_v45  ;;  %v2700_v46 = vadd.f32 %v2698_v17, %v2694_v20  ;;  %v2857_v12 = vstv %s6451_s4  ;;  %v2861_v26 = vstv %s6453_s5  ;;  %s6522_s4 = sld [smem:[#allocation2 + $0xdb]]  ;;  %s6528_s5 = sld [smem:[#allocation2 + $0xef]] }
 0x2b6   : >> { %v2809_v14 = vmul.f32 %v2808_v49, %v7165_v8  ;;  %v2814_v54 = vstv %s6457_s12  ;;  %v2858_v3 = vmul.f32 %v2857_v12, %v7095_v27  ;;  %v2859_v10 = vmul.f32 %v2857_v12, %v7096_v63  ;;  %s6534_s12 = sld [smem:[#allocation2 + $0x1a2]] }
 0x2b7   : >> { %v2805_v59 = vadd.f32 %v2803_v9, %v2799_v43  ;;  %v2810_v61 = vmul.f32 %v2808_v49, %v7191_v28  ;;  %v2865_v21 = vstv %s6463_s9  ;;  %v2871_v17 = vstv %s6465_s13  ;;  %s6537_s9 = sld [smem:[#allocation2 + $0x103]]  ;;  %s6543_s13 = sld [smem:[#allocation2 + $0x117]] }
 0x2b8   : >> { %v2806_v45 = vadd.f32 %v2804_v51, %v2800_v0  ;;  %v2862_v20 = vadd.f32 %v2861_v26, %v2858_v3  ;;  %v2863_v32 = vadd.f32 %v2861_v26, %v2859_v10  ;;  %v2877_v31 = vstv %s6469_s11  ;;  %s6550_s11 = sld [smem:[#allocation2 + $0x1b6]] }
 0x2b9   : >> { %v2866_v22 = vmul.f32 %v2865_v21, %v7142_v37  ;;  %v2867_v27 = vmul.f32 %v2865_v21, %v7143_v34  ;;  %v2872_v63 = vmul.f32 %v2871_v17, %v7149_v35  ;;  %v2873_v9 = vmul.f32 %v2871_v17, %v7150_v23 }
 0x2ba   : >> { %v2701_v43 = vadd.f32 %v2699_v58, %v2695_v5  ;;  %v2815_v49 = vmul.f32 %v2814_v54, %v7192_v62  ;;  %v2820_v12 = vstv %s6479_s7  ;;  %v2883_v0 = vstv %s6481_s10  ;;  %s6553_s7 = sld [smem:[#allocation2 + $0x12b]]  ;;  %s6559_s10 = sld [smem:[#allocation2 + $0x13f]] }
 0x2bb   : >> { %v2868_v51 = vadd.f32 %v2866_v22, %v2862_v20  ;;  %v2869_v26 = vadd.f32 %v2867_v27, %v2863_v32  ;;  %v2878_v37 = vmul.f32 %v2877_v31, %v7129_v25  ;;  %v2879_v34 = vmul.f32 %v2877_v31, %v7130_v18  ;;  %v7198_v27 = vld [vmem:[#allocation82_spill] sm:$0xff] }
 0x2bc   : >> { %v2811_v35 = vadd.f32 %v2809_v14, %v2805_v59  ;;  %v2812_v3 = vadd.f32 %v2810_v61, %v2806_v45  ;;  %v2816_v23 = vmul.f32 %v2814_v54, %v7193_v24  ;;  %v2889_v58 = vstv %s6495_s3  ;;  %s6567_s3 = sld [smem:[#allocation2 + $0x153]] }
 0x2bd   : >> { %v2874_v5 = vadd.f32 %v2872_v63, %v2868_v51  ;;  %v2875_v10 = vadd.f32 %v2873_v9, %v2869_v26  ;;  %v2884_v21 = vmul.f32 %v2883_v0, %v7108_v30  ;;  %v2885_v22 = vmul.f32 %v2883_v0, %v7109_v36 }
 0x2be   : >> { %v2706_v17 = vadd.f32 %v2704_v7, %v2700_v46  ;;  %v2821_v20 = vmul.f32 %v2820_v12, %v7194_v11  ;;  %v2826_v25 = vstv %s6501_s1  ;;  %v2895_v18 = vstv %s6505_s19  ;;  %s6573_s1 = sld [smem:[#allocation2 + $0x167]]  ;;  %s6581_s19 = sld [smem:[#allocation2 + $0x17b]] }
 0x2bf   : >> { %v2880_v14 = vadd.f32 %v2878_v37, %v2874_v5  ;;  %v2881_v54 = vadd.f32 %v2879_v34, %v2875_v10  ;;  %v2890_v59 = vmul.f32 %v2889_v58, %v7131_v52  ;;  %v2891_v61 = vmul.f32 %v2889_v58, %v7173_v48 }
 0x2c0   : >> { %v2817_v30 = vadd.f32 %v2815_v49, %v2811_v35  ;;  %v2818_v45 = vadd.f32 %v2816_v23, %v2812_v3  ;;  %v2822_v7 = vmul.f32 %v2820_v12, %v7170_v41  ;;  %v2901_v36 = vstv %s6511_s2  ;;  %s6587_s2 = sld [smem:[#allocation2 + $0x18f]] }
 0x2c1   : >> { %v2886_v46 = vadd.f32 %v2884_v21, %v2880_v14  ;;  %v2887_v32 = vadd.f32 %v2885_v22, %v2881_v54  ;;  %v2896_v31 = vmul.f32 %v2895_v18, %v7174_v40  ;;  %v2897_v63 = vmul.f32 %v2895_v18, %v7198_v27  ;;  %v7200_v54 = vld [vmem:[#allocation86_spill] sm:$0xff] }
 0x2c2   : >> { %v2707_v9 = vadd.f32 %v6474_v6, %v2701_v43  ;;  %v2827_v52 = vmul.f32 %v2826_v25, %v7195_v2  ;;  %v2832_v0 = vstv %s6519_s15  ;;  %v2907_v48 = vstv %s6522_s4  ;;  %s6595_s15 = sld [smem:[#allocation2 + $0x1a3]]  ;;  %s6601_s4 = sld [smem:[#allocation2 + $0x1b7]] }
 0x2c3   : >> { %v2892_v49 = vadd.f32 %v2890_v59, %v2886_v46  ;;  %v2893_v12 = vadd.f32 %v2891_v61, %v2887_v32  ;;  %v2902_v51 = vmul.f32 %v2901_v36, %v4165_v13  ;;  %v2903_v40 = vmul.f32 %v2901_v36, %v7183_v38  ;;  %v7201_v61 = vld [vmem:[#allocation87_spill] sm:$0xff] }
 0x2c4   : >> { %v2823_v26 = vadd.f32 %v2821_v20, %v2817_v30  ;;  %v2824_v37 = vadd.f32 %v2822_v7, %v2818_v45  ;;  %v2828_v6 = vmul.f32 %v2826_v25, %v7196_v53  ;;  %v2913_v43 = vstv %s6528_s5  ;;  %v7199_v20 = vld [vmem:[#allocation85_spill] sm:$0xff]  ;;  %s7209_s5 = sshll.u32 %s3788_s0, 4  ;;  %s242_s0 = sadd.s32 1, %s3788_s0  }
 0x2c5   : >> { %v2898_v34 = vadd.f32 %v2896_v31, %v2892_v49  ;;  %v2899_v35 = vadd.f32 %v2897_v63, %v2893_v12  ;;  %v2908_v3 = vmul.f32 %v2907_v48, %v7184_v57  ;;  %v2909_v23 = vmul.f32 %v2907_v48, %v4181_v29  ;;  %p239_p12 = scmp.ge.s32.totalorder %s242_s0, 2  }
 0x2c6   : >> { %v2712_v58 = vadd.f32 %v6477_v56, %v2706_v17  ;;  %v2833_v13 = vmul.f32 %v2832_v0, %v7197_v44  ;;  %v2838_v5 = vstv %s6534_s12  ;;  %v2919_v38 = vstv %s6537_s9  ;;  %s2988_s12 = scalar_lea.vmem %s4080_s18, %s7209_s5 [#allocation7]  ;;  %s7210_s9 = sld [smem:[#allocation15_spill]] (%p239_p12) }
 0x2c7   : >> { %v2904_v10 = vadd.f32 %v2902_v51, %v2898_v34  ;;  %v2905_v21 = vadd.f32 %v2903_v40, %v2899_v35  ;;  %v2914_v22 = vmul.f32 %v2913_v43, %v4184_v33  ;;  %v2915_v25 = vmul.f32 %v2913_v43, %v7199_v20  ;;  %v7202_v34 = vld [vmem:[#allocation101_spill] sm:$0xff]  ;;  %s3794_s0 = smov (%p239_p12), [#allocation7]  }
 0x2c8   : >> { %v2829_v18 = vadd.f32 %v2827_v52, %v2823_v26  ;;  %v2830_v57 = vadd.f32 %v2828_v6, %v2824_v37  ;;  %v2834_v29 = vmul.f32 %v2832_v0, %v7126_v4  ;;  %v2925_v14 = vstv %s6543_s13  ;;  %s7211_s13 = sld [smem:[#allocation20_spill]] (%p239_p12)  ;;  %s3714_s21 = sshll.u32 (%p239_p12), %s3794_s0, 4  ;;  %s3715_s21 = int_to_ptr.vmem [resolvable:$false] %s3714_s21 }
 0x2c9   : >> { %v2910_v56 = vadd.f32 %v2908_v3, %v2904_v10  ;;  %v2911_v17 = vadd.f32 %v2909_v23, %v2905_v21  ;;  %v2920_v59 = vmul.f32 %v2919_v38, %v7200_v54  ;;  %v2921_v30 = vmul.f32 %v2919_v38, %v7201_v61  ;;  %v7207_v61 = vld [vmem:[#allocation99_spill] sm:$0xff]  ;;  %s3716_s22 = scalar_lea.vmem (%p239_p12), %s3715_s21, 1024 }
 0x2ca   : >> { %v2713_v45 = vadd.f32 %v6484_v47, %v2707_v9  ;;  %v2839_v33 = vmul.f32 %v2838_v5, %v7148_v60  ;;  %v2844_v7 = vstv %s6550_s11  ;;  %v2931_v36 = vstv %s6553_s7  ;;  %s7212_s11 = sld [smem:[#allocation18_spill]] (%p239_p12) }
 0x2cb   : >> { %v2916_v46 = vadd.f32 %v2914_v22, %v2910_v56  ;;  %v2917_v32 = vadd.f32 %v2915_v25, %v2911_v17  ;;  %v2926_v31 = vmul.f32 %v2925_v14, %v7006_v42  ;;  %v2927_v27 = vmul.f32 %v2925_v14, %v4219_v15 }
 0x2cc   : >> { %v2835_v63 = vadd.f32 %v2833_v13, %v2829_v18  ;;  %v2836_v52 = vadd.f32 %v2834_v29, %v2830_v57  ;;  %v2840_v0 = vmul.f32 %v2838_v5, %v4305_v1  ;;  %v2937_v48 = vstv %s6559_s10  ;;  %v7203_v13 = vld [vmem:[#allocation72_spill] sm:$0xff]  ;;  %s3597_s7 = sshll.u32 (%p239_p12), %s7210_s9, 9 }
 0x2cd   : >> { %v2922_v47 = vadd.f32 %v2920_v59, %v2916_v46  ;;  %v2923_v9 = vadd.f32 %v2921_v30, %v2917_v32  ;;  %v2932_v49 = vmul.f32 %v2931_v36, %v4221_v16  ;;  %v2933_v12 = vmul.f32 %v2931_v36, %v4225_v19  ;;  %v7206_v59 = vld [vmem:[#allocation69_spill] sm:$0xff] }
 0x2ce   : >> { %v2718_v51 = vadd.f32 %v6487_v39, %v2712_v58  ;;  %v2719_v42 = vadd.f32 %v6492_v50, %v2713_v45  ;;  %v2845_v15 = vmul.f32 %v2844_v7, %v7004_v55  ;;  %v2943_v40 = vstv %s6567_s3  ;;  %v7208_v45 = vld [vmem:[#allocation71_spill] sm:$0xff] }
 0x2cf   : >> { %v2928_v26 = vadd.f32 %v2926_v31, %v2922_v47  ;;  %v2929_v37 = vadd.f32 %v2927_v27, %v2923_v9  ;;  %v2938_v6 = vmul.f32 %v2937_v48, %v7165_v8  ;;  %v2939_v16 = vmul.f32 %v2937_v48, %v7191_v28 }
 0x2d0   : >> { %v2841_v43 = vadd.f32 %v2839_v33, %v2835_v63  ;;  %v2842_v19 = vadd.f32 %v2840_v0, %v2836_v52  ;;  %v2846_v39 = vmul.f32 %v2844_v7, %v7202_v34  ;;  %v2949_v35 = vstv %s6573_s1  ;;  %s7213_s1 = sld [smem:[#allocation104_spill]] (%p239_p12)  ;;  %p7214_p7 = scmp.ne.s32.totalorder (%p239_p12), %s7212_s11, 0 }
 0x2d1   : >> { %v2934_v50 = vadd.f32 %v2932_v49, %v2928_v26  ;;  %v2935_v3 = vadd.f32 %v2933_v12, %v2929_v37  ;;  %v2944_v23 = vmul.f32 %v2943_v40, %v7192_v62  ;;  %v2945_v58 = vmul.f32 %v2943_v40, %v7193_v24 }
 0x2d2   : >> { %v7204_v5 = vmax.f32 %v7203_v13, 0.0  ;;  %v7205_v38 = vstv %s4068_s16  ;;  %v2720_v10 = vmax.f32 %v2718_v51, 0.0  ;;  %v2722_v28 = vstv %s4070_s14 }
 0x2d3   : >> { %v2955_v21 = vstv %s6581_s19  ;;  %v2940_v22 = vadd.f32 %v2938_v6, %v2934_v50  ;;  %v2941_v20 = vadd.f32 %v2939_v16, %v2935_v3  ;;  %v2950_v25 = vmul.f32 %v2949_v35, %v7194_v11 }
 0x2d4   : >> { %v2595_v8 = vmul.f32 %v7205_v38, %v7204_v5  ;;  %v2951_v18 = vmul.f32 %v2949_v35, %v7170_v41  ;;  %v2721_v57 = vmax.f32 %v2719_v42, 0.0  ;;  %v2847_v29 = vadd.f32 %v2845_v15, %v2841_v43 }
 0x2d5   : >> { %v2848_v14 = vadd.f32 %v2846_v39, %v2842_v19  ;;  %v2961_v62 = vstv %s6587_s2  ;;  %v2946_v24 = vadd.f32 %v2944_v23, %v2940_v22  ;;  %v2947_v56 = vadd.f32 %v2945_v58, %v2941_v20  ;;  %s3005_s2 = sshll.u32 (%p239_p12), %s4080_s18, 4  ;;  %s6643_s2 = int_to_ptr.vmem [resolvable:$true] %s3005_s2 }
 0x2d6   : >> { %v2956_v17 = vmul.f32 %v2955_v21, %v7195_v2  ;;  %v2957_v54 = vmul.f32 %v2955_v21, %v7196_v53  ;;  %v2596_v30 = vadd.f32 %v7207_v61, %v7206_v59  ;;  %v2597_v33 = vadd.f32 %v2595_v8, %v7208_v45  ;;  %s6640_s19 = scalar_lea.hbm (%p239_p12), %s7213_s1, %s3597_s7  ;;  %p3717_p4 = scmp.lt.s32.totalorder (%p239_p12), %s6643_s2, %s3715_s21 }
 0x2d7   : >> { %v2723_v11 = vmul.f32 %v2722_v28, %v2720_v10  ;;  %v2967_v7 = vstv %s6595_s15  ;;  %v2952_v41 = vadd.f32 %v2950_v25, %v2946_v24  ;;  %v2953_v36 = vadd.f32 %v2951_v18, %v2947_v56  ;;  %s2992_s15 = scalar_lea.sflag (%p239_p12), [#allocation4], %s7211_s13 }
 0x2d8   : >> { %v2962_v46 = vmul.f32 %v2961_v62, %v7197_v44  ;;  %v2963_v32 = vmul.f32 %v2961_v62, %v7126_v4  ;;  %v2724_v31 = vmul.f32 %v2722_v28, %v2721_v57  ;;  %v2849_v27 = vmax.f32 %v2847_v29, 0.0 }
 0x2d9   : >> { %v2850_v63 = vmax.f32 %v2848_v14, 0.0  ;;  %v2973_v2 = vstv %s6601_s4  ;;  %v2958_v52 = vadd.f32 %v2956_v17, %v2952_v41  ;;  %v2959_v53 = vadd.f32 %v2957_v54, %v2953_v36  ;;  %s3710_s4 = scalar_lea.vmem (%p239_p12), %s6643_s2, 512 }
 0x2da   : >> { %v2968_v0 = vmul.f32 %v2967_v7, %v7148_v60  ;;  %v2969_v48 = vmul.f32 %v2967_v7, %v4305_v1  ;;  %v2851_v47 = vstv %s4072_s8  ;;  %v2974_v12 = vmul.f32 %v2973_v2, %v7004_v55  ;;  %p3711_p13 = scmp.ne.s32.totalorder (%p239_p12), %s6643_s2, %s3710_s4  ;;  %p3718_p5 = scmp.lt.s32.totalorder (%p239_p12), %s3716_s22, %s3710_s4 }
 0x2db   : >> { %v2964_v9 = vadd.f32 %v2962_v46, %v2958_v52  ;;  %v2965_v49 = vadd.f32 %v2963_v32, %v2959_v53  ;;  %v2975_v44 = vmul.f32 %v2973_v2, %v7202_v34  ;;  %v2725_v4 = vadd.f32 %v2723_v11, %v2596_v30 }
 0x2dc   : >> { %v2726_v51 = vadd.f32 %v2724_v31, %v2597_v33  ;;  %v2852_v42 = vmul.f32 %v2851_v47, %v2849_v27  ;;  %v2853_v15 = vmul.f32 %v2851_v47, %v2850_v63  ;;  %v2980_v6 = vstv %s4074_s27  ;;  %p3712_p3 = pnand (%p239_p12), %p3711_p13, %p7214_p7  ;;  %p3719_p0 = por (%p239_p12), %p3718_p5, %p3717_p4 }
 0x2dd   : >> { %v2970_v40 = vadd.f32 %v2968_v0, %v2964_v9  ;;  %v2971_v26 = vadd.f32 %v2969_v48, %v2965_v49  ;;  %v2985_v35 = vstv %s4076_s20 }
 0x2de   : >> { %v2854_v1 = vadd.f32 %v2852_v42, %v2725_v4  ;;  %v2855_v16 = vadd.f32 %v2853_v15, %v2726_v51  ;;  %p3713_p6 = pneg (%p239_p12), %p3712_p3 }
 0x2df   : >> { %v2976_v37 = vadd.f32 %v2974_v12, %v2970_v40  ;;  %v2977_v60 = vadd.f32 %v2975_v44, %v2971_v26 }
 0x2e0   : > { %p3720_p8 = pnand (%p239_p12), %p3719_p0, %p3713_p6 }
 0x2e1   : >> { %v2978_v43 = vmax.f32 %v2976_v37, 0.0  ;;  %v2979_v19 = vmax.f32 %v2977_v60, 0.0 }
 0x2e3   : >> { %v2981_v39 = vmul.f32 %v2980_v6, %v2978_v43  ;;  %v2982_v55 = vmul.f32 %v2980_v6, %v2979_v19  ;;  %241 = sbr.rel (!%p239_p12) target bundleno = 148 (0x94), region = 87 }
 0x2e5   : >> { %v2983_v34 = vadd.f32 %v2981_v39, %v2854_v1  ;;  %v2984_v50 = vadd.f32 %v2982_v55, %v2855_v16 }
 0x2e7   : >> { %v2986_v3 = vadd.f32 %v2985_v35, %v2983_v34  ;;  %v2987_v23 = vadd.f32 %v2985_v35, %v2984_v50 }
 0x2e9   : >> { %2989 = vst [vmem:[%s2988_s12] sm:$0xff] %v2986_v3  ;;  %2990 = vst [vmem:[%s2988_s12 + $0x8] sm:$0xff] %v2987_v23 }
 0x2ea   : > { %3723 = shalt.err (!%p3720_p8)
}
 0x2eb   : > { %s3724_s18 = scalar_lea.hbm %s6640_s19, 512  ;;  %s3728_s29 = scalar_lea.hbm %s7213_s1, 1024 }
 0x2ec   : > { %p3725_p9 = scmp.ne.s32.totalorder %s6640_s19, %s3724_s18  ;;  %p3729_p2 = scmp.lt.u32.totalorder %s6640_s19, %s7213_s1 }
 0x2ed   : > { %p3730_p11 = scmp.lt.u32.totalorder %s3728_s29, %s3724_s18  ;;  %p3732_p13 = scmp.lt.u32.totalorder %s3724_s18, %s6640_s19 }
 0x2ee   : > { %p3726_p10 = pnand %p3725_p9, %p7214_p7 }
 0x2ef   : > { %p3731_p12 = por %p3730_p11, %p3729_p2 }
 0x2f0   : > { %p3727_p1 = pneg %p3726_p10 }
 0x2f1   : > { %p3733_p3 = por %p3732_p13, %p3731_p12 }
 0x2f3   : > { %p3734_p6 = pnand %p3733_p3, %p3727_p1 }
 0x2f5   : > { %3737 = shalt.err (!%p3734_p6)
}
 0x2f6   : > { %s3795_s20 = smov 128   ;;  %s3796_s27 = smov 8  }
 0x2f7   : > { %3604 = dma.vmem_to_hbm [thread:$0]  (%p7214_p7), %s6643_s2, 512, %s6640_s19, %s2992_s15, %s3795_s20, %s3795_s20, %s3796_s27  }
 0x2f8 PF: > { %s7215_s8 = sld [smem:[#allocation11_spill]]  ;;  %s7216_s14 = sld [smem:[#allocation19_spill]] }
 0x2f9   : > { %s7217_s16 = sld [smem:[#allocation14_spill]] }
 0x2fe   : > { %s3020_s17 = sand.u32 1, %s7215_s8   ;;  %p7218_p4 = scmp.ne.s32.totalorder %s7216_s14, 0 }
 0x2ff   : > { %p7219_p5 = scmp.ge.s32.totalorder %s7217_s16, 2  ;;  %s3021_s25 = scalar_lea.sflag [#allocation4], %s3020_s17 }
 0x301   : > { %p3615_p0 = pnand %p7219_p5, %p7218_p4 }
 0x303   : > { %3767 = dma.done.wait (!%p3615_p0), %s3021_s25, 512  }
 0x304   : > { %3769 = vsyncadd (!%p3615_p0), %s3021_s25, 4294966784  ;;  %s7220_s12 = sld [smem:[#allocation16_spill]]  ;;  %s7221_s9 = sld [smem:[#allocation12_spill]] }
 0x305   : > { %s7222_s10 = sld [smem:[#allocation13_spill]]  ;;  %s7223_s11 = sld [smem:[#allocation17_spill]] }
 0x30a   : > { %p16_p8 = scmp.ge.s32.totalorder %s7220_s12, 4  }
 0x30c   :  { %18 = sbr.rel (!%p16_p8) target bundleno = 10 (0xa), region = 98 }
 0x313   :  { %3026 = vsyncpa [#allocation3], 1 }
 0x314   :  { %3028 = vsyncpa [#allocation3 + $0x1], 1 }
 0x315   :  { %3029 = vsyncpa [#allocation4], 1 }
 0x316   :  { %3031 = vsyncpa [#allocation4 + $0x1], 1 }
 0x317   :  { %3032 = vsyncpa [#allocation5], 1 }
 0x318   :  { %3034 = vsyncpa [#allocation5 + $0x1], 1 }

</bundles_post_ra>
